<compile_context>
chip_gen: v7x
topology: tpu7x:2x2x1
jax: 0.10.0
libtpu: 0.0.40
codegen_flags: <defaults>
</compile_context>

<pallas_src>
import functools
import math

import jax
import jax.numpy as jnp
from jax.experimental import pallas as pl
from jax.experimental.pallas import tpu as pltpu


# ---------------------------------------------------------------------------
# SamePad2d arithmetic -- faithful to the PyTorch module, including its swapped
# width/height naming (pads derived from dim2's size are applied to dim3 and
# vice versa).  All kernels/strides in this head are square, so the swap only
# matters for the (rare) odd-spatial k=2,s=2 case.
# ---------------------------------------------------------------------------
def _pair(v):
    return (v, v) if isinstance(v, int) else tuple(v)


def _same_pad_amounts(size2, size3, kernel_size, stride):
    k = _pair(kernel_size)
    s = _pair(stride)
    out_w = math.ceil(size2 / s[0])
    out_h = math.ceil(size3 / s[1])
    pad_along_w = (out_w - 1) * s[0] + k[0] - size2
    pad_along_h = (out_h - 1) * s[1] + k[1] - size3
    pad_left = pad_along_w // 2
    pad_right = pad_along_w - pad_left
    pad_top = pad_along_h // 2
    pad_bottom = pad_along_h - pad_top
    # F.pad(x, (pad_left, pad_right, pad_top, pad_bottom)):
    #   dim 2 gets (pad_top, pad_bottom), dim 3 gets (pad_left, pad_right)
    return (pad_top, pad_bottom), (pad_left, pad_right)


def _pick_roi_tile(n, cap=8):
    # Largest divisor of n that is <= cap, preferring >= 2 grid steps so the
    # "parallel" grid axis can be sharded across v7x's two TensorCores.
    cap = max(1, min(cap, n // 2 if n >= 2 else 1))
    for t in range(cap, 0, -1):
        if n % t == 0:
            return t
    return 1


# ---------------------------------------------------------------------------
# Fused kernel: [SamePad2d(3,1)+Conv3x3+ReLU] x4  ->  SamePad2d(2,2) +
# ConvTranspose2d(k=2,s=2) + ReLU  ->  Conv1x1.
# With stride == kernel the transposed conv has no overlap, so it is exactly
# four independent matmuls (one per sub-pixel position).
# ---------------------------------------------------------------------------
def _head_kernel(x_ref, wc_ref, bc_ref, wd_ref, bd_ref, w1_ref, b1_ref,
                 o_ref, act_ref, xp_ref, dp_ref, *, pad_h, pad_w):
    # x_ref  : (T, H, W, C)          ROI features, NHWC (C on the 128-lane axis)
    # wc_ref : (L, 3, 3, C, C)       stacked 3x3 conv weights  wc[l, dy, dx, cin, cout]
    # bc_ref : (L, 1, C)             stacked 3x3 conv biases
    # wd_ref : (2, 2, C, C)          transposed-conv taps      wd[dy, dx, cin, cout]
    # bd_ref : (1, C)                transposed-conv bias
    # w1_ref : (C, K)                final 1x1 conv weight
    # b1_ref : (1, K)                final 1x1 conv bias
    # o_ref  : (T, 4, HH, WW, K)     sub-pixel output; index = 2*dy + dx
    # act_ref: (T, H, W, C)          scratch: intermediate conv activation
    # xp_ref : (T, H+2, W+2, C)      scratch: SamePad2d(3,1)-padded activation
    # dp_ref : (T, HH, WW, C)        scratch: deconv input (SamePad2d(2,2)-padded)
    t, h, w, c = x_ref.shape
    k = o_ref.shape[-1]
    n_layers = wc_ref.shape[0]
    ph0, ph1 = pad_h
    pw0, pw1 = pad_w
    hh = h + ph0 + ph1
    ww = w + pw0 + pw1

    # Zero the pad borders once.  The interiors are fully overwritten every layer /
    # every grid step, so the borders stay zero across steps (scratch persists).
    @pl.when(pl.program_id(0) == 0)
    def _():
        xp_ref[...] = jnp.zeros_like(xp_ref)
        if (ph0, ph1, pw0, pw1) != (0, 0, 0, 0):
            dp_ref[...] = jnp.zeros_like(dp_ref)

    # ---- fcn_conv: 4 x [SamePad2d(3,1) + 3x3 conv + ReLU], all in VMEM ----
    for layer in range(n_layers):
        src = x_ref if layer == 0 else act_ref
        xp_ref[:, 1:1 + h, 1:1 + w, :] = src[...]     # pad=1 every edge (k=3, s=1)

        # 3x3 conv as 9 shifted (T*H*W, C) x (C, C) matmuls on the MXU.
        acc = jnp.zeros((t * h * w, c), jnp.float32)
        for dy in range(3):
            for dx in range(3):
                patch = xp_ref[:, dy:dy + h, dx:dx + w, :].reshape(t * h * w, c)
                acc = acc + jnp.dot(patch, wc_ref[layer, dy, dx],
                                    preferred_element_type=jnp.float32)
        acc = jnp.maximum(acc + bc_ref[layer].astype(jnp.float32), 0.0)
        acc = acc.reshape(t, h, w, c)

        if layer < n_layers - 1:
            act_ref[...] = acc.astype(act_ref.dtype)
        else:
            # Last conv output goes straight into the (possibly padded) deconv
            # input scratch -- SamePad2d(2,2) fused away.
            dp_ref[:, ph0:ph0 + h, pw0:pw0 + w, :] = acc.astype(dp_ref.dtype)

    # ---- deconv (ConvTranspose2d k=2 s=2) + ReLU + final 1x1 conv ----
    xd = dp_ref[...].reshape(t * hh * ww, c)
    bd = bd_ref[...].astype(jnp.float32)
    w1 = w1_ref[...].astype(jnp.float32)
    b1 = b1_ref[...].astype(jnp.float32)
    for dy in range(2):
        for dx in range(2):
            y = jnp.dot(xd, wd_ref[dy, dx], preferred_element_type=jnp.float32)
            y = jnp.maximum(y + bd, 0.0)                       # ReLU after deconv
            z = jnp.dot(y, w1, preferred_element_type=jnp.float32) + b1
            o_ref[:, 2 * dy + dx] = z.reshape(t, hh, ww, k).astype(o_ref.dtype)


# ---------------------------------------------------------------------------
# Full head forward (matches MaskrcnnUpXconvHead.forward, NCHW in / NCHW out).
# ---------------------------------------------------------------------------
def maskrcnn_up_xconv_head(feature_nchw, params):
    wc = jnp.stack([w for w, _ in params["fcn_conv"]])            # (4, 3, 3, C, C)
    bc = jnp.stack([b for _, b in params["fcn_conv"]])[:, None]   # (4, 1, C)
    wd = params["deconv_w"]                                       # (2, 2, C, C)
    bd = params["deconv_b"].reshape(1, -1)                        # (1, C)
    w1 = params["conv1x1_w"]                                      # (C, K)
    b1 = params["conv1x1_b"].reshape(1, -1)                       # (1, K)

    # NCHW -> NHWC so channels sit on the 128-lane axis.
    x = jnp.transpose(feature_nchw, (0, 2, 3, 1))
    n, h, w_sp, c = x.shape
    k = w1.shape[-1]
    n_layers = wc.shape[0]
    t = _pick_roi_tile(n)

    # SamePad2d(2,2) amounts (zero for even spatial sizes; SamePad2d(1,1) is a no-op).
    (ph0, ph1), (pw0, pw1) = _same_pad_amounts(h, w_sp, 2, 2)
    hh, ww = h + ph0 + ph1, w_sp + pw0 + pw1

    kernel = functools.partial(_head_kernel, pad_h=(ph0, ph1), pad_w=(pw0, pw1))

    flops = (2 * 9 * n_layers * n * h * w_sp * c * c
             + 2 * 4 * n * hh * ww * c * (c + k))
    bytes_accessed = int(
        x.dtype.itemsize * (x.size + n * 4 * hh * ww * k)
        + wc.dtype.itemsize * (wc.size + bc.size + wd.size + bd.size
                               + w1.size + b1.size))

    out5 = pl.pallas_call(
        kernel,
        out_shape=jax.ShapeDtypeStruct((n, 4, hh, ww, k), x.dtype),
        grid_spec=pltpu.PrefetchScalarGridSpec(
            num_scalar_prefetch=0,
            grid=(n // t,),
            in_specs=[
                pl.BlockSpec((t, h, w_sp, c), lambda i: (i, 0, 0, 0)),
                pl.BlockSpec((n_layers, 3, 3, c, c), lambda i: (0, 0, 0, 0, 0)),
                pl.BlockSpec((n_layers, 1, c), lambda i: (0, 0, 0)),
                pl.BlockSpec((2, 2, c, c), lambda i: (0, 0, 0, 0)),
                pl.BlockSpec((1, c), lambda i: (0, 0)),
                pl.BlockSpec((c, k), lambda i: (0, 0)),
                pl.BlockSpec((1, k), lambda i: (0, 0)),
            ],
            out_specs=pl.BlockSpec((t, 4, hh, ww, k), lambda i: (i, 0, 0, 0, 0)),
            scratch_shapes=[
                pltpu.VMEM((t, h, w_sp, c), x.dtype),            # activation
                pltpu.VMEM((t, h + 2, w_sp + 2, c), x.dtype),    # SamePad2d(3,1) pad
                pltpu.VMEM((t, hh, ww, c), x.dtype),             # deconv input
            ],
        ),
        compiler_params=pltpu.CompilerParams(dimension_semantics=("parallel",)),
        cost_estimate=pl.CostEstimate(flops=flops, transcendentals=0,
                                      bytes_accessed=bytes_accessed),
    )(x, wc, bc, wd, bd, w1, b1)

    # Sub-pixel -> spatial: out5[n, 2*dy+dx, h, w, k] == out[n, 2h+dy, 2w+dx, k]
    out = out5.reshape(n, 2, 2, hh, ww, k)
    out = jnp.transpose(out, (0, 3, 1, 4, 2, 5)).reshape(n, 2 * hh, 2 * ww, k)
    return jnp.transpose(out, (0, 3, 1, 2))                      # back to NCHW


# ---------------------------------------------------------------------------
# Plain-JAX reference (numerical sanity check).
# ---------------------------------------------------------------------------
def _reference_head(feature_nchw, params):
    hp = jax.lax.Precision.HIGHEST
    x = jnp.transpose(feature_nchw, (0, 2, 3, 1)).astype(jnp.float32)
    for wi, bi in params["fcn_conv"]:
        n, h, w, _ = x.shape
        xp = jnp.pad(x, ((0, 0), (1, 1), (1, 1), (0, 0)))
        acc = jnp.zeros((n, h, w, wi.shape[-1]), jnp.float32)
        for dy in range(3):
            for dx in range(3):
                acc = acc + jnp.einsum("nhwc,cd->nhwd",
                                       xp[:, dy:dy + h, dx:dx + w, :],
                                       wi[dy, dx], precision=hp)
        x = jax.nn.relu(acc + bi)
    n, h, w, _ = x.shape
    (ph0, ph1), (pw0, pw1) = _same_pad_amounts(h, w, 2, 2)
    if (ph0, ph1, pw0, pw1) != (0, 0, 0, 0):
        x = jnp.pad(x, ((0, 0), (ph0, ph1), (pw0, pw1), (0, 0)))
        n, h, w, _ = x.shape
    wd, bd = params["deconv_w"], params["deconv_b"]
    tmp = jnp.einsum("nhwc,yxcd->nhywxd", x, wd, precision=hp) + bd
    tmp = jax.nn.relu(tmp).reshape(n, 2 * h, 2 * w, wd.shape[-1])
    out = jnp.einsum("nhwc,ck->nhwk", tmp, params["conv1x1_w"], precision=hp)
    out = out + params["conv1x1_b"]
    return jnp.transpose(out, (0, 3, 1, 2))


if __name__ == "__main__":
    HEAD_DIM = 128        # cfg.MRCNN.HEAD_DIM (small lane-dense test value)
    NUM_CATEGORY = 8
    N, H, W = 2, 16, 16   # 2 ROIs, 16x16 mask-head features

    key = jax.random.PRNGKey(0)
    ks = jax.random.split(key, 13)

    def _winit(k, shape, fan_in):
        return jax.random.normal(k, shape, dtype=jnp.float32) * math.sqrt(2.0 / fan_in)

    params = {
        "fcn_conv": [
            (_winit(ks[2 * i], (3, 3, HEAD_DIM, HEAD_DIM), 9 * HEAD_DIM),
             0.01 * jax.random.normal(ks[2 * i + 1], (HEAD_DIM,), dtype=jnp.float32))
            for i in range(4)
        ],
        "deconv_w": _winit(ks[8], (2, 2, HEAD_DIM, HEAD_DIM), HEAD_DIM),
        "deconv_b": 0.01 * jax.random.normal(ks[9], (HEAD_DIM,), dtype=jnp.float32),
        "conv1x1_w": _winit(ks[10], (HEAD_DIM, NUM_CATEGORY), HEAD_DIM),
        "conv1x1_b": 0.01 * jax.random.normal(ks[11], (NUM_CATEGORY,), dtype=jnp.float32),
    }
    feature = jax.random.normal(ks[12], (N, HEAD_DIM, H, W), dtype=jnp.float32)

    out = maskrcnn_up_xconv_head(feature, params)
    out = jax.block_until_ready(out)

    ref = _reference_head(feature, params)
    assert out.shape == (N, NUM_CATEGORY, 2 * H, 2 * W), (out.shape,)
    max_err = float(jnp.max(jnp.abs(out - ref)))
    assert jnp.allclose(out, ref, atol=2e-2, rtol=2e-2), f"max abs err {max_err}"

    print("KERNEL_OK")
</pallas_src>

<mosaic_0001>
module attributes {stable_mosaic.version = 11 : i64} {
  func.func @_head_kernel(%arg0: i32, %arg1: memref<1x16x16x128xf32, #tpu.memory_space<vmem>>, %arg2: memref<4x3x3x128x128xf32, #tpu.memory_space<vmem>>, %arg3: memref<4x1x128xf32, #tpu.memory_space<vmem>>, %arg4: memref<2x2x128x128xf32, #tpu.memory_space<vmem>>, %arg5: memref<1x128xf32, #tpu.memory_space<vmem>>, %arg6: memref<128x8xf32, #tpu.memory_space<vmem>>, %arg7: memref<1x8xf32, #tpu.memory_space<vmem>>, %arg8: memref<1x4x16x16x8xf32, #tpu.memory_space<vmem>>, %arg9: memref<1x16x16x128xf32, #tpu.memory_space<vmem>>, %arg10: memref<1x18x18x128xf32, #tpu.memory_space<vmem>>, %arg11: memref<1x16x16x128xf32, #tpu.memory_space<vmem>>) attributes {dimension_semantics = [#tpu.dimension_semantics<parallel>], iteration_bounds = array<i64: 2>, scalar_prefetch = 0 : i64, scratch_operands = 3 : i64, tpu.core_type = #tpu.core_type<tc>, window_params = [{transform_indices = @transform_0, window_bounds = array<i64: 1, 16, 16, 128>}, {pipeline_mode = #tpu.pipeline_mode<synchronous>, transform_indices = @transform_1, window_bounds = array<i64: 4, 3, 3, 128, 128>}, {pipeline_mode = #tpu.pipeline_mode<synchronous>, transform_indices = @transform_2, window_bounds = array<i64: 4, 1, 128>}, {pipeline_mode = #tpu.pipeline_mode<synchronous>, transform_indices = @transform_3, window_bounds = array<i64: 2, 2, 128, 128>}, {pipeline_mode = #tpu.pipeline_mode<synchronous>, transform_indices = @transform_4, window_bounds = array<i64: 1, 128>}, {pipeline_mode = #tpu.pipeline_mode<synchronous>, transform_indices = @transform_5, window_bounds = array<i64: 128, 8>}, {pipeline_mode = #tpu.pipeline_mode<synchronous>, transform_indices = @transform_6, window_bounds = array<i64: 1, 8>}, {transform_indices = @transform_7, window_bounds = array<i64: 1, 4, 16, 16, 8>}]} {
    %c0_i32 = arith.constant 0 : i32
    %0 = arith.cmpi eq, %arg0, %c0_i32 : i32
    %1 = arith.extui %0 : i1 to i32
    %c0_i32_0 = arith.constant 0 : i32
    %2 = arith.cmpi ne, %1, %c0_i32_0 : i32
    scf.if %2 {
      %cst_482 = arith.constant 0.000000e+00 : f32
      %324 = vector.broadcast %cst_482 : f32 to vector<1x18x18x128xf32>
      %c0_483 = arith.constant 0 : index
      %c0_484 = arith.constant 0 : index
      %c0_485 = arith.constant 0 : index
      %c0_486 = arith.constant 0 : index
      %325 = vector.load %arg10[%c0_483, %c0_484, %c0_485, %c0_486] : memref<1x18x18x128xf32, #tpu.memory_space<vmem>>, vector<1x18x18x128xf32>
      tpu.vector_store %arg10[%c0_483, %c0_484, %c0_485, %c0_486], %324 {strides = array<i32>} : memref<1x18x18x128xf32, #tpu.memory_space<vmem>>, vector<1x18x18x128xf32>,
    } else {
    }
    %c0 = arith.constant 0 : index
    %c0_1 = arith.constant 0 : index
    %c0_2 = arith.constant 0 : index
    %c0_3 = arith.constant 0 : index
    %3 = vector.load %arg1[%c0, %c0_1, %c0_2, %c0_3] : memref<1x16x16x128xf32, #tpu.memory_space<vmem>>, vector<1x16x16x128xf32>
    %c0_4 = arith.constant 0 : index
    %c1 = arith.constant 1 : index
    %c1_5 = arith.constant 1 : index
    %c0_6 = arith.constant 0 : index
    %4 = vector.load %arg10[%c0_4, %c1, %c1_5, %c0_6] : memref<1x18x18x128xf32, #tpu.memory_space<vmem>>, vector<1x16x16x128xf32>
    tpu.vector_store %arg10[%c0_4, %c1, %c1_5, %c0_6], %3 {strides = array<i32>} : memref<1x18x18x128xf32, #tpu.memory_space<vmem>>, vector<1x16x16x128xf32>,
    %cst = arith.constant 0.000000e+00 : f32
    %5 = vector.broadcast %cst : f32 to vector<256x128xf32>
    %c0_7 = arith.constant 0 : index
    %c0_8 = arith.constant 0 : index
    %c0_9 = arith.constant 0 : index
    %c0_10 = arith.constant 0 : index
    %6 = vector.load %arg10[%c0_7, %c0_8, %c0_9, %c0_10] : memref<1x18x18x128xf32, #tpu.memory_space<vmem>>, vector<1x16x16x128xf32>
    %7 = vector.shape_cast %6 : vector<1x16x16x128xf32> to vector<256x128xf32>
    %c0_11 = arith.constant 0 : index
    %c0_12 = arith.constant 0 : index
    %c0_13 = arith.constant 0 : index
    %c0_14 = arith.constant 0 : index
    %c0_15 = arith.constant 0 : index
    %8 = vector.load %arg2[%c0_11, %c0_12, %c0_13, %c0_14, %c0_15] : memref<4x3x3x128x128xf32, #tpu.memory_space<vmem>>, vector<1x1x1x128x128xf32>
    %9 = vector.shape_cast %8 : vector<1x1x1x128x128xf32> to vector<128x128xf32>
    %cst_16 = arith.constant dense<0.000000e+00> : vector<256x128xf32>
    %10 = tpu.matmul %7, %9, %cst_16 {dimension_numbers = #tpu.dot_dimension_numbers<[1], [0], [0], [1], [0, 0, 1, 1], [], []>} : vector<256x128xf32>, vector<128x128xf32>, vector<256x128xf32> -> vector<256x128xf32>
    %11 = arith.addf %5, %10 : vector<256x128xf32>
    %c0_17 = arith.constant 0 : index
    %c0_18 = arith.constant 0 : index
    %c1_19 = arith.constant 1 : index
    %c0_20 = arith.constant 0 : index
    %12 = vector.load %arg10[%c0_17, %c0_18, %c1_19, %c0_20] : memref<1x18x18x128xf32, #tpu.memory_space<vmem>>, vector<1x16x16x128xf32>
    %13 = vector.shape_cast %12 : vector<1x16x16x128xf32> to vector<256x128xf32>
    %c0_21 = arith.constant 0 : index
    %c0_22 = arith.constant 0 : index
    %c1_23 = arith.constant 1 : index
    %c0_24 = arith.constant 0 : index
    %c0_25 = arith.constant 0 : index
    %14 = vector.load %arg2[%c0_21, %c0_22, %c1_23, %c0_24, %c0_25] : memref<4x3x3x128x128xf32, #tpu.memory_space<vmem>>, vector<1x1x1x128x128xf32>
    %15 = vector.shape_cast %14 : vector<1x1x1x128x128xf32> to vector<128x128xf32>
    %cst_26 = arith.constant dense<0.000000e+00> : vector<256x128xf32>
    %16 = tpu.matmul %13, %15, %cst_26 {dimension_numbers = #tpu.dot_dimension_numbers<[1], [0], [0], [1], [0, 0, 1, 1], [], []>} : vector<256x128xf32>, vector<128x128xf32>, vector<256x128xf32> -> vector<256x128xf32>
    %17 = arith.addf %11, %16 : vector<256x128xf32>
    %c0_27 = arith.constant 0 : index
    %c0_28 = arith.constant 0 : index
    %c2 = arith.constant 2 : index
    %c0_29 = arith.constant 0 : index
    %18 = vector.load %arg10[%c0_27, %c0_28, %c2, %c0_29] : memref<1x18x18x128xf32, #tpu.memory_space<vmem>>, vector<1x16x16x128xf32>
    %19 = vector.shape_cast %18 : vector<1x16x16x128xf32> to vector<256x128xf32>
    %c0_30 = arith.constant 0 : index
    %c0_31 = arith.constant 0 : index
    %c2_32 = arith.constant 2 : index
    %c0_33 = arith.constant 0 : index
    %c0_34 = arith.constant 0 : index
    %20 = vector.load %arg2[%c0_30, %c0_31, %c2_32, %c0_33, %c0_34] : memref<4x3x3x128x128xf32, #tpu.memory_space<vmem>>, vector<1x1x1x128x128xf32>
    %21 = vector.shape_cast %20 : vector<1x1x1x128x128xf32> to vector<128x128xf32>
    %cst_35 = arith.constant dense<0.000000e+00> : vector<256x128xf32>
    %22 = tpu.matmul %19, %21, %cst_35 {dimension_numbers = #tpu.dot_dimension_numbers<[1], [0], [0], [1], [0, 0, 1, 1], [], []>} : vector<256x128xf32>, vector<128x128xf32>, vector<256x128xf32> -> vector<256x128xf32>
    %23 = arith.addf %17, %22 : vector<256x128xf32>
    %c0_36 = arith.constant 0 : index
    %c1_37 = arith.constant 1 : index
    %c0_38 = arith.constant 0 : index
    %c0_39 = arith.constant 0 : index
    %24 = vector.load %arg10[%c0_36, %c1_37, %c0_38, %c0_39] : memref<1x18x18x128xf32, #tpu.memory_space<vmem>>, vector<1x16x16x128xf32>
    %25 = vector.shape_cast %24 : vector<1x16x16x128xf32> to vector<256x128xf32>
    %c0_40 = arith.constant 0 : index
    %c1_41 = arith.constant 1 : index
    %c0_42 = arith.constant 0 : index
    %c0_43 = arith.constant 0 : index
    %c0_44 = arith.constant 0 : index
    %26 = vector.load %arg2[%c0_40, %c1_41, %c0_42, %c0_43, %c0_44] : memref<4x3x3x128x128xf32, #tpu.memory_space<vmem>>, vector<1x1x1x128x128xf32>
    %27 = vector.shape_cast %26 : vector<1x1x1x128x128xf32> to vector<128x128xf32>
    %cst_45 = arith.constant dense<0.000000e+00> : vector<256x128xf32>
    %28 = tpu.matmul %25, %27, %cst_45 {dimension_numbers = #tpu.dot_dimension_numbers<[1], [0], [0], [1], [0, 0, 1, 1], [], []>} : vector<256x128xf32>, vector<128x128xf32>, vector<256x128xf32> -> vector<256x128xf32>
    %29 = arith.addf %23, %28 : vector<256x128xf32>
    %c0_46 = arith.constant 0 : index
    %c1_47 = arith.constant 1 : index
    %c1_48 = arith.constant 1 : index
    %c0_49 = arith.constant 0 : index
    %30 = vector.load %arg10[%c0_46, %c1_47, %c1_48, %c0_49] : memref<1x18x18x128xf32, #tpu.memory_space<vmem>>, vector<1x16x16x128xf32>
    %31 = vector.shape_cast %30 : vector<1x16x16x128xf32> to vector<256x128xf32>
    %c0_50 = arith.constant 0 : index
    %c1_51 = arith.constant 1 : index
    %c1_52 = arith.constant 1 : index
    %c0_53 = arith.constant 0 : index
    %c0_54 = arith.constant 0 : index
    %32 = vector.load %arg2[%c0_50, %c1_51, %c1_52, %c0_53, %c0_54] : memref<4x3x3x128x128xf32, #tpu.memory_space<vmem>>, vector<1x1x1x128x128xf32>
    %33 = vector.shape_cast %32 : vector<1x1x1x128x128xf32> to vector<128x128xf32>
    %cst_55 = arith.constant dense<0.000000e+00> : vector<256x128xf32>
    %34 = tpu.matmul %31, %33, %cst_55 {dimension_numbers = #tpu.dot_dimension_numbers<[1], [0], [0], [1], [0, 0, 1, 1], [], []>} : vector<256x128xf32>, vector<128x128xf32>, vector<256x128xf32> -> vector<256x128xf32>
    %35 = arith.addf %29, %34 : vector<256x128xf32>
    %c0_56 = arith.constant 0 : index
    %c1_57 = arith.constant 1 : index
    %c2_58 = arith.constant 2 : index
    %c0_59 = arith.constant 0 : index
    %36 = vector.load %arg10[%c0_56, %c1_57, %c2_58, %c0_59] : memref<1x18x18x128xf32, #tpu.memory_space<vmem>>, vector<1x16x16x128xf32>
    %37 = vector.shape_cast %36 : vector<1x16x16x128xf32> to vector<256x128xf32>
    %c0_60 = arith.constant 0 : index
    %c1_61 = arith.constant 1 : index
    %c2_62 = arith.constant 2 : index
    %c0_63 = arith.constant 0 : index
    %c0_64 = arith.constant 0 : index
    %38 = vector.load %arg2[%c0_60, %c1_61, %c2_62, %c0_63, %c0_64] : memref<4x3x3x128x128xf32, #tpu.memory_space<vmem>>, vector<1x1x1x128x128xf32>
    %39 = vector.shape_cast %38 : vector<1x1x1x128x128xf32> to vector<128x128xf32>
    %cst_65 = arith.constant dense<0.000000e+00> : vector<256x128xf32>
    %40 = tpu.matmul %37, %39, %cst_65 {dimension_numbers = #tpu.dot_dimension_numbers<[1], [0], [0], [1], [0, 0, 1, 1], [], []>} : vector<256x128xf32>, vector<128x128xf32>, vector<256x128xf32> -> vector<256x128xf32>
    %41 = arith.addf %35, %40 : vector<256x128xf32>
    %c0_66 = arith.constant 0 : index
    %c2_67 = arith.constant 2 : index
    %c0_68 = arith.constant 0 : index
    %c0_69 = arith.constant 0 : index
    %42 = vector.load %arg10[%c0_66, %c2_67, %c0_68, %c0_69] : memref<1x18x18x128xf32, #tpu.memory_space<vmem>>, vector<1x16x16x128xf32>
    %43 = vector.shape_cast %42 : vector<1x16x16x128xf32> to vector<256x128xf32>
    %c0_70 = arith.constant 0 : index
    %c2_71 = arith.constant 2 : index
    %c0_72 = arith.constant 0 : index
    %c0_73 = arith.constant 0 : index
    %c0_74 = arith.constant 0 : index
    %44 = vector.load %arg2[%c0_70, %c2_71, %c0_72, %c0_73, %c0_74] : memref<4x3x3x128x128xf32, #tpu.memory_space<vmem>>, vector<1x1x1x128x128xf32>
    %45 = vector.shape_cast %44 : vector<1x1x1x128x128xf32> to vector<128x128xf32>
    %cst_75 = arith.constant dense<0.000000e+00> : vector<256x128xf32>
    %46 = tpu.matmul %43, %45, %cst_75 {dimension_numbers = #tpu.dot_dimension_numbers<[1], [0], [0], [1], [0, 0, 1, 1], [], []>} : vector<256x128xf32>, vector<128x128xf32>, vector<256x128xf32> -> vector<256x128xf32>
    %47 = arith.addf %41, %46 : vector<256x128xf32>
    %c0_76 = arith.constant 0 : index
    %c2_77 = arith.constant 2 : index
    %c1_78 = arith.constant 1 : index
    %c0_79 = arith.constant 0 : index
    %48 = vector.load %arg10[%c0_76, %c2_77, %c1_78, %c0_79] : memref<1x18x18x128xf32, #tpu.memory_space<vmem>>, vector<1x16x16x128xf32>
    %49 = vector.shape_cast %48 : vector<1x16x16x128xf32> to vector<256x128xf32>
    %c0_80 = arith.constant 0 : index
    %c2_81 = arith.constant 2 : index
    %c1_82 = arith.constant 1 : index
    %c0_83 = arith.constant 0 : index
    %c0_84 = arith.constant 0 : index
    %50 = vector.load %arg2[%c0_80, %c2_81, %c1_82, %c0_83, %c0_84] : memref<4x3x3x128x128xf32, #tpu.memory_space<vmem>>, vector<1x1x1x128x128xf32>
    %51 = vector.shape_cast %50 : vector<1x1x1x128x128xf32> to vector<128x128xf32>
    %cst_85 = arith.constant dense<0.000000e+00> : vector<256x128xf32>
    %52 = tpu.matmul %49, %51, %cst_85 {dimension_numbers = #tpu.dot_dimension_numbers<[1], [0], [0], [1], [0, 0, 1, 1], [], []>} : vector<256x128xf32>, vector<128x128xf32>, vector<256x128xf32> -> vector<256x128xf32>
    %53 = arith.addf %47, %52 : vector<256x128xf32>
    %c0_86 = arith.constant 0 : index
    %c2_87 = arith.constant 2 : index
    %c2_88 = arith.constant 2 : index
    %c0_89 = arith.constant 0 : index
    %54 = vector.load %arg10[%c0_86, %c2_87, %c2_88, %c0_89] : memref<1x18x18x128xf32, #tpu.memory_space<vmem>>, vector<1x16x16x128xf32>
    %55 = vector.shape_cast %54 : vector<1x16x16x128xf32> to vector<256x128xf32>
    %c0_90 = arith.constant 0 : index
    %c2_91 = arith.constant 2 : index
    %c2_92 = arith.constant 2 : index
    %c0_93 = arith.constant 0 : index
    %c0_94 = arith.constant 0 : index
    %56 = vector.load %arg2[%c0_90, %c2_91, %c2_92, %c0_93, %c0_94] : memref<4x3x3x128x128xf32, #tpu.memory_space<vmem>>, vector<1x1x1x128x128xf32>
    %57 = vector.shape_cast %56 : vector<1x1x1x128x128xf32> to vector<128x128xf32>
    %cst_95 = arith.constant dense<0.000000e+00> : vector<256x128xf32>
    %58 = tpu.matmul %55, %57, %cst_95 {dimension_numbers = #tpu.dot_dimension_numbers<[1], [0], [0], [1], [0, 0, 1, 1], [], []>} : vector<256x128xf32>, vector<128x128xf32>, vector<256x128xf32> -> vector<256x128xf32>
    %59 = arith.addf %53, %58 : vector<256x128xf32>
    %c0_96 = arith.constant 0 : index
    %c0_97 = arith.constant 0 : index
    %c0_98 = arith.constant 0 : index
    %60 = vector.load %arg3[%c0_96, %c0_97, %c0_98] : memref<4x1x128xf32, #tpu.memory_space<vmem>>, vector<1x1x128xf32>
    %61 = vector.shape_cast %60 : vector<1x1x128xf32> to vector<1x128xf32>
    %62 = vector.broadcast %61 : vector<1x128xf32> to vector<256x128xf32>
    %63 = arith.addf %59, %62 : vector<256x128xf32>
    %cst_99 = arith.constant 0.000000e+00 : f32
    %64 = vector.broadcast %cst_99 : f32 to vector<256x128xf32>
    %65 = arith.maximumf %63, %64 : vector<256x128xf32>
    %66 = vector.shape_cast %65 : vector<256x128xf32> to vector<1x16x16x128xf32>
    %c0_100 = arith.constant 0 : index
    %c0_101 = arith.constant 0 : index
    %c0_102 = arith.constant 0 : index
    %c0_103 = arith.constant 0 : index
    %67 = vector.load %arg9[%c0_100, %c0_101, %c0_102, %c0_103] : memref<1x16x16x128xf32, #tpu.memory_space<vmem>>, vector<1x16x16x128xf32>
    tpu.vector_store %arg9[%c0_100, %c0_101, %c0_102, %c0_103], %66 {strides = array<i32>} : memref<1x16x16x128xf32, #tpu.memory_space<vmem>>, vector<1x16x16x128xf32>,
    %c0_104 = arith.constant 0 : index
    %c0_105 = arith.constant 0 : index
    %c0_106 = arith.constant 0 : index
    %c0_107 = arith.constant 0 : index
    %68 = vector.load %arg9[%c0_104, %c0_105, %c0_106, %c0_107] : memref<1x16x16x128xf32, #tpu.memory_space<vmem>>, vector<1x16x16x128xf32>
    %c0_108 = arith.constant 0 : index
    %c1_109 = arith.constant 1 : index
    %c1_110 = arith.constant 1 : index
    %c0_111 = arith.constant 0 : index
    %69 = vector.load %arg10[%c0_108, %c1_109, %c1_110, %c0_111] : memref<1x18x18x128xf32, #tpu.memory_space<vmem>>, vector<1x16x16x128xf32>
    tpu.vector_store %arg10[%c0_108, %c1_109, %c1_110, %c0_111], %68 {strides = array<i32>} : memref<1x18x18x128xf32, #tpu.memory_space<vmem>>, vector<1x16x16x128xf32>,
    %cst_112 = arith.constant 0.000000e+00 : f32
    %70 = vector.broadcast %cst_112 : f32 to vector<256x128xf32>
    %c0_113 = arith.constant 0 : index
    %c0_114 = arith.constant 0 : index
    %c0_115 = arith.constant 0 : index
    %c0_116 = arith.constant 0 : index
    %71 = vector.load %arg10[%c0_113, %c0_114, %c0_115, %c0_116] : memref<1x18x18x128xf32, #tpu.memory_space<vmem>>, vector<1x16x16x128xf32>
    %72 = vector.shape_cast %71 : vector<1x16x16x128xf32> to vector<256x128xf32>
    %c1_117 = arith.constant 1 : index
    %c0_118 = arith.constant 0 : index
    %c0_119 = arith.constant 0 : index
    %c0_120 = arith.constant 0 : index
    %c0_121 = arith.constant 0 : index
    %73 = vector.load %arg2[%c1_117, %c0_118, %c0_119, %c0_120, %c0_121] : memref<4x3x3x128x128xf32, #tpu.memory_space<vmem>>, vector<1x1x1x128x128xf32>
    %74 = vector.shape_cast %73 : vector<1x1x1x128x128xf32> to vector<128x128xf32>
    %cst_122 = arith.constant dense<0.000000e+00> : vector<256x128xf32>
    %75 = tpu.matmul %72, %74, %cst_122 {dimension_numbers = #tpu.dot_dimension_numbers<[1], [0], [0], [1], [0, 0, 1, 1], [], []>} : vector<256x128xf32>, vector<128x128xf32>, vector<256x128xf32> -> vector<256x128xf32>
    %76 = arith.addf %70, %75 : vector<256x128xf32>
    %c0_123 = arith.constant 0 : index
    %c0_124 = arith.constant 0 : index
    %c1_125 = arith.constant 1 : index
    %c0_126 = arith.constant 0 : index
    %77 = vector.load %arg10[%c0_123, %c0_124, %c1_125, %c0_126] : memref<1x18x18x128xf32, #tpu.memory_space<vmem>>, vector<1x16x16x128xf32>
    %78 = vector.shape_cast %77 : vector<1x16x16x128xf32> to vector<256x128xf32>
    %c1_127 = arith.constant 1 : index
    %c0_128 = arith.constant 0 : index
    %c1_129 = arith.constant 1 : index
    %c0_130 = arith.constant 0 : index
    %c0_131 = arith.constant 0 : index
    %79 = vector.load %arg2[%c1_127, %c0_128, %c1_129, %c0_130, %c0_131] : memref<4x3x3x128x128xf32, #tpu.memory_space<vmem>>, vector<1x1x1x128x128xf32>
    %80 = vector.shape_cast %79 : vector<1x1x1x128x128xf32> to vector<128x128xf32>
    %cst_132 = arith.constant dense<0.000000e+00> : vector<256x128xf32>
    %81 = tpu.matmul %78, %80, %cst_132 {dimension_numbers = #tpu.dot_dimension_numbers<[1], [0], [0], [1], [0, 0, 1, 1], [], []>} : vector<256x128xf32>, vector<128x128xf32>, vector<256x128xf32> -> vector<256x128xf32>
    %82 = arith.addf %76, %81 : vector<256x128xf32>
    %c0_133 = arith.constant 0 : index
    %c0_134 = arith.constant 0 : index
    %c2_135 = arith.constant 2 : index
    %c0_136 = arith.constant 0 : index
    %83 = vector.load %arg10[%c0_133, %c0_134, %c2_135, %c0_136] : memref<1x18x18x128xf32, #tpu.memory_space<vmem>>, vector<1x16x16x128xf32>
    %84 = vector.shape_cast %83 : vector<1x16x16x128xf32> to vector<256x128xf32>
    %c1_137 = arith.constant 1 : index
    %c0_138 = arith.constant 0 : index
    %c2_139 = arith.constant 2 : index
    %c0_140 = arith.constant 0 : index
    %c0_141 = arith.constant 0 : index
    %85 = vector.load %arg2[%c1_137, %c0_138, %c2_139, %c0_140, %c0_141] : memref<4x3x3x128x128xf32, #tpu.memory_space<vmem>>, vector<1x1x1x128x128xf32>
    %86 = vector.shape_cast %85 : vector<1x1x1x128x128xf32> to vector<128x128xf32>
    %cst_142 = arith.constant dense<0.000000e+00> : vector<256x128xf32>
    %87 = tpu.matmul %84, %86, %cst_142 {dimension_numbers = #tpu.dot_dimension_numbers<[1], [0], [0], [1], [0, 0, 1, 1], [], []>} : vector<256x128xf32>, vector<128x128xf32>, vector<256x128xf32> -> vector<256x128xf32>
    %88 = arith.addf %82, %87 : vector<256x128xf32>
    %c0_143 = arith.constant 0 : index
    %c1_144 = arith.constant 1 : index
    %c0_145 = arith.constant 0 : index
    %c0_146 = arith.constant 0 : index
    %89 = vector.load %arg10[%c0_143, %c1_144, %c0_145, %c0_146] : memref<1x18x18x128xf32, #tpu.memory_space<vmem>>, vector<1x16x16x128xf32>
    %90 = vector.shape_cast %89 : vector<1x16x16x128xf32> to vector<256x128xf32>
    %c1_147 = arith.constant 1 : index
    %c1_148 = arith.constant 1 : index
    %c0_149 = arith.constant 0 : index
    %c0_150 = arith.constant 0 : index
    %c0_151 = arith.constant 0 : index
    %91 = vector.load %arg2[%c1_147, %c1_148, %c0_149, %c0_150, %c0_151] : memref<4x3x3x128x128xf32, #tpu.memory_space<vmem>>, vector<1x1x1x128x128xf32>
    %92 = vector.shape_cast %91 : vector<1x1x1x128x128xf32> to vector<128x128xf32>
    %cst_152 = arith.constant dense<0.000000e+00> : vector<256x128xf32>
    %93 = tpu.matmul %90, %92, %cst_152 {dimension_numbers = #tpu.dot_dimension_numbers<[1], [0], [0], [1], [0, 0, 1, 1], [], []>} : vector<256x128xf32>, vector<128x128xf32>, vector<256x128xf32> -> vector<256x128xf32>
    %94 = arith.addf %88, %93 : vector<256x128xf32>
    %c0_153 = arith.constant 0 : index
    %c1_154 = arith.constant 1 : index
    %c1_155 = arith.constant 1 : index
    %c0_156 = arith.constant 0 : index
    %95 = vector.load %arg10[%c0_153, %c1_154, %c1_155, %c0_156] : memref<1x18x18x128xf32, #tpu.memory_space<vmem>>, vector<1x16x16x128xf32>
    %96 = vector.shape_cast %95 : vector<1x16x16x128xf32> to vector<256x128xf32>
    %c1_157 = arith.constant 1 : index
    %c1_158 = arith.constant 1 : index
    %c1_159 = arith.constant 1 : index
    %c0_160 = arith.constant 0 : index
    %c0_161 = arith.constant 0 : index
    %97 = vector.load %arg2[%c1_157, %c1_158, %c1_159, %c0_160, %c0_161] : memref<4x3x3x128x128xf32, #tpu.memory_space<vmem>>, vector<1x1x1x128x128xf32>
    %98 = vector.shape_cast %97 : vector<1x1x1x128x128xf32> to vector<128x128xf32>
    %cst_162 = arith.constant dense<0.000000e+00> : vector<256x128xf32>
    %99 = tpu.matmul %96, %98, %cst_162 {dimension_numbers = #tpu.dot_dimension_numbers<[1], [0], [0], [1], [0, 0, 1, 1], [], []>} : vector<256x128xf32>, vector<128x128xf32>, vector<256x128xf32> -> vector<256x128xf32>
    %100 = arith.addf %94, %99 : vector<256x128xf32>
    %c0_163 = arith.constant 0 : index
    %c1_164 = arith.constant 1 : index
    %c2_165 = arith.constant 2 : index
    %c0_166 = arith.constant 0 : index
    %101 = vector.load %arg10[%c0_163, %c1_164, %c2_165, %c0_166] : memref<1x18x18x128xf32, #tpu.memory_space<vmem>>, vector<1x16x16x128xf32>
    %102 = vector.shape_cast %101 : vector<1x16x16x128xf32> to vector<256x128xf32>
    %c1_167 = arith.constant 1 : index
    %c1_168 = arith.constant 1 : index
    %c2_169 = arith.constant 2 : index
    %c0_170 = arith.constant 0 : index
    %c0_171 = arith.constant 0 : index
    %103 = vector.load %arg2[%c1_167, %c1_168, %c2_169, %c0_170, %c0_171] : memref<4x3x3x128x128xf32, #tpu.memory_space<vmem>>, vector<1x1x1x128x128xf32>
    %104 = vector.shape_cast %103 : vector<1x1x1x128x128xf32> to vector<128x128xf32>
    %cst_172 = arith.constant dense<0.000000e+00> : vector<256x128xf32>
    %105 = tpu.matmul %102, %104, %cst_172 {dimension_numbers = #tpu.dot_dimension_numbers<[1], [0], [0], [1], [0, 0, 1, 1], [], []>} : vector<256x128xf32>, vector<128x128xf32>, vector<256x128xf32> -> vector<256x128xf32>
    %106 = arith.addf %100, %105 : vector<256x128xf32>
    %c0_173 = arith.constant 0 : index
    %c2_174 = arith.constant 2 : index
    %c0_175 = arith.constant 0 : index
    %c0_176 = arith.constant 0 : index
    %107 = vector.load %arg10[%c0_173, %c2_174, %c0_175, %c0_176] : memref<1x18x18x128xf32, #tpu.memory_space<vmem>>, vector<1x16x16x128xf32>
    %108 = vector.shape_cast %107 : vector<1x16x16x128xf32> to vector<256x128xf32>
    %c1_177 = arith.constant 1 : index
    %c2_178 = arith.constant 2 : index
    %c0_179 = arith.constant 0 : index
    %c0_180 = arith.constant 0 : index
    %c0_181 = arith.constant 0 : index
    %109 = vector.load %arg2[%c1_177, %c2_178, %c0_179, %c0_180, %c0_181] : memref<4x3x3x128x128xf32, #tpu.memory_space<vmem>>, vector<1x1x1x128x128xf32>
    %110 = vector.shape_cast %109 : vector<1x1x1x128x128xf32> to vector<128x128xf32>
    %cst_182 = arith.constant dense<0.000000e+00> : vector<256x128xf32>
    %111 = tpu.matmul %108, %110, %cst_182 {dimension_numbers = #tpu.dot_dimension_numbers<[1], [0], [0], [1], [0, 0, 1, 1], [], []>} : vector<256x128xf32>, vector<128x128xf32>, vector<256x128xf32> -> vector<256x128xf32>
    %112 = arith.addf %106, %111 : vector<256x128xf32>
    %c0_183 = arith.constant 0 : index
    %c2_184 = arith.constant 2 : index
    %c1_185 = arith.constant 1 : index
    %c0_186 = arith.constant 0 : index
    %113 = vector.load %arg10[%c0_183, %c2_184, %c1_185, %c0_186] : memref<1x18x18x128xf32, #tpu.memory_space<vmem>>, vector<1x16x16x128xf32>
    %114 = vector.shape_cast %113 : vector<1x16x16x128xf32> to vector<256x128xf32>
    %c1_187 = arith.constant 1 : index
    %c2_188 = arith.constant 2 : index
    %c1_189 = arith.constant 1 : index
    %c0_190 = arith.constant 0 : index
    %c0_191 = arith.constant 0 : index
    %115 = vector.load %arg2[%c1_187, %c2_188, %c1_189, %c0_190, %c0_191] : memref<4x3x3x128x128xf32, #tpu.memory_space<vmem>>, vector<1x1x1x128x128xf32>
    %116 = vector.shape_cast %115 : vector<1x1x1x128x128xf32> to vector<128x128xf32>
    %cst_192 = arith.constant dense<0.000000e+00> : vector<256x128xf32>
    %117 = tpu.matmul %114, %116, %cst_192 {dimension_numbers = #tpu.dot_dimension_numbers<[1], [0], [0], [1], [0, 0, 1, 1], [], []>} : vector<256x128xf32>, vector<128x128xf32>, vector<256x128xf32> -> vector<256x128xf32>
    %118 = arith.addf %112, %117 : vector<256x128xf32>
    %c0_193 = arith.constant 0 : index
    %c2_194 = arith.constant 2 : index
    %c2_195 = arith.constant 2 : index
    %c0_196 = arith.constant 0 : index
    %119 = vector.load %arg10[%c0_193, %c2_194, %c2_195, %c0_196] : memref<1x18x18x128xf32, #tpu.memory_space<vmem>>, vector<1x16x16x128xf32>
    %120 = vector.shape_cast %119 : vector<1x16x16x128xf32> to vector<256x128xf32>
    %c1_197 = arith.constant 1 : index
    %c2_198 = arith.constant 2 : index
    %c2_199 = arith.constant 2 : index
    %c0_200 = arith.constant 0 : index
    %c0_201 = arith.constant 0 : index
    %121 = vector.load %arg2[%c1_197, %c2_198, %c2_199, %c0_200, %c0_201] : memref<4x3x3x128x128xf32, #tpu.memory_space<vmem>>, vector<1x1x1x128x128xf32>
    %122 = vector.shape_cast %121 : vector<1x1x1x128x128xf32> to vector<128x128xf32>
    %cst_202 = arith.constant dense<0.000000e+00> : vector<256x128xf32>
    %123 = tpu.matmul %120, %122, %cst_202 {dimension_numbers = #tpu.dot_dimension_numbers<[1], [0], [0], [1], [0, 0, 1, 1], [], []>} : vector<256x128xf32>, vector<128x128xf32>, vector<256x128xf32> -> vector<256x128xf32>
    %124 = arith.addf %118, %123 : vector<256x128xf32>
    %c1_203 = arith.constant 1 : index
    %c0_204 = arith.constant 0 : index
    %c0_205 = arith.constant 0 : index
    %125 = vector.load %arg3[%c1_203, %c0_204, %c0_205] : memref<4x1x128xf32, #tpu.memory_space<vmem>>, vector<1x1x128xf32>
    %126 = vector.shape_cast %125 : vector<1x1x128xf32> to vector<1x128xf32>
    %127 = vector.broadcast %126 : vector<1x128xf32> to vector<256x128xf32>
    %128 = arith.addf %124, %127 : vector<256x128xf32>
    %cst_206 = arith.constant 0.000000e+00 : f32
    %129 = vector.broadcast %cst_206 : f32 to vector<256x128xf32>
    %130 = arith.maximumf %128, %129 : vector<256x128xf32>
    %131 = vector.shape_cast %130 : vector<256x128xf32> to vector<1x16x16x128xf32>
    %c0_207 = arith.constant 0 : index
    %c0_208 = arith.constant 0 : index
    %c0_209 = arith.constant 0 : index
    %c0_210 = arith.constant 0 : index
    %132 = vector.load %arg9[%c0_207, %c0_208, %c0_209, %c0_210] : memref<1x16x16x128xf32, #tpu.memory_space<vmem>>, vector<1x16x16x128xf32>
    tpu.vector_store %arg9[%c0_207, %c0_208, %c0_209, %c0_210], %131 {strides = array<i32>} : memref<1x16x16x128xf32, #tpu.memory_space<vmem>>, vector<1x16x16x128xf32>,
    %c0_211 = arith.constant 0 : index
    %c0_212 = arith.constant 0 : index
    %c0_213 = arith.constant 0 : index
    %c0_214 = arith.constant 0 : index
    %133 = vector.load %arg9[%c0_211, %c0_212, %c0_213, %c0_214] : memref<1x16x16x128xf32, #tpu.memory_space<vmem>>, vector<1x16x16x128xf32>
    %c0_215 = arith.constant 0 : index
    %c1_216 = arith.constant 1 : index
    %c1_217 = arith.constant 1 : index
    %c0_218 = arith.constant 0 : index
    %134 = vector.load %arg10[%c0_215, %c1_216, %c1_217, %c0_218] : memref<1x18x18x128xf32, #tpu.memory_space<vmem>>, vector<1x16x16x128xf32>
    tpu.vector_store %arg10[%c0_215, %c1_216, %c1_217, %c0_218], %133 {strides = array<i32>} : memref<1x18x18x128xf32, #tpu.memory_space<vmem>>, vector<1x16x16x128xf32>,
    %cst_219 = arith.constant 0.000000e+00 : f32
    %135 = vector.broadcast %cst_219 : f32 to vector<256x128xf32>
    %c0_220 = arith.constant 0 : index
    %c0_221 = arith.constant 0 : index
    %c0_222 = arith.constant 0 : index
    %c0_223 = arith.constant 0 : index
    %136 = vector.load %arg10[%c0_220, %c0_221, %c0_222, %c0_223] : memref<1x18x18x128xf32, #tpu.memory_space<vmem>>, vector<1x16x16x128xf32>
    %137 = vector.shape_cast %136 : vector<1x16x16x128xf32> to vector<256x128xf32>
    %c2_224 = arith.constant 2 : index
    %c0_225 = arith.constant 0 : index
    %c0_226 = arith.constant 0 : index
    %c0_227 = arith.constant 0 : index
    %c0_228 = arith.constant 0 : index
    %138 = vector.load %arg2[%c2_224, %c0_225, %c0_226, %c0_227, %c0_228] : memref<4x3x3x128x128xf32, #tpu.memory_space<vmem>>, vector<1x1x1x128x128xf32>
    %139 = vector.shape_cast %138 : vector<1x1x1x128x128xf32> to vector<128x128xf32>
    %cst_229 = arith.constant dense<0.000000e+00> : vector<256x128xf32>
    %140 = tpu.matmul %137, %139, %cst_229 {dimension_numbers = #tpu.dot_dimension_numbers<[1], [0], [0], [1], [0, 0, 1, 1], [], []>} : vector<256x128xf32>, vector<128x128xf32>, vector<256x128xf32> -> vector<256x128xf32>
    %141 = arith.addf %135, %140 : vector<256x128xf32>
    %c0_230 = arith.constant 0 : index
    %c0_231 = arith.constant 0 : index
    %c1_232 = arith.constant 1 : index
    %c0_233 = arith.constant 0 : index
    %142 = vector.load %arg10[%c0_230, %c0_231, %c1_232, %c0_233] : memref<1x18x18x128xf32, #tpu.memory_space<vmem>>, vector<1x16x16x128xf32>
    %143 = vector.shape_cast %142 : vector<1x16x16x128xf32> to vector<256x128xf32>
    %c2_234 = arith.constant 2 : index
    %c0_235 = arith.constant 0 : index
    %c1_236 = arith.constant 1 : index
    %c0_237 = arith.constant 0 : index
    %c0_238 = arith.constant 0 : index
    %144 = vector.load %arg2[%c2_234, %c0_235, %c1_236, %c0_237, %c0_238] : memref<4x3x3x128x128xf32, #tpu.memory_space<vmem>>, vector<1x1x1x128x128xf32>
    %145 = vector.shape_cast %144 : vector<1x1x1x128x128xf32> to vector<128x128xf32>
    %cst_239 = arith.constant dense<0.000000e+00> : vector<256x128xf32>
    %146 = tpu.matmul %143, %145, %cst_239 {dimension_numbers = #tpu.dot_dimension_numbers<[1], [0], [0], [1], [0, 0, 1, 1], [], []>} : vector<256x128xf32>, vector<128x128xf32>, vector<256x128xf32> -> vector<256x128xf32>
    %147 = arith.addf %141, %146 : vector<256x128xf32>
    %c0_240 = arith.constant 0 : index
    %c0_241 = arith.constant 0 : index
    %c2_242 = arith.constant 2 : index
    %c0_243 = arith.constant 0 : index
    %148 = vector.load %arg10[%c0_240, %c0_241, %c2_242, %c0_243] : memref<1x18x18x128xf32, #tpu.memory_space<vmem>>, vector<1x16x16x128xf32>
    %149 = vector.shape_cast %148 : vector<1x16x16x128xf32> to vector<256x128xf32>
    %c2_244 = arith.constant 2 : index
    %c0_245 = arith.constant 0 : index
    %c2_246 = arith.constant 2 : index
    %c0_247 = arith.constant 0 : index
    %c0_248 = arith.constant 0 : index
    %150 = vector.load %arg2[%c2_244, %c0_245, %c2_246, %c0_247, %c0_248] : memref<4x3x3x128x128xf32, #tpu.memory_space<vmem>>, vector<1x1x1x128x128xf32>
    %151 = vector.shape_cast %150 : vector<1x1x1x128x128xf32> to vector<128x128xf32>
    %cst_249 = arith.constant dense<0.000000e+00> : vector<256x128xf32>
    %152 = tpu.matmul %149, %151, %cst_249 {dimension_numbers = #tpu.dot_dimension_numbers<[1], [0], [0], [1], [0, 0, 1, 1], [], []>} : vector<256x128xf32>, vector<128x128xf32>, vector<256x128xf32> -> vector<256x128xf32>
    %153 = arith.addf %147, %152 : vector<256x128xf32>
    %c0_250 = arith.constant 0 : index
    %c1_251 = arith.constant 1 : index
    %c0_252 = arith.constant 0 : index
    %c0_253 = arith.constant 0 : index
    %154 = vector.load %arg10[%c0_250, %c1_251, %c0_252, %c0_253] : memref<1x18x18x128xf32, #tpu.memory_space<vmem>>, vector<1x16x16x128xf32>
    %155 = vector.shape_cast %154 : vector<1x16x16x128xf32> to vector<256x128xf32>
    %c2_254 = arith.constant 2 : index
    %c1_255 = arith.constant 1 : index
    %c0_256 = arith.constant 0 : index
    %c0_257 = arith.constant 0 : index
    %c0_258 = arith.constant 0 : index
    %156 = vector.load %arg2[%c2_254, %c1_255, %c0_256, %c0_257, %c0_258] : memref<4x3x3x128x128xf32, #tpu.memory_space<vmem>>, vector<1x1x1x128x128xf32>
    %157 = vector.shape_cast %156 : vector<1x1x1x128x128xf32> to vector<128x128xf32>
    %cst_259 = arith.constant dense<0.000000e+00> : vector<256x128xf32>
    %158 = tpu.matmul %155, %157, %cst_259 {dimension_numbers = #tpu.dot_dimension_numbers<[1], [0], [0], [1], [0, 0, 1, 1], [], []>} : vector<256x128xf32>, vector<128x128xf32>, vector<256x128xf32> -> vector<256x128xf32>
    %159 = arith.addf %153, %158 : vector<256x128xf32>
    %c0_260 = arith.constant 0 : index
    %c1_261 = arith.constant 1 : index
    %c1_262 = arith.constant 1 : index
    %c0_263 = arith.constant 0 : index
    %160 = vector.load %arg10[%c0_260, %c1_261, %c1_262, %c0_263] : memref<1x18x18x128xf32, #tpu.memory_space<vmem>>, vector<1x16x16x128xf32>
    %161 = vector.shape_cast %160 : vector<1x16x16x128xf32> to vector<256x128xf32>
    %c2_264 = arith.constant 2 : index
    %c1_265 = arith.constant 1 : index
    %c1_266 = arith.constant 1 : index
    %c0_267 = arith.constant 0 : index
    %c0_268 = arith.constant 0 : index
    %162 = vector.load %arg2[%c2_264, %c1_265, %c1_266, %c0_267, %c0_268] : memref<4x3x3x128x128xf32, #tpu.memory_space<vmem>>, vector<1x1x1x128x128xf32>
    %163 = vector.shape_cast %162 : vector<1x1x1x128x128xf32> to vector<128x128xf32>
    %cst_269 = arith.constant dense<0.000000e+00> : vector<256x128xf32>
    %164 = tpu.matmul %161, %163, %cst_269 {dimension_numbers = #tpu.dot_dimension_numbers<[1], [0], [0], [1], [0, 0, 1, 1], [], []>} : vector<256x128xf32>, vector<128x128xf32>, vector<256x128xf32> -> vector<256x128xf32>
    %165 = arith.addf %159, %164 : vector<256x128xf32>
    %c0_270 = arith.constant 0 : index
    %c1_271 = arith.constant 1 : index
    %c2_272 = arith.constant 2 : index
    %c0_273 = arith.constant 0 : index
    %166 = vector.load %arg10[%c0_270, %c1_271, %c2_272, %c0_273] : memref<1x18x18x128xf32, #tpu.memory_space<vmem>>, vector<1x16x16x128xf32>
    %167 = vector.shape_cast %166 : vector<1x16x16x128xf32> to vector<256x128xf32>
    %c2_274 = arith.constant 2 : index
    %c1_275 = arith.constant 1 : index
    %c2_276 = arith.constant 2 : index
    %c0_277 = arith.constant 0 : index
    %c0_278 = arith.constant 0 : index
    %168 = vector.load %arg2[%c2_274, %c1_275, %c2_276, %c0_277, %c0_278] : memref<4x3x3x128x128xf32, #tpu.memory_space<vmem>>, vector<1x1x1x128x128xf32>
    %169 = vector.shape_cast %168 : vector<1x1x1x128x128xf32> to vector<128x128xf32>
    %cst_279 = arith.constant dense<0.000000e+00> : vector<256x128xf32>
    %170 = tpu.matmul %167, %169, %cst_279 {dimension_numbers = #tpu.dot_dimension_numbers<[1], [0], [0], [1], [0, 0, 1, 1], [], []>} : vector<256x128xf32>, vector<128x128xf32>, vector<256x128xf32> -> vector<256x128xf32>
    %171 = arith.addf %165, %170 : vector<256x128xf32>
    %c0_280 = arith.constant 0 : index
    %c2_281 = arith.constant 2 : index
    %c0_282 = arith.constant 0 : index
    %c0_283 = arith.constant 0 : index
    %172 = vector.load %arg10[%c0_280, %c2_281, %c0_282, %c0_283] : memref<1x18x18x128xf32, #tpu.memory_space<vmem>>, vector<1x16x16x128xf32>
    %173 = vector.shape_cast %172 : vector<1x16x16x128xf32> to vector<256x128xf32>
    %c2_284 = arith.constant 2 : index
    %c2_285 = arith.constant 2 : index
    %c0_286 = arith.constant 0 : index
    %c0_287 = arith.constant 0 : index
    %c0_288 = arith.constant 0 : index
    %174 = vector.load %arg2[%c2_284, %c2_285, %c0_286, %c0_287, %c0_288] : memref<4x3x3x128x128xf32, #tpu.memory_space<vmem>>, vector<1x1x1x128x128xf32>
    %175 = vector.shape_cast %174 : vector<1x1x1x128x128xf32> to vector<128x128xf32>
    %cst_289 = arith.constant dense<0.000000e+00> : vector<256x128xf32>
    %176 = tpu.matmul %173, %175, %cst_289 {dimension_numbers = #tpu.dot_dimension_numbers<[1], [0], [0], [1], [0, 0, 1, 1], [], []>} : vector<256x128xf32>, vector<128x128xf32>, vector<256x128xf32> -> vector<256x128xf32>
    %177 = arith.addf %171, %176 : vector<256x128xf32>
    %c0_290 = arith.constant 0 : index
    %c2_291 = arith.constant 2 : index
    %c1_292 = arith.constant 1 : index
    %c0_293 = arith.constant 0 : index
    %178 = vector.load %arg10[%c0_290, %c2_291, %c1_292, %c0_293] : memref<1x18x18x128xf32, #tpu.memory_space<vmem>>, vector<1x16x16x128xf32>
    %179 = vector.shape_cast %178 : vector<1x16x16x128xf32> to vector<256x128xf32>
    %c2_294 = arith.constant 2 : index
    %c2_295 = arith.constant 2 : index
    %c1_296 = arith.constant 1 : index
    %c0_297 = arith.constant 0 : index
    %c0_298 = arith.constant 0 : index
    %180 = vector.load %arg2[%c2_294, %c2_295, %c1_296, %c0_297, %c0_298] : memref<4x3x3x128x128xf32, #tpu.memory_space<vmem>>, vector<1x1x1x128x128xf32>
    %181 = vector.shape_cast %180 : vector<1x1x1x128x128xf32> to vector<128x128xf32>
    %cst_299 = arith.constant dense<0.000000e+00> : vector<256x128xf32>
    %182 = tpu.matmul %179, %181, %cst_299 {dimension_numbers = #tpu.dot_dimension_numbers<[1], [0], [0], [1], [0, 0, 1, 1], [], []>} : vector<256x128xf32>, vector<128x128xf32>, vector<256x128xf32> -> vector<256x128xf32>
    %183 = arith.addf %177, %182 : vector<256x128xf32>
    %c0_300 = arith.constant 0 : index
    %c2_301 = arith.constant 2 : index
    %c2_302 = arith.constant 2 : index
    %c0_303 = arith.constant 0 : index
    %184 = vector.load %arg10[%c0_300, %c2_301, %c2_302, %c0_303] : memref<1x18x18x128xf32, #tpu.memory_space<vmem>>, vector<1x16x16x128xf32>
    %185 = vector.shape_cast %184 : vector<1x16x16x128xf32> to vector<256x128xf32>
    %c2_304 = arith.constant 2 : index
    %c2_305 = arith.constant 2 : index
    %c2_306 = arith.constant 2 : index
    %c0_307 = arith.constant 0 : index
    %c0_308 = arith.constant 0 : index
    %186 = vector.load %arg2[%c2_304, %c2_305, %c2_306, %c0_307, %c0_308] : memref<4x3x3x128x128xf32, #tpu.memory_space<vmem>>, vector<1x1x1x128x128xf32>
    %187 = vector.shape_cast %186 : vector<1x1x1x128x128xf32> to vector<128x128xf32>
    %cst_309 = arith.constant dense<0.000000e+00> : vector<256x128xf32>
    %188 = tpu.matmul %185, %187, %cst_309 {dimension_numbers = #tpu.dot_dimension_numbers<[1], [0], [0], [1], [0, 0, 1, 1], [], []>} : vector<256x128xf32>, vector<128x128xf32>, vector<256x128xf32> -> vector<256x128xf32>
    %189 = arith.addf %183, %188 : vector<256x128xf32>
    %c2_310 = arith.constant 2 : index
    %c0_311 = arith.constant 0 : index
    %c0_312 = arith.constant 0 : index
    %190 = vector.load %arg3[%c2_310, %c0_311, %c0_312] : memref<4x1x128xf32, #tpu.memory_space<vmem>>, vector<1x1x128xf32>
    %191 = vector.shape_cast %190 : vector<1x1x128xf32> to vector<1x128xf32>
    %192 = vector.broadcast %191 : vector<1x128xf32> to vector<256x128xf32>
    %193 = arith.addf %189, %192 : vector<256x128xf32>
    %cst_313 = arith.constant 0.000000e+00 : f32
    %194 = vector.broadcast %cst_313 : f32 to vector<256x128xf32>
    %195 = arith.maximumf %193, %194 : vector<256x128xf32>
    %196 = vector.shape_cast %195 : vector<256x128xf32> to vector<1x16x16x128xf32>
    %c0_314 = arith.constant 0 : index
    %c0_315 = arith.constant 0 : index
    %c0_316 = arith.constant 0 : index
    %c0_317 = arith.constant 0 : index
    %197 = vector.load %arg9[%c0_314, %c0_315, %c0_316, %c0_317] : memref<1x16x16x128xf32, #tpu.memory_space<vmem>>, vector<1x16x16x128xf32>
    tpu.vector_store %arg9[%c0_314, %c0_315, %c0_316, %c0_317], %196 {strides = array<i32>} : memref<1x16x16x128xf32, #tpu.memory_space<vmem>>, vector<1x16x16x128xf32>,
    %c0_318 = arith.constant 0 : index
    %c0_319 = arith.constant 0 : index
    %c0_320 = arith.constant 0 : index
    %c0_321 = arith.constant 0 : index
    %198 = vector.load %arg9[%c0_318, %c0_319, %c0_320, %c0_321] : memref<1x16x16x128xf32, #tpu.memory_space<vmem>>, vector<1x16x16x128xf32>
    %c0_322 = arith.constant 0 : index
    %c1_323 = arith.constant 1 : index
    %c1_324 = arith.constant 1 : index
    %c0_325 = arith.constant 0 : index
    %199 = vector.load %arg10[%c0_322, %c1_323, %c1_324, %c0_325] : memref<1x18x18x128xf32, #tpu.memory_space<vmem>>, vector<1x16x16x128xf32>
    tpu.vector_store %arg10[%c0_322, %c1_323, %c1_324, %c0_325], %198 {strides = array<i32>} : memref<1x18x18x128xf32, #tpu.memory_space<vmem>>, vector<1x16x16x128xf32>,
    %cst_326 = arith.constant 0.000000e+00 : f32
    %200 = vector.broadcast %cst_326 : f32 to vector<256x128xf32>
    %c0_327 = arith.constant 0 : index
    %c0_328 = arith.constant 0 : index
    %c0_329 = arith.constant 0 : index
    %c0_330 = arith.constant 0 : index
    %201 = vector.load %arg10[%c0_327, %c0_328, %c0_329, %c0_330] : memref<1x18x18x128xf32, #tpu.memory_space<vmem>>, vector<1x16x16x128xf32>
    %202 = vector.shape_cast %201 : vector<1x16x16x128xf32> to vector<256x128xf32>
    %c3 = arith.constant 3 : index
    %c0_331 = arith.constant 0 : index
    %c0_332 = arith.constant 0 : index
    %c0_333 = arith.constant 0 : index
    %c0_334 = arith.constant 0 : index
    %203 = vector.load %arg2[%c3, %c0_331, %c0_332, %c0_333, %c0_334] : memref<4x3x3x128x128xf32, #tpu.memory_space<vmem>>, vector<1x1x1x128x128xf32>
    %204 = vector.shape_cast %203 : vector<1x1x1x128x128xf32> to vector<128x128xf32>
    %cst_335 = arith.constant dense<0.000000e+00> : vector<256x128xf32>
    %205 = tpu.matmul %202, %204, %cst_335 {dimension_numbers = #tpu.dot_dimension_numbers<[1], [0], [0], [1], [0, 0, 1, 1], [], []>} : vector<256x128xf32>, vector<128x128xf32>, vector<256x128xf32> -> vector<256x128xf32>
    %206 = arith.addf %200, %205 : vector<256x128xf32>
    %c0_336 = arith.constant 0 : index
    %c0_337 = arith.constant 0 : index
    %c1_338 = arith.constant 1 : index
    %c0_339 = arith.constant 0 : index
    %207 = vector.load %arg10[%c0_336, %c0_337, %c1_338, %c0_339] : memref<1x18x18x128xf32, #tpu.memory_space<vmem>>, vector<1x16x16x128xf32>
    %208 = vector.shape_cast %207 : vector<1x16x16x128xf32> to vector<256x128xf32>
    %c3_340 = arith.constant 3 : index
    %c0_341 = arith.constant 0 : index
    %c1_342 = arith.constant 1 : index
    %c0_343 = arith.constant 0 : index
    %c0_344 = arith.constant 0 : index
    %209 = vector.load %arg2[%c3_340, %c0_341, %c1_342, %c0_343, %c0_344] : memref<4x3x3x128x128xf32, #tpu.memory_space<vmem>>, vector<1x1x1x128x128xf32>
    %210 = vector.shape_cast %209 : vector<1x1x1x128x128xf32> to vector<128x128xf32>
    %cst_345 = arith.constant dense<0.000000e+00> : vector<256x128xf32>
    %211 = tpu.matmul %208, %210, %cst_345 {dimension_numbers = #tpu.dot_dimension_numbers<[1], [0], [0], [1], [0, 0, 1, 1], [], []>} : vector<256x128xf32>, vector<128x128xf32>, vector<256x128xf32> -> vector<256x128xf32>
    %212 = arith.addf %206, %211 : vector<256x128xf32>
    %c0_346 = arith.constant 0 : index
    %c0_347 = arith.constant 0 : index
    %c2_348 = arith.constant 2 : index
    %c0_349 = arith.constant 0 : index
    %213 = vector.load %arg10[%c0_346, %c0_347, %c2_348, %c0_349] : memref<1x18x18x128xf32, #tpu.memory_space<vmem>>, vector<1x16x16x128xf32>
    %214 = vector.shape_cast %213 : vector<1x16x16x128xf32> to vector<256x128xf32>
    %c3_350 = arith.constant 3 : index
    %c0_351 = arith.constant 0 : index
    %c2_352 = arith.constant 2 : index
    %c0_353 = arith.constant 0 : index
    %c0_354 = arith.constant 0 : index
    %215 = vector.load %arg2[%c3_350, %c0_351, %c2_352, %c0_353, %c0_354] : memref<4x3x3x128x128xf32, #tpu.memory_space<vmem>>, vector<1x1x1x128x128xf32>
    %216 = vector.shape_cast %215 : vector<1x1x1x128x128xf32> to vector<128x128xf32>
    %cst_355 = arith.constant dense<0.000000e+00> : vector<256x128xf32>
    %217 = tpu.matmul %214, %216, %cst_355 {dimension_numbers = #tpu.dot_dimension_numbers<[1], [0], [0], [1], [0, 0, 1, 1], [], []>} : vector<256x128xf32>, vector<128x128xf32>, vector<256x128xf32> -> vector<256x128xf32>
    %218 = arith.addf %212, %217 : vector<256x128xf32>
    %c0_356 = arith.constant 0 : index
    %c1_357 = arith.constant 1 : index
    %c0_358 = arith.constant 0 : index
    %c0_359 = arith.constant 0 : index
    %219 = vector.load %arg10[%c0_356, %c1_357, %c0_358, %c0_359] : memref<1x18x18x128xf32, #tpu.memory_space<vmem>>, vector<1x16x16x128xf32>
    %220 = vector.shape_cast %219 : vector<1x16x16x128xf32> to vector<256x128xf32>
    %c3_360 = arith.constant 3 : index
    %c1_361 = arith.constant 1 : index
    %c0_362 = arith.constant 0 : index
    %c0_363 = arith.constant 0 : index
    %c0_364 = arith.constant 0 : index
    %221 = vector.load %arg2[%c3_360, %c1_361, %c0_362, %c0_363, %c0_364] : memref<4x3x3x128x128xf32, #tpu.memory_space<vmem>>, vector<1x1x1x128x128xf32>
    %222 = vector.shape_cast %221 : vector<1x1x1x128x128xf32> to vector<128x128xf32>
    %cst_365 = arith.constant dense<0.000000e+00> : vector<256x128xf32>
    %223 = tpu.matmul %220, %222, %cst_365 {dimension_numbers = #tpu.dot_dimension_numbers<[1], [0], [0], [1], [0, 0, 1, 1], [], []>} : vector<256x128xf32>, vector<128x128xf32>, vector<256x128xf32> -> vector<256x128xf32>
    %224 = arith.addf %218, %223 : vector<256x128xf32>
    %c0_366 = arith.constant 0 : index
    %c1_367 = arith.constant 1 : index
    %c1_368 = arith.constant 1 : index
    %c0_369 = arith.constant 0 : index
    %225 = vector.load %arg10[%c0_366, %c1_367, %c1_368, %c0_369] : memref<1x18x18x128xf32, #tpu.memory_space<vmem>>, vector<1x16x16x128xf32>
    %226 = vector.shape_cast %225 : vector<1x16x16x128xf32> to vector<256x128xf32>
    %c3_370 = arith.constant 3 : index
    %c1_371 = arith.constant 1 : index
    %c1_372 = arith.constant 1 : index
    %c0_373 = arith.constant 0 : index
    %c0_374 = arith.constant 0 : index
    %227 = vector.load %arg2[%c3_370, %c1_371, %c1_372, %c0_373, %c0_374] : memref<4x3x3x128x128xf32, #tpu.memory_space<vmem>>, vector<1x1x1x128x128xf32>
    %228 = vector.shape_cast %227 : vector<1x1x1x128x128xf32> to vector<128x128xf32>
    %cst_375 = arith.constant dense<0.000000e+00> : vector<256x128xf32>
    %229 = tpu.matmul %226, %228, %cst_375 {dimension_numbers = #tpu.dot_dimension_numbers<[1], [0], [0], [1], [0, 0, 1, 1], [], []>} : vector<256x128xf32>, vector<128x128xf32>, vector<256x128xf32> -> vector<256x128xf32>
    %230 = arith.addf %224, %229 : vector<256x128xf32>
    %c0_376 = arith.constant 0 : index
    %c1_377 = arith.constant 1 : index
    %c2_378 = arith.constant 2 : index
    %c0_379 = arith.constant 0 : index
    %231 = vector.load %arg10[%c0_376, %c1_377, %c2_378, %c0_379] : memref<1x18x18x128xf32, #tpu.memory_space<vmem>>, vector<1x16x16x128xf32>
    %232 = vector.shape_cast %231 : vector<1x16x16x128xf32> to vector<256x128xf32>
    %c3_380 = arith.constant 3 : index
    %c1_381 = arith.constant 1 : index
    %c2_382 = arith.constant 2 : index
    %c0_383 = arith.constant 0 : index
    %c0_384 = arith.constant 0 : index
    %233 = vector.load %arg2[%c3_380, %c1_381, %c2_382, %c0_383, %c0_384] : memref<4x3x3x128x128xf32, #tpu.memory_space<vmem>>, vector<1x1x1x128x128xf32>
    %234 = vector.shape_cast %233 : vector<1x1x1x128x128xf32> to vector<128x128xf32>
    %cst_385 = arith.constant dense<0.000000e+00> : vector<256x128xf32>
    %235 = tpu.matmul %232, %234, %cst_385 {dimension_numbers = #tpu.dot_dimension_numbers<[1], [0], [0], [1], [0, 0, 1, 1], [], []>} : vector<256x128xf32>, vector<128x128xf32>, vector<256x128xf32> -> vector<256x128xf32>
    %236 = arith.addf %230, %235 : vector<256x128xf32>
    %c0_386 = arith.constant 0 : index
    %c2_387 = arith.constant 2 : index
    %c0_388 = arith.constant 0 : index
    %c0_389 = arith.constant 0 : index
    %237 = vector.load %arg10[%c0_386, %c2_387, %c0_388, %c0_389] : memref<1x18x18x128xf32, #tpu.memory_space<vmem>>, vector<1x16x16x128xf32>
    %238 = vector.shape_cast %237 : vector<1x16x16x128xf32> to vector<256x128xf32>
    %c3_390 = arith.constant 3 : index
    %c2_391 = arith.constant 2 : index
    %c0_392 = arith.constant 0 : index
    %c0_393 = arith.constant 0 : index
    %c0_394 = arith.constant 0 : index
    %239 = vector.load %arg2[%c3_390, %c2_391, %c0_392, %c0_393, %c0_394] : memref<4x3x3x128x128xf32, #tpu.memory_space<vmem>>, vector<1x1x1x128x128xf32>
    %240 = vector.shape_cast %239 : vector<1x1x1x128x128xf32> to vector<128x128xf32>
    %cst_395 = arith.constant dense<0.000000e+00> : vector<256x128xf32>
    %241 = tpu.matmul %238, %240, %cst_395 {dimension_numbers = #tpu.dot_dimension_numbers<[1], [0], [0], [1], [0, 0, 1, 1], [], []>} : vector<256x128xf32>, vector<128x128xf32>, vector<256x128xf32> -> vector<256x128xf32>
    %242 = arith.addf %236, %241 : vector<256x128xf32>
    %c0_396 = arith.constant 0 : index
    %c2_397 = arith.constant 2 : index
    %c1_398 = arith.constant 1 : index
    %c0_399 = arith.constant 0 : index
    %243 = vector.load %arg10[%c0_396, %c2_397, %c1_398, %c0_399] : memref<1x18x18x128xf32, #tpu.memory_space<vmem>>, vector<1x16x16x128xf32>
    %244 = vector.shape_cast %243 : vector<1x16x16x128xf32> to vector<256x128xf32>
    %c3_400 = arith.constant 3 : index
    %c2_401 = arith.constant 2 : index
    %c1_402 = arith.constant 1 : index
    %c0_403 = arith.constant 0 : index
    %c0_404 = arith.constant 0 : index
    %245 = vector.load %arg2[%c3_400, %c2_401, %c1_402, %c0_403, %c0_404] : memref<4x3x3x128x128xf32, #tpu.memory_space<vmem>>, vector<1x1x1x128x128xf32>
    %246 = vector.shape_cast %245 : vector<1x1x1x128x128xf32> to vector<128x128xf32>
    %cst_405 = arith.constant dense<0.000000e+00> : vector<256x128xf32>
    %247 = tpu.matmul %244, %246, %cst_405 {dimension_numbers = #tpu.dot_dimension_numbers<[1], [0], [0], [1], [0, 0, 1, 1], [], []>} : vector<256x128xf32>, vector<128x128xf32>, vector<256x128xf32> -> vector<256x128xf32>
    %248 = arith.addf %242, %247 : vector<256x128xf32>
    %c0_406 = arith.constant 0 : index
    %c2_407 = arith.constant 2 : index
    %c2_408 = arith.constant 2 : index
    %c0_409 = arith.constant 0 : index
    %249 = vector.load %arg10[%c0_406, %c2_407, %c2_408, %c0_409] : memref<1x18x18x128xf32, #tpu.memory_space<vmem>>, vector<1x16x16x128xf32>
    %250 = vector.shape_cast %249 : vector<1x16x16x128xf32> to vector<256x128xf32>
    %c3_410 = arith.constant 3 : index
    %c2_411 = arith.constant 2 : index
    %c2_412 = arith.constant 2 : index
    %c0_413 = arith.constant 0 : index
    %c0_414 = arith.constant 0 : index
    %251 = vector.load %arg2[%c3_410, %c2_411, %c2_412, %c0_413, %c0_414] : memref<4x3x3x128x128xf32, #tpu.memory_space<vmem>>, vector<1x1x1x128x128xf32>
    %252 = vector.shape_cast %251 : vector<1x1x1x128x128xf32> to vector<128x128xf32>
    %cst_415 = arith.constant dense<0.000000e+00> : vector<256x128xf32>
    %253 = tpu.matmul %250, %252, %cst_415 {dimension_numbers = #tpu.dot_dimension_numbers<[1], [0], [0], [1], [0, 0, 1, 1], [], []>} : vector<256x128xf32>, vector<128x128xf32>, vector<256x128xf32> -> vector<256x128xf32>
    %254 = arith.addf %248, %253 : vector<256x128xf32>
    %c3_416 = arith.constant 3 : index
    %c0_417 = arith.constant 0 : index
    %c0_418 = arith.constant 0 : index
    %255 = vector.load %arg3[%c3_416, %c0_417, %c0_418] : memref<4x1x128xf32, #tpu.memory_space<vmem>>, vector<1x1x128xf32>
    %256 = vector.shape_cast %255 : vector<1x1x128xf32> to vector<1x128xf32>
    %257 = vector.broadcast %256 : vector<1x128xf32> to vector<256x128xf32>
    %258 = arith.addf %254, %257 : vector<256x128xf32>
    %cst_419 = arith.constant 0.000000e+00 : f32
    %259 = vector.broadcast %cst_419 : f32 to vector<256x128xf32>
    %260 = arith.maximumf %258, %259 : vector<256x128xf32>
    %261 = vector.shape_cast %260 : vector<256x128xf32> to vector<1x16x16x128xf32>
    %c0_420 = arith.constant 0 : index
    %c0_421 = arith.constant 0 : index
    %c0_422 = arith.constant 0 : index
    %c0_423 = arith.constant 0 : index
    %262 = vector.load %arg11[%c0_420, %c0_421, %c0_422, %c0_423] : memref<1x16x16x128xf32, #tpu.memory_space<vmem>>, vector<1x16x16x128xf32>
    tpu.vector_store %arg11[%c0_420, %c0_421, %c0_422, %c0_423], %261 {strides = array<i32>} : memref<1x16x16x128xf32, #tpu.memory_space<vmem>>, vector<1x16x16x128xf32>,
    %c0_424 = arith.constant 0 : index
    %c0_425 = arith.constant 0 : index
    %c0_426 = arith.constant 0 : index
    %c0_427 = arith.constant 0 : index
    %263 = vector.load %arg11[%c0_424, %c0_425, %c0_426, %c0_427] : memref<1x16x16x128xf32, #tpu.memory_space<vmem>>, vector<1x16x16x128xf32>
    %264 = vector.shape_cast %263 : vector<1x16x16x128xf32> to vector<256x128xf32>
    %c0_428 = arith.constant 0 : index
    %c0_429 = arith.constant 0 : index
    %265 = vector.load %arg5[%c0_428, %c0_429] : memref<1x128xf32, #tpu.memory_space<vmem>>, vector<1x128xf32>
    %c0_430 = arith.constant 0 : index
    %c0_431 = arith.constant 0 : index
    %266 = vector.load %arg6[%c0_430, %c0_431] : memref<128x8xf32, #tpu.memory_space<vmem>>, vector<128x8xf32>
    %c0_432 = arith.constant 0 : index
    %c0_433 = arith.constant 0 : index
    %267 = vector.load %arg7[%c0_432, %c0_433] : memref<1x8xf32, #tpu.memory_space<vmem>>, vector<1x8xf32>
    %c0_434 = arith.constant 0 : index
    %c0_435 = arith.constant 0 : index
    %c0_436 = arith.constant 0 : index
    %c0_437 = arith.constant 0 : index
    %268 = vector.load %arg4[%c0_434, %c0_435, %c0_436, %c0_437] : memref<2x2x128x128xf32, #tpu.memory_space<vmem>>, vector<1x1x128x128xf32>
    %269 = vector.shape_cast %268 : vector<1x1x128x128xf32> to vector<128x128xf32>
    %cst_438 = arith.constant dense<0.000000e+00> : vector<256x128xf32>
    %270 = tpu.matmul %264, %269, %cst_438 {dimension_numbers = #tpu.dot_dimension_numbers<[1], [0], [0], [1], [0, 0, 1, 1], [], []>} : vector<256x128xf32>, vector<128x128xf32>, vector<256x128xf32> -> vector<256x128xf32>
    %271 = vector.broadcast %265 : vector<1x128xf32> to vector<256x128xf32>
    %272 = arith.addf %270, %271 : vector<256x128xf32>
    %cst_439 = arith.constant 0.000000e+00 : f32
    %273 = vector.broadcast %cst_439 : f32 to vector<256x128xf32>
    %274 = arith.maximumf %272, %273 : vector<256x128xf32>
    %cst_440 = arith.constant dense<0.000000e+00> : vector<256x8xf32>
    %275 = tpu.matmul %274, %266, %cst_440 {dimension_numbers = #tpu.dot_dimension_numbers<[1], [0], [0], [1], [0, 0, 1, 1], [], []>} : vector<256x128xf32>, vector<128x8xf32>, vector<256x8xf32> -> vector<256x8xf32>
    %276 = vector.broadcast %267 : vector<1x8xf32> to vector<256x8xf32>
    %277 = arith.addf %275, %276 : vector<256x8xf32>
    %278 = vector.shape_cast %277 : vector<256x8xf32> to vector<1x16x16x8xf32>
    %c0_441 = arith.constant 0 : index
    %c0_442 = arith.constant 0 : index
    %c0_443 = arith.constant 0 : index
    %c0_444 = arith.constant 0 : index
    %c0_445 = arith.constant 0 : index
    %279 = vector.load %arg8[%c0_441, %c0_442, %c0_443, %c0_444, %c0_445] : memref<1x4x16x16x8xf32, #tpu.memory_space<vmem>>, vector<1x1x16x16x8xf32>
    %280 = vector.shape_cast %279 : vector<1x1x16x16x8xf32> to vector<1x16x16x8xf32>
    %281 = vector.shape_cast %278 : vector<1x16x16x8xf32> to vector<1x1x16x16x8xf32>
    tpu.vector_store %arg8[%c0_441, %c0_442, %c0_443, %c0_444, %c0_445], %281 {strides = array<i32>} : memref<1x4x16x16x8xf32, #tpu.memory_space<vmem>>, vector<1x1x16x16x8xf32>,
    %c0_446 = arith.constant 0 : index
    %c1_447 = arith.constant 1 : index
    %c0_448 = arith.constant 0 : index
    %c0_449 = arith.constant 0 : index
    %282 = vector.load %arg4[%c0_446, %c1_447, %c0_448, %c0_449] : memref<2x2x128x128xf32, #tpu.memory_space<vmem>>, vector<1x1x128x128xf32>
    %283 = vector.shape_cast %282 : vector<1x1x128x128xf32> to vector<128x128xf32>
    %cst_450 = arith.constant dense<0.000000e+00> : vector<256x128xf32>
    %284 = tpu.matmul %264, %283, %cst_450 {dimension_numbers = #tpu.dot_dimension_numbers<[1], [0], [0], [1], [0, 0, 1, 1], [], []>} : vector<256x128xf32>, vector<128x128xf32>, vector<256x128xf32> -> vector<256x128xf32>
    %285 = vector.broadcast %265 : vector<1x128xf32> to vector<256x128xf32>
    %286 = arith.addf %284, %285 : vector<256x128xf32>
    %cst_451 = arith.constant 0.000000e+00 : f32
    %287 = vector.broadcast %cst_451 : f32 to vector<256x128xf32>
    %288 = arith.maximumf %286, %287 : vector<256x128xf32>
    %cst_452 = arith.constant dense<0.000000e+00> : vector<256x8xf32>
    %289 = tpu.matmul %288, %266, %cst_452 {dimension_numbers = #tpu.dot_dimension_numbers<[1], [0], [0], [1], [0, 0, 1, 1], [], []>} : vector<256x128xf32>, vector<128x8xf32>, vector<256x8xf32> -> vector<256x8xf32>
    %290 = vector.broadcast %267 : vector<1x8xf32> to vector<256x8xf32>
    %291 = arith.addf %289, %290 : vector<256x8xf32>
    %292 = vector.shape_cast %291 : vector<256x8xf32> to vector<1x16x16x8xf32>
    %c0_453 = arith.constant 0 : index
    %c1_454 = arith.constant 1 : index
    %c0_455 = arith.constant 0 : index
    %c0_456 = arith.constant 0 : index
    %c0_457 = arith.constant 0 : index
    %293 = vector.load %arg8[%c0_453, %c1_454, %c0_455, %c0_456, %c0_457] : memref<1x4x16x16x8xf32, #tpu.memory_space<vmem>>, vector<1x1x16x16x8xf32>
    %294 = vector.shape_cast %293 : vector<1x1x16x16x8xf32> to vector<1x16x16x8xf32>
    %295 = vector.shape_cast %292 : vector<1x16x16x8xf32> to vector<1x1x16x16x8xf32>
    tpu.vector_store %arg8[%c0_453, %c1_454, %c0_455, %c0_456, %c0_457], %295 {strides = array<i32>} : memref<1x4x16x16x8xf32, #tpu.memory_space<vmem>>, vector<1x1x16x16x8xf32>,
    %c1_458 = arith.constant 1 : index
    %c0_459 = arith.constant 0 : index
    %c0_460 = arith.constant 0 : index
    %c0_461 = arith.constant 0 : index
    %296 = vector.load %arg4[%c1_458, %c0_459, %c0_460, %c0_461] : memref<2x2x128x128xf32, #tpu.memory_space<vmem>>, vector<1x1x128x128xf32>
    %297 = vector.shape_cast %296 : vector<1x1x128x128xf32> to vector<128x128xf32>
    %cst_462 = arith.constant dense<0.000000e+00> : vector<256x128xf32>
    %298 = tpu.matmul %264, %297, %cst_462 {dimension_numbers = #tpu.dot_dimension_numbers<[1], [0], [0], [1], [0, 0, 1, 1], [], []>} : vector<256x128xf32>, vector<128x128xf32>, vector<256x128xf32> -> vector<256x128xf32>
    %299 = vector.broadcast %265 : vector<1x128xf32> to vector<256x128xf32>
    %300 = arith.addf %298, %299 : vector<256x128xf32>
    %cst_463 = arith.constant 0.000000e+00 : f32
    %301 = vector.broadcast %cst_463 : f32 to vector<256x128xf32>
    %302 = arith.maximumf %300, %301 : vector<256x128xf32>
    %cst_464 = arith.constant dense<0.000000e+00> : vector<256x8xf32>
    %303 = tpu.matmul %302, %266, %cst_464 {dimension_numbers = #tpu.dot_dimension_numbers<[1], [0], [0], [1], [0, 0, 1, 1], [], []>} : vector<256x128xf32>, vector<128x8xf32>, vector<256x8xf32> -> vector<256x8xf32>
    %304 = vector.broadcast %267 : vector<1x8xf32> to vector<256x8xf32>
    %305 = arith.addf %303, %304 : vector<256x8xf32>
    %306 = vector.shape_cast %305 : vector<256x8xf32> to vector<1x16x16x8xf32>
    %c0_465 = arith.constant 0 : index
    %c2_466 = arith.constant 2 : index
    %c0_467 = arith.constant 0 : index
    %c0_468 = arith.constant 0 : index
    %c0_469 = arith.constant 0 : index
    %307 = vector.load %arg8[%c0_465, %c2_466, %c0_467, %c0_468, %c0_469] : memref<1x4x16x16x8xf32, #tpu.memory_space<vmem>>, vector<1x1x16x16x8xf32>
    %308 = vector.shape_cast %307 : vector<1x1x16x16x8xf32> to vector<1x16x16x8xf32>
    %309 = vector.shape_cast %306 : vector<1x16x16x8xf32> to vector<1x1x16x16x8xf32>
    tpu.vector_store %arg8[%c0_465, %c2_466, %c0_467, %c0_468, %c0_469], %309 {strides = array<i32>} : memref<1x4x16x16x8xf32, #tpu.memory_space<vmem>>, vector<1x1x16x16x8xf32>,
    %c1_470 = arith.constant 1 : index
    %c1_471 = arith.constant 1 : index
    %c0_472 = arith.constant 0 : index
    %c0_473 = arith.constant 0 : index
    %310 = vector.load %arg4[%c1_470, %c1_471, %c0_472, %c0_473] : memref<2x2x128x128xf32, #tpu.memory_space<vmem>>, vector<1x1x128x128xf32>
    %311 = vector.shape_cast %310 : vector<1x1x128x128xf32> to vector<128x128xf32>
    %cst_474 = arith.constant dense<0.000000e+00> : vector<256x128xf32>
    %312 = tpu.matmul %264, %311, %cst_474 {dimension_numbers = #tpu.dot_dimension_numbers<[1], [0], [0], [1], [0, 0, 1, 1], [], []>} : vector<256x128xf32>, vector<128x128xf32>, vector<256x128xf32> -> vector<256x128xf32>
    %313 = vector.broadcast %265 : vector<1x128xf32> to vector<256x128xf32>
    %314 = arith.addf %312, %313 : vector<256x128xf32>
    %cst_475 = arith.constant 0.000000e+00 : f32
    %315 = vector.broadcast %cst_475 : f32 to vector<256x128xf32>
    %316 = arith.maximumf %314, %315 : vector<256x128xf32>
    %cst_476 = arith.constant dense<0.000000e+00> : vector<256x8xf32>
    %317 = tpu.matmul %316, %266, %cst_476 {dimension_numbers = #tpu.dot_dimension_numbers<[1], [0], [0], [1], [0, 0, 1, 1], [], []>} : vector<256x128xf32>, vector<128x8xf32>, vector<256x8xf32> -> vector<256x8xf32>
    %318 = vector.broadcast %267 : vector<1x8xf32> to vector<256x8xf32>
    %319 = arith.addf %317, %318 : vector<256x8xf32>
    %320 = vector.shape_cast %319 : vector<256x8xf32> to vector<1x16x16x8xf32>
    %c0_477 = arith.constant 0 : index
    %c3_478 = arith.constant 3 : index
    %c0_479 = arith.constant 0 : index
    %c0_480 = arith.constant 0 : index
    %c0_481 = arith.constant 0 : index
    %321 = vector.load %arg8[%c0_477, %c3_478, %c0_479, %c0_480, %c0_481] : memref<1x4x16x16x8xf32, #tpu.memory_space<vmem>>, vector<1x1x16x16x8xf32>
    %322 = vector.shape_cast %321 : vector<1x1x16x16x8xf32> to vector<1x16x16x8xf32>
    %323 = vector.shape_cast %320 : vector<1x16x16x8xf32> to vector<1x1x16x16x8xf32>
    tpu.vector_store %arg8[%c0_477, %c3_478, %c0_479, %c0_480, %c0_481], %323 {strides = array<i32>} : memref<1x4x16x16x8xf32, #tpu.memory_space<vmem>>, vector<1x1x16x16x8xf32>,
    return
  }
  func.func @transform_0(%arg0: i32) -> (i32, i32, i32, i32) {
    %c0_i32 = arith.constant 0 : i32
    %c0_i32_0 = arith.constant 0 : i32
    %c0_i32_1 = arith.constant 0 : i32
    %c0_i32_2 = arith.constant 0 : i32
    return %arg0, %c0_i32, %c0_i32_0, %c0_i32_1 : i32, i32, i32, i32
  }
  func.func @transform_1(%arg0: i32) -> (i32, i32, i32, i32, i32) {
    %c0_i32 = arith.constant 0 : i32
    %c0_i32_0 = arith.constant 0 : i32
    %c0_i32_1 = arith.constant 0 : i32
    %c0_i32_2 = arith.constant 0 : i32
    %c0_i32_3 = arith.constant 0 : i32
    %c0_i32_4 = arith.constant 0 : i32
    return %c0_i32, %c0_i32_0, %c0_i32_1, %c0_i32_2, %c0_i32_3 : i32, i32, i32, i32, i32
  }
  func.func @transform_2(%arg0: i32) -> (i32, i32, i32) {
    %c0_i32 = arith.constant 0 : i32
    %c0_i32_0 = arith.constant 0 : i32
    %c0_i32_1 = arith.constant 0 : i32
    %c0_i32_2 = arith.constant 0 : i32
    return %c0_i32, %c0_i32_0, %c0_i32_1 : i32, i32, i32
  }
  func.func @transform_3(%arg0: i32) -> (i32, i32, i32, i32) {
    %c0_i32 = arith.constant 0 : i32
    %c0_i32_0 = arith.constant 0 : i32
    %c0_i32_1 = arith.constant 0 : i32
    %c0_i32_2 = arith.constant 0 : i32
    %c0_i32_3 = arith.constant 0 : i32
    return %c0_i32, %c0_i32_0, %c0_i32_1, %c0_i32_2 : i32, i32, i32, i32
  }
  func.func @transform_4(%arg0: i32) -> (i32, i32) {
    %c0_i32 = arith.constant 0 : i32
    %c0_i32_0 = arith.constant 0 : i32
    %c0_i32_1 = arith.constant 0 : i32
    return %c0_i32, %c0_i32_0 : i32, i32
  }
  func.func @transform_5(%arg0: i32) -> (i32, i32) {
    %c0_i32 = arith.constant 0 : i32
    %c0_i32_0 = arith.constant 0 : i32
    %c0_i32_1 = arith.constant 0 : i32
    return %c0_i32, %c0_i32_0 : i32, i32
  }
  func.func @transform_6(%arg0: i32) -> (i32, i32) {
    %c0_i32 = arith.constant 0 : i32
    %c0_i32_0 = arith.constant 0 : i32
    %c0_i32_1 = arith.constant 0 : i32
    return %c0_i32, %c0_i32_0 : i32, i32
  }
  func.func @transform_7(%arg0: i32) -> (i32, i32, i32, i32, i32) {
    %c0_i32 = arith.constant 0 : i32
    %c0_i32_0 = arith.constant 0 : i32
    %c0_i32_1 = arith.constant 0 : i32
    %c0_i32_2 = arith.constant 0 : i32
    %c0_i32_3 = arith.constant 0 : i32
    return %arg0, %c0_i32, %c0_i32_0, %c0_i32_1, %c0_i32_2 : i32, i32, i32, i32, i32
  }
}

</mosaic_0001>

<bundles_post_ra>
// kernel: tpu_custom_call.1
= control target key start
LH: loop header
LB: loop body
LE: loop exit
PB: predicated region body
PF: predicated region fallthrough
CT: control target
= control target key end

     0   :  { %s25741_s0 = inlined_call_operand.hbm [shape: f32[2,16,16,128], index: 0, kind: input, shape index: {}]   ;;  %s25742_s1 = inlined_call_operand.hbm [shape: f32[4,3,3,128,128], index: 1, kind: input, shape index: {}]   ;;  %s25743_s2 = inlined_call_operand.hbm [shape: f32[4,1,128], index: 2, kind: input, shape index: {}]   ;;  %s25744_s3 = inlined_call_operand.hbm [shape: f32[2,2,128,128], index: 3, kind: input, shape index: {}]   ;;  %s25745_s4 = inlined_call_operand.hbm [shape: f32[1,128], index: 4, kind: input, shape index: {}]   ;;  %s25746_s5 = inlined_call_operand.vmem [shape: f32[128,8], index: 5, kind: input, shape index: {}]   ;;  %s25747_s6 = inlined_call_operand.hbm [shape: f32[1,8], index: 6, kind: input, shape index: {}]   ;;  %s25748_s7 = inlined_call_operand.vmem [shape: f32[2,4,16,16,8], index: 7, kind: output, shape index: {}]  }
   0x1   :  { %25905 = sst [smem:[#allocation57_spill]] %s25742_s1 }
   0x2   :  { %12 = vsyncpa [#allocation6], 0 }
   0x3   :  { %14 = vsyncpa [#allocation6 + $0x1], 0 }
   0x4   :  { %15 = vsyncpa [#allocation8], 0 }
   0x5   :  { %16 = vsyncpa [#allocation11], 0 }
   0x6   :  { %17 = vsyncpa [#allocation14], 0  ;;  %s22720_s24 = smov 0   ;;  %s22722_s25 = smov 0  }
   0x7   :  { %s22724_s26 = smov 0   ;;  %s22726_s27 = smov 0  }
   0x8 LB: > { %s22669_s28 = smov [#allocation7]   ;;  %s22741_s30 = sadd.s32 4294967295, %s22667_s27   ;;  %s22667_s27 = sphi %s22726_s27, %s26224_s27   ;;  %s22663_s26 = sphi %s22724_s26, %s26223_s26   ;;  %s22659_s25 = sphi %s22722_s25, %s26222_s25   ;;  %s22655_s24 = sphi %s22720_s24, %s26221_s24  }
   0x9   : > { %s218_s29 = sshll.u32 %s22669_s28, 4  ;;  %p14163_p0 = scmp.ge.s32.totalorder %s22667_s27, 1  ;;  %s22747_s29 = int_to_ptr.vmem [resolvable:$true] %s218_s29 }
   0xa   : > { %p25751_p1 = scmp.eq.s32.totalorder %s22741_s30, 0  ;;  %p206_p2 = scmp.lt.s32.totalorder %s22667_s27, 3 }
   0xb   : > { %s22670_s9 = smov [#allocation10]   ;;  %s22671_s12 = smov [#allocation9]  }
   0xc   : > { %p22749_p4 = pnand %p14163_p0, %p206_p2  ;;  %s244_s10 = sshll.u32 %s22670_s9, 4  ;;  %s22761_s10 = int_to_ptr.vmem [resolvable:$true] %s244_s10 }
   0xd   : > { %s231_s13 = sshll.u32 %s22671_s12, 4  ;;  %s25908_s1 = sld [smem:[#allocation57_spill]]  ;;  %s22763_s13 = int_to_ptr.vmem [resolvable:$true] %s231_s13 }
   0xe   : > { %s25906_s8 = scalar_select %p22749_p4, 1, 0 }
   0xf   : > { %p22375_p5 = pneg %p22749_p4 }
  0x11   : > { %p22757_p6 = pnand %p22375_p5, %p25751_p1 }
  0x13   : > { %s22451_s16 = scalar_lea.hbm %s25908_s1, 73728  ;;  %p22773_p8 = pneg %p22757_p6 }
  0x14   : > { %p22452_p7 = scmp.ne.s32.totalorder %s25908_s1, %s22451_s16  ;;  %p22458_p11 = scmp.lt.u32.totalorder %s22451_s16, %s25908_s1 }
  0x16   : > { %p22454_p9 = pnand %p22773_p8, %p22452_p7 }
  0x18   : > { %p22455_p10 = pneg %p22454_p9 }
  0x1a   : > { %p22460_p12 = pnand %p22458_p11, %p22455_p10 }
  0x1c   : > { %22463 = shalt.err (!%p22460_p12)
}
  0x1d   : > { %s22464_s22 = scalar_lea.vmem %s22747_s29, 73728  ;;  %p22472_p5 = scmp.lt.s32.totalorder %s22747_s29, %s22747_s29 }
  0x1e   : > { %p22465_p13 = scmp.ne.s32.totalorder %s22747_s29, %s22464_s22  ;;  %p22473_p3 = scmp.lt.s32.totalorder %s22464_s22, %s22464_s22 }
  0x20   : > { %p22467_p0 = pnand %p22465_p13, %p22773_p8  ;;  %p22474_p7 = por %p22473_p3, %p22472_p5 }
  0x22   : > { %p22468_p2 = pneg %p22467_p0 }
  0x24   : > { %p22475_p9 = pnand %p22474_p7, %p22468_p2 }
  0x26   : > { %22478 = shalt.err (!%p22475_p9)
}
  0x27   : > { %s25749_s23 = smov 128   ;;  %s25750_s28 = smov 8  }
  0x28   : > { %22378 = dma.hbm_to_vmem [thread:$0]  (!%p22757_p6), %s25908_s1, 73728, %s22747_s29, [#allocation8], %s25749_s23, %s25749_s23, %s25750_s28  }
  0x29   : > { %s22479_s16 = scalar_lea.hbm %s25744_s3, 8192 }
  0x2a   : > { %p22480_p3 = scmp.ne.s32.totalorder %s25744_s3, %s22479_s16  ;;  %p22486_p12 = scmp.lt.u32.totalorder %s22479_s16, %s25744_s3 }
  0x2c   : > { %p22482_p10 = pnand %p22480_p3, %p22773_p8 }
  0x2e   : > { %p22483_p11 = pneg %p22482_p10 }
  0x30   : > { %p22488_p13 = pnand %p22486_p12, %p22483_p11 }
  0x32   : > { %22491 = shalt.err (!%p22488_p13)
}
  0x33   : > { %s22492_s29 = scalar_lea.vmem %s22761_s10, 8192  ;;  %p22500_p7 = scmp.lt.s32.totalorder %s22761_s10, %s22761_s10 }
  0x34   : > { %p22493_p0 = scmp.ne.s32.totalorder %s22761_s10, %s22492_s29  ;;  %p22501_p9 = scmp.lt.s32.totalorder %s22492_s29, %s22492_s29 }
  0x36   : > { %p22495_p2 = pnand %p22493_p0, %p22773_p8  ;;  %p22502_p3 = por %p22501_p9, %p22500_p7 }
  0x38   : > { %p22496_p5 = pneg %p22495_p2 }
  0x3a   : > { %p22503_p10 = pnand %p22502_p3, %p22496_p5 }
  0x3c   : > { %22506 = shalt.err (!%p22503_p10)
}
  0x3d   : > { %22384 = dma.hbm_to_vmem [thread:$0]  (!%p22757_p6), %s25744_s3, 8192, %s22761_s10, [#allocation11], %s25749_s23, %s25749_s23, %s25750_s28  }
  0x3e   : > { %s22507_s15 = scalar_lea.hbm %s25743_s2, 64 }
  0x3f   : > { %p22508_p11 = scmp.ne.s32.totalorder %s25743_s2, %s22507_s15  ;;  %p22514_p0 = scmp.lt.u32.totalorder %s22507_s15, %s25743_s2 }
  0x41   : > { %p22510_p12 = pnand %p22508_p11, %p22773_p8 }
  0x43   : > { %p22511_p13 = pneg %p22510_p12 }
  0x45   : > { %p22516_p2 = pnand %p22514_p0, %p22511_p13 }
  0x47   : > { %22519 = shalt.err (!%p22516_p2)
}
  0x48   : > { %s22520_s10 = scalar_lea.vmem %s22763_s13, 64  ;;  %p22528_p3 = scmp.lt.s32.totalorder %s22763_s13, %s22763_s13 }
  0x49   : > { %p22521_p5 = scmp.ne.s32.totalorder %s22763_s13, %s22520_s10  ;;  %p22529_p10 = scmp.lt.s32.totalorder %s22520_s10, %s22520_s10 }
  0x4b   : > { %p22523_p7 = pnand %p22521_p5, %p22773_p8  ;;  %p22530_p11 = por %p22529_p10, %p22528_p3 }
  0x4d   : > { %p22524_p9 = pneg %p22523_p7 }
  0x4f   : > { %p22531_p12 = pnand %p22530_p11, %p22524_p9 }
  0x51   : > { %22534 = shalt.err (!%p22531_p12)
}
  0x52   : > { %s22674_s21 = smov 16   ;;  %s22675_s29 = smov 1  }
  0x53   : > { %22381 = dma.hbm_to_vmem [thread:$0]  (!%p22757_p6), %s25743_s2, 64, %s22763_s13, [#allocation8], %s22674_s21, %s22674_s21, %s22675_s29  }
  0x54   : > { %s22676_s12 = smov [#allocation12]   ;;  %s22677_s15 = smov [#allocation13]  }
  0x55   : > { %s258_s14 = sshll.u32 %s22676_s12, 4  ;;  %s272_s16 = sshll.u32 %s22677_s15, 4  ;;  %s259_s14 = int_to_ptr.vmem [resolvable:$true] %s258_s14  ;;  %s273_s16 = int_to_ptr.vmem [resolvable:$true] %s272_s16 }
  0x56   : > { %s22535_s20 = scalar_lea.hbm %s25745_s4, 16 }
  0x57   : > { %p22536_p13 = scmp.ne.s32.totalorder %s25745_s4, %s22535_s20  ;;  %p22542_p5 = scmp.lt.u32.totalorder %s22535_s20, %s25745_s4 }
  0x59   : > { %p22538_p0 = pnand %p22536_p13, %p22773_p8 }
  0x5b   : > { %p22539_p2 = pneg %p22538_p0 }
  0x5d   : > { %p22544_p7 = pnand %p22542_p5, %p22539_p2 }
  0x5f   : > { %22547 = shalt.err (!%p22544_p7)
}
  0x60   : > { %s22548_s13 = scalar_lea.vmem %s259_s14, 16  ;;  %s22555_s21 = scalar_lea.vmem %s259_s14, 32 }
  0x61   : > { %p22549_p9 = scmp.ne.s32.totalorder %s259_s14, %s22548_s13  ;;  %p22556_p11 = scmp.lt.s32.totalorder %s259_s14, %s259_s14 }
  0x62   : > { %p22557_p12 = scmp.lt.s32.totalorder %s22555_s21, %s22548_s13 }
  0x63   : > { %p22551_p3 = pnand %p22549_p9, %p22773_p8 }
  0x64   : > { %p22558_p1 = por %p22557_p12, %p22556_p11 }
  0x65   : > { %p22552_p10 = pneg %p22551_p3 }
  0x67   : > { %p22559_p4 = pnand %p22558_p1, %p22552_p10 }
  0x69   : > { %22562 = shalt.err (!%p22559_p4)
}
  0x6a   : > { %22387 = dma.hbm_to_vmem [thread:$0]  (!%p22757_p6), %s25745_s4, 16, %s259_s14, [#allocation11]  }
  0x6b   : > { %s22563_s22 = scalar_lea.hbm %s25747_s6, 16 }
  0x6c   : > { %p22564_p13 = scmp.ne.s32.totalorder %s25747_s6, %s22563_s22  ;;  %p22570_p4 = scmp.lt.u32.totalorder %s22563_s22, %s25747_s6 }
  0x6e   : > { %p22566_p0 = pnand %p22564_p13, %p22773_p8 }
  0x70   : > { %p22567_p1 = pneg %p22566_p0 }
  0x72   : > { %p22572_p2 = pnand %p22570_p4, %p22567_p1 }
  0x74   : > { %22575 = shalt.err (!%p22572_p2)
}
  0x75   : > { %s22576_s18 = scalar_lea.vmem %s273_s16, 16  ;;  %s22583_s14 = scalar_lea.vmem %s273_s16, 32 }
  0x76   : > { %p22577_p5 = scmp.ne.s32.totalorder %s273_s16, %s22576_s18  ;;  %p22584_p3 = scmp.lt.s32.totalorder %s273_s16, %s273_s16 }
  0x77   : > { %p22585_p10 = scmp.lt.s32.totalorder %s22583_s14, %s22576_s18 }
  0x78   : > { %p22579_p7 = pnand %p22577_p5, %p22773_p8 }
  0x79   : > { %p22586_p11 = por %p22585_p10, %p22584_p3 }
  0x7a   : > { %p22580_p9 = pneg %p22579_p7 }
  0x7c   : > { %p22587_p12 = pnand %p22586_p11, %p22580_p9 }
  0x7e   : > { %22590 = shalt.err (!%p22587_p12)
}
  0x7f   : > { %22390 = dma.hbm_to_vmem [thread:$0]  (!%p22757_p6), %s25747_s6, 16, %s273_s16, [#allocation14]  }
  0x80   : > { %s22883_s19 = sadd.s32 1, %s22667_s27   ;;  %s30_s13 = sadd.s32 1, %s22663_s26 }
  0x81   : > { %s27_s11 = ssub.s32 %s22667_s27, %s22883_s19  ;;  %p37_p13 = scmp.ne.s32.totalorder %s22663_s26, %s22659_s25 }
  0x82   : > { %p28_p8 = scmp.eq.s32.totalorder %s27_s11, 0  ;;  %p38_p0 = scmp.eq.s32.totalorder %s22667_s27, 0 }
  0x83   : > { %p43_p1 = scmp.ne.s32.totalorder %s22659_s25, %s22655_s24  ;;  %p25910_p2 = scmp.eq.s32.totalorder %s22741_s30, 0 }
  0x84   : > { %s22894_s21 = scalar_select %p28_p8, %s22663_s26, %s30_s13  }
  0x85   : > { %p39_p4 = por %p38_p0, %p37_p13  ;;  %p22898_p5 = por %p25910_p2, %p43_p1 }
  0x86   : > { %p22400_p7 = scmp.lt.s32.totalorder %s22667_s27, 2  ;;  %s283_s29 = sand.u32 1, %s22663_s26  }
  0x87   : > { %s14170_s16 = sshll.u32 %s283_s29, 8  ;;  %s14287_s1 = sshll.u32 %s22667_s27, 12 }
  0x88   : > { %s22908_s9 = scalar_lea.hbm %s25741_s0, %s14287_s1  ;;  %s287_s24 = scalar_lea.vmem [#allocation5], %s14170_s16 }
  0x89   : > { %s294_s12 = sshll.u32 %s287_s24, 4  ;;  %p22912_p6 = pnand %p22400_p7, %p39_p4  ;;  %s22910_s12 = int_to_ptr.vmem [resolvable:$true] %s294_s12 }
  0x8a   : > { %s22916_s27 = scalar_lea.sflag [#allocation6], %s283_s29  ;;  %s22591_s17 = scalar_lea.hbm %s22908_s9, 4096 }
  0x8b   : > { %p22592_p9 = scmp.ne.s32.totalorder %s22908_s9, %s22591_s17  ;;  %p22593_p3 = pneg %p22912_p6 }
  0x8c   : > { %s22596_s20 = scalar_lea.hbm %s25741_s0, 8192  ;;  %p22597_p12 = scmp.lt.u32.totalorder %s22908_s9, %s25741_s0 }
  0x8d   : > { %p22594_p10 = pnand %p22593_p3, %p22592_p9  ;;  %p22598_p8 = scmp.lt.u32.totalorder %s22596_s20, %s22591_s17 }
  0x8e   : > { %p22600_p0 = scmp.lt.u32.totalorder %s22591_s17, %s22908_s9 }
  0x8f   : > { %p22595_p11 = pneg %p22594_p10  ;;  %p22599_p13 = por %p22598_p8, %p22597_p12 }
  0x91   : > { %p22601_p1 = por %p22600_p0, %p22599_p13 }
  0x93   : > { %p22602_p4 = pnand %p22601_p1, %p22595_p11 }
  0x95   : > { %22605 = shalt.err (!%p22602_p4)
}
  0x96   : > { %s22606_s13 = scalar_lea.vmem %s22910_s12, 4096  ;;  %s22678_s29 = smov [#allocation5]  }
  0x97   : > { %p22607_p2 = scmp.ne.s32.totalorder %s22910_s12, %s22606_s13  ;;  %s22611_s16 = sshll.u32 %s22678_s29, 4  ;;  %s22612_s16 = int_to_ptr.vmem [resolvable:$false] %s22611_s16 }
  0x98   : > { %s22613_s1 = scalar_lea.vmem %s22612_s16, 8192  ;;  %p22614_p10 = scmp.lt.s32.totalorder %s22910_s12, %s22612_s16 }
  0x99   : > { %p22609_p7 = pnand %p22607_p2, %p22593_p3  ;;  %p22615_p12 = scmp.lt.s32.totalorder %s22613_s1, %s22606_s13 }
  0x9b   : > { %p22610_p9 = pneg %p22609_p7  ;;  %p22616_p8 = por %p22615_p12, %p22614_p10 }
  0x9d   : > { %p22617_p13 = pnand %p22616_p8, %p22610_p9 }
  0x9f   : > { %22620 = shalt.err (!%p22617_p13)
}
  0xa0   : > { %s25913_s28 = smov 8   ;;  %s25914_s22 = smov 128  }
  0xa1   : > { %22394 = dma.hbm_to_vmem [thread:$0]  (!%p22912_p6), %s22908_s9, 4096, %s22910_s12, %s22916_s27, %s25914_s22, %s25914_s22, %s25913_s28  }
  0xa2   : > { %p25915_p3 = scmp.ne.s32.totalorder %s25906_s8, 0 }
  0xa4   : > { %306 = sbr.rel (%p25915_p3) target bundleno = 3844 (0xf04), region = 48 }
  0xab   : > { %s308_s24 = sand.u32 1, %s22659_s25  }
  0xac   : > { %s14174_s17 = sshll.u32 %s308_s24, 8  ;;  %s309_s18 = scalar_lea.sflag [#allocation6], %s308_s24 }
  0xad   : > { %s22950_s14 = scalar_lea.vmem [#allocation5], %s14174_s17 }
  0xae   : > { %22638 = dma.done.wait (%p22898_p5), %s309_s18, 4096  }
  0xaf   : > { %22640 = vsyncadd (%p22898_p5), %s309_s18, 4294963200  ;;  %p25916_p11 = scmp.eq.s32.totalorder %s22741_s30, 0 }
  0xb1   : > { %22642 = dma.done.wait (%p25916_p11), [#allocation8], 73792   ;;  %p25917_p6 = pmov %p25916_p11 }
  0xb3   : > { %22644 = vsyncadd (%p25917_p6), [#allocation8], 4294893504  ;;  %p25918_p0 = pmov %p25917_p6 }
  0xb5   : > { %22646 = dma.done.wait (%p25918_p0), [#allocation11], 8208   ;;  %p25919_p1 = pmov %p25918_p0 }
  0xb6   : > { %p25920_p4 = pmov %p25918_p0 }
  0xb7   : > { %22648 = vsyncadd (%p25919_p1), [#allocation11], 4294959088 }
  0xb8   : > { %22650 = dma.done.wait (%p25920_p4), [#allocation14], 16   ;;  %p25921_p2 = pmov %p25918_p0 }
  0xb9   : > { %p363_p5 = scmp.lt.s32.totalorder %s22741_s30, 1  ;;  %p25922_p7 = scmp.ne.s32.totalorder %s22741_s30, 0 }
  0xba   : > { %22652 = vsyncadd (%p25921_p2), [#allocation14], 4294967280  ;;  %v22679_v0 = vmov (!%p25922_p7), 0.0  }
  0xbb   : > { %s364_s8 = scalar_select %p363_p5, %s22741_s30, 1 }
  0xbc   : > { %371 = sbr.rel (%p25922_p7) target bundleno = 215 (0xd7), region = 76  ;;  %372 = vst [vmem:[#allocation3] sm:$0xff] (!%p25922_p7), %v22679_v0  ;;  %373 = vst [vmem:[#allocation3 + $0x8] sm:$0xff] (!%p25922_p7), %v22679_v0 }
  0xbd   : > { %s14288_s23 = sshll.u32 %s364_s8, 10  ;;  %374 = vst [vmem:[#allocation3 + $0x10] sm:$0x3] (!%p25922_p7), %v22679_v0  ;;  %375 = vst [vmem:[#allocation3 + $0x18] sm:$0xff] (!%p25922_p7), %v22679_v0 }
  0xbe   : > { %s22973_s15 = scalar_lea.vmem %s25748_s7, %s14288_s23  ;;  %376 = vst [vmem:[#allocation3 + $0x20] sm:$0xff] (!%p25922_p7), %v22679_v0  ;;  %377 = vst [vmem:[#allocation3 + $0x28] sm:$0x3] (!%p25922_p7), %v22679_v0 }
  0xbf   : > { %378 = vst [vmem:[#allocation3 + $0x30] sm:$0xff] (!%p25922_p7), %v22679_v0  ;;  %379 = vst [vmem:[#allocation3 + $0x38] sm:$0xff] (!%p25922_p7), %v22679_v0 }
  0xc0   : > { %380 = vst [vmem:[#allocation3 + $0x40] sm:$0x3] (!%p25922_p7), %v22679_v0  ;;  %381 = vst [vmem:[#allocation3 + $0x48] sm:$0xff] (!%p25922_p7), %v22679_v0 }
  0xc1   : > { %382 = vst [vmem:[#allocation3 + $0x50] sm:$0xff] (!%p25922_p7), %v22679_v0  ;;  %383 = vst [vmem:[#allocation3 + $0x58] sm:$0x3] (!%p25922_p7), %v22679_v0 }
  0xc2   : > { %384 = vst [vmem:[#allocation3 + $0x60] sm:$0xff] (!%p25922_p7), %v22679_v0  ;;  %385 = vst [vmem:[#allocation3 + $0x68] sm:$0xff] (!%p25922_p7), %v22679_v0 }
  0xc3   : > { %386 = vst [vmem:[#allocation3 + $0x70] sm:$0x3] %v22679_v0  ;;  %387 = vst [vmem:[#allocation3 + $0x78] sm:$0xff] %v22679_v0 }
  0xc4   : > { %388 = vst [vmem:[#allocation3 + $0x80] sm:$0xff] %v22679_v0  ;;  %389 = vst [vmem:[#allocation3 + $0x88] sm:$0x3] %v22679_v0 }
  0xc5   : > { %390 = vst [vmem:[#allocation3 + $0x90] sm:$0xff] %v22679_v0  ;;  %391 = vst [vmem:[#allocation3 + $0x98] sm:$0xff] %v22679_v0 }
  0xc6   : > { %392 = vst [vmem:[#allocation3 + $0xa0] sm:$0x3] %v22679_v0  ;;  %393 = vst [vmem:[#allocation3 + $0xa8] sm:$0xff] %v22679_v0 }
  0xc7   : > { %394 = vst [vmem:[#allocation3 + $0xb0] sm:$0xff] %v22679_v0  ;;  %395 = vst [vmem:[#allocation3 + $0xb8] sm:$0x3] %v22679_v0 }
  0xc8   : > { %396 = vst [vmem:[#allocation3 + $0xc0] sm:$0xff] %v22679_v0  ;;  %397 = vst [vmem:[#allocation3 + $0xc8] sm:$0xff] %v22679_v0 }
  0xc9   : > { %398 = vst [vmem:[#allocation3 + $0xd0] sm:$0x3] %v22679_v0  ;;  %399 = vst [vmem:[#allocation3 + $0xd8] sm:$0xff] %v22679_v0 }
  0xca   : > { %400 = vst [vmem:[#allocation3 + $0xe0] sm:$0xff] %v22679_v0  ;;  %401 = vst [vmem:[#allocation3 + $0xe8] sm:$0x3] %v22679_v0 }
  0xcb   : > { %402 = vst [vmem:[#allocation3 + $0xf0] sm:$0xff] %v22679_v0  ;;  %403 = vst [vmem:[#allocation3 + $0xf8] sm:$0xff] %v22679_v0 }
  0xcc   : > { %404 = vst [vmem:[#allocation3 + $0x100] sm:$0x3] %v22679_v0  ;;  %405 = vst [vmem:[#allocation3 + $0x108] sm:$0xff] %v22679_v0 }
  0xcd   : > { %406 = vst [vmem:[#allocation3 + $0x110] sm:$0xff] %v22679_v0  ;;  %407 = vst [vmem:[#allocation3 + $0x118] sm:$0x3] %v22679_v0 }
  0xce   : > { %408 = vst [vmem:[#allocation3 + $0x120] sm:$0xff] %v22679_v0  ;;  %409 = vst [vmem:[#allocation3 + $0x128] sm:$0xff] %v22679_v0 }
  0xcf   : > { %410 = vst [vmem:[#allocation3 + $0x130] sm:$0x3] %v22679_v0  ;;  %411 = vst [vmem:[#allocation3 + $0x138] sm:$0xff] %v22679_v0 }
  0xd0   : > { %412 = vst [vmem:[#allocation3 + $0x140] sm:$0xff] %v22679_v0  ;;  %413 = vst [vmem:[#allocation3 + $0x148] sm:$0x3] %v22679_v0 }
  0xd1   : > { %414 = vst [vmem:[#allocation3 + $0x150] sm:$0xff] %v22679_v0  ;;  %415 = vst [vmem:[#allocation3 + $0x158] sm:$0xff] %v22679_v0 }
  0xd2   : > { %416 = vst [vmem:[#allocation3 + $0x160] sm:$0x3] %v22679_v0  ;;  %417 = vst [vmem:[#allocation3 + $0x168] sm:$0xff] %v22679_v0 }
  0xd3   : > { %418 = vst [vmem:[#allocation3 + $0x170] sm:$0xff] %v22679_v0  ;;  %419 = vst [vmem:[#allocation3 + $0x178] sm:$0x3] %v22679_v0 }
  0xd4   : > { %420 = vst [vmem:[#allocation3 + $0x180] sm:$0xff] %v22679_v0  ;;  %421 = vst [vmem:[#allocation3 + $0x188] sm:$0xff] %v22679_v0 }
  0xd5   : > { %422 = vst [vmem:[#allocation3 + $0x190] sm:$0x3] %v22679_v0  ;;  %423 = vst [vmem:[#allocation3 + $0x198] sm:$0xff] %v22679_v0 }
  0xd6   : > { %424 = vst [vmem:[#allocation3 + $0x1a0] sm:$0xff] %v22679_v0  ;;  %425 = vst [vmem:[#allocation3 + $0x1a8] sm:$0x3] %v22679_v0 }
  0xd7 PF: > { %v572_v1 = vld [vmem:[#allocation7 + $0x80] sm:$0xff]  ;;  %v573_v2 = vld [vmem:[#allocation7 + $0x88] sm:$0xff]  ;;  %v574_v3 = vld [vmem:[#allocation7 + $0x90] sm:$0xff]  ;;  %vm12418_vm0 = vcmask 64512  }
  0xd8   : > { %v19921_v4 = vpack.c.bf16 %v573_v2, %v572_v1  ;;  %v575_v5 = vld [vmem:[#allocation7 + $0x98] sm:$0xff]  ;;  %v576_v7 = vld [vmem:[#allocation7 + $0xa0] sm:$0xff]  ;;  %v577_v8 = vld [vmem:[#allocation7 + $0xa8] sm:$0xff] }
  0xd9   : > { %v19925_v6 = vpack.c.bf16 %v575_v5, %v574_v3  ;;  %v19929_v9 = vpack.c.bf16 %v577_v8, %v576_v7  ;;  %v539_v10 = vld [vmem:[#allocation3 + $0x1] sm:$0xff]  ;;  %v22978_v13 = vld [vmem:[%s22950_s14] sm:$0xff]  ;;  %v22982_v14 = vld [vmem:[%s22950_s14 + $0x8] sm:$0xff] }
  0xda   : > { %19922 = vmatprep.subr.bf16.mxu0 %v19921_v4  ;;  %v578_v11 = vld [vmem:[#allocation7 + $0xb0] sm:$0xff]  ;;  %v579_v12 = vld [vmem:[#allocation7 + $0xb8] sm:$0xff]  ;;  %16433 = vmatprep.mubr.f32.mxu0 %v539_v10  ;;  %459 = vst [vmem:[#allocation3 + $0x19] sm:$0xff] %v22978_v13  ;;  %460 = vst [vmem:[#allocation3 + $0x21] sm:$0xff] %v22982_v14 }
  0xdb   : > { %19924 = vmatpush3.bf16.msra.mxu0 %v19921_v4  ;;  %v22985_v15 = vld [vmem:[%s22950_s14 + $0x10] sm:$0xff]  ;;  %v22988_v16 = vld [vmem:[%s22950_s14 + $0x18] sm:$0xff]  ;;  %v22994_v17 = vld [vmem:[%s22950_s14 + $0x20] sm:$0xff]  ;;  %v19933_v18 = vpack.c.bf16 %v579_v12, %v578_v11 }
  0xdc   : > { %19926 = vmatprep.subr.bf16.mxu0 %v19925_v6  ;;  %461 = vst [vmem:[#allocation3 + $0x31] sm:$0xff] %v22985_v15  ;;  %462 = vst [vmem:[#allocation3 + $0x39] sm:$0xff] %v22988_v16  ;;  %v22998_v19 = vld [vmem:[%s22950_s14 + $0x28] sm:$0xff]  ;;  %v23001_v20 = vld [vmem:[%s22950_s14 + $0x30] sm:$0xff] }
  0xdd   : > { %463 = vst [vmem:[#allocation3 + $0x49] sm:$0xff] %v22994_v17  ;;  %v23004_v21 = vld [vmem:[%s22950_s14 + $0x38] sm:$0xff]  ;;  %v580_v22 = vld [vmem:[#allocation7 + $0xc0] sm:$0xff]  ;;  %v581_v23 = vld [vmem:[#allocation7 + $0xc8] sm:$0xff] }
  0xde   : > { %464 = vst [vmem:[#allocation3 + $0x51] sm:$0xff] %v22998_v19  ;;  %465 = vst [vmem:[#allocation3 + $0x61] sm:$0xff] %v23001_v20  ;;  %v23010_v24 = vld [vmem:[%s22950_s14 + $0x40] sm:$0xff]  ;;  %v23014_v25 = vld [vmem:[%s22950_s14 + $0x48] sm:$0xff]  ;;  %v19937_v29 = vpack.c.bf16 %v581_v23, %v580_v22 }
  0xdf   : > { %19928 = vmatpush3.bf16.msra.mxu0 %v19925_v6  ;;  %466 = vst [vmem:[#allocation3 + $0x69] sm:$0xff] %v23004_v21  ;;  %467 = vst [vmem:[#allocation3 + $0x79] sm:$0xff] %v23010_v24  ;;  %v23017_v26 = vld [vmem:[%s22950_s14 + $0x50] sm:$0xff]  ;;  %v23020_v27 = vld [vmem:[%s22950_s14 + $0x58] sm:$0xff] }
  0xe0   : > { %19930 = vmatprep.subr.bf16.mxu0 %v19929_v9  ;;  %468 = vst [vmem:[#allocation3 + $0x81] sm:$0xff] %v23014_v25  ;;  %469 = vst [vmem:[#allocation3 + $0x91] sm:$0xff] %v23017_v26  ;;  %v23026_v28 = vld [vmem:[%s22950_s14 + $0x60] sm:$0xff]  ;;  %v23030_v30 = vld [vmem:[%s22950_s14 + $0x68] sm:$0xff] }
  0xe1   : > { %470 = vst [vmem:[#allocation3 + $0x99] sm:$0xff] %v23020_v27  ;;  %471 = vst [vmem:[#allocation3 + $0xa9] sm:$0xff] %v23026_v28  ;;  %v23033_v31 = vld [vmem:[%s22950_s14 + $0x70] sm:$0xff]  ;;  %v23036_v32 = vld [vmem:[%s22950_s14 + $0x78] sm:$0xff] }
  0xe2   : > { %v582_v33 = vld [vmem:[#allocation7 + $0xd0] sm:$0xff]  ;;  %v583_v34 = vld [vmem:[#allocation7 + $0xd8] sm:$0xff]  ;;  %472 = vst [vmem:[#allocation3 + $0xb1] sm:$0xff] %v23030_v30  ;;  %473 = vst [vmem:[#allocation3 + $0xc1] sm:$0xff] %v23033_v31 }
  0xe3   : > { %19932 = vmatpush3.bf16.msra.mxu0 %v19929_v9  ;;  %474 = vst [vmem:[#allocation3 + $0xc9] sm:$0xff] %v23036_v32  ;;  %v23042_v35 = vld [vmem:[%s22950_s14 + $0x80] sm:$0xff]  ;;  %v23046_v36 = vld [vmem:[%s22950_s14 + $0x88] sm:$0xff]  ;;  %v23049_v37 = vld [vmem:[%s22950_s14 + $0x90] sm:$0xff]  ;;  %v19941_v40 = vpack.c.bf16 %v583_v34, %v582_v33 }
  0xe4   : > { %19934 = vmatprep.subr.bf16.mxu0 %v19933_v18  ;;  %475 = vst [vmem:[#allocation3 + $0xd9] sm:$0xff] %v23042_v35  ;;  %v23052_v38 = vld [vmem:[%s22950_s14 + $0x98] sm:$0xff]  ;;  %476 = vst [vmem:[#allocation3 + $0xe1] sm:$0xff] %v23046_v36  ;;  %v23058_v39 = vld [vmem:[%s22950_s14 + $0xa0] sm:$0xff] }
  0xe5   : > { %477 = vst [vmem:[#allocation3 + $0xf1] sm:$0xff] %v23049_v37  ;;  %478 = vst [vmem:[#allocation3 + $0xf9] sm:$0xff] %v23052_v38  ;;  %v23062_v41 = vld [vmem:[%s22950_s14 + $0xa8] sm:$0xff]  ;;  %v23065_v42 = vld [vmem:[%s22950_s14 + $0xb0] sm:$0xff] }
  0xe6   : > { %25923 = vst [vmem:[#allocation19_spill] sm:$0xff] %v23058_v39  ;;  %479 = vst [vmem:[#allocation3 + $0x109] sm:$0xff] %v23058_v39  ;;  %v23068_v43 = vld [vmem:[%s22950_s14 + $0xb8] sm:$0xff]  ;;  %v584_v44 = vld [vmem:[#allocation7 + $0xe0] sm:$0xff] }
  0xe7   : > { %19936 = vmatpush3.bf16.msra.mxu0 %v19933_v18  ;;  %25924 = vst [vmem:[#allocation20_spill] sm:$0xff] %v23062_v41  ;;  %25925 = vst [vmem:[#allocation21_spill] sm:$0xff] %v23065_v42  ;;  %v585_v45 = vld [vmem:[#allocation7 + $0xe8] sm:$0xff]  ;;  %v23074_v46 = vld [vmem:[%s22950_s14 + $0xc0] sm:$0xff] }
  0xe8   : > { %19938 = vmatprep.subr.bf16.mxu0 %v19937_v29  ;;  %25926 = vst [vmem:[#allocation22_spill] sm:$0xff] %v23068_v43  ;;  %480 = vst [vmem:[#allocation3 + $0x111] sm:$0xff] %v23062_v41  ;;  %v23078_v47 = vld [vmem:[%s22950_s14 + $0xc8] sm:$0xff]  ;;  %v23081_v48 = vld [vmem:[%s22950_s14 + $0xd0] sm:$0xff]  ;;  %v19945_v51 = vpack.c.bf16 %v585_v45, %v584_v44 }
  0xe9   : > { %481 = vst [vmem:[#allocation3 + $0x121] sm:$0xff] %v23065_v42  ;;  %482 = vst [vmem:[#allocation3 + $0x129] sm:$0xff] %v23068_v43  ;;  %v23084_v49 = vld [vmem:[%s22950_s14 + $0xd8] sm:$0xff]  ;;  %v23090_v50 = vld [vmem:[%s22950_s14 + $0xe0] sm:$0xff] }
  0xea   : > { %25927 = vst [vmem:[#allocation23_spill] sm:$0xff] %v23074_v46  ;;  %483 = vst [vmem:[#allocation3 + $0x139] sm:$0xff] %v23074_v46  ;;  %v23094_v52 = vld [vmem:[%s22950_s14 + $0xe8] sm:$0xff]  ;;  %v586_v53 = vld [vmem:[#allocation7 + $0xf0] sm:$0xff] }
  0xeb   : > { %25928 = vst [vmem:[#allocation24_spill] sm:$0xff] %v23078_v47  ;;  %25929 = vst [vmem:[#allocation25_spill] sm:$0xff] %v23081_v48  ;;  %19940 = vmatpush3.bf16.msra.mxu0 %v19937_v29  ;;  %v587_v54 = vld [vmem:[#allocation7 + $0xf8] sm:$0xff]  ;;  %v523_v56 = vld [vmem:[#allocation7] sm:$0xff] }
  0xec   : > { %25930 = vst [vmem:[#allocation26_spill] sm:$0xff] %v23084_v49  ;;  %484 = vst [vmem:[#allocation3 + $0x141] sm:$0xff] %v23078_v47  ;;  %19942 = vmatprep.subr.bf16.mxu0 %v19941_v40  ;;  %v19949_v55 = vpack.c.bf16 %v587_v54, %v586_v53  ;;  %v524_v57 = vld [vmem:[#allocation7 + $0x8] sm:$0xff]  ;;  %v525_v59 = vld [vmem:[#allocation7 + $0x10] sm:$0xff] }
  0xed   : > { %485 = vst [vmem:[#allocation3 + $0x151] sm:$0xff] %v23081_v48  ;;  %486 = vst [vmem:[#allocation3 + $0x159] sm:$0xff] %v23084_v49  ;;  %v19953_v58 = vpack.c.bf16 %v524_v57, %v523_v56  ;;  %v526_v60 = vld [vmem:[#allocation7 + $0x18] sm:$0xff]  ;;  %v527_v63 = vld [vmem:[#allocation7 + $0x20] sm:$0xff] }
  0xee   : > { %25931 = vst [vmem:[#allocation27_spill] sm:$0xff] %v23090_v50  ;;  %487 = vst [vmem:[#allocation3 + $0x169] sm:$0xff] %v23090_v50  ;;  %v540_v61 = vld [vmem:[#allocation3 + $0x9] sm:$0xff]  ;;  %v19957_v62 = vpack.c.bf16 %v526_v60, %v525_v59  ;;  %v528_v0 = vld [vmem:[#allocation7 + $0x28] sm:$0xff] }
  0xef   : > { %25932 = vst [vmem:[#allocation28_spill] sm:$0xff] %v23094_v52  ;;  %488 = vst [vmem:[#allocation3 + $0x171] sm:$0xff] %v23094_v52  ;;  %19944 = vmatpush3.bf16.msra.mxu0 %v19941_v40  ;;  %v19961_v1 = vpack.c.bf16 %v528_v0, %v527_v63  ;;  %v529_v2 = vld [vmem:[#allocation7 + $0x30] sm:$0xff]  ;;  %v530_v3 = vld [vmem:[#allocation7 + $0x38] sm:$0xff] }
  0xf0   : > { %19946 = vmatprep.subr.bf16.mxu0 %v19945_v51  ;;  %v19965_v4 = vpack.c.bf16 %v530_v3, %v529_v2  ;;  %v531_v5 = vld [vmem:[#allocation7 + $0x40] sm:$0xff]  ;;  %v532_v6 = vld [vmem:[#allocation7 + $0x48] sm:$0xff]  ;;  %v533_v8 = vld [vmem:[#allocation7 + $0x50] sm:$0xff] }
  0xf1   : > { %v19969_v7 = vpack.c.bf16 %v532_v6, %v531_v5  ;;  %v534_v9 = vld [vmem:[#allocation7 + $0x58] sm:$0xff]  ;;  %v535_v11 = vld [vmem:[#allocation7 + $0x60] sm:$0xff]  ;;  %v536_v12 = vld [vmem:[#allocation7 + $0x68] sm:$0xff] }
  0xf2   : > { %v19973_v10 = vpack.c.bf16 %v534_v9, %v533_v8  ;;  %v19977_v18 = vpack.c.bf16 %v536_v12, %v535_v11  ;;  %v537_v22 = vld [vmem:[#allocation7 + $0x70] sm:$0xff]  ;;  %v538_v23 = vld [vmem:[#allocation7 + $0x78] sm:$0xff]  ;;  %v1071_v33 = vld [vmem:[#allocation7 + $0x100] sm:$0xff] }
  0xf3   : > { %19948 = vmatpush3.bf16.msra.mxu0 %v19945_v51  ;;  %v19981_v29 = vpack.c.bf16 %v538_v23, %v537_v22  ;;  %v1072_v34 = vld [vmem:[#allocation7 + $0x108] sm:$0xff]  ;;  %v491_v44 = vld [vmem:[#allocation3] sm:$0xff]  ;;  %v1074_v51 = vld [vmem:[#allocation7 + $0x118] sm:$0xff] }
  0xf4   : > { %19950 = vmatprep.subr.bf16.mxu0 %v19949_v55  ;;  %v19985_v40 = vpack.c.bf16 %v1072_v34, %v1071_v33  ;;  %v1073_v45 = vld [vmem:[#allocation7 + $0x110] sm:$0xff]  ;;  %v492_v53 = vld [vmem:[#allocation3 + $0x8] sm:$0xff]  ;;  %v23127_v54 = vld [vmem:[#allocation3 + $0x18] sm:$0xff] }
  0xf5   : > { %v1075_v56 = vld [vmem:[#allocation7 + $0x120] sm:$0xff]  ;;  %v1076_v57 = vld [vmem:[#allocation7 + $0x128] sm:$0xff]  ;;  %v23138_v0 = vld [vmem:[#allocation3 + $0x48] sm:$0xff] }
  0xf6   : > { %v23132_v59 = vld [vmem:[#allocation3 + $0x30] sm:$0xff]  ;;  %v19993_v60 = vpack.c.bf16 %v1076_v57, %v1075_v56  ;;  %v23136_v63 = vld [vmem:[#allocation3 + $0x38] sm:$0xff]  ;;  %v23144_v5 = vld [vmem:[#allocation3 + $0x60] sm:$0xff] }
  0xf7   : > { %19952 = vmatpush3.bf16.msra.mxu0 %v19949_v55  ;;  %v19989_v55 = vpack.c.bf16 %v1074_v51, %v1073_v45  ;;  %v1079_v2 = vld [vmem:[#allocation7 + $0x140] sm:$0xff]  ;;  %v1080_v3 = vld [vmem:[#allocation7 + $0x148] sm:$0xff]  ;;  %v1082_v8 = vld [vmem:[#allocation7 + $0x158] sm:$0xff] }
  0xf8   : > { %19954 = vmatprep.subr.bf16.mxu0 %v19953_v58  ;;  %v20001_v6 = vpack.c.bf16 %v1080_v3, %v1079_v2  ;;  %v23148_v9 = vld [vmem:[#allocation3 + $0x68] sm:$0xff]  ;;  %v1083_v12 = vld [vmem:[#allocation7 + $0x160] sm:$0xff]  ;;  %v23154_v22 = vld [vmem:[#allocation3 + $0x80] sm:$0xff] }
  0xf9   : > { %v23156_v23 = vld [vmem:[#allocation3 + $0x90] sm:$0xff]  ;;  %v1085_v33 = vld [vmem:[#allocation7 + $0x170] sm:$0xff]  ;;  %v1086_v34 = vld [vmem:[#allocation7 + $0x178] sm:$0xff] }
  0xfa   : > { %16434 = vmatmul.mubr.f32.vlgmr.msra.gmra.mrb[0].mxu0 %v540_v61  ;;  %v1077_v61 = vld [vmem:[#allocation7 + $0x130] sm:$0xff]  ;;  %v20013_v45 = vpack.c.bf16 %v1086_v34, %v1085_v33  ;;  %v1377_v51 = vld [vmem:[#allocation7 + $0x180] sm:$0xff]  ;;  %v23184_v2 = vld [vmem:[#allocation3 + $0xf8] sm:$0xff] }
  0xfb   : > { %19956 = vmatpush3.bf16.msra.mxu0 %v19953_v58  ;;  %16436 = vmatprep.mubr.f32.mxu0 %v22978_v13  ;;  %v23130_v58 = vld [vmem:[#allocation3 + $0x20] sm:$0xff]  ;;  %v23186_v3 = vld [vmem:[#allocation3 + $0x108] sm:$0xff]  ;;  %v23216_v34 = vld [vmem:[#allocation3 + $0x158] sm:$0xff] }
  0xfc   : > { %19958 = vmatprep.subr.bf16.mxu0 %v19957_v62  ;;  %v23168_v56 = vld [vmem:[#allocation3 + $0xc0] sm:$0xff]  ;;  %v23211_v33 = vld [vmem:[%s22950_s14 + $0xf8] sm:$0xff] }
  0xfd   : > { %25934 = vst [vmem:[#allocation30_spill] sm:$0xff] %v23211_v33  ;;  %490 = vst [vmem:[#allocation3 + $0x189] sm:$0xff] %v23211_v33  ;;  %v23225_v33 = vld [vmem:[#allocation3 + $0x1a] sm:$0xff] }
  0xfe   : > { %16437 = vmatmul.mubr.f32.gmra.mrb[2].mxu0 %v22982_v14  ;;  %25935 = vst [vmem:[#allocation31_spill] sm:$0xff] %v23225_v33 }
  0xff   : > { %16439 = vmatprep.mubr.f32.mxu0 %v22985_v15  ;;  %19960 = vmatpush3.bf16.msra.mxu0 %v19957_v62  ;;  %v1078_v62 = vld [vmem:[#allocation7 + $0x138] sm:$0xff] }
 0x100   : > { %19962 = vmatprep.subr.bf16.mxu0 %v19961_v1 }
 0x102   : > { %16440 = vmatmul.mubr.f32.gmra.mrb[4].mxu0 %v22988_v16 }
 0x103   : > { %16442 = vmatprep.mubr.f32.mxu0 %v22994_v17  ;;  %19964 = vmatpush3.bf16.msra.mxu0 %v19961_v1  ;;  %v19997_v1 = vpack.c.bf16 %v1078_v62, %v1077_v61  ;;  %v23174_v61 = vld [vmem:[#allocation3 + $0xd8] sm:$0xff]  ;;  %v23178_v62 = vld [vmem:[#allocation3 + $0xe0] sm:$0xff] }
 0x104   : > { %19966 = vmatprep.subr.bf16.mxu0 %v19965_v4 }
 0x106   : > { %16443 = vmatmul.mubr.f32.gmra.mrb[6].mxu0 %v22998_v19 }
 0x107   : > { %16445 = vmatprep.mubr.f32.mxu0 %v23001_v20  ;;  %19968 = vmatpush3.bf16.msra.mxu0 %v19965_v4  ;;  %v23142_v4 = vld [vmem:[#allocation3 + $0x50] sm:$0xff] }
 0x108   : > { %19970 = vmatprep.subr.bf16.mxu0 %v19969_v7 }
 0x10a   : > { %16446 = vmatmul.mubr.f32.gmra.mrb[8].mxu0 %v23004_v21 }
 0x10b   : > { %16448 = vmatprep.mubr.f32.mxu0 %v23010_v24  ;;  %19972 = vmatpush3.bf16.msra.mxu0 %v19969_v7  ;;  %v1081_v7 = vld [vmem:[#allocation7 + $0x150] sm:$0xff] }
 0x10c   : > { %19974 = vmatprep.subr.bf16.mxu0 %v19973_v10  ;;  %v20005_v11 = vpack.c.bf16 %v1082_v8, %v1081_v7  ;;  %v23192_v7 = vld [vmem:[#allocation3 + $0x120] sm:$0xff]  ;;  %v23196_v8 = vld [vmem:[#allocation3 + $0x128] sm:$0xff] }
 0x10e   : > { %16449 = vmatmul.mubr.f32.gmra.mrb[10].mxu0 %v23014_v25 }
 0x10f   : > { %16451 = vmatprep.mubr.f32.mxu0 %v23017_v26  ;;  %19976 = vmatpush3.bf16.msra.mxu0 %v19973_v10  ;;  %v23150_v10 = vld [vmem:[#allocation3 + $0x78] sm:$0xff] }
 0x110   : > { %19978 = vmatprep.subr.bf16.mxu0 %v19977_v18 }
 0x112   : > { %16452 = vmatmul.mubr.f32.gmra.mrb[12].mxu0 %v23020_v27 }
 0x113   : > { %16454 = vmatprep.mubr.f32.mxu0 %v23026_v28  ;;  %19980 = vmatpush3.bf16.msra.mxu0 %v19977_v18  ;;  %v1084_v18 = vld [vmem:[#allocation7 + $0x168] sm:$0xff] }
 0x114   : > { %19982 = vmatprep.subr.bf16.mxu0 %v19981_v29 }
 0x116   : > { %16455 = vmatmul.mubr.f32.gmra.mrb[14].mxu0 %v23030_v30 }
 0x117   : > { %16457 = vmatprep.mubr.f32.mxu0 %v23033_v31  ;;  %19984 = vmatpush3.bf16.msra.mxu0 %v19981_v29  ;;  %v20009_v29 = vpack.c.bf16 %v1084_v18, %v1083_v12  ;;  %v23202_v12 = vld [vmem:[#allocation3 + $0x140] sm:$0xff]  ;;  %v23204_v18 = vld [vmem:[#allocation3 + $0x150] sm:$0xff] }
 0x118   : > { %19986 = vmatprep.subr.bf16.mxu0 %v19985_v40 }
 0x11a   : > { %16458 = vmatmul.mubr.f32.gmra.mrb[16].mxu0 %v23036_v32 }
 0x11b   : > { %16460 = vmatprep.mubr.f32.mxu0 %v23042_v35 }
 0x11e   : > { %16461 = vmatmul.mubr.f32.gmra.mrb[18].mxu0 %v23046_v36 }
 0x11f   : > { %16463 = vmatprep.mubr.f32.mxu0 %v23049_v37 }
 0x122   : > { %16464 = vmatmul.mubr.f32.gmra.mrb[20].mxu0 %v23052_v38 }
 0x123   : > { %16466 = vmatprep.mubr.f32.mxu0 %v23058_v39  ;;  %v1384_v39 = vld [vmem:[#allocation7 + $0x1b8] sm:$0xff] }
 0x126   : > { %16467 = vmatmul.mubr.f32.gmra.mrb[22].mxu0 %v23062_v41  ;;  %v1383_v41 = vld [vmem:[#allocation7 + $0x1b0] sm:$0xff] }
 0x127   : > { %16469 = vmatprep.mubr.f32.mxu0 %v23065_v42 }
 0x12a   : > { %16470 = vmatmul.mubr.f32.gmra.mrb[24].mxu0 %v23068_v43  ;;  %v23230_v43 = vld [vmem:[#allocation3 + $0x32] sm:$0xff] }
 0x12b   : > { %16472 = vmatprep.mubr.f32.mxu0 %v23074_v46  ;;  %v23228_v46 = vld [vmem:[#allocation3 + $0x22] sm:$0xff]  ;;  %25937 = vst [vmem:[#allocation33_spill] sm:$0xff] %v23230_v43 }
 0x12c   : > { %25936 = vst [vmem:[#allocation32_spill] sm:$0xff] %v23228_v46 }
 0x12e   : > { %16473 = vmatmul.mubr.f32.gmra.mrb[26].mxu0 %v23078_v47  ;;  %v1382_v47 = vld [vmem:[#allocation7 + $0x1a8] sm:$0xff] }
 0x12f   : > { %16475 = vmatprep.mubr.f32.mxu0 %v23081_v48  ;;  %v1381_v48 = vld [vmem:[#allocation7 + $0x1a0] sm:$0xff] }
 0x130   : > { %v20025_v42 = vpack.c.bf16 %v1382_v47, %v1381_v48  ;;  %v23240_v47 = vld [vmem:[#allocation3 + $0x52] sm:$0xff]  ;;  %v23242_v48 = vld [vmem:[#allocation3 + $0x62] sm:$0xff] }
 0x131   : > { %25940 = vst [vmem:[#allocation36_spill] sm:$0xff] %v23240_v47  ;;  %25941 = vst [vmem:[#allocation37_spill] sm:$0xff] %v23242_v48 }
 0x132   : > { %16476 = vmatmul.mubr.f32.gmra.mrb[28].mxu0 %v23084_v49 }
 0x133   : > { %16478 = vmatprep.mubr.f32.mxu0 %v23090_v50  ;;  %v1039_v50 = vld [vmem:[#allocation3 + $0xa] sm:$0xff] }
 0x136   : > { %16479 = vmatmul.mubr.f32.gmra.mrb[30].mxu0 %v23094_v52  ;;  %v1380_v52 = vld [vmem:[#allocation7 + $0x198] sm:$0xff] }
 0x137   : > { %16513 = vmatprep.mubr.f32.mxu0 %v491_v44  ;;  %v23162_v44 = vld [vmem:[#allocation3 + $0xa8] sm:$0xff] }
 0x13a   : > { %16514 = vmatmul.mubr.f32.vlgmr.msra.gmra.mrb[0].mxu0 %v492_v53  ;;  %v1378_v53 = vld [vmem:[#allocation7 + $0x188] sm:$0xff] }
 0x13b   : > { %19988 = vmatpush3.bf16.msra.mxu0 %v19985_v40  ;;  %16516 = vmatprep.mubr.f32.mxu0 %v23127_v54  ;;  %v23160_v40 = vld [vmem:[#allocation3 + $0x98] sm:$0xff]  ;;  %v20017_v57 = vpack.c.bf16 %v1378_v53, %v1377_v51  ;;  %v23222_v51 = vld [vmem:[#allocation3 + $0x170] sm:$0xff]  ;;  %v1038_v53 = vld [vmem:[#allocation3 + $0x2] sm:$0xff] }
 0x13c   : > { %19990 = vmatprep.subr.bf16.mxu0 %v19989_v55 }
 0x13e   : > { %16517 = vmatmul.mubr.f32.gmra.mrb[2].mxu0 %v23130_v58 }
 0x13f   : > { %16519 = vmatprep.mubr.f32.mxu0 %v23132_v59  ;;  %19992 = vmatpush3.bf16.msra.mxu0 %v19989_v55  ;;  %v23166_v55 = vld [vmem:[#allocation3 + $0xb0] sm:$0xff] }
 0x140   : > { %19994 = vmatprep.subr.bf16.mxu0 %v19993_v60 }
 0x142   : > { %16520 = vmatmul.mubr.f32.gmra.mrb[4].mxu0 %v23136_v63 }
 0x143   : > { %16522 = vmatprep.mubr.f32.mxu0 %v23138_v0  ;;  %19996 = vmatpush3.bf16.msra.mxu0 %v19993_v60  ;;  %v23172_v60 = vld [vmem:[#allocation3 + $0xc8] sm:$0xff] }
 0x144   : > { %19998 = vmatprep.subr.bf16.mxu0 %v19997_v1 }
 0x146   : > { %16523 = vmatmul.mubr.f32.gmra.mrb[6].mxu0 %v23142_v4 }
 0x147   : > { %16525 = vmatprep.mubr.f32.mxu0 %v23144_v5  ;;  %20000 = vmatpush3.bf16.msra.mxu0 %v19997_v1  ;;  %v23180_v1 = vld [vmem:[#allocation3 + $0xf0] sm:$0xff] }
 0x148   : > { %20002 = vmatprep.subr.bf16.mxu0 %v20001_v6 }
 0x14a   : > { %16526 = vmatmul.mubr.f32.gmra.mrb[8].mxu0 %v23148_v9 }
 0x14b   : > { %16528 = vmatprep.mubr.f32.mxu0 %v23150_v10  ;;  %20004 = vmatpush3.bf16.msra.mxu0 %v20001_v6  ;;  %v23190_v6 = vld [vmem:[#allocation3 + $0x110] sm:$0xff] }
 0x14c   : > { %20006 = vmatprep.subr.bf16.mxu0 %v20005_v11 }
 0x14e   : > { %16529 = vmatmul.mubr.f32.gmra.mrb[10].mxu0 %v23154_v22 }
 0x14f   : > { %16531 = vmatprep.mubr.f32.mxu0 %v23156_v23  ;;  %20008 = vmatpush3.bf16.msra.mxu0 %v20005_v11  ;;  %v23198_v11 = vld [vmem:[#allocation3 + $0x138] sm:$0xff] }
 0x150   : > { %20010 = vmatprep.subr.bf16.mxu0 %v20009_v29 }
 0x152   : > { %16532 = vmatmul.mubr.f32.gmra.mrb[12].mxu0 %v23160_v40 }
 0x153   : > { %16534 = vmatprep.mubr.f32.mxu0 %v23162_v44  ;;  %20012 = vmatpush3.bf16.msra.mxu0 %v20009_v29  ;;  %v23207_v29 = vld [vmem:[%s22950_s14 + $0xf0] sm:$0xff] }
 0x154   : > { %20014 = vmatprep.subr.bf16.mxu0 %v20013_v45  ;;  %25933 = vst [vmem:[#allocation29_spill] sm:$0xff] %v23207_v29  ;;  %489 = vst [vmem:[#allocation3 + $0x181] sm:$0xff] %v23207_v29  ;;  %v1379_v29 = vld [vmem:[#allocation7 + $0x190] sm:$0xff] }
 0x155   : > { %v20021_v49 = vpack.c.bf16 %v1380_v52, %v1379_v29  ;;  %v23236_v52 = vld [vmem:[#allocation3 + $0x4a] sm:$0xff]  ;;  %v1386_v29 = vld [vmem:[#allocation7 + $0x1c8] sm:$0xff] }
 0x156   : > { %16535 = vmatmul.mubr.f32.gmra.mrb[14].mxu0 %v23166_v55  ;;  %25939 = vst [vmem:[#allocation35_spill] sm:$0xff] %v23236_v52 }
 0x157   : > { %16537 = vmatprep.mubr.f32.mxu0 %v23168_v56  ;;  %20016 = vmatpush3.bf16.msra.mxu0 %v20013_v45  ;;  %v23218_v45 = vld [vmem:[#allocation3 + $0x168] sm:$0xff] }
 0x158   : > { %20018 = vmatprep.subr.bf16.mxu0 %v20017_v57 }
 0x15a   : > { %16538 = vmatmul.mubr.f32.gmra.mrb[16].mxu0 %v23172_v60 }
 0x15b   : > { %16540 = vmatprep.mubr.f32.mxu0 %v23174_v61 }
 0x15e   : > { %16541 = vmatmul.mubr.f32.gmra.mrb[18].mxu0 %v23178_v62 }
 0x15f   : > { %16543 = vmatprep.mubr.f32.mxu0 %v23180_v1 }
 0x162   : > { %16544 = vmatmul.mubr.f32.gmra.mrb[20].mxu0 %v23184_v2 }
 0x163   : > { %16546 = vmatprep.mubr.f32.mxu0 %v23186_v3 }
 0x166   : > { %16547 = vmatmul.mubr.f32.gmra.mrb[22].mxu0 %v23190_v6 }
 0x167   : > { %16549 = vmatprep.mubr.f32.mxu0 %v23192_v7 }
 0x16a   : > { %16550 = vmatmul.mubr.f32.gmra.mrb[24].mxu0 %v23196_v8 }
 0x16b   : > { %16552 = vmatprep.mubr.f32.mxu0 %v23198_v11 }
 0x16e   : > { %16553 = vmatmul.mubr.f32.gmra.mrb[26].mxu0 %v23202_v12 }
 0x16f   : > { %16555 = vmatprep.mubr.f32.mxu0 %v23204_v18 }
 0x172   : > { %16556 = vmatmul.mubr.f32.gmra.mrb[28].mxu0 %v23216_v34 }
 0x173   : > { %16558 = vmatprep.mubr.f32.mxu0 %v23218_v45 }
 0x176   : > { %16559 = vmatmul.mubr.f32.gmra.mrb[30].mxu0 %v23222_v51 }
 0x177   : > { %16593 = vmatprep.mubr.f32.mxu0 %v1038_v53  ;;  %v23234_v53 = vld [vmem:[#allocation3 + $0x3a] sm:$0xff] }
 0x178   : > { %25938 = vst [vmem:[#allocation34_spill] sm:$0xff] %v23234_v53 }
 0x17a   : > { %16594 = vmatmul.mubr.f32.vlgmr.msra.gmra.mrb[0].mxu0 %v1039_v50  ;;  %v20029_v50 = vpack.c.bf16 %v1384_v39, %v1383_v41  ;;  %v23246_v39 = vld [vmem:[#allocation3 + $0x6a] sm:$0xff]  ;;  %v23248_v41 = vld [vmem:[#allocation3 + $0x7a] sm:$0xff] }
 0x17b   : > { %20020 = vmatpush3.bf16.msra.mxu0 %v20017_v57  ;;  %16596 = vmatprep.mubr.f32.mxu0 %v23225_v33  ;;  %v1385_v57 = vld [vmem:[#allocation7 + $0x1c0] sm:$0xff]  ;;  %v1388_v33 = vld [vmem:[#allocation7 + $0x1d8] sm:$0xff]  ;;  %25942 = vst [vmem:[#allocation38_spill] sm:$0xff] %v23246_v39  ;;  %25943 = vst [vmem:[#allocation39_spill] sm:$0xff] %v23248_v41 }
 0x17c   : > { %20022 = vmatprep.subr.bf16.mxu0 %v20021_v49 }
 0x17e   : > { %16597 = vmatmul.mubr.f32.gmra.mrb[2].mxu0 %v23228_v46  ;;  %v1387_v46 = vld [vmem:[#allocation7 + $0x1d0] sm:$0xff] }
 0x17f   : > { %16599 = vmatprep.mubr.f32.mxu0 %v23230_v43  ;;  %20024 = vmatpush3.bf16.msra.mxu0 %v20021_v49  ;;  %v20033_v43 = vpack.c.bf16 %v1386_v29, %v1385_v57  ;;  %v20037_v49 = vpack.c.bf16 %v1388_v33, %v1387_v46  ;;  %v23254_v57 = vld [vmem:[#allocation3 + $0x92] sm:$0xff]  ;;  %v23258_v46 = vld [vmem:[#allocation3 + $0x9a] sm:$0xff]  ;;  %v23260_v33 = vld [vmem:[#allocation3 + $0xaa] sm:$0xff] }
 0x180   : > { %20026 = vmatprep.subr.bf16.mxu0 %v20025_v42 }
 0x182   : > { %16600 = vmatmul.mubr.f32.gmra.mrb[4].mxu0 %v23234_v53  ;;  %v1390_v53 = vld [vmem:[#allocation7 + $0x1e8] sm:$0xff] }
 0x183   : > { %16602 = vmatprep.mubr.f32.mxu0 %v23236_v52  ;;  %20028 = vmatpush3.bf16.msra.mxu0 %v20025_v42  ;;  %v1389_v52 = vld [vmem:[#allocation7 + $0x1e0] sm:$0xff]  ;;  %v23252_v42 = vld [vmem:[#allocation3 + $0x82] sm:$0xff] }
 0x184   : > { %20030 = vmatprep.subr.bf16.mxu0 %v20029_v50  ;;  %v20041_v29 = vpack.c.bf16 %v1390_v53, %v1389_v52  ;;  %v23266_v53 = vld [vmem:[#allocation3 + $0xc2] sm:$0xff] }
 0x185   : > { %25945 = vst [vmem:[#allocation41_spill] sm:$0xff] %v23266_v53 }
 0x186   : > { %16603 = vmatmul.mubr.f32.gmra.mrb[6].mxu0 %v23240_v47  ;;  %v1392_v47 = vld [vmem:[#allocation7 + $0x1f8] sm:$0xff] }
 0x187   : > { %16605 = vmatprep.mubr.f32.mxu0 %v23242_v48  ;;  %20032 = vmatpush3.bf16.msra.mxu0 %v20029_v50  ;;  %v1391_v48 = vld [vmem:[#allocation7 + $0x1f0] sm:$0xff] }
 0x188   : > { %20034 = vmatprep.subr.bf16.mxu0 %v20033_v43  ;;  %v20045_v50 = vpack.c.bf16 %v1392_v47, %v1391_v48  ;;  %v23272_v47 = vld [vmem:[#allocation3 + $0xda] sm:$0xff]  ;;  %v23276_v48 = vld [vmem:[#allocation3 + $0xe2] sm:$0xff] }
 0x189   : > { %25947 = vst [vmem:[#allocation43_spill] sm:$0xff] %v23272_v47  ;;  %25948 = vst [vmem:[#allocation44_spill] sm:$0xff] %v23276_v48 }
 0x18a   : > { %16606 = vmatmul.mubr.f32.gmra.mrb[8].mxu0 %v23246_v39  ;;  %v1684_v39 = vld [vmem:[#allocation7 + $0x208] sm:$0xff] }
 0x18b   : > { %16608 = vmatprep.mubr.f32.mxu0 %v23248_v41  ;;  %20036 = vmatpush3.bf16.msra.mxu0 %v20033_v43  ;;  %v1683_v41 = vld [vmem:[#allocation7 + $0x200] sm:$0xff] }
 0x18c   : > { %20038 = vmatprep.subr.bf16.mxu0 %v20037_v49  ;;  %v23264_v43 = vld [vmem:[#allocation3 + $0xb2] sm:$0xff]  ;;  %v20049_v52 = vpack.c.bf16 %v1684_v39, %v1683_v41  ;;  %v23282_v39 = vld [vmem:[#allocation3 + $0xfa] sm:$0xff]  ;;  %v23284_v41 = vld [vmem:[#allocation3 + $0x10a] sm:$0xff] }
 0x18d   : > { %25944 = vst [vmem:[#allocation40_spill] sm:$0xff] %v23264_v43  ;;  %25950 = vst [vmem:[#allocation46_spill] sm:$0xff] %v23282_v39 }
 0x18e   : > { %16609 = vmatmul.mubr.f32.gmra.mrb[10].mxu0 %v23252_v42  ;;  %25951 = vst [vmem:[#allocation47_spill] sm:$0xff] %v23284_v41 }
 0x18f   : > { %16611 = vmatprep.mubr.f32.mxu0 %v23254_v57  ;;  %20040 = vmatpush3.bf16.msra.mxu0 %v20037_v49  ;;  %v23270_v49 = vld [vmem:[#allocation3 + $0xca] sm:$0xff] }
 0x190   : > { %20042 = vmatprep.subr.bf16.mxu0 %v20041_v29  ;;  %25946 = vst [vmem:[#allocation42_spill] sm:$0xff] %v23270_v49 }
 0x192   : > { %16612 = vmatmul.mubr.f32.gmra.mrb[12].mxu0 %v23258_v46 }
 0x193   : > { %16614 = vmatprep.mubr.f32.mxu0 %v23260_v33  ;;  %20044 = vmatpush3.bf16.msra.mxu0 %v20041_v29  ;;  %v23278_v29 = vld [vmem:[#allocation3 + $0xf2] sm:$0xff] }
 0x194   : > { %20046 = vmatprep.subr.bf16.mxu0 %v20045_v50  ;;  %25949 = vst [vmem:[#allocation45_spill] sm:$0xff] %v23278_v29 }
 0x196   : > { %16615 = vmatmul.mubr.f32.gmra.mrb[14].mxu0 %v23264_v43  ;;  %v1688_v43 = vld [vmem:[#allocation7 + $0x228] sm:$0xff] }
 0x197   : > { %16617 = vmatprep.mubr.f32.mxu0 %v23266_v53  ;;  %20048 = vmatpush3.bf16.msra.mxu0 %v20045_v50  ;;  %v23288_v50 = vld [vmem:[#allocation3 + $0x112] sm:$0xff] }
 0x198   : > { %20050 = vmatprep.subr.bf16.mxu0 %v20049_v52  ;;  %25952 = vst [vmem:[#allocation48_spill] sm:$0xff] %v23288_v50 }
 0x19a   : > { %16618 = vmatmul.mubr.f32.gmra.mrb[16].mxu0 %v23270_v49  ;;  %v23290_v49 = vld [vmem:[#allocation3 + $0x122] sm:$0xff] }
 0x19b   : > { %16620 = vmatprep.mubr.f32.mxu0 %v23272_v47  ;;  %25953 = vst [vmem:[#allocation49_spill] sm:$0xff] %v23290_v49  ;;  %v23294_v47 = vld [vmem:[#allocation3 + $0x12a] sm:$0xff] }
 0x19c   : > { %25954 = vst [vmem:[#allocation50_spill] sm:$0xff] %v23294_v47 }
 0x19e   : > { %16621 = vmatmul.mubr.f32.gmra.mrb[18].mxu0 %v23276_v48  ;;  %v23296_v48 = vld [vmem:[#allocation3 + $0x13a] sm:$0xff] }
 0x19f   : > { %16623 = vmatprep.mubr.f32.mxu0 %v23278_v29  ;;  %25955 = vst [vmem:[#allocation51_spill] sm:$0xff] %v23296_v48  ;;  %v23300_v29 = vld [vmem:[#allocation3 + $0x142] sm:$0xff] }
 0x1a0   : > { %25956 = vst [vmem:[#allocation52_spill] sm:$0xff] %v23300_v29 }
 0x1a2   : > { %16624 = vmatmul.mubr.f32.gmra.mrb[20].mxu0 %v23282_v39  ;;  %v23302_v39 = vld [vmem:[#allocation3 + $0x152] sm:$0xff] }
 0x1a3   : > { %16626 = vmatprep.mubr.f32.mxu0 %v23284_v41  ;;  %25957 = vst [vmem:[#allocation53_spill] sm:$0xff] %v23302_v39  ;;  %v23306_v41 = vld [vmem:[#allocation3 + $0x15a] sm:$0xff] }
 0x1a4   : > { %25958 = vst [vmem:[#allocation54_spill] sm:$0xff] %v23306_v41 }
 0x1a6   : > { %16627 = vmatmul.mubr.f32.gmra.mrb[22].mxu0 %v23288_v50  ;;  %v23308_v50 = vld [vmem:[#allocation3 + $0x16a] sm:$0xff] }
 0x1a7   : > { %16629 = vmatprep.mubr.f32.mxu0 %v23290_v49  ;;  %25959 = vst [vmem:[#allocation55_spill] sm:$0xff] %v23308_v50  ;;  %v23312_v49 = vld [vmem:[#allocation3 + $0x172] sm:$0xff] }
 0x1a8   : > { %25960 = vst [vmem:[#allocation56_spill] sm:$0xff] %v23312_v49 }
 0x1aa   : > { %16630 = vmatmul.mubr.f32.gmra.mrb[24].mxu0 %v23294_v47  ;;  %v1685_v47 = vld [vmem:[#allocation7 + $0x210] sm:$0xff] }
 0x1ab   : > { %16632 = vmatprep.mubr.f32.mxu0 %v23296_v48  ;;  %v1686_v48 = vld [vmem:[#allocation7 + $0x218] sm:$0xff] }
 0x1ac   : > { %v20053_v53 = vpack.c.bf16 %v1686_v48, %v1685_v47  ;;  %v1692_v47 = vld [vmem:[#allocation7 + $0x248] sm:$0xff]  ;;  %v1695_v48 = vld [vmem:[#allocation7 + $0x260] sm:$0xff] }
 0x1ae   : > { %16633 = vmatmul.mubr.f32.gmra.mrb[26].mxu0 %v23300_v29  ;;  %v1687_v29 = vld [vmem:[#allocation7 + $0x220] sm:$0xff] }
 0x1af   : > { %16635 = vmatprep.mubr.f32.mxu0 %v23302_v39  ;;  %v1689_v39 = vld [vmem:[#allocation7 + $0x230] sm:$0xff] }
 0x1b2   : > { %16636 = vmatmul.mubr.f32.gmra.mrb[28].mxu0 %v23306_v41  ;;  %v20057_v41 = vpack.c.bf16 %v1688_v43, %v1687_v29  ;;  %v1694_v43 = vld [vmem:[#allocation7 + $0x258] sm:$0xff]  ;;  %v1696_v29 = vld [vmem:[#allocation7 + $0x268] sm:$0xff] }
 0x1b3   : > { %16638 = vmatprep.mubr.f32.mxu0 %v23308_v50  ;;  %v1690_v50 = vld [vmem:[#allocation7 + $0x238] sm:$0xff] }
 0x1b6   : > { %16639 = vmatmul.mubr.f32.gmra.mrb[30].mxu0 %v23312_v49  ;;  %v20061_v49 = vpack.c.bf16 %v1690_v50, %v1689_v39  ;;  %v20073_v39 = vpack.c.bf16 %v1696_v29, %v1695_v48  ;;  %v1698_v50 = vld [vmem:[#allocation7 + $0x278] sm:$0xff] }
 0x1b7   : > { %16673 = vmatprep.mubr.f32.mxu0 %v23127_v54  ;;  %v1691_v54 = vld [vmem:[#allocation7 + $0x240] sm:$0xff]  ;;  %v1992_v48 = vld [vmem:[#allocation7 + $0x298] sm:$0xff] }
 0x1ba   : > { %16674 = vmatmul.mubr.f32.vlgmr.msra.gmra.mrb[0].mxu0 %v23130_v58  ;;  %v20065_v58 = vpack.c.bf16 %v1692_v47, %v1691_v54  ;;  %v1989_v54 = vld [vmem:[#allocation7 + $0x280] sm:$0xff]  ;;  %v1990_v47 = vld [vmem:[#allocation7 + $0x288] sm:$0xff] }
 0x1bb   : > { %20052 = vmatpush3.bf16.msra.mxu0 %v20049_v52  ;;  %16676 = vmatprep.mubr.f32.mxu0 %v23132_v59  ;;  %v1693_v52 = vld [vmem:[#allocation7 + $0x250] sm:$0xff] }
 0x1bc   : > { %20054 = vmatprep.subr.bf16.mxu0 %v20053_v53 }
 0x1be   : > { %16677 = vmatmul.mubr.f32.gmra.mrb[2].mxu0 %v23136_v63 }
 0x1bf   : > { %16679 = vmatprep.mubr.f32.mxu0 %v23138_v0  ;;  %20056 = vmatpush3.bf16.msra.mxu0 %v20053_v53  ;;  %v20069_v53 = vpack.c.bf16 %v1694_v43, %v1693_v52  ;;  %v23344_v52 = vld [vmem:[#allocation3 + $0x180] sm:$0xff]  ;;  %v23348_v43 = vld [vmem:[#allocation3 + $0x188] sm:$0xff] }
 0x1c0   : > { %20058 = vmatprep.subr.bf16.mxu0 %v20057_v41 }
 0x1c2   : > { %16680 = vmatmul.mubr.f32.gmra.mrb[4].mxu0 %v23142_v4 }
 0x1c3   : > { %16682 = vmatprep.mubr.f32.mxu0 %v23144_v5  ;;  %20060 = vmatpush3.bf16.msra.mxu0 %v20057_v41  ;;  %v1697_v41 = vld [vmem:[#allocation7 + $0x270] sm:$0xff] }
 0x1c4   : > { %20062 = vmatprep.subr.bf16.mxu0 %v20061_v49 }
 0x1c6   : > { %16683 = vmatmul.mubr.f32.gmra.mrb[6].mxu0 %v23148_v9 }
 0x1c7   : > { %16685 = vmatprep.mubr.f32.mxu0 %v23150_v10  ;;  %20064 = vmatpush3.bf16.msra.mxu0 %v20061_v49  ;;  %v20077_v49 = vpack.c.bf16 %v1698_v50, %v1697_v41  ;;  %v1994_v41 = vld [vmem:[#allocation7 + $0x2a8] sm:$0xff] }
 0x1c8   : > { %20066 = vmatprep.subr.bf16.mxu0 %v20065_v58 }
 0x1ca   : > { %16686 = vmatmul.mubr.f32.gmra.mrb[8].mxu0 %v23154_v22 }
 0x1cb   : > { %16688 = vmatprep.mubr.f32.mxu0 %v23156_v23  ;;  %20068 = vmatpush3.bf16.msra.mxu0 %v20065_v58  ;;  %v20081_v58 = vpack.c.bf16 %v1990_v47, %v1989_v54  ;;  %v1996_v54 = vld [vmem:[#allocation7 + $0x2b8] sm:$0xff] }
 0x1cc   : > { %20070 = vmatprep.subr.bf16.mxu0 %v20069_v53 }
 0x1ce   : > { %16689 = vmatmul.mubr.f32.gmra.mrb[10].mxu0 %v23160_v40 }
 0x1cf   : > { %16691 = vmatprep.mubr.f32.mxu0 %v23162_v44  ;;  %20072 = vmatpush3.bf16.msra.mxu0 %v20069_v53  ;;  %v1991_v53 = vld [vmem:[#allocation7 + $0x290] sm:$0xff] }
 0x1d0   : > { %20074 = vmatprep.subr.bf16.mxu0 %v20073_v39  ;;  %v20085_v29 = vpack.c.bf16 %v1992_v48, %v1991_v53  ;;  %v1998_v53 = vld [vmem:[#allocation7 + $0x2c8] sm:$0xff] }
 0x1d1   : > { %v2002_v48 = vld [vmem:[#allocation7 + $0x2e8] sm:$0xff] }
 0x1d2   : > { %16692 = vmatmul.mubr.f32.gmra.mrb[12].mxu0 %v23166_v55 }
 0x1d3   : > { %16694 = vmatprep.mubr.f32.mxu0 %v23168_v56  ;;  %20076 = vmatpush3.bf16.msra.mxu0 %v20073_v39  ;;  %v1993_v39 = vld [vmem:[#allocation7 + $0x2a0] sm:$0xff] }
 0x1d4   : > { %20078 = vmatprep.subr.bf16.mxu0 %v20077_v49  ;;  %v20089_v50 = vpack.c.bf16 %v1994_v41, %v1993_v39  ;;  %v2297_v39 = vld [vmem:[#allocation7 + $0x308] sm:$0xff]  ;;  %v25968_v41 = vld [vmem:[#allocation26_spill] sm:$0xff] }
 0x1d6   : > { %16695 = vmatmul.mubr.f32.gmra.mrb[14].mxu0 %v23172_v60 }
 0x1d7   : > { %16697 = vmatprep.mubr.f32.mxu0 %v23174_v61  ;;  %20080 = vmatpush3.bf16.msra.mxu0 %v20077_v49  ;;  %v1995_v49 = vld [vmem:[#allocation7 + $0x2b0] sm:$0xff] }
 0x1d8   : > { %20082 = vmatprep.subr.bf16.mxu0 %v20081_v58  ;;  %v20093_v47 = vpack.c.bf16 %v1996_v54, %v1995_v49  ;;  %v2299_v49 = vld [vmem:[#allocation7 + $0x318] sm:$0xff]  ;;  %v25972_v54 = vld [vmem:[#allocation30_spill] sm:$0xff] }
 0x1da   : > { %16698 = vmatmul.mubr.f32.gmra.mrb[16].mxu0 %v23178_v62 }
 0x1db   : > { %16700 = vmatprep.mubr.f32.mxu0 %v23180_v1 }
 0x1de   : > { %16701 = vmatmul.mubr.f32.gmra.mrb[18].mxu0 %v23184_v2 }
 0x1df   : > { %16703 = vmatprep.mubr.f32.mxu0 %v23186_v3 }
 0x1e2   : > { %16704 = vmatmul.mubr.f32.gmra.mrb[20].mxu0 %v23190_v6 }
 0x1e3   : > { %16706 = vmatprep.mubr.f32.mxu0 %v23192_v7 }
 0x1e6   : > { %16707 = vmatmul.mubr.f32.gmra.mrb[22].mxu0 %v23196_v8 }
 0x1e7   : > { %16709 = vmatprep.mubr.f32.mxu0 %v23198_v11 }
 0x1ea   : > { %16710 = vmatmul.mubr.f32.gmra.mrb[24].mxu0 %v23202_v12 }
 0x1eb   : > { %16712 = vmatprep.mubr.f32.mxu0 %v23204_v18 }
 0x1ee   : > { %16713 = vmatmul.mubr.f32.gmra.mrb[26].mxu0 %v23216_v34 }
 0x1ef   : > { %16715 = vmatprep.mubr.f32.mxu0 %v23218_v45 }
 0x1f2   : > { %16716 = vmatmul.mubr.f32.gmra.mrb[28].mxu0 %v23222_v51 }
 0x1f3   : > { %16718 = vmatprep.mubr.f32.mxu0 %v23344_v52 }
 0x1f6   : > { %16719 = vmatmul.mubr.f32.gmra.mrb[30].mxu0 %v23348_v43 }
 0x1f7   : > { %16753 = vmatprep.mubr.f32.mxu0 %v22978_v13  ;;  %v1997_v13 = vld [vmem:[#allocation7 + $0x2c0] sm:$0xff] }
 0x1fa   : > { %16754 = vmatmul.mubr.f32.vlgmr.msra.gmra.mrb[0].mxu0 %v22982_v14  ;;  %v20097_v14 = vpack.c.bf16 %v1998_v53, %v1997_v13  ;;  %v2300_v53 = vld [vmem:[#allocation7 + $0x320] sm:$0xff] }
 0x1fb   : > { %20084 = vmatpush3.bf16.msra.mxu0 %v20081_v58  ;;  %16756 = vmatprep.mubr.f32.mxu0 %v22985_v15  ;;  %v1999_v15 = vld [vmem:[#allocation7 + $0x2d0] sm:$0xff]  ;;  %v2000_v58 = vld [vmem:[#allocation7 + $0x2d8] sm:$0xff] }
 0x1fc   : > { %20086 = vmatprep.subr.bf16.mxu0 %v20085_v29 }
 0x1fe   : > { %16757 = vmatmul.mubr.f32.gmra.mrb[2].mxu0 %v22988_v16  ;;  %v20101_v16 = vpack.c.bf16 %v2000_v58, %v1999_v15  ;;  %v25974_v15 = vld [vmem:[#allocation32_spill] sm:$0xff]  ;;  %v25975_v58 = vld [vmem:[#allocation33_spill] sm:$0xff] }
 0x1ff   : > { %16759 = vmatprep.mubr.f32.mxu0 %v22994_v17  ;;  %20088 = vmatpush3.bf16.msra.mxu0 %v20085_v29  ;;  %v2001_v17 = vld [vmem:[#allocation7 + $0x2e0] sm:$0xff]  ;;  %v2004_v29 = vld [vmem:[#allocation7 + $0x2f8] sm:$0xff] }
 0x200   : > { %20090 = vmatprep.subr.bf16.mxu0 %v20089_v50 }
 0x202   : > { %16760 = vmatmul.mubr.f32.gmra.mrb[4].mxu0 %v22998_v19  ;;  %v20105_v19 = vpack.c.bf16 %v2002_v48, %v2001_v17  ;;  %v2302_v17 = vld [vmem:[#allocation7 + $0x330] sm:$0xff]  ;;  %v2303_v48 = vld [vmem:[#allocation7 + $0x338] sm:$0xff] }
 0x203   : > { %16762 = vmatprep.mubr.f32.mxu0 %v23001_v20  ;;  %20092 = vmatpush3.bf16.msra.mxu0 %v20089_v50  ;;  %v2003_v20 = vld [vmem:[#allocation7 + $0x2f0] sm:$0xff] }
 0x204   : > { %20094 = vmatprep.subr.bf16.mxu0 %v20093_v47  ;;  %v2298_v50 = vld [vmem:[#allocation7 + $0x310] sm:$0xff] }
 0x205   : > { %v20117_v13 = vpack.c.bf16 %v2299_v49, %v2298_v50  ;;  %v2602_v49 = vld [vmem:[#allocation7 + $0x380] sm:$0xff] }
 0x206   : > { %16763 = vmatmul.mubr.f32.gmra.mrb[6].mxu0 %v23004_v21  ;;  %v20109_v21 = vpack.c.bf16 %v2004_v29, %v2003_v20  ;;  %v25977_v20 = vld [vmem:[#allocation35_spill] sm:$0xff]  ;;  %v20125_v29 = vpack.c.bf16 %v2303_v48, %v2302_v17  ;;  %v25992_v17 = vld [vmem:[#allocation50_spill] sm:$0xff] }
 0x207   : > { %16765 = vmatprep.mubr.f32.mxu0 %v23010_v24  ;;  %20096 = vmatpush3.bf16.msra.mxu0 %v20093_v47  ;;  %v2296_v24 = vld [vmem:[#allocation7 + $0x300] sm:$0xff]  ;;  %v25973_v47 = vld [vmem:[#allocation31_spill] sm:$0xff] }
 0x208   : > { %20098 = vmatprep.subr.bf16.mxu0 %v20097_v14  ;;  %v25993_v48 = vld [vmem:[#allocation51_spill] sm:$0xff] }
 0x20a   : > { %16766 = vmatmul.mubr.f32.gmra.mrb[8].mxu0 %v23014_v25  ;;  %v20113_v25 = vpack.c.bf16 %v2297_v39, %v2296_v24  ;;  %v2305_v24 = vld [vmem:[#allocation7 + $0x348] sm:$0xff]  ;;  %v25978_v39 = vld [vmem:[#allocation36_spill] sm:$0xff] }
 0x20b   : > { %16768 = vmatprep.mubr.f32.mxu0 %v23017_v26  ;;  %20100 = vmatpush3.bf16.msra.mxu0 %v20097_v14  ;;  %v25961_v26 = vld [vmem:[#allocation19_spill] sm:$0xff] }
 0x20c   : > { %20102 = vmatprep.subr.bf16.mxu0 %v20101_v16  ;;  %v2301_v14 = vld [vmem:[#allocation7 + $0x328] sm:$0xff] }
 0x20e   : > { %16769 = vmatmul.mubr.f32.gmra.mrb[10].mxu0 %v23020_v27  ;;  %v25962_v27 = vld [vmem:[#allocation20_spill] sm:$0xff] }
 0x20f   : > { %16771 = vmatprep.mubr.f32.mxu0 %v23026_v28  ;;  %20104 = vmatpush3.bf16.msra.mxu0 %v20101_v16  ;;  %v25963_v28 = vld [vmem:[#allocation21_spill] sm:$0xff]  ;;  %v20121_v16 = vpack.c.bf16 %v2301_v14, %v2300_v53  ;;  %v25985_v53 = vld [vmem:[#allocation43_spill] sm:$0xff]  ;;  %v25988_v14 = vld [vmem:[#allocation46_spill] sm:$0xff] }
 0x210   : > { %20106 = vmatprep.subr.bf16.mxu0 %v20105_v19 }
 0x212   : > { %16772 = vmatmul.mubr.f32.gmra.mrb[12].mxu0 %v23030_v30  ;;  %v25964_v30 = vld [vmem:[#allocation22_spill] sm:$0xff] }
 0x213   : > { %16774 = vmatprep.mubr.f32.mxu0 %v23033_v31  ;;  %20108 = vmatpush3.bf16.msra.mxu0 %v20105_v19  ;;  %v25965_v31 = vld [vmem:[#allocation23_spill] sm:$0xff]  ;;  %v25976_v19 = vld [vmem:[#allocation34_spill] sm:$0xff] }
 0x214   : > { %20110 = vmatprep.subr.bf16.mxu0 %v20109_v21 }
 0x216   : > { %16775 = vmatmul.mubr.f32.gmra.mrb[14].mxu0 %v23036_v32  ;;  %v25966_v32 = vld [vmem:[#allocation24_spill] sm:$0xff] }
 0x217   : > { %16777 = vmatprep.mubr.f32.mxu0 %v23042_v35  ;;  %20112 = vmatpush3.bf16.msra.mxu0 %v20109_v21  ;;  %v25967_v35 = vld [vmem:[#allocation25_spill] sm:$0xff]  ;;  %v2304_v21 = vld [vmem:[#allocation7 + $0x340] sm:$0xff] }
 0x218   : > { %20114 = vmatprep.subr.bf16.mxu0 %v20113_v25 }
 0x21a   : > { %16778 = vmatmul.mubr.f32.gmra.mrb[16].mxu0 %v23046_v36  ;;  %v25969_v36 = vld [vmem:[#allocation27_spill] sm:$0xff] }
 0x21b   : > { %16780 = vmatprep.mubr.f32.mxu0 %v23049_v37  ;;  %v25970_v37 = vld [vmem:[#allocation28_spill] sm:$0xff] }
 0x21e   : > { %16781 = vmatmul.mubr.f32.gmra.mrb[18].mxu0 %v23052_v38  ;;  %v25971_v38 = vld [vmem:[#allocation29_spill] sm:$0xff] }
 0x21f   : > { %16783 = vmatprep.mubr.f32.mxu0 %v25961_v26  ;;  %v25979_v26 = vld [vmem:[#allocation37_spill] sm:$0xff] }
 0x222   : > { %16784 = vmatmul.mubr.f32.gmra.mrb[20].mxu0 %v25962_v27  ;;  %v2306_v27 = vld [vmem:[#allocation7 + $0x350] sm:$0xff] }
 0x223   : > { %16786 = vmatprep.mubr.f32.mxu0 %v25963_v28  ;;  %v2307_v28 = vld [vmem:[#allocation7 + $0x358] sm:$0xff] }
 0x226   : > { %16787 = vmatmul.mubr.f32.gmra.mrb[22].mxu0 %v25964_v30  ;;  %v25980_v30 = vld [vmem:[#allocation38_spill] sm:$0xff] }
 0x227   : > { %16789 = vmatprep.mubr.f32.mxu0 %v25965_v31  ;;  %v25981_v31 = vld [vmem:[#allocation39_spill] sm:$0xff] }
 0x22a   : > { %16790 = vmatmul.mubr.f32.gmra.mrb[24].mxu0 %v25966_v32  ;;  %v20133_v32 = vpack.c.bf16 %v2307_v28, %v2306_v27  ;;  %v2605_v27 = vld [vmem:[#allocation7 + $0x398] sm:$0xff] }
 0x22b   : > { %16792 = vmatprep.mubr.f32.mxu0 %v25967_v35  ;;  %v2308_v35 = vld [vmem:[#allocation7 + $0x360] sm:$0xff] }
 0x22e   : > { %16793 = vmatmul.mubr.f32.gmra.mrb[26].mxu0 %v25968_v41  ;;  %v2309_v41 = vld [vmem:[#allocation7 + $0x368] sm:$0xff] }
 0x22f   : > { %16795 = vmatprep.mubr.f32.mxu0 %v25969_v36  ;;  %v20137_v36 = vpack.c.bf16 %v2309_v41, %v2308_v35  ;;  %v2608_v35 = vld [vmem:[#allocation7 + $0x3b0] sm:$0xff]  ;;  %v2609_v41 = vld [vmem:[#allocation7 + $0x3b8] sm:$0xff] }
 0x232   : > { %16796 = vmatmul.mubr.f32.gmra.mrb[28].mxu0 %v25970_v37  ;;  %v2310_v37 = vld [vmem:[#allocation7 + $0x370] sm:$0xff] }
 0x233   : > { %16798 = vmatprep.mubr.f32.mxu0 %v25971_v38  ;;  %v2311_v38 = vld [vmem:[#allocation7 + $0x378] sm:$0xff] }
 0x234   : > { %v20141_v50 = vpack.c.bf16 %v2311_v38, %v2310_v37  ;;  %v2611_v37 = vld [vmem:[#allocation7 + $0x3c8] sm:$0xff]  ;;  %v2613_v38 = vld [vmem:[#allocation7 + $0x3d8] sm:$0xff] }
 0x236   : > { %16799 = vmatmul.mubr.f32.gmra.mrb[30].mxu0 %v25972_v54  ;;  %v2603_v54 = vld [vmem:[#allocation7 + $0x388] sm:$0xff] }
 0x237   : > { %16833 = vmatprep.mubr.f32.mxu0 %v25973_v47  ;;  %v25982_v47 = vld [vmem:[#allocation40_spill] sm:$0xff] }
 0x23a   : > { %16834 = vmatmul.mubr.f32.vlgmr.msra.gmra.mrb[0].mxu0 %v25974_v15  ;;  %v25989_v15 = vld [vmem:[#allocation47_spill] sm:$0xff] }
 0x23b   : > { %20116 = vmatpush3.bf16.msra.mxu0 %v20113_v25  ;;  %16836 = vmatprep.mubr.f32.mxu0 %v25975_v58  ;;  %v20129_v25 = vpack.c.bf16 %v2305_v24, %v2304_v21  ;;  %v25990_v58 = vld [vmem:[#allocation48_spill] sm:$0xff]  ;;  %v25997_v21 = vld [vmem:[#allocation55_spill] sm:$0xff] }
 0x23c   : > { %20118 = vmatprep.subr.bf16.mxu0 %v20117_v13  ;;  %v23412_v24 = vld [vmem:[#allocation3 + $0x182] sm:$0xff] }
 0x23e   : > { %16837 = vmatmul.mubr.f32.gmra.mrb[2].mxu0 %v25976_v19  ;;  %v25994_v19 = vld [vmem:[#allocation52_spill] sm:$0xff] }
 0x23f   : > { %16839 = vmatprep.mubr.f32.mxu0 %v25977_v20  ;;  %20120 = vmatpush3.bf16.msra.mxu0 %v20117_v13  ;;  %v25983_v13 = vld [vmem:[#allocation41_spill] sm:$0xff] }
 0x240   : > { %20122 = vmatprep.subr.bf16.mxu0 %v20121_v16  ;;  %v25995_v20 = vld [vmem:[#allocation53_spill] sm:$0xff] }
 0x242   : > { %16840 = vmatmul.mubr.f32.gmra.mrb[4].mxu0 %v25978_v39  ;;  %v25998_v39 = vld [vmem:[#allocation56_spill] sm:$0xff] }
 0x243   : > { %16842 = vmatprep.mubr.f32.mxu0 %v25979_v26  ;;  %20124 = vmatpush3.bf16.msra.mxu0 %v20121_v16  ;;  %v25991_v16 = vld [vmem:[#allocation49_spill] sm:$0xff] }
 0x244   : > { %20126 = vmatprep.subr.bf16.mxu0 %v20125_v29  ;;  %v23416_v26 = vld [vmem:[#allocation3 + $0x18a] sm:$0xff] }
 0x246   : > { %16843 = vmatmul.mubr.f32.gmra.mrb[6].mxu0 %v25980_v30  ;;  %v2606_v30 = vld [vmem:[#allocation7 + $0x3a0] sm:$0xff] }
 0x247   : > { %16845 = vmatprep.mubr.f32.mxu0 %v25981_v31  ;;  %20128 = vmatpush3.bf16.msra.mxu0 %v20125_v29  ;;  %v25996_v29 = vld [vmem:[#allocation54_spill] sm:$0xff]  ;;  %v2607_v31 = vld [vmem:[#allocation7 + $0x3a8] sm:$0xff] }
 0x248   : > { %20130 = vmatprep.subr.bf16.mxu0 %v20129_v25 }
 0x24a   : > { %16846 = vmatmul.mubr.f32.gmra.mrb[8].mxu0 %v23252_v42  ;;  %v20145_v42 = vpack.c.bf16 %v2603_v54, %v2602_v49  ;;  %v2617_v49 = vld [vmem:[#allocation7 + $0x3f8] sm:$0xff]  ;;  %v2909_v54 = vld [vmem:[#allocation7 + $0x408] sm:$0xff] }
 0x24b   : > { %16848 = vmatprep.mubr.f32.mxu0 %v23254_v57  ;;  %20132 = vmatpush3.bf16.msra.mxu0 %v20129_v25  ;;  %v25984_v57 = vld [vmem:[#allocation42_spill] sm:$0xff]  ;;  %v2604_v25 = vld [vmem:[#allocation7 + $0x390] sm:$0xff] }
 0x24c   : > { %20134 = vmatprep.subr.bf16.mxu0 %v20133_v32  ;;  %v20149_v28 = vpack.c.bf16 %v2605_v27, %v2604_v25  ;;  %v2919_v27 = vld [vmem:[#allocation7 + $0x458] sm:$0xff] }
 0x24e   : > { %16849 = vmatmul.mubr.f32.gmra.mrb[10].mxu0 %v23258_v46  ;;  %v25986_v46 = vld [vmem:[#allocation44_spill] sm:$0xff] }
 0x24f   : > { %16851 = vmatprep.mubr.f32.mxu0 %v23260_v33  ;;  %20136 = vmatpush3.bf16.msra.mxu0 %v20133_v32  ;;  %v25987_v33 = vld [vmem:[#allocation45_spill] sm:$0xff]  ;;  %v20153_v32 = vpack.c.bf16 %v2607_v31, %v2606_v30  ;;  %v2578_v31 = vld [vmem:[#allocation3 + $0x99] sm:$0xff] }
 0x250   : > { %20138 = vmatprep.subr.bf16.mxu0 %v20137_v36  ;;  %v3441_v30 = vld [vmem:[#allocation7 + $0x558] sm:$0xff] }
 0x252   : > { %16852 = vmatmul.mubr.f32.gmra.mrb[12].mxu0 %v25982_v47 }
 0x253   : > { %16854 = vmatprep.mubr.f32.mxu0 %v25983_v13  ;;  %20140 = vmatpush3.bf16.msra.mxu0 %v20137_v36  ;;  %v20157_v36 = vpack.c.bf16 %v2609_v41, %v2608_v35  ;;  %v2914_v13 = vld [vmem:[#allocation7 + $0x430] sm:$0xff] }
 0x254   : > { %20142 = vmatprep.subr.bf16.mxu0 %v20141_v50 }
 0x256   : > { %16855 = vmatmul.mubr.f32.gmra.mrb[14].mxu0 %v25984_v57  ;;  %v2915_v57 = vld [vmem:[#allocation7 + $0x438] sm:$0xff] }
 0x257   : > { %16857 = vmatprep.mubr.f32.mxu0 %v25985_v53  ;;  %20144 = vmatpush3.bf16.msra.mxu0 %v20141_v50  ;;  %v2615_v50 = vld [vmem:[#allocation7 + $0x3e8] sm:$0xff]  ;;  %v3436_v53 = vld [vmem:[#allocation7 + $0x530] sm:$0xff] }
 0x258   : > { %20146 = vmatprep.subr.bf16.mxu0 %v20145_v42 }
 0x25a   : > { %16858 = vmatmul.mubr.f32.gmra.mrb[16].mxu0 %v25986_v46  ;;  %v3437_v46 = vld [vmem:[#allocation7 + $0x538] sm:$0xff] }
 0x25b   : > { %16860 = vmatprep.mubr.f32.mxu0 %v25987_v33  ;;  %v2574_v33 = vld [vmem:[#allocation3 + $0x69] sm:$0xff] }
 0x25e   : > { %16861 = vmatmul.mubr.f32.gmra.mrb[18].mxu0 %v25988_v14  ;;  %v2575_v14 = vld [vmem:[#allocation3 + $0x79] sm:$0xff] }
 0x25f   : > { %16863 = vmatprep.mubr.f32.mxu0 %v25989_v15  ;;  %v20189_v15 = vpack.c.bf16 %v2915_v57, %v2914_v13  ;;  %v2885_v13 = vld [vmem:[#allocation3 + $0xaa] sm:$0xff]  ;;  %v2887_v57 = vld [vmem:[#allocation3 + $0xc2] sm:$0xff] }
 0x262   : > { %16864 = vmatmul.mubr.f32.gmra.mrb[20].mxu0 %v25990_v58  ;;  %v2916_v58 = vld [vmem:[#allocation7 + $0x440] sm:$0xff] }
 0x263   : > { %16866 = vmatprep.mubr.f32.mxu0 %v25991_v16  ;;  %v20221_v16 = vpack.c.bf16 %v3437_v46, %v3436_v53  ;;  %v2888_v53 = vld [vmem:[#allocation3 + $0xca] sm:$0xff]  ;;  %v2889_v46 = vld [vmem:[#allocation3 + $0xda] sm:$0xff] }
 0x266   : > { %16867 = vmatmul.mubr.f32.gmra.mrb[22].mxu0 %v25992_v17  ;;  %v2917_v17 = vld [vmem:[#allocation7 + $0x448] sm:$0xff] }
 0x267   : > { %16869 = vmatprep.mubr.f32.mxu0 %v25993_v48  ;;  %v3438_v48 = vld [vmem:[#allocation7 + $0x540] sm:$0xff] }
 0x26a   : > { %16870 = vmatmul.mubr.f32.gmra.mrb[24].mxu0 %v25994_v19  ;;  %v3439_v19 = vld [vmem:[#allocation7 + $0x548] sm:$0xff] }
 0x26b   : > { %16872 = vmatprep.mubr.f32.mxu0 %v25995_v20  ;;  %v2576_v20 = vld [vmem:[#allocation3 + $0x81] sm:$0xff]  ;;  %v20225_v25 = vpack.c.bf16 %v3439_v19, %v3438_v48  ;;  %v2896_v48 = vld [vmem:[#allocation3 + $0x12a] sm:$0xff] }
 0x26c   : > { %v2897_v19 = vld [vmem:[#allocation3 + $0x13a] sm:$0xff] }
 0x26e   : > { %16873 = vmatmul.mubr.f32.gmra.mrb[26].mxu0 %v25996_v29  ;;  %v2577_v29 = vld [vmem:[#allocation3 + $0x91] sm:$0xff] }
 0x26f   : > { %16875 = vmatprep.mubr.f32.mxu0 %v25997_v21  ;;  %v20193_v21 = vpack.c.bf16 %v2917_v17, %v2916_v58  ;;  %v2893_v58 = vld [vmem:[#allocation3 + $0x10a] sm:$0xff]  ;;  %v2895_v17 = vld [vmem:[#allocation3 + $0x122] sm:$0xff] }
 0x272   : > { %16876 = vmatmul.mubr.f32.gmra.mrb[28].mxu0 %v25998_v39  ;;  %v2918_v39 = vld [vmem:[#allocation7 + $0x450] sm:$0xff] }
 0x273   : > { %16878 = vmatprep.mubr.f32.mxu0 %v23412_v24  ;;  %v20197_v35 = vpack.c.bf16 %v2919_v27, %v2918_v39  ;;  %v2901_v39 = vld [vmem:[#allocation3 + $0x16a] sm:$0xff]  ;;  %v2905_v27 = vld [vmem:[#allocation3 + $0x19a] sm:$0xff] }
 0x276   : > { %16879 = vmatmul.mubr.f32.gmra.mrb[30].mxu0 %v23416_v26 }
 0x277   : > { %16913 = vmatprep.mubr.f32.mxu0 %v23132_v59  ;;  %v2610_v59 = vld [vmem:[#allocation7 + $0x3c0] sm:$0xff] }
 0x27a   : > { %16914 = vmatmul.mubr.f32.vlgmr.msra.gmra.mrb[0].mxu0 %v23136_v63  ;;  %v20161_v63 = vpack.c.bf16 %v2611_v37, %v2610_v59  ;;  %v2921_v59 = vld [vmem:[#allocation7 + $0x468] sm:$0xff] }
 0x27b   : > { %20148 = vmatpush3.bf16.msra.mxu0 %v20145_v42  ;;  %16916 = vmatprep.mubr.f32.mxu0 %v23138_v0  ;;  %v2612_v0 = vld [vmem:[#allocation7 + $0x3d0] sm:$0xff]  ;;  %v2580_v37 = vld [vmem:[#allocation3 + $0xb1] sm:$0xff] }
 0x27c   : > { %20150 = vmatprep.subr.bf16.mxu0 %v20149_v28 }
 0x27e   : > { %16917 = vmatmul.mubr.f32.gmra.mrb[2].mxu0 %v23142_v4  ;;  %v20165_v4 = vpack.c.bf16 %v2613_v38, %v2612_v0  ;;  %v2922_v38 = vld [vmem:[#allocation7 + $0x470] sm:$0xff] }
 0x27f   : > { %16919 = vmatprep.mubr.f32.mxu0 %v23144_v5  ;;  %20152 = vmatpush3.bf16.msra.mxu0 %v20149_v28  ;;  %v2614_v5 = vld [vmem:[#allocation7 + $0x3e0] sm:$0xff]  ;;  %v3440_v28 = vld [vmem:[#allocation7 + $0x550] sm:$0xff] }
 0x280   : > { %20154 = vmatprep.subr.bf16.mxu0 %v20153_v32  ;;  %v20229_v41 = vpack.c.bf16 %v3441_v30, %v3440_v28  ;;  %v2906_v28 = vld [vmem:[#allocation3 + $0x1a2] sm:$0xff]  ;;  %v3442_v30 = vld [vmem:[#allocation7 + $0x560] sm:$0xff] }
 0x282   : > { %16920 = vmatmul.mubr.f32.gmra.mrb[4].mxu0 %v23148_v9  ;;  %v20169_v9 = vpack.c.bf16 %v2615_v50, %v2614_v5  ;;  %v2582_v5 = vld [vmem:[#allocation3 + $0xc9] sm:$0xff]  ;;  %v2583_v50 = vld [vmem:[#allocation3 + $0xd9] sm:$0xff] }
 0x283   : > { %16922 = vmatprep.mubr.f32.mxu0 %v23150_v10  ;;  %20156 = vmatpush3.bf16.msra.mxu0 %v20153_v32  ;;  %v2616_v10 = vld [vmem:[#allocation7 + $0x3f0] sm:$0xff]  ;;  %v2579_v32 = vld [vmem:[#allocation3 + $0xa9] sm:$0xff] }
 0x284   : > { %20158 = vmatprep.subr.bf16.mxu0 %v20157_v36 }
 0x286   : > { %16923 = vmatmul.mubr.f32.gmra.mrb[6].mxu0 %v23154_v22  ;;  %v20173_v22 = vpack.c.bf16 %v2617_v49, %v2616_v10  ;;  %v2584_v10 = vld [vmem:[#allocation3 + $0xe1] sm:$0xff]  ;;  %v2585_v49 = vld [vmem:[#allocation3 + $0xf1] sm:$0xff] }
 0x287   : > { %16925 = vmatprep.mubr.f32.mxu0 %v23156_v23  ;;  %20160 = vmatpush3.bf16.msra.mxu0 %v20157_v36  ;;  %v2908_v23 = vld [vmem:[#allocation7 + $0x400] sm:$0xff] }
 0x288   : > { %20162 = vmatprep.subr.bf16.mxu0 %v20161_v63  ;;  %v2920_v36 = vld [vmem:[#allocation7 + $0x460] sm:$0xff] }
 0x289   : > { %v20201_v0 = vpack.c.bf16 %v2921_v59, %v2920_v36  ;;  %v3397_v59 = vld [vmem:[#allocation3 + $0x1] sm:$0xff] }
 0x28a   : > { %16926 = vmatmul.mubr.f32.gmra.mrb[8].mxu0 %v23160_v40  ;;  %v20177_v40 = vpack.c.bf16 %v2909_v54, %v2908_v23  ;;  %v2587_v23 = vld [vmem:[#allocation3 + $0x109] sm:$0xff]  ;;  %v2588_v54 = vld [vmem:[#allocation3 + $0x111] sm:$0xff]  ;;  %17153 = vmatprep.mubr.f32.mxu1 %v3397_v59 }
 0x28b   : > { %16928 = vmatprep.mubr.f32.mxu0 %v23162_v44  ;;  %20164 = vmatpush3.bf16.msra.mxu0 %v20161_v63  ;;  %v2293_v44 = vld [vmem:[#allocation3 + $0x198] sm:$0xff]  ;;  %v2581_v63 = vld [vmem:[#allocation3 + $0xc1] sm:$0xff] }
 0x28c   : > { %20166 = vmatprep.subr.bf16.mxu0 %v20165_v4 }
 0x28e   : > { %16929 = vmatmul.mubr.f32.gmra.mrb[10].mxu0 %v23166_v55  ;;  %v2294_v55 = vld [vmem:[#allocation3 + $0x1a0] sm:$0xff] }
 0x28f   : > { %16931 = vmatprep.mubr.f32.mxu0 %v23168_v56  ;;  %20168 = vmatpush3.bf16.msra.mxu0 %v20165_v4  ;;  %v2569_v56 = vld [vmem:[#allocation3 + $0x31] sm:$0xff]  ;;  %v2923_v4 = vld [vmem:[#allocation7 + $0x478] sm:$0xff] }
 0x290   : > { %20170 = vmatprep.subr.bf16.mxu0 %v20169_v9 }
 0x292   : > { %16932 = vmatmul.mubr.f32.gmra.mrb[12].mxu0 %v23172_v60  ;;  %v2910_v60 = vld [vmem:[#allocation7 + $0x410] sm:$0xff] }
 0x293   : > { %16934 = vmatprep.mubr.f32.mxu0 %v23174_v61  ;;  %20172 = vmatpush3.bf16.msra.mxu0 %v20169_v9  ;;  %v2911_v61 = vld [vmem:[#allocation7 + $0x418] sm:$0xff]  ;;  %v20205_v9 = vpack.c.bf16 %v2923_v4, %v2922_v38 }
 0x294   : > { %20174 = vmatprep.subr.bf16.mxu0 %v20173_v22  ;;  %v3384_v38 = vld [vmem:[#allocation7 + $0x498] sm:$0xff] }
 0x296   : > { %16935 = vmatmul.mubr.f32.gmra.mrb[14].mxu0 %v23178_v62  ;;  %v3430_v62 = vld [vmem:[#allocation7 + $0x500] sm:$0xff] }
 0x297   : > { %16937 = vmatprep.mubr.f32.mxu0 %v23180_v1  ;;  %20176 = vmatpush3.bf16.msra.mxu0 %v20173_v22  ;;  %v3431_v1 = vld [vmem:[#allocation7 + $0x508] sm:$0xff] }
 0x298   : > { %20178 = vmatprep.subr.bf16.mxu0 %v20177_v40  ;;  %v2586_v22 = vld [vmem:[#allocation3 + $0xf9] sm:$0xff] }
 0x29a   : > { %16938 = vmatmul.mubr.f32.gmra.mrb[16].mxu0 %v23184_v2  ;;  %v3432_v2 = vld [vmem:[#allocation7 + $0x510] sm:$0xff] }
 0x29b   : > { %16940 = vmatprep.mubr.f32.mxu0 %v23186_v3  ;;  %v2570_v3 = vld [vmem:[#allocation3 + $0x39] sm:$0xff] }
 0x29e   : > { %16941 = vmatmul.mubr.f32.gmra.mrb[18].mxu0 %v23190_v6  ;;  %v20209_v6 = vpack.c.bf16 %v3431_v1, %v3430_v62  ;;  %v2595_v62 = vld [vmem:[#allocation3 + $0x169] sm:$0xff]  ;;  %v2596_v1 = vld [vmem:[#allocation3 + $0x171] sm:$0xff] }
 0x29f   : > { %16943 = vmatprep.mubr.f32.mxu0 %v23192_v7  ;;  %v3433_v7 = vld [vmem:[#allocation7 + $0x518] sm:$0xff] }
 0x2a0   : > { %20210 = vmatprep.subr.bf16.mxu1 %v20209_v6 }
 0x2a1   : > { %20212 = vmatpush3.bf16.msra.mxu1 %v20209_v6  ;;  %v22449_v6 = vld [vmem:[#allocation3 + $0x189] sm:$0xff] }
 0x2a2   : > { %16944 = vmatmul.mubr.f32.gmra.mrb[20].mxu0 %v23196_v8  ;;  %v2571_v8 = vld [vmem:[#allocation3 + $0x49] sm:$0xff] }
 0x2a3   : > { %16946 = vmatprep.mubr.f32.mxu0 %v23198_v11  ;;  %v20181_v11 = vpack.c.bf16 %v2911_v61, %v2910_v60  ;;  %v2593_v60 = vld [vmem:[#allocation3 + $0x151] sm:$0xff]  ;;  %v2594_v61 = vld [vmem:[#allocation3 + $0x159] sm:$0xff] }
 0x2a6   : > { %16947 = vmatmul.mubr.f32.gmra.mrb[22].mxu0 %v23202_v12  ;;  %v2912_v12 = vld [vmem:[#allocation7 + $0x420] sm:$0xff] }
 0x2a7   : > { %16949 = vmatprep.mubr.f32.mxu0 %v23204_v18  ;;  %v20213_v18 = vpack.c.bf16 %v3433_v7, %v3432_v2  ;;  %v22448_v2 = vld [vmem:[#allocation3 + $0x181] sm:$0xff] }
 0x2a8   : > { %v2600_v7 = vld [vmem:[#allocation3 + $0x1a1] sm:$0xff] }
 0x2a9   : > { %20214 = vmatprep.subr.bf16.mxu1 %v20213_v18 }
 0x2aa   : > { %16950 = vmatmul.mubr.f32.gmra.mrb[24].mxu0 %v23216_v34  ;;  %v2913_v34 = vld [vmem:[#allocation7 + $0x428] sm:$0xff]  ;;  %20216 = vmatpush3.bf16.msra.mxu1 %v20213_v18 }
 0x2ab   : > { %16952 = vmatprep.mubr.f32.mxu0 %v23218_v45  ;;  %v3434_v45 = vld [vmem:[#allocation7 + $0x520] sm:$0xff]  ;;  %v20185_v47 = vpack.c.bf16 %v2913_v34, %v2912_v12  ;;  %v2879_v34 = vld [vmem:[#allocation3 + $0x62] sm:$0xff] }
 0x2ac   : > { %v2877_v12 = vld [vmem:[#allocation3 + $0x4a] sm:$0xff]  ;;  %v2878_v18 = vld [vmem:[#allocation3 + $0x52] sm:$0xff] }
 0x2ae   : > { %16953 = vmatmul.mubr.f32.gmra.mrb[26].mxu0 %v23222_v51  ;;  %v3435_v51 = vld [vmem:[#allocation7 + $0x528] sm:$0xff] }
 0x2af   : > { %16955 = vmatprep.mubr.f32.mxu0 %v23344_v52  ;;  %v2572_v52 = vld [vmem:[#allocation3 + $0x51] sm:$0xff]  ;;  %v20217_v42 = vpack.c.bf16 %v3435_v51, %v3434_v45  ;;  %v2881_v51 = vld [vmem:[#allocation3 + $0x7a] sm:$0xff] }
 0x2b0   : > { %v2880_v45 = vld [vmem:[#allocation3 + $0x6a] sm:$0xff] }
 0x2b1   : > { %20218 = vmatprep.subr.bf16.mxu1 %v20217_v42 }
 0x2b2   : > { %16956 = vmatmul.mubr.f32.gmra.mrb[28].mxu0 %v23348_v43  ;;  %v2573_v43 = vld [vmem:[#allocation3 + $0x61] sm:$0xff]  ;;  %20220 = vmatpush3.bf16.msra.mxu1 %v20217_v42  ;;  %v2886_v42 = vld [vmem:[#allocation3 + $0xb2] sm:$0xff] }
 0x2b3   : > { %16958 = vmatprep.mubr.f32.mxu0 %v2293_v44  ;;  %20222 = vmatprep.subr.bf16.mxu1 %v20221_v16  ;;  %v2590_v44 = vld [vmem:[#allocation3 + $0x129] sm:$0xff] }
 0x2b6   : > { %16959 = vmatmul.mubr.f32.gmra.mrb[30].mxu0 %v2294_v55  ;;  %20224 = vmatpush3.bf16.msra.mxu1 %v20221_v16  ;;  %v2591_v55 = vld [vmem:[#allocation3 + $0x139] sm:$0xff] }
 0x2b7   : > { %16993 = vmatprep.mubr.f32.mxu0 %v2569_v56  ;;  %20226 = vmatprep.subr.bf16.mxu1 %v20225_v25  ;;  %v2592_v56 = vld [vmem:[#allocation3 + $0x141] sm:$0xff]  ;;  %v2894_v16 = vld [vmem:[#allocation3 + $0x112] sm:$0xff] }
 0x2ba   : > { %16994 = vmatmul.mubr.f32.vlgmr.msra.gmra.mrb[0].mxu0 %v2570_v3  ;;  %20228 = vmatpush3.bf16.msra.mxu1 %v20225_v25  ;;  %v2599_v3 = vld [vmem:[#allocation3 + $0x199] sm:$0xff] }
 0x2bb   : > { %20180 = vmatpush3.bf16.msra.mxu0 %v20177_v40  ;;  %16996 = vmatprep.mubr.f32.mxu0 %v2571_v8  ;;  %v2589_v40 = vld [vmem:[#allocation3 + $0x121] sm:$0xff]  ;;  %v2875_v8 = vld [vmem:[#allocation3 + $0x32] sm:$0xff] }
 0x2bc   : > { %20182 = vmatprep.subr.bf16.mxu0 %v20181_v11  ;;  %20230 = vmatprep.subr.bf16.mxu1 %v20229_v41  ;;  %v2902_v25 = vld [vmem:[#allocation3 + $0x172] sm:$0xff] }
 0x2be   : > { %16997 = vmatmul.mubr.f32.gmra.mrb[2].mxu0 %v2572_v52  ;;  %20232 = vmatpush3.bf16.msra.mxu1 %v20229_v41  ;;  %v2882_v52 = vld [vmem:[#allocation3 + $0x82] sm:$0xff] }
 0x2bf   : > { %16999 = vmatprep.mubr.f32.mxu0 %v2573_v43  ;;  %20184 = vmatpush3.bf16.msra.mxu0 %v20181_v11  ;;  %v2876_v11 = vld [vmem:[#allocation3 + $0x3a] sm:$0xff]  ;;  %v2883_v43 = vld [vmem:[#allocation3 + $0x92] sm:$0xff]  ;;  %v3445_v41 = vld [vmem:[#allocation7 + $0x578] sm:$0xff] }
 0x2c0   : > { %20186 = vmatprep.subr.bf16.mxu0 %v20185_v47 }
 0x2c2   : > { %17000 = vmatmul.mubr.f32.gmra.mrb[4].mxu0 %v2574_v33  ;;  %v2890_v33 = vld [vmem:[#allocation3 + $0xe2] sm:$0xff] }
 0x2c3   : > { %17002 = vmatprep.mubr.f32.mxu0 %v2575_v14  ;;  %20188 = vmatpush3.bf16.msra.mxu0 %v20185_v47  ;;  %v2884_v47 = vld [vmem:[#allocation3 + $0x9a] sm:$0xff]  ;;  %v2891_v14 = vld [vmem:[#allocation3 + $0xf2] sm:$0xff] }
 0x2c4   : > { %20190 = vmatprep.subr.bf16.mxu0 %v20189_v15 }
 0x2c6   : > { %17003 = vmatmul.mubr.f32.gmra.mrb[6].mxu0 %v2576_v20  ;;  %v2898_v20 = vld [vmem:[#allocation3 + $0x142] sm:$0xff] }
 0x2c7   : > { %17005 = vmatprep.mubr.f32.mxu0 %v2577_v29  ;;  %20192 = vmatpush3.bf16.msra.mxu0 %v20189_v15  ;;  %v2892_v15 = vld [vmem:[#allocation3 + $0xfa] sm:$0xff]  ;;  %v2899_v29 = vld [vmem:[#allocation3 + $0x152] sm:$0xff] }
 0x2c8   : > { %20194 = vmatprep.subr.bf16.mxu0 %v20193_v21 }
 0x2ca   : > { %17006 = vmatmul.mubr.f32.gmra.mrb[8].mxu0 %v2578_v31  ;;  %v3443_v31 = vld [vmem:[#allocation7 + $0x568] sm:$0xff] }
 0x2cb   : > { %17008 = vmatprep.mubr.f32.mxu0 %v2579_v32  ;;  %20196 = vmatpush3.bf16.msra.mxu0 %v20193_v21  ;;  %v2900_v21 = vld [vmem:[#allocation3 + $0x15a] sm:$0xff]  ;;  %v20233_v32 = vpack.c.bf16 %v3443_v31, %v3442_v30 }
 0x2cc   : > { %20198 = vmatprep.subr.bf16.mxu0 %v20197_v35 }
 0x2cd   : > { %20234 = vmatprep.subr.bf16.mxu1 %v20233_v32 }
 0x2ce   : > { %17009 = vmatmul.mubr.f32.gmra.mrb[10].mxu0 %v2580_v37  ;;  %20236 = vmatpush3.bf16.msra.mxu1 %v20233_v32  ;;  %v3398_v37 = vld [vmem:[#allocation3 + $0x9] sm:$0xff] }
 0x2cf   : > { %17011 = vmatprep.mubr.f32.mxu0 %v2581_v63  ;;  %20200 = vmatpush3.bf16.msra.mxu0 %v20197_v35  ;;  %v3444_v35 = vld [vmem:[#allocation7 + $0x570] sm:$0xff]  ;;  %v3382_v63 = vld [vmem:[#allocation7 + $0x488] sm:$0xff] }
 0x2d0   : > { %20202 = vmatprep.subr.bf16.mxu0 %v20201_v0  ;;  %v20237_v36 = vpack.c.bf16 %v3445_v41, %v3444_v35 }
 0x2d2   : > { %17012 = vmatmul.mubr.f32.gmra.mrb[12].mxu0 %v2582_v5  ;;  %20238 = vmatprep.subr.bf16.mxu1 %v20237_v36  ;;  %v3385_v5 = vld [vmem:[#allocation7 + $0x4a0] sm:$0xff] }
 0x2d3   : > { %17014 = vmatprep.mubr.f32.mxu0 %v2583_v50  ;;  %20204 = vmatpush3.bf16.msra.mxu0 %v20201_v0  ;;  %v3383_v0 = vld [vmem:[#allocation7 + $0x490] sm:$0xff]  ;;  %v3386_v50 = vld [vmem:[#allocation7 + $0x4a8] sm:$0xff] }
 0x2d4   : > { %20206 = vmatprep.subr.bf16.mxu0 %v20205_v9  ;;  %20240 = vmatpush3.bf16.msra.mxu1 %v20237_v36  ;;  %v20245_v4 = vpack.c.bf16 %v3384_v38, %v3383_v0 }
 0x2d6   : > { %17015 = vmatmul.mubr.f32.gmra.mrb[14].mxu0 %v2584_v10  ;;  %v3387_v10 = vld [vmem:[#allocation7 + $0x4b0] sm:$0xff] }
 0x2d7   : > { %17017 = vmatprep.mubr.f32.mxu0 %v2585_v49  ;;  %20208 = vmatpush3.bf16.msra.mxu0 %v20205_v9  ;;  %v20249_v9 = vpack.c.bf16 %v3386_v50, %v3385_v5  ;;  %v3388_v49 = vld [vmem:[#allocation7 + $0x4b8] sm:$0xff] }
 0x2d8   : > { %17154 = vmatmul.mubr.f32.vlgmr.msra.gmra.mrb[0].mxu1 %v3398_v37 }
 0x2da   : > { %17018 = vmatmul.mubr.f32.gmra.mrb[16].mxu0 %v2586_v22  ;;  %v20253_v22 = vpack.c.bf16 %v3388_v49, %v3387_v10 }
 0x2db   : > { %17020 = vmatprep.mubr.f32.mxu0 %v2587_v23  ;;  %v3389_v23 = vld [vmem:[#allocation7 + $0x4c0] sm:$0xff] }
 0x2de   : > { %17021 = vmatmul.mubr.f32.gmra.mrb[18].mxu0 %v2588_v54  ;;  %v3390_v54 = vld [vmem:[#allocation7 + $0x4c8] sm:$0xff] }
 0x2df   : > { %17023 = vmatprep.mubr.f32.mxu0 %v2589_v40  ;;  %v20257_v40 = vpack.c.bf16 %v3390_v54, %v3389_v23 }
 0x2e2   : > { %17024 = vmatmul.mubr.f32.gmra.mrb[20].mxu0 %v2590_v44  ;;  %v3391_v44 = vld [vmem:[#allocation7 + $0x4d0] sm:$0xff] }
 0x2e3   : > { %17026 = vmatprep.mubr.f32.mxu0 %v2591_v55  ;;  %v3392_v55 = vld [vmem:[#allocation7 + $0x4d8] sm:$0xff] }
 0x2e6   : > { %17027 = vmatmul.mubr.f32.gmra.mrb[22].mxu0 %v2592_v56  ;;  %v20261_v56 = vpack.c.bf16 %v3392_v55, %v3391_v44 }
 0x2e7   : > { %17029 = vmatprep.mubr.f32.mxu0 %v2593_v60  ;;  %v3393_v60 = vld [vmem:[#allocation7 + $0x4e0] sm:$0xff] }
 0x2ea   : > { %17030 = vmatmul.mubr.f32.gmra.mrb[24].mxu0 %v2594_v61  ;;  %v3394_v61 = vld [vmem:[#allocation7 + $0x4e8] sm:$0xff] }
 0x2eb   : > { %17032 = vmatprep.mubr.f32.mxu0 %v2595_v62  ;;  %v20265_v62 = vpack.c.bf16 %v3394_v61, %v3393_v60 }
 0x2ee   : > { %17033 = vmatmul.mubr.f32.gmra.mrb[26].mxu0 %v2596_v1  ;;  %v3395_v1 = vld [vmem:[#allocation7 + $0x4f0] sm:$0xff] }
 0x2ef   : > { %17035 = vmatprep.mubr.f32.mxu0 %v22448_v2  ;;  %v3396_v2 = vld [vmem:[#allocation7 + $0x4f8] sm:$0xff] }
 0x2f2   : > { %17036 = vmatmul.mubr.f32.gmra.mrb[28].mxu0 %v22449_v6  ;;  %v3929_v6 = vld [vmem:[#allocation7 + $0x580] sm:$0xff] }
 0x2f3   : > { %17038 = vmatprep.mubr.f32.mxu0 %v2599_v3  ;;  %v20269_v3 = vpack.c.bf16 %v3396_v2, %v3395_v1 }
 0x2f6   : > { %17039 = vmatmul.mubr.f32.gmra.mrb[30].mxu0 %v2600_v7  ;;  %v3930_v7 = vld [vmem:[#allocation7 + $0x588] sm:$0xff] }
 0x2f7   : > { %17073 = vmatprep.mubr.f32.mxu0 %v2875_v8  ;;  %v23451_v8 = vpack.c.bf16 %v3930_v7, %v3929_v6 }
 0x2fa   : > { %17074 = vmatmul.mubr.f32.vlgmr.msra.gmra.mrb[0].mxu0 %v2876_v11  ;;  %v23454_v11 = vld [vmem:[#allocation9] ss:$0 sm:$0xff] }
 0x2fb   : > { %17076 = vmatprep.mubr.f32.mxu0 %v2877_v12 }
 0x2fe   : > { %17077 = vmatmul.mubr.f32.gmra.mrb[2].mxu0 %v2878_v18 }
 0x2ff   : > { %17079 = vmatprep.mubr.f32.mxu0 %v2879_v34 }
 0x302   : > { %17080 = vmatmul.mubr.f32.gmra.mrb[4].mxu0 %v2880_v45 }
 0x303   : > { %17082 = vmatprep.mubr.f32.mxu0 %v2881_v51 }
 0x306   : > { %17083 = vmatmul.mubr.f32.gmra.mrb[6].mxu0 %v2882_v52 }
 0x307   : > { %17085 = vmatprep.mubr.f32.mxu0 %v2883_v43 }
 0x30a   : > { %17086 = vmatmul.mubr.f32.gmra.mrb[8].mxu0 %v2884_v47 }
 0x30b   : > { %17088 = vmatprep.mubr.f32.mxu0 %v2885_v13 }
 0x30e   : > { %17089 = vmatmul.mubr.f32.gmra.mrb[10].mxu0 %v2886_v42 }
 0x30f   : > { %17091 = vmatprep.mubr.f32.mxu0 %v2887_v57 }
 0x312   : > { %17092 = vmatmul.mubr.f32.gmra.mrb[12].mxu0 %v2888_v53 }
 0x313   : > { %17094 = vmatprep.mubr.f32.mxu0 %v2889_v46 }
 0x316   : > { %17095 = vmatmul.mubr.f32.gmra.mrb[14].mxu0 %v2890_v33 }
 0x317   : > { %17097 = vmatprep.mubr.f32.mxu0 %v2891_v14 }
 0x31a   : > { %17098 = vmatmul.mubr.f32.gmra.mrb[16].mxu0 %v2892_v15 }
 0x31b   : > { %17100 = vmatprep.mubr.f32.mxu0 %v2893_v58 }
 0x31e   : > { %17101 = vmatmul.mubr.f32.gmra.mrb[18].mxu0 %v2894_v16 }
 0x31f   : > { %17103 = vmatprep.mubr.f32.mxu0 %v2895_v17 }
 0x322   : > { %17104 = vmatmul.mubr.f32.gmra.mrb[20].mxu0 %v2896_v48 }
 0x323   : > { %17106 = vmatprep.mubr.f32.mxu0 %v2897_v19 }
 0x326   : > { %17107 = vmatmul.mubr.f32.gmra.mrb[22].mxu0 %v2898_v20 }
 0x327   : > { %17109 = vmatprep.mubr.f32.mxu0 %v2899_v29 }
 0x32a   : > { %17110 = vmatmul.mubr.f32.gmra.mrb[24].mxu0 %v2900_v21 }
 0x32b   : > { %17112 = vmatprep.mubr.f32.mxu0 %v2901_v39 }
 0x32e   : > { %17113 = vmatmul.mubr.f32.gmra.mrb[26].mxu0 %v2902_v25 }
 0x32f   : > { %17115 = vmatprep.mubr.f32.mxu0 %v23412_v24  ;;  %v3381_v24 = vld [vmem:[#allocation7 + $0x480] sm:$0xff] }
 0x332   : > { %17116 = vmatmul.mubr.f32.gmra.mrb[28].mxu0 %v23416_v26  ;;  %v20241_v26 = vpack.c.bf16 %v3382_v63, %v3381_v24 }
 0x333   : > { %17118 = vmatprep.mubr.f32.mxu0 %v2905_v27 }
 0x334   : > { %20242 = vmatprep.subr.bf16.mxu1 %v20241_v26 }
 0x335   : > { %20244 = vmatpush3.bf16.msra.mxu1 %v20241_v26 }
 0x336   : > { %17119 = vmatmul.mubr.f32.gmra.mrb[30].mxu0 %v2906_v28  ;;  %20246 = vmatprep.subr.bf16.mxu1 %v20245_v4 }
 0x339   : > { %20248 = vmatpush3.bf16.msra.mxu1 %v20245_v4 }
 0x33a   : > { %20250 = vmatprep.subr.bf16.mxu1 %v20249_v9 }
 0x33d   : > { %20252 = vmatpush3.bf16.msra.mxu1 %v20249_v9 }
 0x33e   : > { %20254 = vmatprep.subr.bf16.mxu1 %v20253_v22 }
 0x341   : > { %20256 = vmatpush3.bf16.msra.mxu1 %v20253_v22 }
 0x342   : > { %20258 = vmatprep.subr.bf16.mxu1 %v20257_v40 }
 0x345   : > { %20260 = vmatpush3.bf16.msra.mxu1 %v20257_v40 }
 0x346   : > { %20262 = vmatprep.subr.bf16.mxu1 %v20261_v56 }
 0x349   : > { %20264 = vmatpush3.bf16.msra.mxu1 %v20261_v56 }
 0x34a   : > { %20266 = vmatprep.subr.bf16.mxu1 %v20265_v62 }
 0x34d   : > { %20268 = vmatpush3.bf16.msra.mxu1 %v20265_v62 }
 0x34e   : > { %20270 = vmatprep.subr.bf16.mxu1 %v20269_v3 }
 0x351   : > { %20272 = vmatpush3.bf16.msra.mxu1 %v20269_v3 }
 0x352   : > { %20274 = vmatprep.subr.bf16.mxu1 %v23451_v8 }
 0x3cd   : > { %v17075_v12 = vpop.f32.mrb[0].mxu0 }
 0x3ce   : > { %v3189_v18 = vadd.f32 %v17075_v12, %v23454_v11  ;;  %v2990_v34 = vpop.f32.mrb[1].mxu0 }
 0x3cf   : > { %v3188_v45 = vadd.f32 %v23454_v11, %v2990_v34 }
 0x3d0   : > { %v3221_v51 = vmax.f32 %v3189_v18, 0.0 }
 0x3d1   : > { %v3220_v52 = vmax.f32 %v3188_v45, 0.0  ;;  %v17078_v43 = vpop.f32.mrb[2].mxu0 }
 0x3d2   : > { %3317 = vst [vmem:[#allocation3 + $0x21] sm:$0xff] %v3221_v51  ;;  %v3191_v47 = vadd.f32 %v17078_v43, %v23454_v11  ;;  %v3000_v13 = vpop.f32.mrb[3].mxu0 }
 0x3d3   : > { %3316 = vst [vmem:[#allocation3 + $0x19] sm:$0xff] %v3220_v52  ;;  %v3190_v42 = vadd.f32 %v23454_v11, %v3000_v13  ;;  %17156 = vmatprep.mubr.f32.mxu1 %v3220_v52 }
 0x3d4   : > { %v3223_v57 = vmax.f32 %v3191_v47, 0.0  ;;  %17157 = vmatmul.mubr.f32.gmra.mrb[2].mxu1 %v3221_v51 }
 0x3d5   : > { %v3222_v53 = vmax.f32 %v3190_v42, 0.0  ;;  %v17081_v46 = vpop.f32.mrb[4].mxu0 }
 0x3d6   : > { %3319 = vst [vmem:[#allocation3 + $0x39] sm:$0xff] %v3223_v57  ;;  %v3193_v33 = vadd.f32 %v17081_v46, %v23454_v11  ;;  %v3010_v14 = vpop.f32.mrb[5].mxu0 }
 0x3d7   : > { %3318 = vst [vmem:[#allocation3 + $0x31] sm:$0xff] %v3222_v53  ;;  %v3192_v15 = vadd.f32 %v23454_v11, %v3010_v14  ;;  %17159 = vmatprep.mubr.f32.mxu1 %v3222_v53 }
 0x3d8   : > { %v3225_v58 = vmax.f32 %v3193_v33, 0.0  ;;  %17160 = vmatmul.mubr.f32.gmra.mrb[4].mxu1 %v3223_v57 }
 0x3d9   : > { %v3224_v16 = vmax.f32 %v3192_v15, 0.0  ;;  %v17084_v17 = vpop.f32.mrb[6].mxu0 }
 0x3da   : > { %3321 = vst [vmem:[#allocation3 + $0x51] sm:$0xff] %v3225_v58  ;;  %v3195_v48 = vadd.f32 %v17084_v17, %v23454_v11  ;;  %v3020_v19 = vpop.f32.mrb[7].mxu0 }
 0x3db   : > { %3320 = vst [vmem:[#allocation3 + $0x49] sm:$0xff] %v3224_v16  ;;  %v3194_v20 = vadd.f32 %v23454_v11, %v3020_v19  ;;  %17162 = vmatprep.mubr.f32.mxu1 %v3224_v16 }
 0x3dc   : > { %v3227_v29 = vmax.f32 %v3195_v48, 0.0  ;;  %17163 = vmatmul.mubr.f32.gmra.mrb[6].mxu1 %v3225_v58 }
 0x3dd   : > { %v3226_v21 = vmax.f32 %v3194_v20, 0.0  ;;  %v17087_v39 = vpop.f32.mrb[8].mxu0 }
 0x3de   : > { %3323 = vst [vmem:[#allocation3 + $0x69] sm:$0xff] %v3227_v29  ;;  %v3197_v25 = vadd.f32 %v17087_v39, %v23454_v11  ;;  %v3030_v27 = vpop.f32.mrb[9].mxu0 }
 0x3df   : > { %3322 = vst [vmem:[#allocation3 + $0x61] sm:$0xff] %v3226_v21  ;;  %v3196_v28 = vadd.f32 %v23454_v11, %v3030_v27  ;;  %17165 = vmatprep.mubr.f32.mxu1 %v3226_v21 }
 0x3e0   : > { %v3229_v30 = vmax.f32 %v3197_v25, 0.0  ;;  %17166 = vmatmul.mubr.f32.gmra.mrb[8].mxu1 %v3227_v29 }
 0x3e1   : > { %v3228_v31 = vmax.f32 %v3196_v28, 0.0  ;;  %v17090_v32 = vpop.f32.mrb[10].mxu0 }
 0x3e2   : > { %3325 = vst [vmem:[#allocation3 + $0x81] sm:$0xff] %v3229_v30  ;;  %v3199_v35 = vadd.f32 %v17090_v32, %v23454_v11  ;;  %v3040_v41 = vpop.f32.mrb[11].mxu0 }
 0x3e3   : > { %3324 = vst [vmem:[#allocation3 + $0x79] sm:$0xff] %v3228_v31  ;;  %v3198_v36 = vadd.f32 %v23454_v11, %v3040_v41  ;;  %17168 = vmatprep.mubr.f32.mxu1 %v3228_v31 }
 0x3e4   : > { %v3231_v59 = vmax.f32 %v3199_v35, 0.0  ;;  %17169 = vmatmul.mubr.f32.gmra.mrb[10].mxu1 %v3229_v30  ;;  %v3348_v35 = vld [vmem:[#allocation3] sm:$0xff] }
 0x3e5   : > { %v23468_v37 = vmax.f32 %v3198_v36, 0.0  ;;  %v17093_v24 = vpop.f32.mrb[12].mxu0  ;;  %v3931_v36 = vld [vmem:[#allocation7 + $0x590] sm:$0xff] }
 0x3e6   : > { %3327 = vst [vmem:[#allocation3 + $0x99] sm:$0xff] %v3231_v59  ;;  %v3201_v63 = vadd.f32 %v17093_v24, %v23454_v11  ;;  %v3050_v26 = vpop.f32.mrb[13].mxu0 }
 0x3e7   : > { %3326 = vst [vmem:[#allocation3 + $0x91] sm:$0xff] %v23468_v37  ;;  %v3200_v0 = vadd.f32 %v23454_v11, %v3050_v26  ;;  %17171 = vmatprep.mubr.f32.mxu1 %v23468_v37  ;;  %v3349_v26 = vld [vmem:[#allocation3 + $0x8] sm:$0xff] }
 0x3e8   : > { %v23474_v38 = vmax.f32 %v3201_v63, 0.0  ;;  %17172 = vmatmul.mubr.f32.gmra.mrb[12].mxu1 %v3231_v59  ;;  %v3932_v59 = vld [vmem:[#allocation7 + $0x598] sm:$0xff] }
 0x3e9   : > { %v23476_v4 = vmax.f32 %v3200_v0, 0.0  ;;  %v17096_v5 = vpop.f32.mrb[14].mxu0  ;;  %v20277_v0 = vpack.c.bf16 %v3932_v59, %v3931_v36 }
 0x3ea   : > { %3329 = vst [vmem:[#allocation3 + $0xb1] sm:$0xff] %v23474_v38  ;;  %v3203_v50 = vadd.f32 %v17096_v5, %v23454_v11  ;;  %v3060_v9 = vpop.f32.mrb[15].mxu0  ;;  %v3934_v5 = vld [vmem:[#allocation7 + $0x5a8] sm:$0xff] }
 0x3eb   : > { %3328 = vst [vmem:[#allocation3 + $0xa9] sm:$0xff] %v23476_v4  ;;  %v3202_v10 = vadd.f32 %v23454_v11, %v3060_v9  ;;  %17174 = vmatprep.mubr.f32.mxu1 %v23476_v4 }
 0x3ec   : > { %v23483_v49 = vmax.f32 %v3203_v50, 0.0  ;;  %17175 = vmatmul.mubr.f32.gmra.mrb[14].mxu1 %v23474_v38  ;;  %v23574_v50 = vld [vmem:[#allocation3 + $0x18] sm:$0xff] }
 0x3ed   : > { %v23486_v22 = vmax.f32 %v3202_v10, 0.0  ;;  %v17099_v23 = vpop.f32.mrb[16].mxu0  ;;  %v23578_v10 = vld [vmem:[#allocation3 + $0x20] sm:$0xff] }
 0x3ee   : > { %3331 = vst [vmem:[#allocation3 + $0xc9] sm:$0xff] %v23483_v49  ;;  %v3205_v54 = vadd.f32 %v17099_v23, %v23454_v11  ;;  %v3070_v40 = vpop.f32.mrb[17].mxu0  ;;  %v3935_v23 = vld [vmem:[#allocation7 + $0x5b0] sm:$0xff] }
 0x3ef   : > { %3330 = vst [vmem:[#allocation3 + $0xc1] sm:$0xff] %v23486_v22  ;;  %v3204_v44 = vadd.f32 %v23454_v11, %v3070_v40  ;;  %17177 = vmatprep.mubr.f32.mxu1 %v23486_v22  ;;  %v23581_v40 = vld [vmem:[#allocation3 + $0x30] sm:$0xff] }
 0x3f0   : > { %v23493_v55 = vmax.f32 %v3205_v54, 0.0  ;;  %17178 = vmatmul.mubr.f32.gmra.mrb[16].mxu1 %v23483_v49  ;;  %v3936_v54 = vld [vmem:[#allocation7 + $0x5b8] sm:$0xff] }
 0x3f1   : > { %v23496_v56 = vmax.f32 %v3204_v44, 0.0  ;;  %v17102_v60 = vpop.f32.mrb[18].mxu0  ;;  %v20285_v44 = vpack.c.bf16 %v3936_v54, %v3935_v23 }
 0x3f2   : > { %3333 = vst [vmem:[#allocation3 + $0xe1] sm:$0xff] %v23493_v55  ;;  %v3207_v61 = vadd.f32 %v17102_v60, %v23454_v11  ;;  %v3080_v62 = vpop.f32.mrb[19].mxu0  ;;  %v23584_v60 = vld [vmem:[#allocation3 + $0x38] sm:$0xff] }
 0x3f3   : > { %3332 = vst [vmem:[#allocation3 + $0xd9] sm:$0xff] %v23496_v56  ;;  %v3206_v1 = vadd.f32 %v23454_v11, %v3080_v62  ;;  %17180 = vmatprep.mubr.f32.mxu1 %v23496_v56  ;;  %v3938_v62 = vld [vmem:[#allocation7 + $0x5c8] sm:$0xff] }
 0x3f4   : > { %v23503_v2 = vmax.f32 %v3207_v61, 0.0  ;;  %17181 = vmatmul.mubr.f32.gmra.mrb[18].mxu1 %v23493_v55  ;;  %v3937_v61 = vld [vmem:[#allocation7 + $0x5c0] sm:$0xff] }
 0x3f5   : > { %v23506_v3 = vmax.f32 %v3206_v1, 0.0  ;;  %v17105_v6 = vpop.f32.mrb[20].mxu0  ;;  %v20289_v1 = vpack.c.bf16 %v3938_v62, %v3937_v61 }
 0x3f6   : > { %3335 = vst [vmem:[#allocation3 + $0xf9] sm:$0xff] %v23503_v2  ;;  %v3209_v7 = vadd.f32 %v17105_v6, %v23454_v11  ;;  %v3090_v12 = vpop.f32.mrb[21].mxu0  ;;  %v23590_v6 = vld [vmem:[#allocation3 + $0x50] sm:$0xff] }
 0x3f7   : > { %3334 = vst [vmem:[#allocation3 + $0xf1] sm:$0xff] %v23506_v3  ;;  %v3208_v18 = vadd.f32 %v23454_v11, %v3090_v12  ;;  %17183 = vmatprep.mubr.f32.mxu1 %v23506_v3  ;;  %v3940_v12 = vld [vmem:[#allocation7 + $0x5d8] sm:$0xff] }
 0x3f8   : > { %v23513_v34 = vmax.f32 %v3209_v7, 0.0  ;;  %17184 = vmatmul.mubr.f32.gmra.mrb[20].mxu1 %v23503_v2  ;;  %v3939_v7 = vld [vmem:[#allocation7 + $0x5d0] sm:$0xff] }
 0x3f9   : > { %v23516_v45 = vmax.f32 %v3208_v18, 0.0  ;;  %v17108_v51 = vpop.f32.mrb[22].mxu0  ;;  %v23593_v18 = vld [vmem:[#allocation3 + $0x60] sm:$0xff] }
 0x3fa   : > { %3337 = vst [vmem:[#allocation3 + $0x111] sm:$0xff] %v23513_v34  ;;  %v3211_v52 = vadd.f32 %v17108_v51, %v23454_v11  ;;  %v3100_v43 = vpop.f32.mrb[23].mxu0  ;;  %v20293_v51 = vpack.c.bf16 %v3940_v12, %v3939_v7  ;;  %v23623_v36 = vld [vmem:[#allocation3 + $0xd8] sm:$0xff]  ;;  %v23626_v59 = vld [vmem:[#allocation3 + $0xe0] sm:$0xff] }
 0x3fb   : > { %3336 = vst [vmem:[#allocation3 + $0x109] sm:$0xff] %v23516_v45  ;;  %v3210_v47 = vadd.f32 %v23454_v11, %v3100_v43  ;;  %17186 = vmatprep.mubr.f32.mxu1 %v23516_v45  ;;  %v3941_v43 = vld [vmem:[#allocation7 + $0x5e0] sm:$0xff]  ;;  %v3896_v7 = vld [vmem:[#allocation3 + $0x2] sm:$0xff] }
 0x3fc   : > { %v23523_v13 = vmax.f32 %v3211_v52, 0.0  ;;  %17187 = vmatmul.mubr.f32.gmra.mrb[22].mxu1 %v23513_v34  ;;  %v23596_v52 = vld [vmem:[#allocation3 + $0x68] sm:$0xff] }
 0x3fd   : > { %v23526_v42 = vmax.f32 %v3210_v47, 0.0  ;;  %v17111_v57 = vpop.f32.mrb[24].mxu0  ;;  %v3942_v47 = vld [vmem:[#allocation7 + $0x5e8] sm:$0xff] }
 0x3fe   : > { %3339 = vst [vmem:[#allocation3 + $0x129] sm:$0xff] %v23523_v13  ;;  %v3213_v53 = vadd.f32 %v17111_v57, %v23454_v11  ;;  %v3110_v46 = vpop.f32.mrb[25].mxu0  ;;  %v23599_v57 = vld [vmem:[#allocation3 + $0x78] sm:$0xff] }
 0x3ff   : > { %3338 = vst [vmem:[#allocation3 + $0x121] sm:$0xff] %v23526_v42  ;;  %v3212_v33 = vadd.f32 %v23454_v11, %v3110_v46  ;;  %17189 = vmatprep.mubr.f32.mxu1 %v23526_v42  ;;  %v23602_v46 = vld [vmem:[#allocation3 + $0x80] sm:$0xff] }
 0x400   : > { %v23533_v14 = vmax.f32 %v3213_v53, 0.0  ;;  %17190 = vmatmul.mubr.f32.gmra.mrb[24].mxu1 %v23523_v13  ;;  %v20297_v53 = vpack.c.bf16 %v3942_v47, %v3941_v43  ;;  %v4238_v43 = vld [vmem:[#allocation7 + $0x618] sm:$0xff] }
 0x401   : > { %v23536_v15 = vmax.f32 %v3212_v33, 0.0  ;;  %v17114_v58 = vpop.f32.mrb[26].mxu0  ;;  %v3943_v33 = vld [vmem:[#allocation7 + $0x5f0] sm:$0xff]  ;;  %v3897_v47 = vld [vmem:[#allocation3 + $0xa] sm:$0xff] }
 0x402   : > { %3341 = vst [vmem:[#allocation3 + $0x141] sm:$0xff] %v23533_v14  ;;  %v3215_v16 = vadd.f32 %v17114_v58, %v23454_v11  ;;  %v3120_v17 = vpop.f32.mrb[27].mxu0  ;;  %v3944_v58 = vld [vmem:[#allocation7 + $0x5f8] sm:$0xff] }
 0x403   : > { %3340 = vst [vmem:[#allocation3 + $0x139] sm:$0xff] %v23536_v15  ;;  %v3214_v48 = vadd.f32 %v23454_v11, %v3120_v17  ;;  %17192 = vmatprep.mubr.f32.mxu1 %v23536_v15  ;;  %v20301_v17 = vpack.c.bf16 %v3944_v58, %v3943_v33  ;;  %v4239_v33 = vld [vmem:[#allocation7 + $0x620] sm:$0xff]  ;;  %v4240_v58 = vld [vmem:[#allocation7 + $0x628] sm:$0xff] }
 0x404   : > { %v23543_v19 = vmax.f32 %v3215_v16, 0.0  ;;  %17193 = vmatmul.mubr.f32.gmra.mrb[26].mxu1 %v23533_v14  ;;  %v23605_v16 = vld [vmem:[#allocation3 + $0x90] sm:$0xff] }
 0x405   : > { %v23546_v20 = vmax.f32 %v3214_v48, 0.0  ;;  %v17117_v29 = vpop.f32.mrb[28].mxu0  ;;  %v23608_v48 = vld [vmem:[#allocation3 + $0x98] sm:$0xff] }
 0x406   : > { %3343 = vst [vmem:[#allocation3 + $0x159] sm:$0xff] %v23543_v19  ;;  %v3217_v21 = vadd.f32 %v17117_v29, %v23454_v11  ;;  %v3130_v39 = vpop.f32.mrb[29].mxu0  ;;  %v4235_v29 = vld [vmem:[#allocation7 + $0x600] sm:$0xff]  ;;  %v23644_v23 = vld [vmem:[#allocation3 + $0x128] sm:$0xff] }
 0x407   : > { %3342 = vst [vmem:[#allocation3 + $0x151] sm:$0xff] %v23546_v20  ;;  %v3216_v25 = vadd.f32 %v23454_v11, %v3130_v39  ;;  %17195 = vmatprep.mubr.f32.mxu1 %v23546_v20  ;;  %v23611_v39 = vld [vmem:[#allocation3 + $0xa8] sm:$0xff] }
 0x408   : > { %v23553_v27 = vmax.f32 %v3217_v21, 0.0  ;;  %17196 = vmatmul.mubr.f32.gmra.mrb[28].mxu1 %v23543_v19  ;;  %v4236_v21 = vld [vmem:[#allocation7 + $0x608] sm:$0xff] }
 0x409   : > { %v23556_v28 = vmax.f32 %v3216_v25, 0.0  ;;  %v17120_v30 = vpop.f32.mrb[30].mxu0  ;;  %v20305_v25 = vpack.c.bf16 %v4236_v21, %v4235_v29  ;;  %v20313_v29 = vpack.c.bf16 %v4240_v58, %v4239_v33  ;;  %v23668_v21 = vld [vmem:[#allocation3 + $0x22] sm:$0xff]  ;;  %v23680_v58 = vld [vmem:[#allocation3 + $0x52] sm:$0xff] }
 0x40a   : > { %3345 = vst [vmem:[#allocation3 + $0x171] sm:$0xff] %v23553_v27  ;;  %v23560_v31 = vadd.f32 %v17120_v30, %v23454_v11  ;;  %v3140_v32 = vpop.f32.mrb[31].mxu0  ;;  %v23614_v30 = vld [vmem:[#allocation3 + $0xb0] sm:$0xff]  ;;  %v23647_v54 = vld [vmem:[#allocation3 + $0x138] sm:$0xff]  ;;  %26002 = vst [vmem:[#allocation22_spill] sm:$0xff] %v23668_v21 }
 0x40b   : > { %3344 = vst [vmem:[#allocation3 + $0x169] sm:$0xff] %v23556_v28  ;;  %v23564_v41 = vadd.f32 %v23454_v11, %v3140_v32  ;;  %17198 = vmatprep.mubr.f32.mxu1 %v23556_v28  ;;  %v3933_v11 = vld [vmem:[#allocation7 + $0x5a0] sm:$0xff]  ;;  %v23617_v32 = vld [vmem:[#allocation3 + $0xc0] sm:$0xff]  ;;  %26006 = vst [vmem:[#allocation26_spill] sm:$0xff] %v23680_v58 }
 0x40c   : > { %25999 = vst [vmem:[#allocation19_spill] sm:$0xff] %v23560_v31  ;;  %v25791_v24 = vmax.f32 %v23560_v31, 0.0  ;;  %17199 = vmatmul.mubr.f32.gmra.mrb[30].mxu1 %v23553_v27  ;;  %v20281_v9 = vpack.c.bf16 %v3934_v5, %v3933_v11  ;;  %v23635_v11 = vld [vmem:[#allocation3 + $0x108] sm:$0xff]  ;;  %v23638_v5 = vld [vmem:[#allocation3 + $0x110] sm:$0xff] }
 0x40d   : > { %v25792_v63 = vmax.f32 %v23564_v41, 0.0  ;;  %17233 = vmatprep.mubr.f32.mxu1 %v3348_v35  ;;  %v23620_v35 = vld [vmem:[#allocation3 + $0xc8] sm:$0xff]  ;;  %v23671_v31 = vld [vmem:[#allocation3 + $0x32] sm:$0xff] }
 0x40e   : > { %3347 = vst [vmem:[#allocation3 + $0x189] sm:$0xff] %v25791_v24  ;;  %v23653_v61 = vld [vmem:[#allocation3 + $0x150] sm:$0xff]  ;;  %v23656_v62 = vld [vmem:[#allocation3 + $0x158] sm:$0xff]  ;;  %v4241_v24 = vld [vmem:[#allocation7 + $0x630] sm:$0xff] }
 0x40f   : > { %3346 = vst [vmem:[#allocation3 + $0x181] sm:$0xff] %v25792_v63  ;;  %v4242_v63 = vld [vmem:[#allocation7 + $0x638] sm:$0xff]  ;;  %26003 = vst [vmem:[#allocation23_spill] sm:$0xff] %v23671_v31 }
 0x410   : > { %17234 = vmatmul.mubr.f32.vlgmr.msra.gmra.mrb[0].mxu1 %v3349_v26  ;;  %v23629_v26 = vld [vmem:[#allocation3 + $0xf0] sm:$0xff] }
 0x411   : > { %17236 = vmatprep.mubr.f32.mxu1 %v23574_v50  ;;  %20276 = vmatpush3.bf16.msra.mxu1 %v23451_v8  ;;  %v23587_v8 = vld [vmem:[#allocation3 + $0x48] sm:$0xff] }
 0x412   : > { %20278 = vmatprep.subr.bf16.mxu1 %v20277_v0  ;;  %v23662_v12 = vld [vmem:[#allocation3 + $0x170] sm:$0xff] }
 0x413   : > { %26001 = vst [vmem:[#allocation21_spill] sm:$0xff] %v23662_v12 }
 0x414   : > { %17237 = vmatmul.mubr.f32.gmra.mrb[2].mxu1 %v23578_v10 }
 0x415   : > { %17239 = vmatprep.mubr.f32.mxu1 %v23581_v40  ;;  %20280 = vmatpush3.bf16.msra.mxu1 %v20277_v0  ;;  %v23632_v0 = vld [vmem:[#allocation3 + $0xf8] sm:$0xff] }
 0x416   : > { %20282 = vmatprep.subr.bf16.mxu1 %v20281_v9 }
 0x418   : > { %17240 = vmatmul.mubr.f32.gmra.mrb[4].mxu1 %v23584_v60 }
 0x419   : > { %17242 = vmatprep.mubr.f32.mxu1 %v23587_v8  ;;  %20284 = vmatpush3.bf16.msra.mxu1 %v20281_v9  ;;  %v23641_v9 = vld [vmem:[#allocation3 + $0x120] sm:$0xff] }
 0x41a   : > { %20286 = vmatprep.subr.bf16.mxu1 %v20285_v44 }
 0x41c   : > { %17243 = vmatmul.mubr.f32.gmra.mrb[6].mxu1 %v23590_v6 }
 0x41d   : > { %17245 = vmatprep.mubr.f32.mxu1 %v23593_v18  ;;  %20288 = vmatpush3.bf16.msra.mxu1 %v20285_v44  ;;  %v23650_v44 = vld [vmem:[#allocation3 + $0x140] sm:$0xff] }
 0x41e   : > { %20290 = vmatprep.subr.bf16.mxu1 %v20289_v1 }
 0x420   : > { %17246 = vmatmul.mubr.f32.gmra.mrb[8].mxu1 %v23596_v52 }
 0x421   : > { %17248 = vmatprep.mubr.f32.mxu1 %v23599_v57  ;;  %20292 = vmatpush3.bf16.msra.mxu1 %v20289_v1  ;;  %v23659_v1 = vld [vmem:[#allocation3 + $0x168] sm:$0xff] }
 0x422   : > { %20294 = vmatprep.subr.bf16.mxu1 %v20293_v51  ;;  %26000 = vst [vmem:[#allocation20_spill] sm:$0xff] %v23659_v1 }
 0x424   : > { %17249 = vmatmul.mubr.f32.gmra.mrb[10].mxu1 %v23602_v46 }
 0x425   : > { %17251 = vmatprep.mubr.f32.mxu1 %v23605_v16  ;;  %20296 = vmatpush3.bf16.msra.mxu1 %v20293_v51  ;;  %v4237_v51 = vld [vmem:[#allocation7 + $0x610] sm:$0xff] }
 0x426   : > { %20298 = vmatprep.subr.bf16.mxu1 %v20297_v53 }
 0x428   : > { %17252 = vmatmul.mubr.f32.gmra.mrb[12].mxu1 %v23608_v48 }
 0x429   : > { %17254 = vmatprep.mubr.f32.mxu1 %v23611_v39  ;;  %20300 = vmatpush3.bf16.msra.mxu1 %v20297_v53  ;;  %v20309_v53 = vpack.c.bf16 %v4238_v43, %v4237_v51  ;;  %v23674_v51 = vld [vmem:[#allocation3 + $0x3a] sm:$0xff]  ;;  %v4243_v43 = vld [vmem:[#allocation7 + $0x640] sm:$0xff] }
 0x42a   : > { %20302 = vmatprep.subr.bf16.mxu1 %v20301_v17  ;;  %26004 = vst [vmem:[#allocation24_spill] sm:$0xff] %v23674_v51 }
 0x42c   : > { %17255 = vmatmul.mubr.f32.gmra.mrb[14].mxu1 %v23614_v30 }
 0x42d   : > { %17257 = vmatprep.mubr.f32.mxu1 %v23617_v32  ;;  %20304 = vmatpush3.bf16.msra.mxu1 %v20301_v17  ;;  %v23665_v17 = vld [vmem:[#allocation3 + $0x1a] sm:$0xff] }
 0x42e   : > { %20306 = vmatprep.subr.bf16.mxu1 %v20305_v25 }
 0x430   : > { %17258 = vmatmul.mubr.f32.gmra.mrb[16].mxu1 %v23620_v35 }
 0x431   : > { %17260 = vmatprep.mubr.f32.mxu1 %v23623_v36 }
 0x434   : > { %17261 = vmatmul.mubr.f32.gmra.mrb[18].mxu1 %v23626_v59 }
 0x435   : > { %17263 = vmatprep.mubr.f32.mxu1 %v23629_v26 }
 0x438   : > { %17264 = vmatmul.mubr.f32.gmra.mrb[20].mxu1 %v23632_v0 }
 0x439   : > { %17266 = vmatprep.mubr.f32.mxu1 %v23635_v11 }
 0x43c   : > { %17267 = vmatmul.mubr.f32.gmra.mrb[22].mxu1 %v23638_v5 }
 0x43d   : > { %17269 = vmatprep.mubr.f32.mxu1 %v23641_v9 }
 0x440   : > { %17270 = vmatmul.mubr.f32.gmra.mrb[24].mxu1 %v23644_v23 }
 0x441   : > { %17272 = vmatprep.mubr.f32.mxu1 %v23647_v54 }
 0x444   : > { %17273 = vmatmul.mubr.f32.gmra.mrb[26].mxu1 %v23650_v44 }
 0x445   : > { %17275 = vmatprep.mubr.f32.mxu1 %v23653_v61 }
 0x448   : > { %17276 = vmatmul.mubr.f32.gmra.mrb[28].mxu1 %v23656_v62 }
 0x449   : > { %17278 = vmatprep.mubr.f32.mxu1 %v23659_v1 }
 0x44c   : > { %17279 = vmatmul.mubr.f32.gmra.mrb[30].mxu1 %v23662_v12 }
 0x44d   : > { %17313 = vmatprep.mubr.f32.mxu1 %v3896_v7  ;;  %v20317_v7 = vpack.c.bf16 %v4242_v63, %v4241_v24  ;;  %v23683_v24 = vld [vmem:[#allocation3 + $0x62] sm:$0xff] }
 0x44e   : > { %26007 = vst [vmem:[#allocation27_spill] sm:$0xff] %v23683_v24 }
 0x450   : > { %17314 = vmatmul.mubr.f32.vlgmr.msra.gmra.mrb[0].mxu1 %v3897_v47  ;;  %v4244_v47 = vld [vmem:[#allocation7 + $0x648] sm:$0xff] }
 0x451   : > { %17316 = vmatprep.mubr.f32.mxu1 %v23665_v17  ;;  %20308 = vmatpush3.bf16.msra.mxu1 %v20305_v25  ;;  %v23677_v25 = vld [vmem:[#allocation3 + $0x4a] sm:$0xff]  ;;  %v20321_v33 = vpack.c.bf16 %v4244_v47, %v4243_v43  ;;  %v23692_v47 = vld [vmem:[#allocation3 + $0x82] sm:$0xff] }
 0x452   : > { %20310 = vmatprep.subr.bf16.mxu1 %v20309_v53  ;;  %26005 = vst [vmem:[#allocation25_spill] sm:$0xff] %v23677_v25 }
 0x454   : > { %17317 = vmatmul.mubr.f32.gmra.mrb[2].mxu1 %v23668_v21  ;;  %v4245_v21 = vld [vmem:[#allocation7 + $0x650] sm:$0xff] }
 0x455   : > { %17319 = vmatprep.mubr.f32.mxu1 %v23671_v31  ;;  %20312 = vmatpush3.bf16.msra.mxu1 %v20309_v53  ;;  %v4246_v31 = vld [vmem:[#allocation7 + $0x658] sm:$0xff] }
 0x456   : > { %20314 = vmatprep.subr.bf16.mxu1 %v20313_v29  ;;  %v20325_v63 = vpack.c.bf16 %v4246_v31, %v4245_v21  ;;  %v23686_v53 = vld [vmem:[#allocation3 + $0x6a] sm:$0xff]  ;;  %v23695_v31 = vld [vmem:[#allocation3 + $0x92] sm:$0xff] }
 0x457   : > { %26008 = vst [vmem:[#allocation28_spill] sm:$0xff] %v23686_v53 }
 0x458   : > { %17320 = vmatmul.mubr.f32.gmra.mrb[4].mxu1 %v23674_v51  ;;  %v4247_v51 = vld [vmem:[#allocation7 + $0x660] sm:$0xff] }
 0x459   : > { %17322 = vmatprep.mubr.f32.mxu1 %v23677_v25  ;;  %20316 = vmatpush3.bf16.msra.mxu1 %v20313_v29  ;;  %v4248_v25 = vld [vmem:[#allocation7 + $0x668] sm:$0xff] }
 0x45a   : > { %20318 = vmatprep.subr.bf16.mxu1 %v20317_v7  ;;  %v23689_v29 = vld [vmem:[#allocation3 + $0x7a] sm:$0xff]  ;;  %v20329_v43 = vpack.c.bf16 %v4248_v25, %v4247_v51  ;;  %v23701_v51 = vld [vmem:[#allocation3 + $0xaa] sm:$0xff] }
 0x45b   : > { %26009 = vst [vmem:[#allocation29_spill] sm:$0xff] %v23689_v29  ;;  %26010 = vst [vmem:[#allocation30_spill] sm:$0xff] %v23701_v51 }
 0x45c   : > { %17323 = vmatmul.mubr.f32.gmra.mrb[6].mxu1 %v23680_v58  ;;  %v4249_v58 = vld [vmem:[#allocation7 + $0x670] sm:$0xff] }
 0x45d   : > { %17325 = vmatprep.mubr.f32.mxu1 %v23683_v24  ;;  %20320 = vmatpush3.bf16.msra.mxu1 %v20317_v7  ;;  %v4250_v24 = vld [vmem:[#allocation7 + $0x678] sm:$0xff]  ;;  %v23698_v7 = vld [vmem:[#allocation3 + $0x9a] sm:$0xff] }
 0x45e   : > { %20322 = vmatprep.subr.bf16.mxu1 %v20321_v33  ;;  %v20333_v21 = vpack.c.bf16 %v4250_v24, %v4249_v58  ;;  %v23710_v58 = vld [vmem:[#allocation3 + $0xca] sm:$0xff]  ;;  %v23713_v24 = vld [vmem:[#allocation3 + $0xda] sm:$0xff] }
 0x45f   : > { %26013 = vst [vmem:[#allocation33_spill] sm:$0xff] %v23710_v58  ;;  %26014 = vst [vmem:[#allocation34_spill] sm:$0xff] %v23713_v24 }
 0x460   : > { %17326 = vmatmul.mubr.f32.gmra.mrb[8].mxu1 %v23686_v53  ;;  %v4541_v53 = vld [vmem:[#allocation7 + $0x680] sm:$0xff] }
 0x461   : > { %17328 = vmatprep.mubr.f32.mxu1 %v23689_v29  ;;  %20324 = vmatpush3.bf16.msra.mxu1 %v20321_v33  ;;  %v4542_v29 = vld [vmem:[#allocation7 + $0x688] sm:$0xff] }
 0x462   : > { %20326 = vmatprep.subr.bf16.mxu1 %v20325_v63  ;;  %v20337_v25 = vpack.c.bf16 %v4542_v29, %v4541_v53  ;;  %v23704_v33 = vld [vmem:[#allocation3 + $0xb2] sm:$0xff]  ;;  %v23722_v29 = vld [vmem:[#allocation3 + $0xfa] sm:$0xff] }
 0x463   : > { %26011 = vst [vmem:[#allocation31_spill] sm:$0xff] %v23704_v33  ;;  %v23719_v53 = vld [vmem:[#allocation3 + $0xf2] sm:$0xff]  ;;  %26017 = vst [vmem:[#allocation37_spill] sm:$0xff] %v23722_v29 }
 0x464   : > { %17329 = vmatmul.mubr.f32.gmra.mrb[10].mxu1 %v23692_v47  ;;  %26016 = vst [vmem:[#allocation36_spill] sm:$0xff] %v23719_v53 }
 0x465   : > { %17331 = vmatprep.mubr.f32.mxu1 %v23695_v31  ;;  %20328 = vmatpush3.bf16.msra.mxu1 %v20325_v63  ;;  %v23707_v63 = vld [vmem:[#allocation3 + $0xc2] sm:$0xff] }
 0x466   : > { %20330 = vmatprep.subr.bf16.mxu1 %v20329_v43  ;;  %26012 = vst [vmem:[#allocation32_spill] sm:$0xff] %v23707_v63 }
 0x468   : > { %17332 = vmatmul.mubr.f32.gmra.mrb[12].mxu1 %v23698_v7 }
 0x469   : > { %17334 = vmatprep.mubr.f32.mxu1 %v23701_v51  ;;  %20332 = vmatpush3.bf16.msra.mxu1 %v20329_v43  ;;  %v23716_v43 = vld [vmem:[#allocation3 + $0xe2] sm:$0xff]  ;;  %v4546_v51 = vld [vmem:[#allocation7 + $0x6a8] sm:$0xff] }
 0x46a   : > { %20334 = vmatprep.subr.bf16.mxu1 %v20333_v21  ;;  %26015 = vst [vmem:[#allocation35_spill] sm:$0xff] %v23716_v43 }
 0x46c   : > { %17335 = vmatmul.mubr.f32.gmra.mrb[14].mxu1 %v23704_v33  ;;  %v4545_v33 = vld [vmem:[#allocation7 + $0x6a0] sm:$0xff] }
 0x46d   : > { %17337 = vmatprep.mubr.f32.mxu1 %v23707_v63  ;;  %20336 = vmatpush3.bf16.msra.mxu1 %v20333_v21  ;;  %v23725_v21 = vld [vmem:[#allocation3 + $0x10a] sm:$0xff]  ;;  %v4543_v63 = vld [vmem:[#allocation7 + $0x690] sm:$0xff] }
 0x46e   : > { %20338 = vmatprep.subr.bf16.mxu1 %v20337_v25  ;;  %26018 = vst [vmem:[#allocation38_spill] sm:$0xff] %v23725_v21 }
 0x470   : > { %17338 = vmatmul.mubr.f32.gmra.mrb[16].mxu1 %v23710_v58  ;;  %v23728_v58 = vld [vmem:[#allocation3 + $0x112] sm:$0xff] }
 0x471   : > { %17340 = vmatprep.mubr.f32.mxu1 %v23713_v24  ;;  %26019 = vst [vmem:[#allocation39_spill] sm:$0xff] %v23728_v58  ;;  %v23731_v24 = vld [vmem:[#allocation3 + $0x122] sm:$0xff] }
 0x472   : > { %26020 = vst [vmem:[#allocation40_spill] sm:$0xff] %v23731_v24 }
 0x474   : > { %17341 = vmatmul.mubr.f32.gmra.mrb[18].mxu1 %v23716_v43  ;;  %v23734_v43 = vld [vmem:[#allocation3 + $0x12a] sm:$0xff] }
 0x475   : > { %17343 = vmatprep.mubr.f32.mxu1 %v23719_v53  ;;  %26021 = vst [vmem:[#allocation41_spill] sm:$0xff] %v23734_v43  ;;  %v23737_v53 = vld [vmem:[#allocation3 + $0x13a] sm:$0xff] }
 0x476   : > { %26022 = vst [vmem:[#allocation42_spill] sm:$0xff] %v23737_v53 }
 0x478   : > { %17344 = vmatmul.mubr.f32.gmra.mrb[20].mxu1 %v23722_v29  ;;  %v23740_v29 = vld [vmem:[#allocation3 + $0x142] sm:$0xff] }
 0x479   : > { %17346 = vmatprep.mubr.f32.mxu1 %v23725_v21  ;;  %26023 = vst [vmem:[#allocation43_spill] sm:$0xff] %v23740_v29  ;;  %v23743_v21 = vld [vmem:[#allocation3 + $0x152] sm:$0xff] }
 0x47a   : > { %26024 = vst [vmem:[#allocation44_spill] sm:$0xff] %v23743_v21 }
 0x47c   : > { %17347 = vmatmul.mubr.f32.gmra.mrb[22].mxu1 %v23728_v58  ;;  %v23746_v58 = vld [vmem:[#allocation3 + $0x15a] sm:$0xff] }
 0x47d   : > { %17349 = vmatprep.mubr.f32.mxu1 %v23731_v24  ;;  %26025 = vst [vmem:[#allocation45_spill] sm:$0xff] %v23746_v58  ;;  %v23749_v24 = vld [vmem:[#allocation3 + $0x16a] sm:$0xff] }
 0x47e   : > { %26026 = vst [vmem:[#allocation46_spill] sm:$0xff] %v23749_v24 }
 0x480   : > { %17350 = vmatmul.mubr.f32.gmra.mrb[24].mxu1 %v23734_v43  ;;  %v23752_v43 = vld [vmem:[#allocation3 + $0x172] sm:$0xff] }
 0x481   : > { %17352 = vmatprep.mubr.f32.mxu1 %v23737_v53  ;;  %26027 = vst [vmem:[#allocation47_spill] sm:$0xff] %v23752_v43  ;;  %v4544_v53 = vld [vmem:[#allocation7 + $0x698] sm:$0xff] }
 0x484   : > { %17353 = vmatmul.mubr.f32.gmra.mrb[26].mxu1 %v23740_v29  ;;  %v20341_v29 = vpack.c.bf16 %v4544_v53, %v4543_v63  ;;  %v4550_v63 = vld [vmem:[#allocation7 + $0x6c8] sm:$0xff]  ;;  %v4553_v53 = vld [vmem:[#allocation7 + $0x6e0] sm:$0xff] }
 0x485   : > { %17355 = vmatprep.mubr.f32.mxu1 %v23743_v21  ;;  %v4547_v21 = vld [vmem:[#allocation7 + $0x6b0] sm:$0xff] }
 0x488   : > { %17356 = vmatmul.mubr.f32.gmra.mrb[28].mxu1 %v23746_v58  ;;  %v20345_v58 = vpack.c.bf16 %v4546_v51, %v4545_v33  ;;  %v4552_v51 = vld [vmem:[#allocation7 + $0x6d8] sm:$0xff] }
 0x489   : > { %17358 = vmatprep.mubr.f32.mxu1 %v23749_v24  ;;  %v4548_v24 = vld [vmem:[#allocation7 + $0x6b8] sm:$0xff] }
 0x48c   : > { %17359 = vmatmul.mubr.f32.gmra.mrb[30].mxu1 %v23752_v43  ;;  %v20349_v43 = vpack.c.bf16 %v4548_v24, %v4547_v21  ;;  %v4554_v24 = vld [vmem:[#allocation7 + $0x6e8] sm:$0xff]  ;;  %v4556_v21 = vld [vmem:[#allocation7 + $0x6f8] sm:$0xff] }
 0x48d   : > { %17393 = vmatprep.mubr.f32.mxu1 %v23574_v50  ;;  %v4549_v50 = vld [vmem:[#allocation7 + $0x6c0] sm:$0xff] }
 0x490   : > { %17394 = vmatmul.mubr.f32.vlgmr.msra.gmra.mrb[0].mxu1 %v23578_v10  ;;  %v20353_v10 = vpack.c.bf16 %v4550_v63, %v4549_v50  ;;  %v4847_v50 = vld [vmem:[#allocation7 + $0x700] sm:$0xff]  ;;  %v4848_v63 = vld [vmem:[#allocation7 + $0x708] sm:$0xff] }
 0x491   : > { %17396 = vmatprep.mubr.f32.mxu1 %v23581_v40  ;;  %20340 = vmatpush3.bf16.msra.mxu1 %v20337_v25  ;;  %v4551_v25 = vld [vmem:[#allocation7 + $0x6d0] sm:$0xff] }
 0x492   : > { %20342 = vmatprep.subr.bf16.mxu1 %v20341_v29  ;;  %v20357_v33 = vpack.c.bf16 %v4552_v51, %v4551_v25  ;;  %v23785_v25 = vld [vmem:[#allocation3 + $0x180] sm:$0xff]  ;;  %v23788_v51 = vld [vmem:[#allocation3 + $0x188] sm:$0xff] }
 0x493   : > { %26028 = vst [vmem:[#allocation48_spill] sm:$0xff] %v23785_v25  ;;  %26029 = vst [vmem:[#allocation49_spill] sm:$0xff] %v23788_v51 }
 0x494   : > { %17397 = vmatmul.mubr.f32.gmra.mrb[2].mxu1 %v23584_v60 }
 0x495   : > { %17399 = vmatprep.mubr.f32.mxu1 %v23587_v8  ;;  %20344 = vmatpush3.bf16.msra.mxu1 %v20341_v29  ;;  %v4555_v29 = vld [vmem:[#allocation7 + $0x6f0] sm:$0xff] }
 0x496   : > { %20346 = vmatprep.subr.bf16.mxu1 %v20345_v58 }
 0x498   : > { %17400 = vmatmul.mubr.f32.gmra.mrb[4].mxu1 %v23590_v6 }
 0x499   : > { %17402 = vmatprep.mubr.f32.mxu1 %v23593_v18  ;;  %20348 = vmatpush3.bf16.msra.mxu1 %v20345_v58  ;;  %v20361_v58 = vpack.c.bf16 %v4554_v24, %v4553_v53  ;;  %v4850_v53 = vld [vmem:[#allocation7 + $0x718] sm:$0xff]  ;;  %v4508_v24 = vld [vmem:[#allocation3 + $0x19] sm:$0xff] }
 0x49a   : > { %20350 = vmatprep.subr.bf16.mxu1 %v20349_v43 }
 0x49c   : > { %17403 = vmatmul.mubr.f32.gmra.mrb[6].mxu1 %v23596_v52 }
 0x49d   : > { %17405 = vmatprep.mubr.f32.mxu1 %v23599_v57  ;;  %20352 = vmatpush3.bf16.msra.mxu1 %v20349_v43  ;;  %v20365_v43 = vpack.c.bf16 %v4556_v21, %v4555_v29  ;;  %v4509_v29 = vld [vmem:[#allocation3 + $0x21] sm:$0xff]  ;;  %v4851_v21 = vld [vmem:[#allocation7 + $0x720] sm:$0xff] }
 0x49e   : > { %20354 = vmatprep.subr.bf16.mxu1 %v20353_v10 }
 0x4a0   : > { %17406 = vmatmul.mubr.f32.gmra.mrb[8].mxu1 %v23602_v46 }
 0x4a1   : > { %17408 = vmatprep.mubr.f32.mxu1 %v23605_v16  ;;  %20356 = vmatpush3.bf16.msra.mxu1 %v20353_v10  ;;  %v20369_v10 = vpack.c.bf16 %v4848_v63, %v4847_v50  ;;  %v23791_v50 = vld [vmem:[#allocation3 + $0x31] sm:$0xff] }
 0x4a2   : > { %20358 = vmatprep.subr.bf16.mxu1 %v20357_v33 }
 0x4a4   : > { %17409 = vmatmul.mubr.f32.gmra.mrb[10].mxu1 %v23608_v48 }
 0x4a5   : > { %17411 = vmatprep.mubr.f32.mxu1 %v23611_v39  ;;  %20360 = vmatpush3.bf16.msra.mxu1 %v20357_v33  ;;  %v4849_v33 = vld [vmem:[#allocation7 + $0x710] sm:$0xff] }
 0x4a6   : > { %20362 = vmatprep.subr.bf16.mxu1 %v20361_v58 }
 0x4a8   : > { %17412 = vmatmul.mubr.f32.gmra.mrb[12].mxu1 %v23614_v30 }
 0x4a9   : > { %17414 = vmatprep.mubr.f32.mxu1 %v23617_v32  ;;  %20364 = vmatpush3.bf16.msra.mxu1 %v20361_v58  ;;  %v20373_v58 = vpack.c.bf16 %v4850_v53, %v4849_v33  ;;  %v23800_v53 = vld [vmem:[#allocation3 + $0x51] sm:$0xff] }
 0x4aa   : > { %20366 = vmatprep.subr.bf16.mxu1 %v20365_v43  ;;  %26032 = vst [vmem:[#allocation52_spill] sm:$0xff] %v23800_v53 }
 0x4ac   : > { %17415 = vmatmul.mubr.f32.gmra.mrb[14].mxu1 %v23620_v35 }
 0x4ad   : > { %17417 = vmatprep.mubr.f32.mxu1 %v23623_v36  ;;  %20368 = vmatpush3.bf16.msra.mxu1 %v20365_v43  ;;  %v4852_v43 = vld [vmem:[#allocation7 + $0x728] sm:$0xff] }
 0x4ae   : > { %20370 = vmatprep.subr.bf16.mxu1 %v20369_v10  ;;  %v20377_v63 = vpack.c.bf16 %v4852_v43, %v4851_v21  ;;  %v23806_v43 = vld [vmem:[#allocation3 + $0x69] sm:$0xff] }
 0x4af   : > { %26034 = vst [vmem:[#allocation54_spill] sm:$0xff] %v23806_v43 }
 0x4b0   : > { %17418 = vmatmul.mubr.f32.gmra.mrb[16].mxu1 %v23626_v59 }
 0x4b1   : > { %17420 = vmatprep.mubr.f32.mxu1 %v23629_v26 }
 0x4b4   : > { %17421 = vmatmul.mubr.f32.gmra.mrb[18].mxu1 %v23632_v0 }
 0x4b5   : > { %17423 = vmatprep.mubr.f32.mxu1 %v23635_v11 }
 0x4b8   : > { %17424 = vmatmul.mubr.f32.gmra.mrb[20].mxu1 %v23638_v5 }
 0x4b9   : > { %17426 = vmatprep.mubr.f32.mxu1 %v23641_v9 }
 0x4bc   : > { %17427 = vmatmul.mubr.f32.gmra.mrb[22].mxu1 %v23644_v23 }
 0x4bd   : > { %17429 = vmatprep.mubr.f32.mxu1 %v23647_v54 }
 0x4c0   : > { %17430 = vmatmul.mubr.f32.gmra.mrb[24].mxu1 %v23650_v44 }
 0x4c1   : > { %17432 = vmatprep.mubr.f32.mxu1 %v23653_v61 }
 0x4c4   : > { %17433 = vmatmul.mubr.f32.gmra.mrb[26].mxu1 %v23656_v62 }
 0x4c5   : > { %17435 = vmatprep.mubr.f32.mxu1 %v23659_v1  ;;  %v4854_v1 = vld [vmem:[#allocation7 + $0x738] sm:$0xff] }
 0x4c8   : > { %17436 = vmatmul.mubr.f32.gmra.mrb[28].mxu1 %v23662_v12  ;;  %v4853_v12 = vld [vmem:[#allocation7 + $0x730] sm:$0xff] }
 0x4c9   : > { %17438 = vmatprep.mubr.f32.mxu1 %v23785_v25  ;;  %v23794_v25 = vld [vmem:[#allocation3 + $0x39] sm:$0xff]  ;;  %v20381_v33 = vpack.c.bf16 %v4854_v1, %v4853_v12 }
 0x4ca   : > { %26030 = vst [vmem:[#allocation50_spill] sm:$0xff] %v23794_v25  ;;  %v23809_v1 = vld [vmem:[#allocation3 + $0x79] sm:$0xff] }
 0x4cc   : > { %17439 = vmatmul.mubr.f32.gmra.mrb[30].mxu1 %v23788_v51  ;;  %v23797_v51 = vld [vmem:[#allocation3 + $0x49] sm:$0xff] }
 0x4cd   : > { %17473 = vmatprep.mubr.f32.mxu1 %v4508_v24  ;;  %26031 = vst [vmem:[#allocation51_spill] sm:$0xff] %v23797_v51  ;;  %v4855_v24 = vld [vmem:[#allocation7 + $0x740] sm:$0xff] }
 0x4d0   : > { %17474 = vmatmul.mubr.f32.vlgmr.msra.gmra.mrb[0].mxu1 %v4509_v29  ;;  %v4856_v29 = vld [vmem:[#allocation7 + $0x748] sm:$0xff] }
 0x4d1   : > { %17476 = vmatprep.mubr.f32.mxu1 %v23791_v50  ;;  %20372 = vmatpush3.bf16.msra.mxu1 %v20369_v10  ;;  %v23803_v10 = vld [vmem:[#allocation3 + $0x61] sm:$0xff]  ;;  %v20385_v21 = vpack.c.bf16 %v4856_v29, %v4855_v24  ;;  %v23816_v24 = vld [vmem:[#allocation3 + $0x99] sm:$0xff] }
 0x4d2   : > { %20374 = vmatprep.subr.bf16.mxu1 %v20373_v58  ;;  %26033 = vst [vmem:[#allocation53_spill] sm:$0xff] %v23803_v10  ;;  %v4861_v29 = vld [vmem:[#allocation7 + $0x770] sm:$0xff] }
 0x4d4   : > { %17477 = vmatmul.mubr.f32.gmra.mrb[2].mxu1 %v23794_v25  ;;  %v4857_v25 = vld [vmem:[#allocation7 + $0x750] sm:$0xff] }
 0x4d5   : > { %17479 = vmatprep.mubr.f32.mxu1 %v23797_v51  ;;  %20376 = vmatpush3.bf16.msra.mxu1 %v20373_v58  ;;  %v4858_v51 = vld [vmem:[#allocation7 + $0x758] sm:$0xff] }
 0x4d6   : > { %20378 = vmatprep.subr.bf16.mxu1 %v20377_v63  ;;  %v20389_v12 = vpack.c.bf16 %v4858_v51, %v4857_v25  ;;  %v23812_v58 = vld [vmem:[#allocation3 + $0x81] sm:$0xff]  ;;  %v5153_v51 = vld [vmem:[#allocation7 + $0x780] sm:$0xff] }
 0x4d8   : > { %17480 = vmatmul.mubr.f32.gmra.mrb[4].mxu1 %v23800_v53  ;;  %v4859_v53 = vld [vmem:[#allocation7 + $0x760] sm:$0xff] }
 0x4d9   : > { %17482 = vmatprep.mubr.f32.mxu1 %v23803_v10  ;;  %20380 = vmatpush3.bf16.msra.mxu1 %v20377_v63  ;;  %v4860_v10 = vld [vmem:[#allocation7 + $0x768] sm:$0xff] }
 0x4da   : > { %20382 = vmatprep.subr.bf16.mxu1 %v20381_v33  ;;  %v20393_v63 = vpack.c.bf16 %v4860_v10, %v4859_v53  ;;  %v5163_v10 = vld [vmem:[#allocation7 + $0x7d0] sm:$0xff] }
 0x4dc   : > { %17483 = vmatmul.mubr.f32.gmra.mrb[6].mxu1 %v23806_v43  ;;  %v4862_v43 = vld [vmem:[#allocation7 + $0x778] sm:$0xff] }
 0x4dd   : > { %17485 = vmatprep.mubr.f32.mxu1 %v23809_v1  ;;  %20384 = vmatpush3.bf16.msra.mxu1 %v20381_v33  ;;  %v20397_v25 = vpack.c.bf16 %v4862_v43, %v4861_v29  ;;  %v5154_v33 = vld [vmem:[#allocation7 + $0x788] sm:$0xff]  ;;  %v26044_v43 = vld [vmem:[#allocation28_spill] sm:$0xff]  ;;  %v5165_v29 = vld [vmem:[#allocation7 + $0x7e0] sm:$0xff] }
 0x4de   : > { %20386 = vmatprep.subr.bf16.mxu1 %v20385_v21 }
 0x4e0   : > { %17486 = vmatmul.mubr.f32.gmra.mrb[8].mxu1 %v23812_v58 }
 0x4e1   : > { %17488 = vmatprep.mubr.f32.mxu1 %v23468_v37  ;;  %20388 = vmatpush3.bf16.msra.mxu1 %v20385_v21  ;;  %v20401_v37 = vpack.c.bf16 %v5154_v33, %v5153_v51  ;;  %v5164_v21 = vld [vmem:[#allocation7 + $0x7d8] sm:$0xff]  ;;  %v5167_v33 = vld [vmem:[#allocation7 + $0x7f0] sm:$0xff] }
 0x4e2   : > { %20390 = vmatprep.subr.bf16.mxu1 %v20389_v12 }
 0x4e4   : > { %17489 = vmatmul.mubr.f32.gmra.mrb[10].mxu1 %v23816_v24 }
 0x4e5   : > { %17491 = vmatprep.mubr.f32.mxu1 %v23476_v4  ;;  %20392 = vmatpush3.bf16.msra.mxu1 %v20389_v12  ;;  %v5155_v4 = vld [vmem:[#allocation7 + $0x790] sm:$0xff]  ;;  %v26045_v12 = vld [vmem:[#allocation29_spill] sm:$0xff] }
 0x4e6   : > { %20394 = vmatprep.subr.bf16.mxu1 %v20393_v63 }
 0x4e8   : > { %17492 = vmatmul.mubr.f32.gmra.mrb[12].mxu1 %v23474_v38  ;;  %v26035_v38 = vmax.f32 %v23564_v41, 0.0  ;;  %v26042_v41 = vld [vmem:[#allocation26_spill] sm:$0xff] }
 0x4e9   : > { %17494 = vmatprep.mubr.f32.mxu1 %v23486_v22  ;;  %20396 = vmatpush3.bf16.msra.mxu1 %v20393_v63  ;;  %v26036_v22 = vld [vmem:[#allocation19_spill] sm:$0xff]  ;;  %v20421_v63 = vpack.c.bf16 %v5164_v21, %v5163_v10  ;;  %v5461_v10 = vld [vmem:[#allocation7 + $0x810] sm:$0xff]  ;;  %v5462_v21 = vld [vmem:[#allocation7 + $0x818] sm:$0xff] }
 0x4ea   : > { %20398 = vmatprep.subr.bf16.mxu1 %v20397_v25 }
 0x4ec   : > { %17495 = vmatmul.mubr.f32.gmra.mrb[14].mxu1 %v23483_v49  ;;  %v5156_v49 = vld [vmem:[#allocation7 + $0x798] sm:$0xff] }
 0x4ed   : > { %17497 = vmatprep.mubr.f32.mxu1 %v23496_v56  ;;  %20400 = vmatpush3.bf16.msra.mxu1 %v20397_v25  ;;  %v20405_v56 = vpack.c.bf16 %v5156_v49, %v5155_v4  ;;  %v5166_v25 = vld [vmem:[#allocation7 + $0x7e8] sm:$0xff]  ;;  %v5459_v49 = vld [vmem:[#allocation7 + $0x800] sm:$0xff] }
 0x4ee   : > { %20402 = vmatprep.subr.bf16.mxu1 %v20401_v37  ;;  %v20425_v51 = vpack.c.bf16 %v5166_v25, %v5165_v29  ;;  %v5465_v25 = vld [vmem:[#allocation7 + $0x830] sm:$0xff] }
 0x4f0   : > { %17498 = vmatmul.mubr.f32.gmra.mrb[16].mxu1 %v23493_v55  ;;  %v26037_v55 = vmax.f32 %v26036_v22, 0.0  ;;  %v5460_v22 = vld [vmem:[#allocation7 + $0x808] sm:$0xff] }
 0x4f1   : > { %17500 = vmatprep.mubr.f32.mxu1 %v23506_v3  ;;  %v5158_v3 = vld [vmem:[#allocation7 + $0x7a8] sm:$0xff] }
 0x4f4   : > { %17501 = vmatmul.mubr.f32.gmra.mrb[18].mxu1 %v23503_v2  ;;  %v5157_v2 = vld [vmem:[#allocation7 + $0x7a0] sm:$0xff] }
 0x4f5   : > { %17503 = vmatprep.mubr.f32.mxu1 %v23516_v45  ;;  %v26039_v45 = vld [vmem:[#allocation23_spill] sm:$0xff] }
 0x4f8   : > { %17504 = vmatmul.mubr.f32.gmra.mrb[20].mxu1 %v23513_v34  ;;  %v26038_v34 = vld [vmem:[#allocation22_spill] sm:$0xff] }
 0x4f9   : > { %17506 = vmatprep.mubr.f32.mxu1 %v23526_v42  ;;  %v5159_v42 = vld [vmem:[#allocation7 + $0x7b0] sm:$0xff] }
 0x4fc   : > { %17507 = vmatmul.mubr.f32.gmra.mrb[22].mxu1 %v23523_v13  ;;  %v20409_v13 = vpack.c.bf16 %v5158_v3, %v5157_v2  ;;  %v26050_v2 = vld [vmem:[#allocation34_spill] sm:$0xff]  ;;  %v26052_v3 = vld [vmem:[#allocation36_spill] sm:$0xff] }
 0x4fd   : > { %17509 = vmatprep.mubr.f32.mxu1 %v23536_v15  ;;  %v26040_v15 = vld [vmem:[#allocation24_spill] sm:$0xff] }
 0x500   : > { %17510 = vmatmul.mubr.f32.gmra.mrb[24].mxu1 %v23533_v14  ;;  %v5160_v14 = vld [vmem:[#allocation7 + $0x7b8] sm:$0xff] }
 0x501   : > { %17512 = vmatprep.mubr.f32.mxu1 %v23546_v20  ;;  %v20413_v20 = vpack.c.bf16 %v5160_v14, %v5159_v42  ;;  %v26056_v42 = vld [vmem:[#allocation40_spill] sm:$0xff]  ;;  %v26057_v14 = vld [vmem:[#allocation41_spill] sm:$0xff] }
 0x504   : > { %17513 = vmatmul.mubr.f32.gmra.mrb[26].mxu1 %v23543_v19  ;;  %v26041_v19 = vld [vmem:[#allocation25_spill] sm:$0xff] }
 0x505   : > { %17515 = vmatprep.mubr.f32.mxu1 %v23556_v28  ;;  %v5162_v28 = vld [vmem:[#allocation7 + $0x7c8] sm:$0xff] }
 0x508   : > { %17516 = vmatmul.mubr.f32.gmra.mrb[28].mxu1 %v23553_v27  ;;  %v5161_v27 = vld [vmem:[#allocation7 + $0x7c0] sm:$0xff] }
 0x509   : > { %17518 = vmatprep.mubr.f32.mxu1 %v26035_v38  ;;  %v20417_v53 = vpack.c.bf16 %v5162_v28, %v5161_v27  ;;  %v26046_v38 = vld [vmem:[#allocation30_spill] sm:$0xff]  ;;  %v26061_v27 = vld [vmem:[#allocation45_spill] sm:$0xff] }
 0x50a   : > { %v26062_v28 = vld [vmem:[#allocation46_spill] sm:$0xff] }
 0x50c   : > { %17519 = vmatmul.mubr.f32.gmra.mrb[30].mxu1 %v26037_v55  ;;  %v26047_v55 = vld [vmem:[#allocation31_spill] sm:$0xff] }
 0x50d   : > { %17553 = vmatprep.mubr.f32.mxu1 %v23665_v17  ;;  %v26043_v17 = vld [vmem:[#allocation27_spill] sm:$0xff] }
 0x510   : > { %17554 = vmatmul.mubr.f32.vlgmr.msra.gmra.mrb[0].mxu1 %v26038_v34  ;;  %v26053_v34 = vld [vmem:[#allocation37_spill] sm:$0xff] }
 0x511   : > { %17556 = vmatprep.mubr.f32.mxu1 %v26039_v45  ;;  %20404 = vmatpush3.bf16.msra.mxu1 %v20401_v37  ;;  %v5168_v37 = vld [vmem:[#allocation7 + $0x7f8] sm:$0xff]  ;;  %v26054_v45 = vld [vmem:[#allocation38_spill] sm:$0xff] }
 0x512   : > { %20406 = vmatprep.subr.bf16.mxu1 %v20405_v56  ;;  %v20429_v4 = vpack.c.bf16 %v5168_v37, %v5167_v33  ;;  %v5468_v37 = vld [vmem:[#allocation7 + $0x848] sm:$0xff] }
 0x514   : > { %17557 = vmatmul.mubr.f32.gmra.mrb[2].mxu1 %v26040_v15  ;;  %v26058_v15 = vld [vmem:[#allocation42_spill] sm:$0xff] }
 0x515   : > { %17559 = vmatprep.mubr.f32.mxu1 %v26041_v19  ;;  %20408 = vmatpush3.bf16.msra.mxu1 %v20405_v56  ;;  %v26048_v56 = vld [vmem:[#allocation32_spill] sm:$0xff]  ;;  %v26059_v19 = vld [vmem:[#allocation43_spill] sm:$0xff] }
 0x516   : > { %20410 = vmatprep.subr.bf16.mxu1 %v20409_v13 }
 0x518   : > { %17560 = vmatmul.mubr.f32.gmra.mrb[4].mxu1 %v26042_v41  ;;  %v26063_v41 = vld [vmem:[#allocation47_spill] sm:$0xff] }
 0x519   : > { %17562 = vmatprep.mubr.f32.mxu1 %v26043_v17  ;;  %20412 = vmatpush3.bf16.msra.mxu1 %v20409_v13  ;;  %v26055_v13 = vld [vmem:[#allocation39_spill] sm:$0xff]  ;;  %v23871_v17 = vld [vmem:[#allocation3 + $0x182] sm:$0xff] }
 0x51a   : > { %20414 = vmatprep.subr.bf16.mxu1 %v20413_v20 }
 0x51c   : > { %17563 = vmatmul.mubr.f32.gmra.mrb[6].mxu1 %v26044_v43  ;;  %v20437_v43 = vpack.c.bf16 %v5462_v21, %v5461_v10  ;;  %v26072_v10 = vld [vmem:[#allocation54_spill] sm:$0xff] }
 0x51d   : > { %17565 = vmatprep.mubr.f32.mxu1 %v26045_v12  ;;  %20416 = vmatpush3.bf16.msra.mxu1 %v20413_v20  ;;  %v26060_v20 = vld [vmem:[#allocation44_spill] sm:$0xff]  ;;  %v5463_v12 = vld [vmem:[#allocation7 + $0x820] sm:$0xff] }
 0x51e   : > { %20418 = vmatprep.subr.bf16.mxu1 %v20417_v53 }
 0x520   : > { %17566 = vmatmul.mubr.f32.gmra.mrb[8].mxu1 %v23692_v47  ;;  %v20433_v47 = vpack.c.bf16 %v5460_v22, %v5459_v49  ;;  %v5474_v49 = vld [vmem:[#allocation7 + $0x878] sm:$0xff]  ;;  %v5766_v22 = vld [vmem:[#allocation7 + $0x888] sm:$0xff] }
 0x521   : > { %17568 = vmatprep.mubr.f32.mxu1 %v23695_v31  ;;  %20420 = vmatpush3.bf16.msra.mxu1 %v20417_v53  ;;  %v26049_v31 = vld [vmem:[#allocation33_spill] sm:$0xff] }
 0x522   : > { %20422 = vmatprep.subr.bf16.mxu1 %v20421_v63  ;;  %v23874_v53 = vld [vmem:[#allocation3 + $0x18a] sm:$0xff] }
 0x524   : > { %17569 = vmatmul.mubr.f32.gmra.mrb[10].mxu1 %v23698_v7  ;;  %v26051_v7 = vld [vmem:[#allocation35_spill] sm:$0xff] }
 0x525   : > { %17571 = vmatprep.mubr.f32.mxu1 %v26046_v38  ;;  %20424 = vmatpush3.bf16.msra.mxu1 %v20421_v63  ;;  %v5464_v63 = vld [vmem:[#allocation7 + $0x828] sm:$0xff]  ;;  %v5470_v38 = vld [vmem:[#allocation7 + $0x858] sm:$0xff] }
 0x526   : > { %20426 = vmatprep.subr.bf16.mxu1 %v20425_v51  ;;  %v20441_v29 = vpack.c.bf16 %v5464_v63, %v5463_v12  ;;  %v5776_v63 = vld [vmem:[#allocation7 + $0x8d8] sm:$0xff] }
 0x528   : > { %17572 = vmatmul.mubr.f32.gmra.mrb[12].mxu1 %v26047_v55  ;;  %v5770_v55 = vld [vmem:[#allocation7 + $0x8a8] sm:$0xff] }
 0x529   : > { %17574 = vmatprep.mubr.f32.mxu1 %v26048_v56  ;;  %20428 = vmatpush3.bf16.msra.mxu1 %v20425_v51  ;;  %v5466_v51 = vld [vmem:[#allocation7 + $0x838] sm:$0xff]  ;;  %v6292_v56 = vld [vmem:[#allocation7 + $0x9a0] sm:$0xff] }
 0x52a   : > { %20430 = vmatprep.subr.bf16.mxu1 %v20429_v4  ;;  %v20445_v33 = vpack.c.bf16 %v5466_v51, %v5465_v25  ;;  %v6299_v25 = vld [vmem:[#allocation7 + $0x9d8] sm:$0xff]  ;;  %v5434_v51 = vld [vmem:[#allocation3 + $0x91] sm:$0xff] }
 0x52c   : > { %17575 = vmatmul.mubr.f32.gmra.mrb[14].mxu1 %v26049_v31  ;;  %v26068_v31 = vld [vmem:[#allocation50_spill] sm:$0xff] }
 0x52d   : > { %17577 = vmatprep.mubr.f32.mxu1 %v26050_v2  ;;  %20432 = vmatpush3.bf16.msra.mxu1 %v20429_v4  ;;  %v5472_v4 = vld [vmem:[#allocation7 + $0x868] sm:$0xff] }
 0x52e   : > { %20434 = vmatprep.subr.bf16.mxu1 %v20433_v47  ;;  %v26069_v2 = vld [vmem:[#allocation51_spill] sm:$0xff] }
 0x530   : > { %17578 = vmatmul.mubr.f32.gmra.mrb[16].mxu1 %v26051_v7 }
 0x531   : > { %17580 = vmatprep.mubr.f32.mxu1 %v26052_v3  ;;  %v5771_v3 = vld [vmem:[#allocation7 + $0x8b0] sm:$0xff] }
 0x534   : > { %17581 = vmatmul.mubr.f32.gmra.mrb[18].mxu1 %v26053_v34  ;;  %v5772_v34 = vld [vmem:[#allocation7 + $0x8b8] sm:$0xff] }
 0x535   : > { %17583 = vmatprep.mubr.f32.mxu1 %v26054_v45  ;;  %v6294_v45 = vld [vmem:[#allocation7 + $0x9b0] sm:$0xff] }
 0x538   : > { %17584 = vmatmul.mubr.f32.gmra.mrb[20].mxu1 %v26055_v13  ;;  %v6295_v13 = vld [vmem:[#allocation7 + $0x9b8] sm:$0xff] }
 0x539   : > { %17586 = vmatprep.mubr.f32.mxu1 %v26056_v42  ;;  %v26070_v42 = vld [vmem:[#allocation52_spill] sm:$0xff] }
 0x53c   : > { %17587 = vmatmul.mubr.f32.gmra.mrb[22].mxu1 %v26057_v14  ;;  %v26071_v14 = vld [vmem:[#allocation53_spill] sm:$0xff] }
 0x53d   : > { %17589 = vmatprep.mubr.f32.mxu1 %v26058_v15  ;;  %v20477_v15 = vpack.c.bf16 %v5772_v34, %v5771_v3  ;;  %v5740_v3 = vld [vmem:[#allocation3 + $0x92] sm:$0xff]  ;;  %v5742_v34 = vld [vmem:[#allocation3 + $0xaa] sm:$0xff] }
 0x540   : > { %17590 = vmatmul.mubr.f32.gmra.mrb[24].mxu1 %v26059_v19  ;;  %v5773_v19 = vld [vmem:[#allocation7 + $0x8c0] sm:$0xff] }
 0x541   : > { %17592 = vmatprep.mubr.f32.mxu1 %v26060_v20  ;;  %v20509_v20 = vpack.c.bf16 %v6295_v13, %v6294_v45  ;;  %v5743_v45 = vld [vmem:[#allocation3 + $0xb2] sm:$0xff]  ;;  %v5744_v13 = vld [vmem:[#allocation3 + $0xc2] sm:$0xff] }
 0x544   : > { %17593 = vmatmul.mubr.f32.gmra.mrb[26].mxu1 %v26061_v27  ;;  %v5774_v27 = vld [vmem:[#allocation7 + $0x8c8] sm:$0xff] }
 0x545   : > { %17595 = vmatprep.mubr.f32.mxu1 %v26062_v28  ;;  %v6296_v28 = vld [vmem:[#allocation7 + $0x9c0] sm:$0xff]  ;;  %v20481_v21 = vpack.c.bf16 %v5774_v27, %v5773_v19 }
 0x546   : > { %v5748_v19 = vld [vmem:[#allocation3 + $0xf2] sm:$0xff]  ;;  %v5750_v27 = vld [vmem:[#allocation3 + $0x10a] sm:$0xff] }
 0x548   : > { %17596 = vmatmul.mubr.f32.gmra.mrb[28].mxu1 %v26063_v41  ;;  %v6297_v41 = vld [vmem:[#allocation7 + $0x9c8] sm:$0xff] }
 0x549   : > { %17598 = vmatprep.mubr.f32.mxu1 %v23871_v17  ;;  %v20513_v12 = vpack.c.bf16 %v6297_v41, %v6296_v28  ;;  %v5751_v28 = vld [vmem:[#allocation3 + $0x112] sm:$0xff]  ;;  %v5752_v41 = vld [vmem:[#allocation3 + $0x122] sm:$0xff] }
 0x54c   : > { %17599 = vmatmul.mubr.f32.gmra.mrb[30].mxu1 %v23874_v53 }
 0x54d   : > { %17633 = vmatprep.mubr.f32.mxu1 %v23581_v40  ;;  %v5467_v40 = vld [vmem:[#allocation7 + $0x840] sm:$0xff] }
 0x550   : > { %17634 = vmatmul.mubr.f32.vlgmr.msra.gmra.mrb[0].mxu1 %v23584_v60  ;;  %v20449_v60 = vpack.c.bf16 %v5468_v37, %v5467_v40  ;;  %v5777_v40 = vld [vmem:[#allocation7 + $0x8e0] sm:$0xff]  ;;  %v5778_v37 = vld [vmem:[#allocation7 + $0x8e8] sm:$0xff] }
 0x551   : > { %17636 = vmatprep.mubr.f32.mxu1 %v23587_v8  ;;  %20436 = vmatpush3.bf16.msra.mxu1 %v20433_v47  ;;  %v5469_v8 = vld [vmem:[#allocation7 + $0x850] sm:$0xff]  ;;  %v6293_v47 = vld [vmem:[#allocation7 + $0x9a8] sm:$0xff] }
 0x552   : > { %20438 = vmatprep.subr.bf16.mxu1 %v20437_v43 }
 0x554   : > { %17637 = vmatmul.mubr.f32.gmra.mrb[2].mxu1 %v23590_v6  ;;  %v20453_v6 = vpack.c.bf16 %v5470_v38, %v5469_v8  ;;  %v6301_v8 = vld [vmem:[#allocation7 + $0x9e8] sm:$0xff]  ;;  %v5436_v38 = vld [vmem:[#allocation3 + $0xa9] sm:$0xff] }
 0x555   : > { %17639 = vmatprep.mubr.f32.mxu1 %v23593_v18  ;;  %20440 = vmatpush3.bf16.msra.mxu1 %v20437_v43  ;;  %v5471_v18 = vld [vmem:[#allocation7 + $0x860] sm:$0xff]  ;;  %v5775_v43 = vld [vmem:[#allocation7 + $0x8d0] sm:$0xff] }
 0x556   : > { %20442 = vmatprep.subr.bf16.mxu1 %v20441_v29 }
 0x558   : > { %17640 = vmatmul.mubr.f32.gmra.mrb[4].mxu1 %v23596_v52  ;;  %v20457_v52 = vpack.c.bf16 %v5472_v4, %v5471_v18  ;;  %v5437_v18 = vld [vmem:[#allocation3 + $0xb1] sm:$0xff]  ;;  %v5779_v4 = vld [vmem:[#allocation7 + $0x8f0] sm:$0xff] }
 0x559   : > { %17642 = vmatprep.mubr.f32.mxu1 %v23599_v57  ;;  %20444 = vmatpush3.bf16.msra.mxu1 %v20441_v29  ;;  %v5473_v57 = vld [vmem:[#allocation7 + $0x870] sm:$0xff] }
 0x55a   : > { %20446 = vmatprep.subr.bf16.mxu1 %v20445_v33  ;;  %v6298_v29 = vld [vmem:[#allocation7 + $0x9d0] sm:$0xff] }
 0x55c   : > { %17643 = vmatmul.mubr.f32.gmra.mrb[6].mxu1 %v23602_v46  ;;  %v20461_v46 = vpack.c.bf16 %v5474_v49, %v5473_v57  ;;  %v5438_v57 = vld [vmem:[#allocation3 + $0xc1] sm:$0xff] }
 0x55d   : > { %17645 = vmatprep.mubr.f32.mxu1 %v23605_v16  ;;  %20448 = vmatpush3.bf16.msra.mxu1 %v20445_v33  ;;  %v5765_v16 = vld [vmem:[#allocation7 + $0x880] sm:$0xff]  ;;  %v20485_v33 = vpack.c.bf16 %v5776_v63, %v5775_v43  ;;  %v5755_v43 = vld [vmem:[#allocation3 + $0x142] sm:$0xff]  ;;  %v5757_v63 = vld [vmem:[#allocation3 + $0x15a] sm:$0xff] }
 0x55e   : > { %20450 = vmatprep.subr.bf16.mxu1 %v20449_v60 }
 0x560   : > { %17646 = vmatmul.mubr.f32.gmra.mrb[8].mxu1 %v23608_v48  ;;  %v20465_v48 = vpack.c.bf16 %v5766_v22, %v5765_v16  ;;  %v5441_v16 = vld [vmem:[#allocation3 + $0xe1] sm:$0xff]  ;;  %v5442_v22 = vld [vmem:[#allocation3 + $0xf1] sm:$0xff] }
 0x561   : > { %17648 = vmatprep.mubr.f32.mxu1 %v23611_v39  ;;  %20452 = vmatpush3.bf16.msra.mxu1 %v20449_v60  ;;  %v26064_v39 = vld [vmem:[#allocation20_spill] sm:$0xff]  ;;  %v6300_v60 = vld [vmem:[#allocation7 + $0x9e0] sm:$0xff] }
 0x562   : > { %20454 = vmatprep.subr.bf16.mxu1 %v20453_v6 }
 0x564   : > { %17649 = vmatmul.mubr.f32.gmra.mrb[10].mxu1 %v23614_v30  ;;  %v26065_v30 = vld [vmem:[#allocation21_spill] sm:$0xff] }
 0x565   : > { %17651 = vmatprep.mubr.f32.mxu1 %v23617_v32  ;;  %20456 = vmatpush3.bf16.msra.mxu1 %v20453_v6  ;;  %v26066_v32 = vld [vmem:[#allocation48_spill] sm:$0xff]  ;;  %v20521_v6 = vpack.c.bf16 %v6301_v8, %v6300_v60  ;;  %v6256_v8 = vld [vmem:[#allocation3 + $0x9] sm:$0xff] }
 0x566   : > { %20458 = vmatprep.subr.bf16.mxu1 %v20457_v52  ;;  %v6255_v60 = vld [vmem:[#allocation3 + $0x1] sm:$0xff] }
 0x567   : > { %17873 = vmatprep.mubr.f32.mxu0 %v6255_v60 }
 0x568   : > { %17652 = vmatmul.mubr.f32.gmra.mrb[12].mxu1 %v23620_v35  ;;  %v5150_v35 = vld [vmem:[#allocation3 + $0x198] sm:$0xff] }
 0x569   : > { %17654 = vmatprep.mubr.f32.mxu1 %v23623_v36  ;;  %20460 = vmatpush3.bf16.msra.mxu1 %v20457_v52  ;;  %v26067_v36 = vld [vmem:[#allocation49_spill] sm:$0xff] }
 0x56a   : > { %20462 = vmatprep.subr.bf16.mxu1 %v20461_v46  ;;  %v5780_v52 = vld [vmem:[#allocation7 + $0x8f8] sm:$0xff] }
 0x56b   : > { %v20493_v49 = vpack.c.bf16 %v5780_v52, %v5779_v4  ;;  %v6243_v4 = vld [vmem:[#allocation7 + $0x920] sm:$0xff]  ;;  %v6244_v52 = vld [vmem:[#allocation7 + $0x928] sm:$0xff] }
 0x56c   : > { %17655 = vmatmul.mubr.f32.gmra.mrb[14].mxu1 %v23626_v59  ;;  %v5151_v59 = vld [vmem:[#allocation3 + $0x1a0] sm:$0xff] }
 0x56d   : > { %17657 = vmatprep.mubr.f32.mxu1 %v23629_v26  ;;  %20464 = vmatpush3.bf16.msra.mxu1 %v20461_v46  ;;  %v5767_v26 = vld [vmem:[#allocation7 + $0x890] sm:$0xff] }
 0x56e   : > { %20466 = vmatprep.subr.bf16.mxu1 %v20465_v48  ;;  %v5440_v46 = vld [vmem:[#allocation3 + $0xd9] sm:$0xff] }
 0x570   : > { %17658 = vmatmul.mubr.f32.gmra.mrb[16].mxu1 %v23632_v0  ;;  %v5768_v0 = vld [vmem:[#allocation7 + $0x898] sm:$0xff] }
 0x571   : > { %17660 = vmatprep.mubr.f32.mxu1 %v23635_v11  ;;  %v6288_v11 = vld [vmem:[#allocation7 + $0x980] sm:$0xff] }
 0x574   : > { %17661 = vmatmul.mubr.f32.gmra.mrb[18].mxu1 %v23638_v5  ;;  %v6289_v5 = vld [vmem:[#allocation7 + $0x988] sm:$0xff] }
 0x575   : > { %17663 = vmatprep.mubr.f32.mxu1 %v23641_v9  ;;  %v6290_v9 = vld [vmem:[#allocation7 + $0x990] sm:$0xff] }
 0x578   : > { %17664 = vmatmul.mubr.f32.gmra.mrb[20].mxu1 %v23644_v23  ;;  %v20497_v23 = vpack.c.bf16 %v6289_v5, %v6288_v11  ;;  %v5452_v11 = vld [vmem:[#allocation3 + $0x169] sm:$0xff]  ;;  %v5453_v5 = vld [vmem:[#allocation3 + $0x171] sm:$0xff] }
 0x579   : > { %17666 = vmatprep.mubr.f32.mxu1 %v23647_v54  ;;  %v6291_v54 = vld [vmem:[#allocation7 + $0x998] sm:$0xff] }
 0x57a   : > { %20498 = vmatprep.subr.bf16.mxu0 %v20497_v23 }
 0x57b   : > { %20500 = vmatpush3.bf16.msra.mxu0 %v20497_v23  ;;  %v5456_v23 = vld [vmem:[#allocation3 + $0x199] sm:$0xff] }
 0x57c   : > { %17667 = vmatmul.mubr.f32.gmra.mrb[22].mxu1 %v23650_v44  ;;  %v20469_v44 = vpack.c.bf16 %v5768_v0, %v5767_v26  ;;  %v5450_v26 = vld [vmem:[#allocation3 + $0x151] sm:$0xff]  ;;  %v5451_v0 = vld [vmem:[#allocation3 + $0x159] sm:$0xff] }
 0x57d   : > { %17669 = vmatprep.mubr.f32.mxu1 %v23653_v61  ;;  %v5769_v61 = vld [vmem:[#allocation7 + $0x8a0] sm:$0xff] }
 0x57e   : > { %v20473_v7 = vpack.c.bf16 %v5770_v55, %v5769_v61  ;;  %v5732_v61 = vld [vmem:[#allocation3 + $0x32] sm:$0xff]  ;;  %v5734_v55 = vld [vmem:[#allocation3 + $0x4a] sm:$0xff] }
 0x580   : > { %17670 = vmatmul.mubr.f32.gmra.mrb[24].mxu1 %v23656_v62  ;;  %v20501_v62 = vpack.c.bf16 %v6291_v54, %v6290_v9  ;;  %v5454_v9 = vld [vmem:[#allocation3 + $0x181] sm:$0xff]  ;;  %v5455_v54 = vld [vmem:[#allocation3 + $0x189] sm:$0xff] }
 0x581   : > { %17672 = vmatprep.mubr.f32.mxu1 %v26064_v39  ;;  %v5444_v39 = vld [vmem:[#allocation3 + $0x109] sm:$0xff] }
 0x582   : > { %20502 = vmatprep.subr.bf16.mxu0 %v20501_v62 }
 0x583   : > { %20504 = vmatpush3.bf16.msra.mxu0 %v20501_v62  ;;  %v5733_v62 = vld [vmem:[#allocation3 + $0x3a] sm:$0xff] }
 0x584   : > { %17673 = vmatmul.mubr.f32.gmra.mrb[26].mxu1 %v26065_v30  ;;  %v5445_v30 = vld [vmem:[#allocation3 + $0x111] sm:$0xff] }
 0x585   : > { %17675 = vmatprep.mubr.f32.mxu1 %v26066_v32  ;;  %v5446_v32 = vld [vmem:[#allocation3 + $0x121] sm:$0xff] }
 0x588   : > { %17676 = vmatmul.mubr.f32.gmra.mrb[28].mxu1 %v26067_v36  ;;  %v5448_v36 = vld [vmem:[#allocation3 + $0x139] sm:$0xff] }
 0x589   : > { %17678 = vmatprep.mubr.f32.mxu1 %v5150_v35  ;;  %v5447_v35 = vld [vmem:[#allocation3 + $0x129] sm:$0xff] }
 0x58c   : > { %17679 = vmatmul.mubr.f32.gmra.mrb[30].mxu1 %v5151_v59  ;;  %v5449_v59 = vld [vmem:[#allocation3 + $0x141] sm:$0xff] }
 0x58d   : > { %17713 = vmatprep.mubr.f32.mxu1 %v23791_v50  ;;  %v20505_v50 = vpack.c.bf16 %v6293_v47, %v6292_v56  ;;  %v5735_v56 = vld [vmem:[#allocation3 + $0x52] sm:$0xff]  ;;  %v5736_v47 = vld [vmem:[#allocation3 + $0x62] sm:$0xff] }
 0x58f   : > { %20506 = vmatprep.subr.bf16.mxu0 %v20505_v50 }
 0x590   : > { %17714 = vmatmul.mubr.f32.vlgmr.msra.gmra.mrb[0].mxu1 %v26068_v31  ;;  %20508 = vmatpush3.bf16.msra.mxu0 %v20505_v50  ;;  %v5737_v31 = vld [vmem:[#allocation3 + $0x6a] sm:$0xff]  ;;  %v5741_v50 = vld [vmem:[#allocation3 + $0x9a] sm:$0xff] }
 0x591   : > { %17716 = vmatprep.mubr.f32.mxu1 %v26069_v2  ;;  %20468 = vmatpush3.bf16.msra.mxu1 %v20465_v48  ;;  %v5443_v48 = vld [vmem:[#allocation3 + $0xf9] sm:$0xff] }
 0x592   : > { %20470 = vmatprep.subr.bf16.mxu1 %v20469_v44  ;;  %20510 = vmatprep.subr.bf16.mxu0 %v20509_v20  ;;  %v5738_v2 = vld [vmem:[#allocation3 + $0x7a] sm:$0xff] }
 0x594   : > { %17717 = vmatmul.mubr.f32.gmra.mrb[2].mxu1 %v26070_v42  ;;  %20512 = vmatpush3.bf16.msra.mxu0 %v20509_v20  ;;  %v5745_v42 = vld [vmem:[#allocation3 + $0xca] sm:$0xff]  ;;  %v5749_v20 = vld [vmem:[#allocation3 + $0xfa] sm:$0xff] }
 0x595   : > { %17719 = vmatprep.mubr.f32.mxu1 %v26071_v14  ;;  %20472 = vmatpush3.bf16.msra.mxu1 %v20469_v44  ;;  %v5457_v44 = vld [vmem:[#allocation3 + $0x1a1] sm:$0xff] }
 0x596   : > { %20474 = vmatprep.subr.bf16.mxu1 %v20473_v7  ;;  %20514 = vmatprep.subr.bf16.mxu0 %v20513_v12  ;;  %v5746_v14 = vld [vmem:[#allocation3 + $0xda] sm:$0xff] }
 0x598   : > { %17720 = vmatmul.mubr.f32.gmra.mrb[4].mxu1 %v26072_v10  ;;  %20516 = vmatpush3.bf16.msra.mxu0 %v20513_v12  ;;  %v5753_v10 = vld [vmem:[#allocation3 + $0x12a] sm:$0xff]  ;;  %v5756_v12 = vld [vmem:[#allocation3 + $0x152] sm:$0xff] }
 0x599   : > { %17722 = vmatprep.mubr.f32.mxu1 %v23809_v1  ;;  %20476 = vmatpush3.bf16.msra.mxu1 %v20473_v7  ;;  %v20517_v1 = vpack.c.bf16 %v6299_v25, %v6298_v29  ;;  %v5739_v7 = vld [vmem:[#allocation3 + $0x82] sm:$0xff]  ;;  %v5758_v29 = vld [vmem:[#allocation3 + $0x16a] sm:$0xff]  ;;  %v5759_v25 = vld [vmem:[#allocation3 + $0x172] sm:$0xff] }
 0x59a   : > { %20478 = vmatprep.subr.bf16.mxu1 %v20477_v15 }
 0x59b   : > { %20518 = vmatprep.subr.bf16.mxu0 %v20517_v1 }
 0x59c   : > { %17723 = vmatmul.mubr.f32.gmra.mrb[6].mxu1 %v23812_v58  ;;  %v20489_v58 = vpack.c.bf16 %v5778_v37, %v5777_v40  ;;  %20520 = vmatpush3.bf16.msra.mxu0 %v20517_v1  ;;  %v6302_v40 = vld [vmem:[#allocation7 + $0x9f0] sm:$0xff]  ;;  %v6303_v1 = vld [vmem:[#allocation7 + $0x9f8] sm:$0xff] }
 0x59d   : > { %17725 = vmatprep.mubr.f32.mxu1 %v5434_v51  ;;  %20480 = vmatpush3.bf16.msra.mxu1 %v20477_v15  ;;  %v5747_v15 = vld [vmem:[#allocation3 + $0xe2] sm:$0xff]  ;;  %v5762_v51 = vld [vmem:[#allocation3 + $0x19a] sm:$0xff]  ;;  %v20525_v37 = vpack.c.bf16 %v6303_v1, %v6302_v40 }
 0x59e   : > { %20482 = vmatprep.subr.bf16.mxu1 %v20481_v21  ;;  %20522 = vmatprep.subr.bf16.mxu0 %v20521_v6 }
 0x5a0   : > { %17726 = vmatmul.mubr.f32.gmra.mrb[8].mxu1 %v23816_v24  ;;  %v5439_v24 = vld [vmem:[#allocation3 + $0xc9] sm:$0xff]  ;;  %20524 = vmatpush3.bf16.msra.mxu0 %v20521_v6 }
 0x5a1   : > { %17728 = vmatprep.mubr.f32.mxu1 %v5436_v38  ;;  %20484 = vmatpush3.bf16.msra.mxu1 %v20481_v21  ;;  %v5754_v21 = vld [vmem:[#allocation3 + $0x13a] sm:$0xff]  ;;  %v6239_v38 = vld [vmem:[#allocation7 + $0x900] sm:$0xff] }
 0x5a2   : > { %20486 = vmatprep.subr.bf16.mxu1 %v20485_v33  ;;  %20526 = vmatprep.subr.bf16.mxu0 %v20525_v37 }
 0x5a4   : > { %17729 = vmatmul.mubr.f32.gmra.mrb[10].mxu1 %v5437_v18  ;;  %20528 = vmatpush3.bf16.msra.mxu0 %v20525_v37  ;;  %v6242_v18 = vld [vmem:[#allocation7 + $0x918] sm:$0xff] }
 0x5a5   : > { %17731 = vmatprep.mubr.f32.mxu1 %v5438_v57  ;;  %20488 = vmatpush3.bf16.msra.mxu1 %v20485_v33  ;;  %v5763_v33 = vld [vmem:[#allocation3 + $0x1a2] sm:$0xff]  ;;  %v20537_v57 = vpack.c.bf16 %v6244_v52, %v6243_v4 }
 0x5a6   : > { %20490 = vmatprep.subr.bf16.mxu1 %v20489_v58 }
 0x5a7   : > { %17874 = vmatmul.mubr.f32.vlgmr.msra.gmra.mrb[32].mxu0 %v6256_v8 }
 0x5a8   : > { %17732 = vmatmul.mubr.f32.gmra.mrb[12].mxu1 %v5439_v24  ;;  %v6246_v24 = vld [vmem:[#allocation7 + $0x938] sm:$0xff] }
 0x5a9   : > { %17734 = vmatprep.mubr.f32.mxu1 %v5440_v46  ;;  %20492 = vmatpush3.bf16.msra.mxu1 %v20489_v58  ;;  %v6240_v58 = vld [vmem:[#allocation7 + $0x908] sm:$0xff] }
 0x5aa   : > { %20494 = vmatprep.subr.bf16.mxu1 %v20493_v49  ;;  %v20529_v6 = vpack.c.bf16 %v6240_v58, %v6239_v38 }
 0x5ac   : > { %17735 = vmatmul.mubr.f32.gmra.mrb[14].mxu1 %v5441_v16  ;;  %20530 = vmatprep.subr.bf16.mxu0 %v20529_v6  ;;  %v6247_v16 = vld [vmem:[#allocation7 + $0x940] sm:$0xff] }
 0x5ad   : > { %17737 = vmatprep.mubr.f32.mxu1 %v5442_v22  ;;  %20496 = vmatpush3.bf16.msra.mxu1 %v20493_v49  ;;  %v6245_v49 = vld [vmem:[#allocation7 + $0x930] sm:$0xff]  ;;  %v6248_v22 = vld [vmem:[#allocation7 + $0x948] sm:$0xff] }
 0x5ae   : > { %20532 = vmatpush3.bf16.msra.mxu0 %v20529_v6  ;;  %v20541_v46 = vpack.c.bf16 %v6246_v24, %v6245_v49 }
 0x5b0   : > { %17738 = vmatmul.mubr.f32.gmra.mrb[16].mxu1 %v5443_v48  ;;  %v20545_v48 = vpack.c.bf16 %v6248_v22, %v6247_v16 }
 0x5b1   : > { %17740 = vmatprep.mubr.f32.mxu1 %v5444_v39  ;;  %v6249_v39 = vld [vmem:[#allocation7 + $0x950] sm:$0xff] }
 0x5b4   : > { %17741 = vmatmul.mubr.f32.gmra.mrb[18].mxu1 %v5445_v30  ;;  %v6250_v30 = vld [vmem:[#allocation7 + $0x958] sm:$0xff] }
 0x5b5   : > { %17743 = vmatprep.mubr.f32.mxu1 %v5446_v32  ;;  %v20549_v32 = vpack.c.bf16 %v6250_v30, %v6249_v39 }
 0x5b8   : > { %17744 = vmatmul.mubr.f32.gmra.mrb[20].mxu1 %v5447_v35  ;;  %v6251_v35 = vld [vmem:[#allocation7 + $0x960] sm:$0xff] }
 0x5b9   : > { %17746 = vmatprep.mubr.f32.mxu1 %v5448_v36  ;;  %v6252_v36 = vld [vmem:[#allocation7 + $0x968] sm:$0xff] }
 0x5bc   : > { %17747 = vmatmul.mubr.f32.gmra.mrb[22].mxu1 %v5449_v59  ;;  %v20553_v59 = vpack.c.bf16 %v6252_v36, %v6251_v35 }
 0x5bd   : > { %17749 = vmatprep.mubr.f32.mxu1 %v5450_v26  ;;  %v6253_v26 = vld [vmem:[#allocation7 + $0x970] sm:$0xff] }
 0x5c0   : > { %17750 = vmatmul.mubr.f32.gmra.mrb[24].mxu1 %v5451_v0  ;;  %v6254_v0 = vld [vmem:[#allocation7 + $0x978] sm:$0xff] }
 0x5c1   : > { %17752 = vmatprep.mubr.f32.mxu1 %v5452_v11  ;;  %v20557_v11 = vpack.c.bf16 %v6254_v0, %v6253_v26 }
 0x5c4   : > { %17753 = vmatmul.mubr.f32.gmra.mrb[26].mxu1 %v5453_v5  ;;  %v6787_v5 = vld [vmem:[#allocation7 + $0xa00] sm:$0xff] }
 0x5c5   : > { %17755 = vmatprep.mubr.f32.mxu1 %v5454_v9  ;;  %v6788_v9 = vld [vmem:[#allocation7 + $0xa08] sm:$0xff] }
 0x5c8   : > { %17756 = vmatmul.mubr.f32.gmra.mrb[28].mxu1 %v5455_v54  ;;  %v23921_v54 = vld [vmem:[#allocation9 + $0x1] ss:$0 sm:$0xff] }
 0x5c9   : > { %17758 = vmatprep.mubr.f32.mxu1 %v5456_v23  ;;  %v23918_v23 = vpack.c.bf16 %v6788_v9, %v6787_v5 }
 0x5cc   : > { %17759 = vmatmul.mubr.f32.gmra.mrb[30].mxu1 %v5457_v44 }
 0x5cd   : > { %17793 = vmatprep.mubr.f32.mxu1 %v5732_v61 }
 0x5d0   : > { %17794 = vmatmul.mubr.f32.vlgmr.msra.gmra.mrb[0].mxu1 %v5733_v62 }
 0x5d1   : > { %17796 = vmatprep.mubr.f32.mxu1 %v5734_v55 }
 0x5d4   : > { %17797 = vmatmul.mubr.f32.gmra.mrb[2].mxu1 %v5735_v56 }
 0x5d5   : > { %17799 = vmatprep.mubr.f32.mxu1 %v5736_v47 }
 0x5d8   : > { %17800 = vmatmul.mubr.f32.gmra.mrb[4].mxu1 %v5737_v31 }
 0x5d9   : > { %17802 = vmatprep.mubr.f32.mxu1 %v5738_v2 }
 0x5dc   : > { %17803 = vmatmul.mubr.f32.gmra.mrb[6].mxu1 %v5739_v7 }
 0x5dd   : > { %17805 = vmatprep.mubr.f32.mxu1 %v5740_v3 }
 0x5e0   : > { %17806 = vmatmul.mubr.f32.gmra.mrb[8].mxu1 %v5741_v50 }
 0x5e1   : > { %17808 = vmatprep.mubr.f32.mxu1 %v5742_v34 }
 0x5e4   : > { %17809 = vmatmul.mubr.f32.gmra.mrb[10].mxu1 %v5743_v45 }
 0x5e5   : > { %17811 = vmatprep.mubr.f32.mxu1 %v5744_v13 }
 0x5e8   : > { %17812 = vmatmul.mubr.f32.gmra.mrb[12].mxu1 %v5745_v42 }
 0x5e9   : > { %17814 = vmatprep.mubr.f32.mxu1 %v5746_v14 }
 0x5ec   : > { %17815 = vmatmul.mubr.f32.gmra.mrb[14].mxu1 %v5747_v15 }
 0x5ed   : > { %17817 = vmatprep.mubr.f32.mxu1 %v5748_v19 }
 0x5f0   : > { %17818 = vmatmul.mubr.f32.gmra.mrb[16].mxu1 %v5749_v20 }
 0x5f1   : > { %17820 = vmatprep.mubr.f32.mxu1 %v5750_v27 }
 0x5f4   : > { %17821 = vmatmul.mubr.f32.gmra.mrb[18].mxu1 %v5751_v28 }
 0x5f5   : > { %17823 = vmatprep.mubr.f32.mxu1 %v5752_v41 }
 0x5f8   : > { %17824 = vmatmul.mubr.f32.gmra.mrb[20].mxu1 %v5753_v10 }
 0x5f9   : > { %17826 = vmatprep.mubr.f32.mxu1 %v5754_v21 }
 0x5fc   : > { %17827 = vmatmul.mubr.f32.gmra.mrb[22].mxu1 %v5755_v43 }
 0x5fd   : > { %17829 = vmatprep.mubr.f32.mxu1 %v5756_v12 }
 0x600   : > { %17830 = vmatmul.mubr.f32.gmra.mrb[24].mxu1 %v5757_v63 }
 0x601   : > { %17832 = vmatprep.mubr.f32.mxu1 %v5758_v29 }
 0x604   : > { %17833 = vmatmul.mubr.f32.gmra.mrb[26].mxu1 %v5759_v25 }
 0x605   : > { %17835 = vmatprep.mubr.f32.mxu1 %v23871_v17  ;;  %v6241_v17 = vld [vmem:[#allocation7 + $0x910] sm:$0xff] }
 0x608   : > { %17836 = vmatmul.mubr.f32.gmra.mrb[28].mxu1 %v23874_v53  ;;  %v20533_v53 = vpack.c.bf16 %v6242_v18, %v6241_v17 }
 0x609   : > { %17838 = vmatprep.mubr.f32.mxu1 %v5762_v51 }
 0x60a   : > { %20534 = vmatprep.subr.bf16.mxu0 %v20533_v53 }
 0x60b   : > { %20536 = vmatpush3.bf16.msra.mxu0 %v20533_v53 }
 0x60c   : > { %17839 = vmatmul.mubr.f32.gmra.mrb[30].mxu1 %v5763_v33  ;;  %20538 = vmatprep.subr.bf16.mxu0 %v20537_v57 }
 0x60f   : > { %20540 = vmatpush3.bf16.msra.mxu0 %v20537_v57 }
 0x610   : > { %20542 = vmatprep.subr.bf16.mxu0 %v20541_v46 }
 0x613   : > { %20544 = vmatpush3.bf16.msra.mxu0 %v20541_v46 }
 0x614   : > { %20546 = vmatprep.subr.bf16.mxu0 %v20545_v48 }
 0x617   : > { %20548 = vmatpush3.bf16.msra.mxu0 %v20545_v48 }
 0x618   : > { %20550 = vmatprep.subr.bf16.mxu0 %v20549_v32 }
 0x61b   : > { %20552 = vmatpush3.bf16.msra.mxu0 %v20549_v32 }
 0x61c   : > { %20554 = vmatprep.subr.bf16.mxu0 %v20553_v59 }
 0x61f   : > { %20556 = vmatpush3.bf16.msra.mxu0 %v20553_v59 }
 0x620   : > { %20558 = vmatprep.subr.bf16.mxu0 %v20557_v11 }
 0x623   : > { %20560 = vmatpush3.bf16.msra.mxu0 %v20557_v11 }
 0x624   : > { %20562 = vmatprep.subr.bf16.mxu0 %v23918_v23 }
 0x6a3   : > { %v17795_v44 = vpop.f32.mrb[0].mxu1 }
 0x6a4   : > { %v6047_v61 = vadd.f32 %v17795_v44, %v23921_v54  ;;  %v5847_v62 = vpop.f32.mrb[1].mxu1 }
 0x6a5   : > { %v6046_v55 = vadd.f32 %v23921_v54, %v5847_v62 }
 0x6a6   : > { %v6079_v56 = vmax.f32 %v6047_v61, 0.0 }
 0x6a7   : > { %v6078_v47 = vmax.f32 %v6046_v55, 0.0  ;;  %v17798_v31 = vpop.f32.mrb[2].mxu1 }
 0x6a8   : > { %6175 = vst [vmem:[#allocation3 + $0x21] sm:$0xff] %v6079_v56  ;;  %v6049_v2 = vadd.f32 %v17798_v31, %v23921_v54  ;;  %v5857_v7 = vpop.f32.mrb[3].mxu1 }
 0x6a9   : > { %6174 = vst [vmem:[#allocation3 + $0x19] sm:$0xff] %v6078_v47  ;;  %v6048_v3 = vadd.f32 %v23921_v54, %v5857_v7  ;;  %17876 = vmatprep.mubr.f32.mxu0 %v6078_v47 }
 0x6aa   : > { %v6081_v50 = vmax.f32 %v6049_v2, 0.0  ;;  %17877 = vmatmul.mubr.f32.gmra.mrb[34].mxu0 %v6079_v56 }
 0x6ab   : > { %v6080_v34 = vmax.f32 %v6048_v3, 0.0  ;;  %v17801_v45 = vpop.f32.mrb[4].mxu1 }
 0x6ac   : > { %6177 = vst [vmem:[#allocation3 + $0x39] sm:$0xff] %v6081_v50  ;;  %v6051_v13 = vadd.f32 %v17801_v45, %v23921_v54  ;;  %v5867_v42 = vpop.f32.mrb[5].mxu1 }
 0x6ad   : > { %6176 = vst [vmem:[#allocation3 + $0x31] sm:$0xff] %v6080_v34  ;;  %v6050_v14 = vadd.f32 %v23921_v54, %v5867_v42  ;;  %17879 = vmatprep.mubr.f32.mxu0 %v6080_v34 }
 0x6ae   : > { %v6083_v15 = vmax.f32 %v6051_v13, 0.0  ;;  %17880 = vmatmul.mubr.f32.gmra.mrb[36].mxu0 %v6081_v50 }
 0x6af   : > { %v6082_v19 = vmax.f32 %v6050_v14, 0.0  ;;  %v17804_v20 = vpop.f32.mrb[6].mxu1 }
 0x6b0   : > { %6179 = vst [vmem:[#allocation3 + $0x51] sm:$0xff] %v6083_v15  ;;  %v6053_v27 = vadd.f32 %v17804_v20, %v23921_v54  ;;  %v5877_v28 = vpop.f32.mrb[7].mxu1 }
 0x6b1   : > { %6178 = vst [vmem:[#allocation3 + $0x49] sm:$0xff] %v6082_v19  ;;  %v6052_v41 = vadd.f32 %v23921_v54, %v5877_v28  ;;  %17882 = vmatprep.mubr.f32.mxu0 %v6082_v19 }
 0x6b2   : > { %v6085_v10 = vmax.f32 %v6053_v27, 0.0  ;;  %17883 = vmatmul.mubr.f32.gmra.mrb[38].mxu0 %v6083_v15 }
 0x6b3   : > { %v6084_v21 = vmax.f32 %v6052_v41, 0.0  ;;  %v17807_v43 = vpop.f32.mrb[8].mxu1 }
 0x6b4   : > { %6181 = vst [vmem:[#allocation3 + $0x69] sm:$0xff] %v6085_v10  ;;  %v6055_v12 = vadd.f32 %v17807_v43, %v23921_v54  ;;  %v5887_v63 = vpop.f32.mrb[9].mxu1 }
 0x6b5   : > { %6180 = vst [vmem:[#allocation3 + $0x61] sm:$0xff] %v6084_v21  ;;  %v6054_v29 = vadd.f32 %v23921_v54, %v5887_v63  ;;  %17885 = vmatprep.mubr.f32.mxu0 %v6084_v21 }
 0x6b6   : > { %v6087_v25 = vmax.f32 %v6055_v12, 0.0  ;;  %17886 = vmatmul.mubr.f32.gmra.mrb[40].mxu0 %v6085_v10 }
 0x6b7   : > { %v6086_v51 = vmax.f32 %v6054_v29, 0.0  ;;  %v17810_v33 = vpop.f32.mrb[10].mxu1 }
 0x6b8   : > { %6183 = vst [vmem:[#allocation3 + $0x81] sm:$0xff] %v6087_v25  ;;  %v6057_v40 = vadd.f32 %v17810_v33, %v23921_v54  ;;  %v5897_v1 = vpop.f32.mrb[11].mxu1 }
 0x6b9   : > { %6182 = vst [vmem:[#allocation3 + $0x79] sm:$0xff] %v6086_v51  ;;  %v6056_v37 = vadd.f32 %v23921_v54, %v5897_v1  ;;  %17888 = vmatprep.mubr.f32.mxu0 %v6086_v51 }
 0x6ba   : > { %v6089_v60 = vmax.f32 %v6057_v40, 0.0  ;;  %17889 = vmatmul.mubr.f32.gmra.mrb[42].mxu0 %v6087_v25  ;;  %v6206_v40 = vld [vmem:[#allocation3] sm:$0xff] }
 0x6bb   : > { %v23935_v8 = vmax.f32 %v6056_v37, 0.0  ;;  %v17813_v38 = vpop.f32.mrb[12].mxu1  ;;  %v6789_v37 = vld [vmem:[#allocation7 + $0xa10] sm:$0xff] }
 0x6bc   : > { %6185 = vst [vmem:[#allocation3 + $0x99] sm:$0xff] %v6089_v60  ;;  %v6059_v58 = vadd.f32 %v17813_v38, %v23921_v54  ;;  %v5907_v6 = vpop.f32.mrb[13].mxu1 }
 0x6bd   : > { %6184 = vst [vmem:[#allocation3 + $0x91] sm:$0xff] %v23935_v8  ;;  %v6058_v17 = vadd.f32 %v23921_v54, %v5907_v6  ;;  %17891 = vmatprep.mubr.f32.mxu0 %v23935_v8  ;;  %v6207_v6 = vld [vmem:[#allocation3 + $0x8] sm:$0xff] }
 0x6be   : > { %v23941_v18 = vmax.f32 %v6059_v58, 0.0  ;;  %17892 = vmatmul.mubr.f32.gmra.mrb[44].mxu0 %v6089_v60  ;;  %v6790_v60 = vld [vmem:[#allocation7 + $0xa18] sm:$0xff] }
 0x6bf   : > { %v23943_v53 = vmax.f32 %v6058_v17, 0.0  ;;  %v17816_v4 = vpop.f32.mrb[14].mxu1  ;;  %v20565_v17 = vpack.c.bf16 %v6790_v60, %v6789_v37 }
 0x6c0   : > { %6187 = vst [vmem:[#allocation3 + $0xb1] sm:$0xff] %v23941_v18  ;;  %v6061_v52 = vadd.f32 %v17816_v4, %v23921_v54  ;;  %v5917_v57 = vpop.f32.mrb[15].mxu1  ;;  %v6792_v4 = vld [vmem:[#allocation7 + $0xa28] sm:$0xff] }
 0x6c1   : > { %6186 = vst [vmem:[#allocation3 + $0xa9] sm:$0xff] %v23943_v53  ;;  %v6060_v49 = vadd.f32 %v23921_v54, %v5917_v57  ;;  %17894 = vmatprep.mubr.f32.mxu0 %v23943_v53 }
 0x6c2   : > { %v23950_v24 = vmax.f32 %v6061_v52, 0.0  ;;  %17895 = vmatmul.mubr.f32.gmra.mrb[46].mxu0 %v23941_v18  ;;  %v24041_v52 = vld [vmem:[#allocation3 + $0x18] sm:$0xff] }
 0x6c3   : > { %v23953_v46 = vmax.f32 %v6060_v49, 0.0  ;;  %v17819_v16 = vpop.f32.mrb[16].mxu1  ;;  %v24045_v49 = vld [vmem:[#allocation3 + $0x20] sm:$0xff] }
 0x6c4   : > { %6189 = vst [vmem:[#allocation3 + $0xc9] sm:$0xff] %v23950_v24  ;;  %v6063_v22 = vadd.f32 %v17819_v16, %v23921_v54  ;;  %v5927_v48 = vpop.f32.mrb[17].mxu1  ;;  %v6793_v16 = vld [vmem:[#allocation7 + $0xa30] sm:$0xff] }
 0x6c5   : > { %6188 = vst [vmem:[#allocation3 + $0xc1] sm:$0xff] %v23953_v46  ;;  %v6062_v39 = vadd.f32 %v23921_v54, %v5927_v48  ;;  %17897 = vmatprep.mubr.f32.mxu0 %v23953_v46  ;;  %v24048_v48 = vld [vmem:[#allocation3 + $0x30] sm:$0xff] }
 0x6c6   : > { %v23960_v30 = vmax.f32 %v6063_v22, 0.0  ;;  %17898 = vmatmul.mubr.f32.gmra.mrb[48].mxu0 %v23950_v24  ;;  %v6794_v22 = vld [vmem:[#allocation7 + $0xa38] sm:$0xff] }
 0x6c7   : > { %v23963_v32 = vmax.f32 %v6062_v39, 0.0  ;;  %v17822_v35 = vpop.f32.mrb[18].mxu1  ;;  %v20573_v39 = vpack.c.bf16 %v6794_v22, %v6793_v16 }
 0x6c8   : > { %6191 = vst [vmem:[#allocation3 + $0xe1] sm:$0xff] %v23960_v30  ;;  %v6065_v36 = vadd.f32 %v17822_v35, %v23921_v54  ;;  %v5937_v59 = vpop.f32.mrb[19].mxu1  ;;  %v24051_v35 = vld [vmem:[#allocation3 + $0x38] sm:$0xff] }
 0x6c9   : > { %6190 = vst [vmem:[#allocation3 + $0xd9] sm:$0xff] %v23963_v32  ;;  %v6064_v26 = vadd.f32 %v23921_v54, %v5937_v59  ;;  %17900 = vmatprep.mubr.f32.mxu0 %v23963_v32  ;;  %v6796_v59 = vld [vmem:[#allocation7 + $0xa48] sm:$0xff] }
 0x6ca   : > { %v23970_v0 = vmax.f32 %v6065_v36, 0.0  ;;  %17901 = vmatmul.mubr.f32.gmra.mrb[50].mxu0 %v23960_v30  ;;  %v6795_v36 = vld [vmem:[#allocation7 + $0xa40] sm:$0xff] }
 0x6cb   : > { %v23973_v11 = vmax.f32 %v6064_v26, 0.0  ;;  %v17825_v5 = vpop.f32.mrb[20].mxu1  ;;  %v20577_v26 = vpack.c.bf16 %v6796_v59, %v6795_v36 }
 0x6cc   : > { %6193 = vst [vmem:[#allocation3 + $0xf9] sm:$0xff] %v23970_v0  ;;  %v6067_v9 = vadd.f32 %v17825_v5, %v23921_v54  ;;  %v5947_v44 = vpop.f32.mrb[21].mxu1  ;;  %v24057_v5 = vld [vmem:[#allocation3 + $0x50] sm:$0xff] }
 0x6cd   : > { %6192 = vst [vmem:[#allocation3 + $0xf1] sm:$0xff] %v23973_v11  ;;  %v6066_v61 = vadd.f32 %v23921_v54, %v5947_v44  ;;  %17903 = vmatprep.mubr.f32.mxu0 %v23973_v11  ;;  %v6798_v44 = vld [vmem:[#allocation7 + $0xa58] sm:$0xff] }
 0x6ce   : > { %v23980_v62 = vmax.f32 %v6067_v9, 0.0  ;;  %17904 = vmatmul.mubr.f32.gmra.mrb[52].mxu0 %v23970_v0  ;;  %v6797_v9 = vld [vmem:[#allocation7 + $0xa50] sm:$0xff] }
 0x6cf   : > { %v23983_v55 = vmax.f32 %v6066_v61, 0.0  ;;  %v17828_v56 = vpop.f32.mrb[22].mxu1  ;;  %v24060_v61 = vld [vmem:[#allocation3 + $0x60] sm:$0xff] }
 0x6d0   : > { %6195 = vst [vmem:[#allocation3 + $0x111] sm:$0xff] %v23980_v62  ;;  %v6069_v47 = vadd.f32 %v17828_v56, %v23921_v54  ;;  %v5957_v31 = vpop.f32.mrb[23].mxu1  ;;  %v20581_v56 = vpack.c.bf16 %v6798_v44, %v6797_v9  ;;  %v24090_v37 = vld [vmem:[#allocation3 + $0xd8] sm:$0xff]  ;;  %v24093_v60 = vld [vmem:[#allocation3 + $0xe0] sm:$0xff] }
 0x6d1   : > { %6194 = vst [vmem:[#allocation3 + $0x109] sm:$0xff] %v23983_v55  ;;  %v6068_v2 = vadd.f32 %v23921_v54, %v5957_v31  ;;  %17906 = vmatprep.mubr.f32.mxu0 %v23983_v55  ;;  %v6799_v31 = vld [vmem:[#allocation7 + $0xa60] sm:$0xff]  ;;  %v6754_v9 = vld [vmem:[#allocation3 + $0x2] sm:$0xff] }
 0x6d2   : > { %v23990_v7 = vmax.f32 %v6069_v47, 0.0  ;;  %17907 = vmatmul.mubr.f32.gmra.mrb[54].mxu0 %v23980_v62  ;;  %v24063_v47 = vld [vmem:[#allocation3 + $0x68] sm:$0xff] }
 0x6d3   : > { %v23993_v3 = vmax.f32 %v6068_v2, 0.0  ;;  %v17831_v50 = vpop.f32.mrb[24].mxu1  ;;  %v6800_v2 = vld [vmem:[#allocation7 + $0xa68] sm:$0xff] }
 0x6d4   : > { %6197 = vst [vmem:[#allocation3 + $0x129] sm:$0xff] %v23990_v7  ;;  %v6071_v34 = vadd.f32 %v17831_v50, %v23921_v54  ;;  %v5967_v45 = vpop.f32.mrb[25].mxu1  ;;  %v24066_v50 = vld [vmem:[#allocation3 + $0x78] sm:$0xff] }
 0x6d5   : > { %6196 = vst [vmem:[#allocation3 + $0x121] sm:$0xff] %v23993_v3  ;;  %v6070_v13 = vadd.f32 %v23921_v54, %v5967_v45  ;;  %17909 = vmatprep.mubr.f32.mxu0 %v23993_v3  ;;  %v24069_v45 = vld [vmem:[#allocation3 + $0x80] sm:$0xff] }
 0x6d6   : > { %v24000_v42 = vmax.f32 %v6071_v34, 0.0  ;;  %17910 = vmatmul.mubr.f32.gmra.mrb[56].mxu0 %v23990_v7  ;;  %v20585_v34 = vpack.c.bf16 %v6800_v2, %v6799_v31  ;;  %v7096_v31 = vld [vmem:[#allocation7 + $0xa98] sm:$0xff] }
 0x6d7   : > { %v24003_v14 = vmax.f32 %v6070_v13, 0.0  ;;  %v17834_v15 = vpop.f32.mrb[26].mxu1  ;;  %v6801_v13 = vld [vmem:[#allocation7 + $0xa70] sm:$0xff]  ;;  %v6755_v2 = vld [vmem:[#allocation3 + $0xa] sm:$0xff] }
 0x6d8   : > { %6199 = vst [vmem:[#allocation3 + $0x141] sm:$0xff] %v24000_v42  ;;  %v6073_v19 = vadd.f32 %v17834_v15, %v23921_v54  ;;  %v5977_v20 = vpop.f32.mrb[27].mxu1  ;;  %v6802_v15 = vld [vmem:[#allocation7 + $0xa78] sm:$0xff] }
 0x6d9   : > { %6198 = vst [vmem:[#allocation3 + $0x139] sm:$0xff] %v24003_v14  ;;  %v6072_v27 = vadd.f32 %v23921_v54, %v5977_v20  ;;  %17912 = vmatprep.mubr.f32.mxu0 %v24003_v14  ;;  %v20589_v20 = vpack.c.bf16 %v6802_v15, %v6801_v13  ;;  %v7097_v13 = vld [vmem:[#allocation7 + $0xaa0] sm:$0xff]  ;;  %v7098_v15 = vld [vmem:[#allocation7 + $0xaa8] sm:$0xff] }
 0x6da   : > { %v24010_v28 = vmax.f32 %v6073_v19, 0.0  ;;  %17913 = vmatmul.mubr.f32.gmra.mrb[58].mxu0 %v24000_v42  ;;  %v24072_v19 = vld [vmem:[#allocation3 + $0x90] sm:$0xff] }
 0x6db   : > { %v24013_v41 = vmax.f32 %v6072_v27, 0.0  ;;  %v17837_v10 = vpop.f32.mrb[28].mxu1  ;;  %v24075_v27 = vld [vmem:[#allocation3 + $0x98] sm:$0xff] }
 0x6dc   : > { %6201 = vst [vmem:[#allocation3 + $0x159] sm:$0xff] %v24010_v28  ;;  %v6075_v21 = vadd.f32 %v17837_v10, %v23921_v54  ;;  %v5987_v43 = vpop.f32.mrb[29].mxu1  ;;  %v7093_v10 = vld [vmem:[#allocation7 + $0xa80] sm:$0xff]  ;;  %v24111_v16 = vld [vmem:[#allocation3 + $0x128] sm:$0xff] }
 0x6dd   : > { %6200 = vst [vmem:[#allocation3 + $0x151] sm:$0xff] %v24013_v41  ;;  %v6074_v12 = vadd.f32 %v23921_v54, %v5987_v43  ;;  %17915 = vmatprep.mubr.f32.mxu0 %v24013_v41  ;;  %v24078_v43 = vld [vmem:[#allocation3 + $0xa8] sm:$0xff] }
 0x6de   : > { %v24020_v63 = vmax.f32 %v6075_v21, 0.0  ;;  %17916 = vmatmul.mubr.f32.gmra.mrb[60].mxu0 %v24010_v28  ;;  %v7094_v21 = vld [vmem:[#allocation7 + $0xa88] sm:$0xff] }
 0x6df   : > { %v24023_v29 = vmax.f32 %v6074_v12, 0.0  ;;  %v17840_v25 = vpop.f32.mrb[30].mxu1  ;;  %v20593_v12 = vpack.c.bf16 %v7094_v21, %v7093_v10  ;;  %v20601_v10 = vpack.c.bf16 %v7098_v15, %v7097_v13  ;;  %v24135_v21 = vld [vmem:[#allocation3 + $0x22] sm:$0xff]  ;;  %v24147_v15 = vld [vmem:[#allocation3 + $0x52] sm:$0xff] }
 0x6e0   : > { %6203 = vst [vmem:[#allocation3 + $0x171] sm:$0xff] %v24020_v63  ;;  %v24027_v51 = vadd.f32 %v17840_v25, %v23921_v54  ;;  %v5997_v33 = vpop.f32.mrb[31].mxu1  ;;  %v24081_v25 = vld [vmem:[#allocation3 + $0xb0] sm:$0xff]  ;;  %v24114_v22 = vld [vmem:[#allocation3 + $0x138] sm:$0xff]  ;;  %26076 = vst [vmem:[#allocation22_spill] sm:$0xff] %v24135_v21 }
 0x6e1   : > { %6202 = vst [vmem:[#allocation3 + $0x169] sm:$0xff] %v24023_v29  ;;  %v24031_v1 = vadd.f32 %v23921_v54, %v5997_v33  ;;  %17918 = vmatprep.mubr.f32.mxu0 %v24023_v29  ;;  %v6791_v54 = vld [vmem:[#allocation7 + $0xa20] sm:$0xff]  ;;  %v24084_v33 = vld [vmem:[#allocation3 + $0xc0] sm:$0xff]  ;;  %26080 = vst [vmem:[#allocation26_spill] sm:$0xff] %v24147_v15 }
 0x6e2   : > { %26073 = vst [vmem:[#allocation55_spill] sm:$0xff] %v24027_v51  ;;  %v25829_v38 = vmax.f32 %v24027_v51, 0.0  ;;  %17919 = vmatmul.mubr.f32.gmra.mrb[62].mxu0 %v24020_v63  ;;  %v20569_v57 = vpack.c.bf16 %v6792_v4, %v6791_v54  ;;  %v24102_v54 = vld [vmem:[#allocation3 + $0x108] sm:$0xff]  ;;  %v24105_v4 = vld [vmem:[#allocation3 + $0x110] sm:$0xff] }
 0x6e3   : > { %v25830_v58 = vmax.f32 %v24031_v1, 0.0  ;;  %17953 = vmatprep.mubr.f32.mxu0 %v6206_v40  ;;  %v24087_v40 = vld [vmem:[#allocation3 + $0xc8] sm:$0xff]  ;;  %v24138_v51 = vld [vmem:[#allocation3 + $0x32] sm:$0xff] }
 0x6e4   : > { %6205 = vst [vmem:[#allocation3 + $0x189] sm:$0xff] %v25829_v38  ;;  %v24120_v36 = vld [vmem:[#allocation3 + $0x150] sm:$0xff]  ;;  %v24123_v59 = vld [vmem:[#allocation3 + $0x158] sm:$0xff]  ;;  %v7099_v38 = vld [vmem:[#allocation7 + $0xab0] sm:$0xff] }
 0x6e5   : > { %6204 = vst [vmem:[#allocation3 + $0x181] sm:$0xff] %v25830_v58  ;;  %v7100_v58 = vld [vmem:[#allocation7 + $0xab8] sm:$0xff]  ;;  %26077 = vst [vmem:[#allocation23_spill] sm:$0xff] %v24138_v51 }
 0x6e6   : > { %17954 = vmatmul.mubr.f32.vlgmr.msra.gmra.mrb[32].mxu0 %v6207_v6  ;;  %v24096_v6 = vld [vmem:[#allocation3 + $0xf0] sm:$0xff] }
 0x6e7   : > { %17956 = vmatprep.mubr.f32.mxu0 %v24041_v52  ;;  %20564 = vmatpush3.bf16.msra.mxu0 %v23918_v23  ;;  %v24054_v23 = vld [vmem:[#allocation3 + $0x48] sm:$0xff] }
 0x6e8   : > { %20566 = vmatprep.subr.bf16.mxu0 %v20565_v17  ;;  %v24129_v44 = vld [vmem:[#allocation3 + $0x170] sm:$0xff] }
 0x6e9   : > { %26075 = vst [vmem:[#allocation19_spill] sm:$0xff] %v24129_v44 }
 0x6ea   : > { %17957 = vmatmul.mubr.f32.gmra.mrb[34].mxu0 %v24045_v49 }
 0x6eb   : > { %17959 = vmatprep.mubr.f32.mxu0 %v24048_v48  ;;  %20568 = vmatpush3.bf16.msra.mxu0 %v20565_v17  ;;  %v24099_v17 = vld [vmem:[#allocation3 + $0xf8] sm:$0xff] }
 0x6ec   : > { %20570 = vmatprep.subr.bf16.mxu0 %v20569_v57 }
 0x6ee   : > { %17960 = vmatmul.mubr.f32.gmra.mrb[36].mxu0 %v24051_v35 }
 0x6ef   : > { %17962 = vmatprep.mubr.f32.mxu0 %v24054_v23  ;;  %20572 = vmatpush3.bf16.msra.mxu0 %v20569_v57  ;;  %v24108_v57 = vld [vmem:[#allocation3 + $0x120] sm:$0xff] }
 0x6f0   : > { %20574 = vmatprep.subr.bf16.mxu0 %v20573_v39 }
 0x6f2   : > { %17963 = vmatmul.mubr.f32.gmra.mrb[38].mxu0 %v24057_v5 }
 0x6f3   : > { %17965 = vmatprep.mubr.f32.mxu0 %v24060_v61  ;;  %20576 = vmatpush3.bf16.msra.mxu0 %v20573_v39  ;;  %v24117_v39 = vld [vmem:[#allocation3 + $0x140] sm:$0xff] }
 0x6f4   : > { %20578 = vmatprep.subr.bf16.mxu0 %v20577_v26 }
 0x6f6   : > { %17966 = vmatmul.mubr.f32.gmra.mrb[40].mxu0 %v24063_v47 }
 0x6f7   : > { %17968 = vmatprep.mubr.f32.mxu0 %v24066_v50  ;;  %20580 = vmatpush3.bf16.msra.mxu0 %v20577_v26  ;;  %v24126_v26 = vld [vmem:[#allocation3 + $0x168] sm:$0xff] }
 0x6f8   : > { %20582 = vmatprep.subr.bf16.mxu0 %v20581_v56  ;;  %26074 = vst [vmem:[#allocation56_spill] sm:$0xff] %v24126_v26 }
 0x6fa   : > { %17969 = vmatmul.mubr.f32.gmra.mrb[42].mxu0 %v24069_v45 }
 0x6fb   : > { %17971 = vmatprep.mubr.f32.mxu0 %v24072_v19  ;;  %20584 = vmatpush3.bf16.msra.mxu0 %v20581_v56  ;;  %v7095_v56 = vld [vmem:[#allocation7 + $0xa90] sm:$0xff] }
 0x6fc   : > { %20586 = vmatprep.subr.bf16.mxu0 %v20585_v34 }
 0x6fe   : > { %17972 = vmatmul.mubr.f32.gmra.mrb[44].mxu0 %v24075_v27 }
 0x6ff   : > { %17974 = vmatprep.mubr.f32.mxu0 %v24078_v43  ;;  %20588 = vmatpush3.bf16.msra.mxu0 %v20585_v34  ;;  %v20597_v34 = vpack.c.bf16 %v7096_v31, %v7095_v56  ;;  %v24141_v56 = vld [vmem:[#allocation3 + $0x3a] sm:$0xff]  ;;  %v7101_v31 = vld [vmem:[#allocation7 + $0xac0] sm:$0xff] }
 0x700   : > { %20590 = vmatprep.subr.bf16.mxu0 %v20589_v20  ;;  %26078 = vst [vmem:[#allocation24_spill] sm:$0xff] %v24141_v56 }
 0x702   : > { %17975 = vmatmul.mubr.f32.gmra.mrb[46].mxu0 %v24081_v25 }
 0x703   : > { %17977 = vmatprep.mubr.f32.mxu0 %v24084_v33  ;;  %20592 = vmatpush3.bf16.msra.mxu0 %v20589_v20  ;;  %v24132_v20 = vld [vmem:[#allocation3 + $0x1a] sm:$0xff] }
 0x704   : > { %20594 = vmatprep.subr.bf16.mxu0 %v20593_v12 }
 0x706   : > { %17978 = vmatmul.mubr.f32.gmra.mrb[48].mxu0 %v24087_v40 }
 0x707   : > { %17980 = vmatprep.mubr.f32.mxu0 %v24090_v37 }
 0x70a   : > { %17981 = vmatmul.mubr.f32.gmra.mrb[50].mxu0 %v24093_v60 }
 0x70b   : > { %17983 = vmatprep.mubr.f32.mxu0 %v24096_v6 }
 0x70e   : > { %17984 = vmatmul.mubr.f32.gmra.mrb[52].mxu0 %v24099_v17 }
 0x70f   : > { %17986 = vmatprep.mubr.f32.mxu0 %v24102_v54 }
 0x712   : > { %17987 = vmatmul.mubr.f32.gmra.mrb[54].mxu0 %v24105_v4 }
 0x713   : > { %17989 = vmatprep.mubr.f32.mxu0 %v24108_v57 }
 0x716   : > { %17990 = vmatmul.mubr.f32.gmra.mrb[56].mxu0 %v24111_v16 }
 0x717   : > { %17992 = vmatprep.mubr.f32.mxu0 %v24114_v22 }
 0x71a   : > { %17993 = vmatmul.mubr.f32.gmra.mrb[58].mxu0 %v24117_v39 }
 0x71b   : > { %17995 = vmatprep.mubr.f32.mxu0 %v24120_v36 }
 0x71e   : > { %17996 = vmatmul.mubr.f32.gmra.mrb[60].mxu0 %v24123_v59 }
 0x71f   : > { %17998 = vmatprep.mubr.f32.mxu0 %v24126_v26 }
 0x722   : > { %17999 = vmatmul.mubr.f32.gmra.mrb[62].mxu0 %v24129_v44 }
 0x723   : > { %18033 = vmatprep.mubr.f32.mxu0 %v6754_v9  ;;  %v20605_v9 = vpack.c.bf16 %v7100_v58, %v7099_v38  ;;  %v24150_v38 = vld [vmem:[#allocation3 + $0x62] sm:$0xff] }
 0x724   : > { %26081 = vst [vmem:[#allocation27_spill] sm:$0xff] %v24150_v38 }
 0x726   : > { %18034 = vmatmul.mubr.f32.vlgmr.msra.gmra.mrb[32].mxu0 %v6755_v2  ;;  %v7102_v2 = vld [vmem:[#allocation7 + $0xac8] sm:$0xff] }
 0x727   : > { %18036 = vmatprep.mubr.f32.mxu0 %v24132_v20  ;;  %20596 = vmatpush3.bf16.msra.mxu0 %v20593_v12  ;;  %v24144_v12 = vld [vmem:[#allocation3 + $0x4a] sm:$0xff]  ;;  %v20609_v13 = vpack.c.bf16 %v7102_v2, %v7101_v31  ;;  %v24159_v2 = vld [vmem:[#allocation3 + $0x82] sm:$0xff] }
 0x728   : > { %20598 = vmatprep.subr.bf16.mxu0 %v20597_v34  ;;  %26079 = vst [vmem:[#allocation25_spill] sm:$0xff] %v24144_v12 }
 0x72a   : > { %18037 = vmatmul.mubr.f32.gmra.mrb[34].mxu0 %v24135_v21  ;;  %v7103_v21 = vld [vmem:[#allocation7 + $0xad0] sm:$0xff] }
 0x72b   : > { %18039 = vmatprep.mubr.f32.mxu0 %v24138_v51  ;;  %20600 = vmatpush3.bf16.msra.mxu0 %v20597_v34  ;;  %v7104_v51 = vld [vmem:[#allocation7 + $0xad8] sm:$0xff] }
 0x72c   : > { %20602 = vmatprep.subr.bf16.mxu0 %v20601_v10  ;;  %v20613_v58 = vpack.c.bf16 %v7104_v51, %v7103_v21  ;;  %v24153_v34 = vld [vmem:[#allocation3 + $0x6a] sm:$0xff]  ;;  %v24162_v51 = vld [vmem:[#allocation3 + $0x92] sm:$0xff] }
 0x72d   : > { %26082 = vst [vmem:[#allocation28_spill] sm:$0xff] %v24153_v34 }
 0x72e   : > { %18040 = vmatmul.mubr.f32.gmra.mrb[36].mxu0 %v24141_v56  ;;  %v7105_v56 = vld [vmem:[#allocation7 + $0xae0] sm:$0xff] }
 0x72f   : > { %18042 = vmatprep.mubr.f32.mxu0 %v24144_v12  ;;  %20604 = vmatpush3.bf16.msra.mxu0 %v20601_v10  ;;  %v7106_v12 = vld [vmem:[#allocation7 + $0xae8] sm:$0xff] }
 0x730   : > { %20606 = vmatprep.subr.bf16.mxu0 %v20605_v9  ;;  %v24156_v10 = vld [vmem:[#allocation3 + $0x7a] sm:$0xff]  ;;  %v20617_v31 = vpack.c.bf16 %v7106_v12, %v7105_v56  ;;  %v24168_v56 = vld [vmem:[#allocation3 + $0xaa] sm:$0xff] }
 0x731   : > { %26083 = vst [vmem:[#allocation29_spill] sm:$0xff] %v24156_v10  ;;  %26084 = vst [vmem:[#allocation30_spill] sm:$0xff] %v24168_v56 }
 0x732   : > { %18043 = vmatmul.mubr.f32.gmra.mrb[38].mxu0 %v24147_v15  ;;  %v7107_v15 = vld [vmem:[#allocation7 + $0xaf0] sm:$0xff] }
 0x733   : > { %18045 = vmatprep.mubr.f32.mxu0 %v24150_v38  ;;  %20608 = vmatpush3.bf16.msra.mxu0 %v20605_v9  ;;  %v7108_v38 = vld [vmem:[#allocation7 + $0xaf8] sm:$0xff]  ;;  %v24165_v9 = vld [vmem:[#allocation3 + $0x9a] sm:$0xff] }
 0x734   : > { %20610 = vmatprep.subr.bf16.mxu0 %v20609_v13  ;;  %v20621_v21 = vpack.c.bf16 %v7108_v38, %v7107_v15  ;;  %v24177_v15 = vld [vmem:[#allocation3 + $0xca] sm:$0xff]  ;;  %v24180_v38 = vld [vmem:[#allocation3 + $0xda] sm:$0xff] }
 0x735   : > { %26087 = vst [vmem:[#allocation33_spill] sm:$0xff] %v24177_v15  ;;  %26088 = vst [vmem:[#allocation34_spill] sm:$0xff] %v24180_v38 }
 0x736   : > { %18046 = vmatmul.mubr.f32.gmra.mrb[40].mxu0 %v24153_v34  ;;  %v7399_v34 = vld [vmem:[#allocation7 + $0xb00] sm:$0xff] }
 0x737   : > { %18048 = vmatprep.mubr.f32.mxu0 %v24156_v10  ;;  %20612 = vmatpush3.bf16.msra.mxu0 %v20609_v13  ;;  %v7400_v10 = vld [vmem:[#allocation7 + $0xb08] sm:$0xff] }
 0x738   : > { %20614 = vmatprep.subr.bf16.mxu0 %v20613_v58  ;;  %v20625_v12 = vpack.c.bf16 %v7400_v10, %v7399_v34  ;;  %v24171_v13 = vld [vmem:[#allocation3 + $0xb2] sm:$0xff]  ;;  %v24189_v10 = vld [vmem:[#allocation3 + $0xfa] sm:$0xff] }
 0x739   : > { %26085 = vst [vmem:[#allocation31_spill] sm:$0xff] %v24171_v13  ;;  %v24186_v34 = vld [vmem:[#allocation3 + $0xf2] sm:$0xff]  ;;  %26091 = vst [vmem:[#allocation37_spill] sm:$0xff] %v24189_v10 }
 0x73a   : > { %18049 = vmatmul.mubr.f32.gmra.mrb[42].mxu0 %v24159_v2  ;;  %26090 = vst [vmem:[#allocation36_spill] sm:$0xff] %v24186_v34 }
 0x73b   : > { %18051 = vmatprep.mubr.f32.mxu0 %v24162_v51  ;;  %20616 = vmatpush3.bf16.msra.mxu0 %v20613_v58  ;;  %v24174_v58 = vld [vmem:[#allocation3 + $0xc2] sm:$0xff] }
 0x73c   : > { %20618 = vmatprep.subr.bf16.mxu0 %v20617_v31  ;;  %26086 = vst [vmem:[#allocation32_spill] sm:$0xff] %v24174_v58 }
 0x73e   : > { %18052 = vmatmul.mubr.f32.gmra.mrb[44].mxu0 %v24165_v9 }
 0x73f   : > { %18054 = vmatprep.mubr.f32.mxu0 %v24168_v56  ;;  %20620 = vmatpush3.bf16.msra.mxu0 %v20617_v31  ;;  %v24183_v31 = vld [vmem:[#allocation3 + $0xe2] sm:$0xff]  ;;  %v7404_v56 = vld [vmem:[#allocation7 + $0xb28] sm:$0xff] }
 0x740   : > { %20622 = vmatprep.subr.bf16.mxu0 %v20621_v21  ;;  %26089 = vst [vmem:[#allocation35_spill] sm:$0xff] %v24183_v31 }
 0x742   : > { %18055 = vmatmul.mubr.f32.gmra.mrb[46].mxu0 %v24171_v13  ;;  %v7403_v13 = vld [vmem:[#allocation7 + $0xb20] sm:$0xff] }
 0x743   : > { %18057 = vmatprep.mubr.f32.mxu0 %v24174_v58  ;;  %20624 = vmatpush3.bf16.msra.mxu0 %v20621_v21  ;;  %v24192_v21 = vld [vmem:[#allocation3 + $0x10a] sm:$0xff]  ;;  %v7401_v58 = vld [vmem:[#allocation7 + $0xb10] sm:$0xff] }
 0x744   : > { %20626 = vmatprep.subr.bf16.mxu0 %v20625_v12  ;;  %26092 = vst [vmem:[#allocation38_spill] sm:$0xff] %v24192_v21 }
 0x746   : > { %18058 = vmatmul.mubr.f32.gmra.mrb[48].mxu0 %v24177_v15  ;;  %v24195_v15 = vld [vmem:[#allocation3 + $0x112] sm:$0xff] }
 0x747   : > { %18060 = vmatprep.mubr.f32.mxu0 %v24180_v38  ;;  %26093 = vst [vmem:[#allocation39_spill] sm:$0xff] %v24195_v15  ;;  %v24198_v38 = vld [vmem:[#allocation3 + $0x122] sm:$0xff] }
 0x748   : > { %26094 = vst [vmem:[#allocation40_spill] sm:$0xff] %v24198_v38 }
 0x74a   : > { %18061 = vmatmul.mubr.f32.gmra.mrb[50].mxu0 %v24183_v31  ;;  %v24201_v31 = vld [vmem:[#allocation3 + $0x12a] sm:$0xff] }
 0x74b   : > { %18063 = vmatprep.mubr.f32.mxu0 %v24186_v34  ;;  %26095 = vst [vmem:[#allocation41_spill] sm:$0xff] %v24201_v31  ;;  %v24204_v34 = vld [vmem:[#allocation3 + $0x13a] sm:$0xff] }
 0x74c   : > { %26096 = vst [vmem:[#allocation42_spill] sm:$0xff] %v24204_v34 }
 0x74e   : > { %18064 = vmatmul.mubr.f32.gmra.mrb[52].mxu0 %v24189_v10  ;;  %v24207_v10 = vld [vmem:[#allocation3 + $0x142] sm:$0xff] }
 0x74f   : > { %18066 = vmatprep.mubr.f32.mxu0 %v24192_v21  ;;  %26097 = vst [vmem:[#allocation43_spill] sm:$0xff] %v24207_v10  ;;  %v24210_v21 = vld [vmem:[#allocation3 + $0x152] sm:$0xff] }
 0x750   : > { %26098 = vst [vmem:[#allocation44_spill] sm:$0xff] %v24210_v21 }
 0x752   : > { %18067 = vmatmul.mubr.f32.gmra.mrb[54].mxu0 %v24195_v15  ;;  %v24213_v15 = vld [vmem:[#allocation3 + $0x15a] sm:$0xff] }
 0x753   : > { %18069 = vmatprep.mubr.f32.mxu0 %v24198_v38  ;;  %26099 = vst [vmem:[#allocation45_spill] sm:$0xff] %v24213_v15  ;;  %v24216_v38 = vld [vmem:[#allocation3 + $0x16a] sm:$0xff] }
 0x754   : > { %26100 = vst [vmem:[#allocation46_spill] sm:$0xff] %v24216_v38 }
 0x756   : > { %18070 = vmatmul.mubr.f32.gmra.mrb[56].mxu0 %v24201_v31  ;;  %v24219_v31 = vld [vmem:[#allocation3 + $0x172] sm:$0xff] }
 0x757   : > { %18072 = vmatprep.mubr.f32.mxu0 %v24204_v34  ;;  %26101 = vst [vmem:[#allocation47_spill] sm:$0xff] %v24219_v31  ;;  %v7402_v34 = vld [vmem:[#allocation7 + $0xb18] sm:$0xff] }
 0x75a   : > { %18073 = vmatmul.mubr.f32.gmra.mrb[58].mxu0 %v24207_v10  ;;  %v20629_v10 = vpack.c.bf16 %v7402_v34, %v7401_v58  ;;  %v7408_v58 = vld [vmem:[#allocation7 + $0xb48] sm:$0xff]  ;;  %v7411_v34 = vld [vmem:[#allocation7 + $0xb60] sm:$0xff] }
 0x75b   : > { %18075 = vmatprep.mubr.f32.mxu0 %v24210_v21  ;;  %v7405_v21 = vld [vmem:[#allocation7 + $0xb30] sm:$0xff] }
 0x75e   : > { %18076 = vmatmul.mubr.f32.gmra.mrb[60].mxu0 %v24213_v15  ;;  %v20633_v15 = vpack.c.bf16 %v7404_v56, %v7403_v13  ;;  %v7410_v56 = vld [vmem:[#allocation7 + $0xb58] sm:$0xff] }
 0x75f   : > { %18078 = vmatprep.mubr.f32.mxu0 %v24216_v38  ;;  %v7406_v38 = vld [vmem:[#allocation7 + $0xb38] sm:$0xff] }
 0x762   : > { %18079 = vmatmul.mubr.f32.gmra.mrb[62].mxu0 %v24219_v31  ;;  %v20637_v31 = vpack.c.bf16 %v7406_v38, %v7405_v21  ;;  %v7412_v38 = vld [vmem:[#allocation7 + $0xb68] sm:$0xff]  ;;  %v7414_v21 = vld [vmem:[#allocation7 + $0xb78] sm:$0xff] }
 0x763   : > { %18113 = vmatprep.mubr.f32.mxu0 %v24041_v52  ;;  %v7407_v52 = vld [vmem:[#allocation7 + $0xb40] sm:$0xff] }
 0x766   : > { %18114 = vmatmul.mubr.f32.vlgmr.msra.gmra.mrb[32].mxu0 %v24045_v49  ;;  %v20641_v49 = vpack.c.bf16 %v7408_v58, %v7407_v52  ;;  %v7705_v52 = vld [vmem:[#allocation7 + $0xb80] sm:$0xff]  ;;  %v7706_v58 = vld [vmem:[#allocation7 + $0xb88] sm:$0xff] }
 0x767   : > { %18116 = vmatprep.mubr.f32.mxu0 %v24048_v48  ;;  %20628 = vmatpush3.bf16.msra.mxu0 %v20625_v12  ;;  %v7409_v12 = vld [vmem:[#allocation7 + $0xb50] sm:$0xff] }
 0x768   : > { %20630 = vmatprep.subr.bf16.mxu0 %v20629_v10  ;;  %v20645_v13 = vpack.c.bf16 %v7410_v56, %v7409_v12  ;;  %v24252_v12 = vld [vmem:[#allocation3 + $0x180] sm:$0xff]  ;;  %v24255_v56 = vld [vmem:[#allocation3 + $0x188] sm:$0xff] }
 0x769   : > { %26102 = vst [vmem:[#allocation20_spill] sm:$0xff] %v24252_v12  ;;  %26103 = vst [vmem:[#allocation21_spill] sm:$0xff] %v24255_v56 }
 0x76a   : > { %18117 = vmatmul.mubr.f32.gmra.mrb[34].mxu0 %v24051_v35 }
 0x76b   : > { %18119 = vmatprep.mubr.f32.mxu0 %v24054_v23  ;;  %20632 = vmatpush3.bf16.msra.mxu0 %v20629_v10  ;;  %v7413_v10 = vld [vmem:[#allocation7 + $0xb70] sm:$0xff] }
 0x76c   : > { %20634 = vmatprep.subr.bf16.mxu0 %v20633_v15 }
 0x76e   : > { %18120 = vmatmul.mubr.f32.gmra.mrb[36].mxu0 %v24057_v5 }
 0x76f   : > { %18122 = vmatprep.mubr.f32.mxu0 %v24060_v61  ;;  %20636 = vmatpush3.bf16.msra.mxu0 %v20633_v15  ;;  %v20649_v15 = vpack.c.bf16 %v7412_v38, %v7411_v34  ;;  %v7708_v34 = vld [vmem:[#allocation7 + $0xb98] sm:$0xff]  ;;  %v7366_v38 = vld [vmem:[#allocation3 + $0x19] sm:$0xff] }
 0x770   : > { %20638 = vmatprep.subr.bf16.mxu0 %v20637_v31 }
 0x772   : > { %18123 = vmatmul.mubr.f32.gmra.mrb[38].mxu0 %v24063_v47 }
 0x773   : > { %18125 = vmatprep.mubr.f32.mxu0 %v24066_v50  ;;  %20640 = vmatpush3.bf16.msra.mxu0 %v20637_v31  ;;  %v20653_v31 = vpack.c.bf16 %v7414_v21, %v7413_v10  ;;  %v7367_v10 = vld [vmem:[#allocation3 + $0x21] sm:$0xff]  ;;  %v7709_v21 = vld [vmem:[#allocation7 + $0xba0] sm:$0xff] }
 0x774   : > { %20642 = vmatprep.subr.bf16.mxu0 %v20641_v49 }
 0x776   : > { %18126 = vmatmul.mubr.f32.gmra.mrb[40].mxu0 %v24069_v45 }
 0x777   : > { %18128 = vmatprep.mubr.f32.mxu0 %v24072_v19  ;;  %20644 = vmatpush3.bf16.msra.mxu0 %v20641_v49  ;;  %v20657_v49 = vpack.c.bf16 %v7706_v58, %v7705_v52  ;;  %v24258_v52 = vld [vmem:[#allocation3 + $0x31] sm:$0xff] }
 0x778   : > { %20646 = vmatprep.subr.bf16.mxu0 %v20645_v13 }
 0x77a   : > { %18129 = vmatmul.mubr.f32.gmra.mrb[42].mxu0 %v24075_v27 }
 0x77b   : > { %18131 = vmatprep.mubr.f32.mxu0 %v24078_v43  ;;  %20648 = vmatpush3.bf16.msra.mxu0 %v20645_v13  ;;  %v7707_v13 = vld [vmem:[#allocation7 + $0xb90] sm:$0xff] }
 0x77c   : > { %20650 = vmatprep.subr.bf16.mxu0 %v20649_v15 }
 0x77e   : > { %18132 = vmatmul.mubr.f32.gmra.mrb[44].mxu0 %v24081_v25 }
 0x77f   : > { %18134 = vmatprep.mubr.f32.mxu0 %v24084_v33  ;;  %20652 = vmatpush3.bf16.msra.mxu0 %v20649_v15  ;;  %v20661_v15 = vpack.c.bf16 %v7708_v34, %v7707_v13  ;;  %v24267_v34 = vld [vmem:[#allocation3 + $0x51] sm:$0xff] }
 0x780   : > { %20654 = vmatprep.subr.bf16.mxu0 %v20653_v31  ;;  %26106 = vst [vmem:[#allocation50_spill] sm:$0xff] %v24267_v34 }
 0x782   : > { %18135 = vmatmul.mubr.f32.gmra.mrb[46].mxu0 %v24087_v40 }
 0x783   : > { %18137 = vmatprep.mubr.f32.mxu0 %v24090_v37  ;;  %20656 = vmatpush3.bf16.msra.mxu0 %v20653_v31  ;;  %v7710_v31 = vld [vmem:[#allocation7 + $0xba8] sm:$0xff] }
 0x784   : > { %20658 = vmatprep.subr.bf16.mxu0 %v20657_v49  ;;  %v20665_v58 = vpack.c.bf16 %v7710_v31, %v7709_v21  ;;  %v24273_v31 = vld [vmem:[#allocation3 + $0x69] sm:$0xff] }
 0x785   : > { %26108 = vst [vmem:[#allocation52_spill] sm:$0xff] %v24273_v31 }
 0x786   : > { %18138 = vmatmul.mubr.f32.gmra.mrb[48].mxu0 %v24093_v60 }
 0x787   : > { %18140 = vmatprep.mubr.f32.mxu0 %v24096_v6 }
 0x78a   : > { %18141 = vmatmul.mubr.f32.gmra.mrb[50].mxu0 %v24099_v17 }
 0x78b   : > { %18143 = vmatprep.mubr.f32.mxu0 %v24102_v54 }
 0x78e   : > { %18144 = vmatmul.mubr.f32.gmra.mrb[52].mxu0 %v24105_v4 }
 0x78f   : > { %18146 = vmatprep.mubr.f32.mxu0 %v24108_v57 }
 0x792   : > { %18147 = vmatmul.mubr.f32.gmra.mrb[54].mxu0 %v24111_v16 }
 0x793   : > { %18149 = vmatprep.mubr.f32.mxu0 %v24114_v22 }
 0x796   : > { %18150 = vmatmul.mubr.f32.gmra.mrb[56].mxu0 %v24117_v39 }
 0x797   : > { %18152 = vmatprep.mubr.f32.mxu0 %v24120_v36 }
 0x79a   : > { %18153 = vmatmul.mubr.f32.gmra.mrb[58].mxu0 %v24123_v59 }
 0x79b   : > { %18155 = vmatprep.mubr.f32.mxu0 %v24126_v26  ;;  %v7712_v26 = vld [vmem:[#allocation7 + $0xbb8] sm:$0xff] }
 0x79e   : > { %18156 = vmatmul.mubr.f32.gmra.mrb[60].mxu0 %v24129_v44  ;;  %v7711_v44 = vld [vmem:[#allocation7 + $0xbb0] sm:$0xff] }
 0x79f   : > { %18158 = vmatprep.mubr.f32.mxu0 %v24252_v12  ;;  %v24261_v12 = vld [vmem:[#allocation3 + $0x39] sm:$0xff]  ;;  %v20669_v13 = vpack.c.bf16 %v7712_v26, %v7711_v44 }
 0x7a0   : > { %26104 = vst [vmem:[#allocation48_spill] sm:$0xff] %v24261_v12  ;;  %v24276_v26 = vld [vmem:[#allocation3 + $0x79] sm:$0xff] }
 0x7a2   : > { %18159 = vmatmul.mubr.f32.gmra.mrb[62].mxu0 %v24255_v56  ;;  %v24264_v56 = vld [vmem:[#allocation3 + $0x49] sm:$0xff] }
 0x7a3   : > { %18193 = vmatprep.mubr.f32.mxu0 %v7366_v38  ;;  %26105 = vst [vmem:[#allocation49_spill] sm:$0xff] %v24264_v56  ;;  %v7713_v38 = vld [vmem:[#allocation7 + $0xbc0] sm:$0xff] }
 0x7a6   : > { %18194 = vmatmul.mubr.f32.vlgmr.msra.gmra.mrb[32].mxu0 %v7367_v10  ;;  %v7714_v10 = vld [vmem:[#allocation7 + $0xbc8] sm:$0xff] }
 0x7a7   : > { %18196 = vmatprep.mubr.f32.mxu0 %v24258_v52  ;;  %20660 = vmatpush3.bf16.msra.mxu0 %v20657_v49  ;;  %v24270_v49 = vld [vmem:[#allocation3 + $0x61] sm:$0xff]  ;;  %v20673_v21 = vpack.c.bf16 %v7714_v10, %v7713_v38  ;;  %v24283_v38 = vld [vmem:[#allocation3 + $0x99] sm:$0xff] }
 0x7a8   : > { %20662 = vmatprep.subr.bf16.mxu0 %v20661_v15  ;;  %26107 = vst [vmem:[#allocation51_spill] sm:$0xff] %v24270_v49  ;;  %v7719_v10 = vld [vmem:[#allocation7 + $0xbf0] sm:$0xff] }
 0x7aa   : > { %18197 = vmatmul.mubr.f32.gmra.mrb[34].mxu0 %v24261_v12  ;;  %v7715_v12 = vld [vmem:[#allocation7 + $0xbd0] sm:$0xff] }
 0x7ab   : > { %18199 = vmatprep.mubr.f32.mxu0 %v24264_v56  ;;  %20664 = vmatpush3.bf16.msra.mxu0 %v20661_v15  ;;  %v7716_v56 = vld [vmem:[#allocation7 + $0xbd8] sm:$0xff] }
 0x7ac   : > { %20666 = vmatprep.subr.bf16.mxu0 %v20665_v58  ;;  %v20677_v44 = vpack.c.bf16 %v7716_v56, %v7715_v12  ;;  %v24279_v15 = vld [vmem:[#allocation3 + $0x81] sm:$0xff]  ;;  %v8011_v56 = vld [vmem:[#allocation7 + $0xc00] sm:$0xff] }
 0x7ae   : > { %18200 = vmatmul.mubr.f32.gmra.mrb[36].mxu0 %v24267_v34  ;;  %v7717_v34 = vld [vmem:[#allocation7 + $0xbe0] sm:$0xff] }
 0x7af   : > { %18202 = vmatprep.mubr.f32.mxu0 %v24270_v49  ;;  %20668 = vmatpush3.bf16.msra.mxu0 %v20665_v58  ;;  %v7718_v49 = vld [vmem:[#allocation7 + $0xbe8] sm:$0xff] }
 0x7b0   : > { %20670 = vmatprep.subr.bf16.mxu0 %v20669_v13  ;;  %v20681_v58 = vpack.c.bf16 %v7718_v49, %v7717_v34  ;;  %v8021_v49 = vld [vmem:[#allocation7 + $0xc50] sm:$0xff] }
 0x7b2   : > { %18203 = vmatmul.mubr.f32.gmra.mrb[38].mxu0 %v24273_v31  ;;  %v7720_v31 = vld [vmem:[#allocation7 + $0xbf8] sm:$0xff] }
 0x7b3   : > { %18205 = vmatprep.mubr.f32.mxu0 %v24276_v26  ;;  %20672 = vmatpush3.bf16.msra.mxu0 %v20669_v13  ;;  %v20685_v12 = vpack.c.bf16 %v7720_v31, %v7719_v10  ;;  %v8012_v13 = vld [vmem:[#allocation7 + $0xc08] sm:$0xff]  ;;  %v26118_v31 = vld [vmem:[#allocation28_spill] sm:$0xff]  ;;  %v8023_v10 = vld [vmem:[#allocation7 + $0xc60] sm:$0xff] }
 0x7b4   : > { %20674 = vmatprep.subr.bf16.mxu0 %v20673_v21 }
 0x7b6   : > { %18206 = vmatmul.mubr.f32.gmra.mrb[40].mxu0 %v24279_v15 }
 0x7b7   : > { %18208 = vmatprep.mubr.f32.mxu0 %v23935_v8  ;;  %20676 = vmatpush3.bf16.msra.mxu0 %v20673_v21  ;;  %v20689_v8 = vpack.c.bf16 %v8012_v13, %v8011_v56  ;;  %v8022_v21 = vld [vmem:[#allocation7 + $0xc58] sm:$0xff]  ;;  %v8025_v13 = vld [vmem:[#allocation7 + $0xc70] sm:$0xff] }
 0x7b8   : > { %20678 = vmatprep.subr.bf16.mxu0 %v20677_v44 }
 0x7ba   : > { %18209 = vmatmul.mubr.f32.gmra.mrb[42].mxu0 %v24283_v38 }
 0x7bb   : > { %18211 = vmatprep.mubr.f32.mxu0 %v23943_v53  ;;  %20680 = vmatpush3.bf16.msra.mxu0 %v20677_v44  ;;  %v8013_v53 = vld [vmem:[#allocation7 + $0xc10] sm:$0xff]  ;;  %v26119_v44 = vld [vmem:[#allocation29_spill] sm:$0xff] }
 0x7bc   : > { %20682 = vmatprep.subr.bf16.mxu0 %v20681_v58 }
 0x7be   : > { %18212 = vmatmul.mubr.f32.gmra.mrb[44].mxu0 %v23941_v18  ;;  %v26109_v18 = vmax.f32 %v24031_v1, 0.0  ;;  %v26116_v1 = vld [vmem:[#allocation26_spill] sm:$0xff] }
 0x7bf   : > { %18214 = vmatprep.mubr.f32.mxu0 %v23953_v46  ;;  %20684 = vmatpush3.bf16.msra.mxu0 %v20681_v58  ;;  %v26110_v46 = vld [vmem:[#allocation55_spill] sm:$0xff]  ;;  %v20709_v58 = vpack.c.bf16 %v8022_v21, %v8021_v49  ;;  %v8319_v49 = vld [vmem:[#allocation7 + $0xc90] sm:$0xff]  ;;  %v8320_v21 = vld [vmem:[#allocation7 + $0xc98] sm:$0xff] }
 0x7c0   : > { %20686 = vmatprep.subr.bf16.mxu0 %v20685_v12 }
 0x7c2   : > { %18215 = vmatmul.mubr.f32.gmra.mrb[46].mxu0 %v23950_v24  ;;  %v8014_v24 = vld [vmem:[#allocation7 + $0xc18] sm:$0xff] }
 0x7c3   : > { %18217 = vmatprep.mubr.f32.mxu0 %v23963_v32  ;;  %20688 = vmatpush3.bf16.msra.mxu0 %v20685_v12  ;;  %v20693_v32 = vpack.c.bf16 %v8014_v24, %v8013_v53  ;;  %v8024_v12 = vld [vmem:[#allocation7 + $0xc68] sm:$0xff]  ;;  %v8317_v24 = vld [vmem:[#allocation7 + $0xc80] sm:$0xff] }
 0x7c4   : > { %20690 = vmatprep.subr.bf16.mxu0 %v20689_v8  ;;  %v20713_v56 = vpack.c.bf16 %v8024_v12, %v8023_v10  ;;  %v8323_v12 = vld [vmem:[#allocation7 + $0xcb0] sm:$0xff] }
 0x7c6   : > { %18218 = vmatmul.mubr.f32.gmra.mrb[48].mxu0 %v23960_v30  ;;  %v26111_v30 = vmax.f32 %v26110_v46, 0.0  ;;  %v8318_v46 = vld [vmem:[#allocation7 + $0xc88] sm:$0xff] }
 0x7c7   : > { %18220 = vmatprep.mubr.f32.mxu0 %v23973_v11  ;;  %v8016_v11 = vld [vmem:[#allocation7 + $0xc28] sm:$0xff] }
 0x7ca   : > { %18221 = vmatmul.mubr.f32.gmra.mrb[50].mxu0 %v23970_v0  ;;  %v8015_v0 = vld [vmem:[#allocation7 + $0xc20] sm:$0xff] }
 0x7cb   : > { %18223 = vmatprep.mubr.f32.mxu0 %v23983_v55  ;;  %v26113_v55 = vld [vmem:[#allocation23_spill] sm:$0xff] }
 0x7ce   : > { %18224 = vmatmul.mubr.f32.gmra.mrb[52].mxu0 %v23980_v62  ;;  %v26112_v62 = vld [vmem:[#allocation22_spill] sm:$0xff] }
 0x7cf   : > { %18226 = vmatprep.mubr.f32.mxu0 %v23993_v3  ;;  %v8017_v3 = vld [vmem:[#allocation7 + $0xc30] sm:$0xff] }
 0x7d2   : > { %18227 = vmatmul.mubr.f32.gmra.mrb[54].mxu0 %v23990_v7  ;;  %v20697_v7 = vpack.c.bf16 %v8016_v11, %v8015_v0  ;;  %v26124_v0 = vld [vmem:[#allocation34_spill] sm:$0xff]  ;;  %v26126_v11 = vld [vmem:[#allocation36_spill] sm:$0xff] }
 0x7d3   : > { %18229 = vmatprep.mubr.f32.mxu0 %v24003_v14  ;;  %v26114_v14 = vld [vmem:[#allocation24_spill] sm:$0xff] }
 0x7d6   : > { %18230 = vmatmul.mubr.f32.gmra.mrb[56].mxu0 %v24000_v42  ;;  %v8018_v42 = vld [vmem:[#allocation7 + $0xc38] sm:$0xff] }
 0x7d7   : > { %18232 = vmatprep.mubr.f32.mxu0 %v24013_v41  ;;  %v20701_v41 = vpack.c.bf16 %v8018_v42, %v8017_v3  ;;  %v26130_v3 = vld [vmem:[#allocation40_spill] sm:$0xff]  ;;  %v26131_v42 = vld [vmem:[#allocation41_spill] sm:$0xff] }
 0x7da   : > { %18233 = vmatmul.mubr.f32.gmra.mrb[58].mxu0 %v24010_v28  ;;  %v26115_v28 = vld [vmem:[#allocation25_spill] sm:$0xff] }
 0x7db   : > { %18235 = vmatprep.mubr.f32.mxu0 %v24023_v29  ;;  %v8020_v29 = vld [vmem:[#allocation7 + $0xc48] sm:$0xff] }
 0x7de   : > { %18236 = vmatmul.mubr.f32.gmra.mrb[60].mxu0 %v24020_v63  ;;  %v8019_v63 = vld [vmem:[#allocation7 + $0xc40] sm:$0xff] }
 0x7df   : > { %18238 = vmatprep.mubr.f32.mxu0 %v26109_v18  ;;  %v20705_v34 = vpack.c.bf16 %v8020_v29, %v8019_v63  ;;  %v26120_v18 = vld [vmem:[#allocation30_spill] sm:$0xff]  ;;  %v26135_v63 = vld [vmem:[#allocation45_spill] sm:$0xff] }
 0x7e0   : > { %v26136_v29 = vld [vmem:[#allocation46_spill] sm:$0xff] }
 0x7e2   : > { %18239 = vmatmul.mubr.f32.gmra.mrb[62].mxu0 %v26111_v30  ;;  %v26121_v30 = vld [vmem:[#allocation31_spill] sm:$0xff] }
 0x7e3   : > { %18273 = vmatprep.mubr.f32.mxu0 %v24132_v20  ;;  %v26117_v20 = vld [vmem:[#allocation27_spill] sm:$0xff] }
 0x7e6   : > { %18274 = vmatmul.mubr.f32.vlgmr.msra.gmra.mrb[32].mxu0 %v26112_v62  ;;  %v26127_v62 = vld [vmem:[#allocation37_spill] sm:$0xff] }
 0x7e7   : > { %18276 = vmatprep.mubr.f32.mxu0 %v26113_v55  ;;  %20692 = vmatpush3.bf16.msra.mxu0 %v20689_v8  ;;  %v8026_v8 = vld [vmem:[#allocation7 + $0xc78] sm:$0xff]  ;;  %v26128_v55 = vld [vmem:[#allocation38_spill] sm:$0xff] }
 0x7e8   : > { %20694 = vmatprep.subr.bf16.mxu0 %v20693_v32  ;;  %v20717_v53 = vpack.c.bf16 %v8026_v8, %v8025_v13  ;;  %v8326_v8 = vld [vmem:[#allocation7 + $0xcc8] sm:$0xff] }
 0x7ea   : > { %18277 = vmatmul.mubr.f32.gmra.mrb[34].mxu0 %v26114_v14  ;;  %v26132_v14 = vld [vmem:[#allocation42_spill] sm:$0xff] }
 0x7eb   : > { %18279 = vmatprep.mubr.f32.mxu0 %v26115_v28  ;;  %20696 = vmatpush3.bf16.msra.mxu0 %v20693_v32  ;;  %v26122_v32 = vld [vmem:[#allocation32_spill] sm:$0xff]  ;;  %v26133_v28 = vld [vmem:[#allocation43_spill] sm:$0xff] }
 0x7ec   : > { %20698 = vmatprep.subr.bf16.mxu0 %v20697_v7 }
 0x7ee   : > { %18280 = vmatmul.mubr.f32.gmra.mrb[36].mxu0 %v26116_v1  ;;  %v26137_v1 = vld [vmem:[#allocation47_spill] sm:$0xff] }
 0x7ef   : > { %18282 = vmatprep.mubr.f32.mxu0 %v26117_v20  ;;  %20700 = vmatpush3.bf16.msra.mxu0 %v20697_v7  ;;  %v26129_v7 = vld [vmem:[#allocation39_spill] sm:$0xff]  ;;  %v24338_v20 = vld [vmem:[#allocation3 + $0x182] sm:$0xff] }
 0x7f0   : > { %20702 = vmatprep.subr.bf16.mxu0 %v20701_v41 }
 0x7f2   : > { %18283 = vmatmul.mubr.f32.gmra.mrb[38].mxu0 %v26118_v31  ;;  %v20725_v31 = vpack.c.bf16 %v8320_v21, %v8319_v49  ;;  %v26146_v49 = vld [vmem:[#allocation52_spill] sm:$0xff] }
 0x7f3   : > { %18285 = vmatprep.mubr.f32.mxu0 %v26119_v44  ;;  %20704 = vmatpush3.bf16.msra.mxu0 %v20701_v41  ;;  %v26134_v41 = vld [vmem:[#allocation44_spill] sm:$0xff]  ;;  %v8321_v44 = vld [vmem:[#allocation7 + $0xca0] sm:$0xff] }
 0x7f4   : > { %20706 = vmatprep.subr.bf16.mxu0 %v20705_v34 }
 0x7f6   : > { %18286 = vmatmul.mubr.f32.gmra.mrb[40].mxu0 %v24159_v2  ;;  %v20721_v2 = vpack.c.bf16 %v8318_v46, %v8317_v24  ;;  %v8332_v24 = vld [vmem:[#allocation7 + $0xcf8] sm:$0xff]  ;;  %v8624_v46 = vld [vmem:[#allocation7 + $0xd08] sm:$0xff] }
 0x7f7   : > { %18288 = vmatprep.mubr.f32.mxu0 %v24162_v51  ;;  %20708 = vmatpush3.bf16.msra.mxu0 %v20705_v34  ;;  %v26123_v51 = vld [vmem:[#allocation33_spill] sm:$0xff] }
 0x7f8   : > { %20710 = vmatprep.subr.bf16.mxu0 %v20709_v58  ;;  %v24341_v34 = vld [vmem:[#allocation3 + $0x18a] sm:$0xff] }
 0x7fa   : > { %18289 = vmatmul.mubr.f32.gmra.mrb[42].mxu0 %v24165_v9  ;;  %v26125_v9 = vld [vmem:[#allocation35_spill] sm:$0xff] }
 0x7fb   : > { %18291 = vmatprep.mubr.f32.mxu0 %v26120_v18  ;;  %20712 = vmatpush3.bf16.msra.mxu0 %v20709_v58  ;;  %v8322_v58 = vld [vmem:[#allocation7 + $0xca8] sm:$0xff]  ;;  %v8328_v18 = vld [vmem:[#allocation7 + $0xcd8] sm:$0xff] }
 0x7fc   : > { %20714 = vmatprep.subr.bf16.mxu0 %v20713_v56  ;;  %v20729_v10 = vpack.c.bf16 %v8322_v58, %v8321_v44  ;;  %v8634_v58 = vld [vmem:[#allocation7 + $0xd58] sm:$0xff] }
 0x7fe   : > { %18292 = vmatmul.mubr.f32.gmra.mrb[44].mxu0 %v26121_v30  ;;  %v8628_v30 = vld [vmem:[#allocation7 + $0xd28] sm:$0xff] }
 0x7ff   : > { %18294 = vmatprep.mubr.f32.mxu0 %v26122_v32  ;;  %20716 = vmatpush3.bf16.msra.mxu0 %v20713_v56  ;;  %v8324_v56 = vld [vmem:[#allocation7 + $0xcb8] sm:$0xff]  ;;  %v9150_v32 = vld [vmem:[#allocation7 + $0xe20] sm:$0xff] }
 0x800   : > { %20718 = vmatprep.subr.bf16.mxu0 %v20717_v53  ;;  %v20733_v13 = vpack.c.bf16 %v8324_v56, %v8323_v12  ;;  %v9157_v12 = vld [vmem:[#allocation7 + $0xe58] sm:$0xff]  ;;  %v8292_v56 = vld [vmem:[#allocation3 + $0x91] sm:$0xff] }
 0x802   : > { %18295 = vmatmul.mubr.f32.gmra.mrb[46].mxu0 %v26123_v51  ;;  %v26142_v51 = vld [vmem:[#allocation48_spill] sm:$0xff] }
 0x803   : > { %18297 = vmatprep.mubr.f32.mxu0 %v26124_v0  ;;  %20720 = vmatpush3.bf16.msra.mxu0 %v20717_v53  ;;  %v8330_v53 = vld [vmem:[#allocation7 + $0xce8] sm:$0xff]  ;;  %v26143_v0 = vld [vmem:[#allocation49_spill] sm:$0xff] }
 0x804   : > { %20722 = vmatprep.subr.bf16.mxu0 %v20721_v2 }
 0x806   : > { %18298 = vmatmul.mubr.f32.gmra.mrb[48].mxu0 %v26125_v9 }
 0x807   : > { %18300 = vmatprep.mubr.f32.mxu0 %v26126_v11  ;;  %v8629_v11 = vld [vmem:[#allocation7 + $0xd30] sm:$0xff] }
 0x80a   : > { %18301 = vmatmul.mubr.f32.gmra.mrb[50].mxu0 %v26127_v62  ;;  %v8630_v62 = vld [vmem:[#allocation7 + $0xd38] sm:$0xff] }
 0x80b   : > { %18303 = vmatprep.mubr.f32.mxu0 %v26128_v55  ;;  %v9152_v55 = vld [vmem:[#allocation7 + $0xe30] sm:$0xff] }
 0x80e   : > { %18304 = vmatmul.mubr.f32.gmra.mrb[52].mxu0 %v26129_v7  ;;  %v9153_v7 = vld [vmem:[#allocation7 + $0xe38] sm:$0xff] }
 0x80f   : > { %18306 = vmatprep.mubr.f32.mxu0 %v26130_v3  ;;  %v26144_v3 = vld [vmem:[#allocation50_spill] sm:$0xff] }
 0x812   : > { %18307 = vmatmul.mubr.f32.gmra.mrb[54].mxu0 %v26131_v42  ;;  %v26145_v42 = vld [vmem:[#allocation51_spill] sm:$0xff] }
 0x813   : > { %18309 = vmatprep.mubr.f32.mxu0 %v26132_v14  ;;  %v20765_v14 = vpack.c.bf16 %v8630_v62, %v8629_v11  ;;  %v8598_v11 = vld [vmem:[#allocation3 + $0x92] sm:$0xff]  ;;  %v8600_v62 = vld [vmem:[#allocation3 + $0xaa] sm:$0xff] }
 0x816   : > { %18310 = vmatmul.mubr.f32.gmra.mrb[56].mxu0 %v26133_v28  ;;  %v8631_v28 = vld [vmem:[#allocation7 + $0xd40] sm:$0xff] }
 0x817   : > { %18312 = vmatprep.mubr.f32.mxu0 %v26134_v41  ;;  %v20797_v41 = vpack.c.bf16 %v9153_v7, %v9152_v55  ;;  %v8601_v55 = vld [vmem:[#allocation3 + $0xb2] sm:$0xff]  ;;  %v8602_v7 = vld [vmem:[#allocation3 + $0xc2] sm:$0xff] }
 0x81a   : > { %18313 = vmatmul.mubr.f32.gmra.mrb[58].mxu0 %v26135_v63  ;;  %v8632_v63 = vld [vmem:[#allocation7 + $0xd48] sm:$0xff] }
 0x81b   : > { %18315 = vmatprep.mubr.f32.mxu0 %v26136_v29  ;;  %v9154_v29 = vld [vmem:[#allocation7 + $0xe40] sm:$0xff]  ;;  %v20769_v21 = vpack.c.bf16 %v8632_v63, %v8631_v28 }
 0x81c   : > { %v8606_v28 = vld [vmem:[#allocation3 + $0xf2] sm:$0xff]  ;;  %v8608_v63 = vld [vmem:[#allocation3 + $0x10a] sm:$0xff] }
 0x81e   : > { %18316 = vmatmul.mubr.f32.gmra.mrb[60].mxu0 %v26137_v1  ;;  %v9155_v1 = vld [vmem:[#allocation7 + $0xe48] sm:$0xff] }
 0x81f   : > { %18318 = vmatprep.mubr.f32.mxu0 %v24338_v20  ;;  %v20801_v44 = vpack.c.bf16 %v9155_v1, %v9154_v29  ;;  %v8609_v29 = vld [vmem:[#allocation3 + $0x112] sm:$0xff]  ;;  %v8610_v1 = vld [vmem:[#allocation3 + $0x122] sm:$0xff] }
 0x822   : > { %18319 = vmatmul.mubr.f32.gmra.mrb[62].mxu0 %v24341_v34 }
 0x823   : > { %18353 = vmatprep.mubr.f32.mxu0 %v24048_v48  ;;  %v8325_v48 = vld [vmem:[#allocation7 + $0xcc0] sm:$0xff] }
 0x826   : > { %18354 = vmatmul.mubr.f32.vlgmr.msra.gmra.mrb[32].mxu0 %v24051_v35  ;;  %v20737_v35 = vpack.c.bf16 %v8326_v8, %v8325_v48  ;;  %v8635_v48 = vld [vmem:[#allocation7 + $0xd60] sm:$0xff]  ;;  %v8636_v8 = vld [vmem:[#allocation7 + $0xd68] sm:$0xff] }
 0x827   : > { %18356 = vmatprep.mubr.f32.mxu0 %v24054_v23  ;;  %20724 = vmatpush3.bf16.msra.mxu0 %v20721_v2  ;;  %v8327_v23 = vld [vmem:[#allocation7 + $0xcd0] sm:$0xff]  ;;  %v9151_v2 = vld [vmem:[#allocation7 + $0xe28] sm:$0xff] }
 0x828   : > { %20726 = vmatprep.subr.bf16.mxu0 %v20725_v31 }
 0x82a   : > { %18357 = vmatmul.mubr.f32.gmra.mrb[34].mxu0 %v24057_v5  ;;  %v20741_v5 = vpack.c.bf16 %v8328_v18, %v8327_v23  ;;  %v9159_v23 = vld [vmem:[#allocation7 + $0xe68] sm:$0xff]  ;;  %v8294_v18 = vld [vmem:[#allocation3 + $0xa9] sm:$0xff] }
 0x82b   : > { %18359 = vmatprep.mubr.f32.mxu0 %v24060_v61  ;;  %20728 = vmatpush3.bf16.msra.mxu0 %v20725_v31  ;;  %v8329_v61 = vld [vmem:[#allocation7 + $0xce0] sm:$0xff]  ;;  %v8633_v31 = vld [vmem:[#allocation7 + $0xd50] sm:$0xff] }
 0x82c   : > { %20730 = vmatprep.subr.bf16.mxu0 %v20729_v10 }
 0x82e   : > { %18360 = vmatmul.mubr.f32.gmra.mrb[36].mxu0 %v24063_v47  ;;  %v20745_v47 = vpack.c.bf16 %v8330_v53, %v8329_v61  ;;  %v8295_v61 = vld [vmem:[#allocation3 + $0xb1] sm:$0xff]  ;;  %v8637_v53 = vld [vmem:[#allocation7 + $0xd70] sm:$0xff] }
 0x82f   : > { %18362 = vmatprep.mubr.f32.mxu0 %v24066_v50  ;;  %20732 = vmatpush3.bf16.msra.mxu0 %v20729_v10  ;;  %v8331_v50 = vld [vmem:[#allocation7 + $0xcf0] sm:$0xff] }
 0x830   : > { %20734 = vmatprep.subr.bf16.mxu0 %v20733_v13  ;;  %v9156_v10 = vld [vmem:[#allocation7 + $0xe50] sm:$0xff] }
 0x832   : > { %18363 = vmatmul.mubr.f32.gmra.mrb[38].mxu0 %v24069_v45  ;;  %v20749_v45 = vpack.c.bf16 %v8332_v24, %v8331_v50  ;;  %v8296_v50 = vld [vmem:[#allocation3 + $0xc1] sm:$0xff] }
 0x833   : > { %18365 = vmatprep.mubr.f32.mxu0 %v24072_v19  ;;  %20736 = vmatpush3.bf16.msra.mxu0 %v20733_v13  ;;  %v8623_v19 = vld [vmem:[#allocation7 + $0xd00] sm:$0xff]  ;;  %v20773_v13 = vpack.c.bf16 %v8634_v58, %v8633_v31  ;;  %v8613_v31 = vld [vmem:[#allocation3 + $0x142] sm:$0xff]  ;;  %v8615_v58 = vld [vmem:[#allocation3 + $0x15a] sm:$0xff] }
 0x834   : > { %20738 = vmatprep.subr.bf16.mxu0 %v20737_v35 }
 0x836   : > { %18366 = vmatmul.mubr.f32.gmra.mrb[40].mxu0 %v24075_v27  ;;  %v20753_v27 = vpack.c.bf16 %v8624_v46, %v8623_v19  ;;  %v8299_v19 = vld [vmem:[#allocation3 + $0xe1] sm:$0xff]  ;;  %v8300_v46 = vld [vmem:[#allocation3 + $0xf1] sm:$0xff] }
 0x837   : > { %18368 = vmatprep.mubr.f32.mxu0 %v24078_v43  ;;  %20740 = vmatpush3.bf16.msra.mxu0 %v20737_v35  ;;  %v26138_v43 = vld [vmem:[#allocation56_spill] sm:$0xff]  ;;  %v9158_v35 = vld [vmem:[#allocation7 + $0xe60] sm:$0xff] }
 0x838   : > { %20742 = vmatprep.subr.bf16.mxu0 %v20741_v5 }
 0x83a   : > { %18369 = vmatmul.mubr.f32.gmra.mrb[42].mxu0 %v24081_v25  ;;  %v26139_v25 = vld [vmem:[#allocation19_spill] sm:$0xff] }
 0x83b   : > { %18371 = vmatprep.mubr.f32.mxu0 %v24084_v33  ;;  %20744 = vmatpush3.bf16.msra.mxu0 %v20741_v5  ;;  %v26140_v33 = vld [vmem:[#allocation20_spill] sm:$0xff]  ;;  %v20809_v5 = vpack.c.bf16 %v9159_v23, %v9158_v35  ;;  %v9114_v23 = vld [vmem:[#allocation3 + $0x9] sm:$0xff] }
 0x83c   : > { %20746 = vmatprep.subr.bf16.mxu0 %v20745_v47  ;;  %v9113_v35 = vld [vmem:[#allocation3 + $0x1] sm:$0xff] }
 0x83d   : > { %18593 = vmatprep.mubr.f32.mxu1 %v9113_v35 }
 0x83e   : > { %18372 = vmatmul.mubr.f32.gmra.mrb[44].mxu0 %v24087_v40  ;;  %v8008_v40 = vld [vmem:[#allocation3 + $0x198] sm:$0xff] }
 0x83f   : > { %18374 = vmatprep.mubr.f32.mxu0 %v24090_v37  ;;  %20748 = vmatpush3.bf16.msra.mxu0 %v20745_v47  ;;  %v26141_v37 = vld [vmem:[#allocation21_spill] sm:$0xff] }
 0x840   : > { %20750 = vmatprep.subr.bf16.mxu0 %v20749_v45  ;;  %v8638_v47 = vld [vmem:[#allocation7 + $0xd78] sm:$0xff] }
 0x841   : > { %v20781_v24 = vpack.c.bf16 %v8638_v47, %v8637_v53  ;;  %v9101_v53 = vld [vmem:[#allocation7 + $0xda0] sm:$0xff]  ;;  %v9102_v47 = vld [vmem:[#allocation7 + $0xda8] sm:$0xff] }
 0x842   : > { %18375 = vmatmul.mubr.f32.gmra.mrb[46].mxu0 %v24093_v60  ;;  %v8009_v60 = vld [vmem:[#allocation3 + $0x1a0] sm:$0xff] }
 0x843   : > { %18377 = vmatprep.mubr.f32.mxu0 %v24096_v6  ;;  %20752 = vmatpush3.bf16.msra.mxu0 %v20749_v45  ;;  %v8625_v6 = vld [vmem:[#allocation7 + $0xd10] sm:$0xff] }
 0x844   : > { %20754 = vmatprep.subr.bf16.mxu0 %v20753_v27  ;;  %v8298_v45 = vld [vmem:[#allocation3 + $0xd9] sm:$0xff] }
 0x846   : > { %18378 = vmatmul.mubr.f32.gmra.mrb[48].mxu0 %v24099_v17  ;;  %v8626_v17 = vld [vmem:[#allocation7 + $0xd18] sm:$0xff] }
 0x847   : > { %18380 = vmatprep.mubr.f32.mxu0 %v24102_v54  ;;  %v9146_v54 = vld [vmem:[#allocation7 + $0xe00] sm:$0xff] }
 0x84a   : > { %18381 = vmatmul.mubr.f32.gmra.mrb[50].mxu0 %v24105_v4  ;;  %v9147_v4 = vld [vmem:[#allocation7 + $0xe08] sm:$0xff] }
 0x84b   : > { %18383 = vmatprep.mubr.f32.mxu0 %v24108_v57  ;;  %v9148_v57 = vld [vmem:[#allocation7 + $0xe10] sm:$0xff] }
 0x84e   : > { %18384 = vmatmul.mubr.f32.gmra.mrb[52].mxu0 %v24111_v16  ;;  %v20785_v16 = vpack.c.bf16 %v9147_v4, %v9146_v54  ;;  %v8310_v54 = vld [vmem:[#allocation3 + $0x169] sm:$0xff]  ;;  %v8311_v4 = vld [vmem:[#allocation3 + $0x171] sm:$0xff] }
 0x84f   : > { %18386 = vmatprep.mubr.f32.mxu0 %v24114_v22  ;;  %v9149_v22 = vld [vmem:[#allocation7 + $0xe18] sm:$0xff] }
 0x850   : > { %20786 = vmatprep.subr.bf16.mxu1 %v20785_v16 }
 0x851   : > { %20788 = vmatpush3.bf16.msra.mxu1 %v20785_v16  ;;  %v8314_v16 = vld [vmem:[#allocation3 + $0x199] sm:$0xff] }
 0x852   : > { %18387 = vmatmul.mubr.f32.gmra.mrb[54].mxu0 %v24117_v39  ;;  %v20757_v39 = vpack.c.bf16 %v8626_v17, %v8625_v6  ;;  %v8308_v6 = vld [vmem:[#allocation3 + $0x151] sm:$0xff]  ;;  %v8309_v17 = vld [vmem:[#allocation3 + $0x159] sm:$0xff] }
 0x853   : > { %18389 = vmatprep.mubr.f32.mxu0 %v24120_v36  ;;  %v8627_v36 = vld [vmem:[#allocation7 + $0xd20] sm:$0xff] }
 0x854   : > { %v20761_v9 = vpack.c.bf16 %v8628_v30, %v8627_v36  ;;  %v8590_v36 = vld [vmem:[#allocation3 + $0x32] sm:$0xff]  ;;  %v8592_v30 = vld [vmem:[#allocation3 + $0x4a] sm:$0xff] }
 0x856   : > { %18390 = vmatmul.mubr.f32.gmra.mrb[56].mxu0 %v24123_v59  ;;  %v20789_v59 = vpack.c.bf16 %v9149_v22, %v9148_v57  ;;  %v8312_v57 = vld [vmem:[#allocation3 + $0x181] sm:$0xff]  ;;  %v8313_v22 = vld [vmem:[#allocation3 + $0x189] sm:$0xff] }
 0x857   : > { %18392 = vmatprep.mubr.f32.mxu0 %v26138_v43  ;;  %v8302_v43 = vld [vmem:[#allocation3 + $0x109] sm:$0xff] }
 0x858   : > { %20790 = vmatprep.subr.bf16.mxu1 %v20789_v59 }
 0x859   : > { %20792 = vmatpush3.bf16.msra.mxu1 %v20789_v59  ;;  %v8591_v59 = vld [vmem:[#allocation3 + $0x3a] sm:$0xff] }
 0x85a   : > { %18393 = vmatmul.mubr.f32.gmra.mrb[58].mxu0 %v26139_v25  ;;  %v8303_v25 = vld [vmem:[#allocation3 + $0x111] sm:$0xff] }
 0x85b   : > { %18395 = vmatprep.mubr.f32.mxu0 %v26140_v33  ;;  %v8304_v33 = vld [vmem:[#allocation3 + $0x121] sm:$0xff] }
 0x85e   : > { %18396 = vmatmul.mubr.f32.gmra.mrb[60].mxu0 %v26141_v37  ;;  %v8306_v37 = vld [vmem:[#allocation3 + $0x139] sm:$0xff] }
 0x85f   : > { %18398 = vmatprep.mubr.f32.mxu0 %v8008_v40  ;;  %v8305_v40 = vld [vmem:[#allocation3 + $0x129] sm:$0xff] }
 0x862   : > { %18399 = vmatmul.mubr.f32.gmra.mrb[62].mxu0 %v8009_v60  ;;  %v8307_v60 = vld [vmem:[#allocation3 + $0x141] sm:$0xff] }
 0x863   : > { %18433 = vmatprep.mubr.f32.mxu0 %v24258_v52  ;;  %v20793_v52 = vpack.c.bf16 %v9151_v2, %v9150_v32  ;;  %v8593_v32 = vld [vmem:[#allocation3 + $0x52] sm:$0xff]  ;;  %v8594_v2 = vld [vmem:[#allocation3 + $0x62] sm:$0xff] }
 0x865   : > { %20794 = vmatprep.subr.bf16.mxu1 %v20793_v52 }
 0x866   : > { %18434 = vmatmul.mubr.f32.vlgmr.msra.gmra.mrb[32].mxu0 %v26142_v51  ;;  %20796 = vmatpush3.bf16.msra.mxu1 %v20793_v52  ;;  %v8595_v51 = vld [vmem:[#allocation3 + $0x6a] sm:$0xff]  ;;  %v8599_v52 = vld [vmem:[#allocation3 + $0x9a] sm:$0xff] }
 0x867   : > { %18436 = vmatprep.mubr.f32.mxu0 %v26143_v0  ;;  %20756 = vmatpush3.bf16.msra.mxu0 %v20753_v27  ;;  %v8301_v27 = vld [vmem:[#allocation3 + $0xf9] sm:$0xff] }
 0x868   : > { %20758 = vmatprep.subr.bf16.mxu0 %v20757_v39  ;;  %20798 = vmatprep.subr.bf16.mxu1 %v20797_v41  ;;  %v8596_v0 = vld [vmem:[#allocation3 + $0x7a] sm:$0xff] }
 0x86a   : > { %18437 = vmatmul.mubr.f32.gmra.mrb[34].mxu0 %v26144_v3  ;;  %20800 = vmatpush3.bf16.msra.mxu1 %v20797_v41  ;;  %v8603_v3 = vld [vmem:[#allocation3 + $0xca] sm:$0xff]  ;;  %v8607_v41 = vld [vmem:[#allocation3 + $0xfa] sm:$0xff] }
 0x86b   : > { %18439 = vmatprep.mubr.f32.mxu0 %v26145_v42  ;;  %20760 = vmatpush3.bf16.msra.mxu0 %v20757_v39  ;;  %v8315_v39 = vld [vmem:[#allocation3 + $0x1a1] sm:$0xff] }
 0x86c   : > { %20762 = vmatprep.subr.bf16.mxu0 %v20761_v9  ;;  %20802 = vmatprep.subr.bf16.mxu1 %v20801_v44  ;;  %v8604_v42 = vld [vmem:[#allocation3 + $0xda] sm:$0xff] }
 0x86e   : > { %18440 = vmatmul.mubr.f32.gmra.mrb[36].mxu0 %v26146_v49  ;;  %20804 = vmatpush3.bf16.msra.mxu1 %v20801_v44  ;;  %v8611_v49 = vld [vmem:[#allocation3 + $0x12a] sm:$0xff]  ;;  %v8614_v44 = vld [vmem:[#allocation3 + $0x152] sm:$0xff] }
 0x86f   : > { %18442 = vmatprep.mubr.f32.mxu0 %v24276_v26  ;;  %20764 = vmatpush3.bf16.msra.mxu0 %v20761_v9  ;;  %v20805_v26 = vpack.c.bf16 %v9157_v12, %v9156_v10  ;;  %v8597_v9 = vld [vmem:[#allocation3 + $0x82] sm:$0xff]  ;;  %v8616_v10 = vld [vmem:[#allocation3 + $0x16a] sm:$0xff]  ;;  %v8617_v12 = vld [vmem:[#allocation3 + $0x172] sm:$0xff] }
 0x870   : > { %20766 = vmatprep.subr.bf16.mxu0 %v20765_v14 }
 0x871   : > { %20806 = vmatprep.subr.bf16.mxu1 %v20805_v26 }
 0x872   : > { %18443 = vmatmul.mubr.f32.gmra.mrb[38].mxu0 %v24279_v15  ;;  %v20777_v15 = vpack.c.bf16 %v8636_v8, %v8635_v48  ;;  %20808 = vmatpush3.bf16.msra.mxu1 %v20805_v26  ;;  %v9160_v48 = vld [vmem:[#allocation7 + $0xe70] sm:$0xff]  ;;  %v9161_v26 = vld [vmem:[#allocation7 + $0xe78] sm:$0xff] }
 0x873   : > { %18445 = vmatprep.mubr.f32.mxu0 %v8292_v56  ;;  %20768 = vmatpush3.bf16.msra.mxu0 %v20765_v14  ;;  %v8605_v14 = vld [vmem:[#allocation3 + $0xe2] sm:$0xff]  ;;  %v8620_v56 = vld [vmem:[#allocation3 + $0x19a] sm:$0xff]  ;;  %v20813_v8 = vpack.c.bf16 %v9161_v26, %v9160_v48 }
 0x874   : > { %20770 = vmatprep.subr.bf16.mxu0 %v20769_v21  ;;  %20810 = vmatprep.subr.bf16.mxu1 %v20809_v5 }
 0x876   : > { %18446 = vmatmul.mubr.f32.gmra.mrb[40].mxu0 %v24283_v38  ;;  %v8297_v38 = vld [vmem:[#allocation3 + $0xc9] sm:$0xff]  ;;  %20812 = vmatpush3.bf16.msra.mxu1 %v20809_v5 }
 0x877   : > { %18448 = vmatprep.mubr.f32.mxu0 %v8294_v18  ;;  %20772 = vmatpush3.bf16.msra.mxu0 %v20769_v21  ;;  %v8612_v21 = vld [vmem:[#allocation3 + $0x13a] sm:$0xff]  ;;  %v9097_v18 = vld [vmem:[#allocation7 + $0xd80] sm:$0xff] }
 0x878   : > { %20774 = vmatprep.subr.bf16.mxu0 %v20773_v13  ;;  %20814 = vmatprep.subr.bf16.mxu1 %v20813_v8 }
 0x87a   : > { %18449 = vmatmul.mubr.f32.gmra.mrb[42].mxu0 %v8295_v61  ;;  %20816 = vmatpush3.bf16.msra.mxu1 %v20813_v8  ;;  %v9100_v61 = vld [vmem:[#allocation7 + $0xd98] sm:$0xff] }
 0x87b   : > { %18451 = vmatprep.mubr.f32.mxu0 %v8296_v50  ;;  %20776 = vmatpush3.bf16.msra.mxu0 %v20773_v13  ;;  %v8621_v13 = vld [vmem:[#allocation3 + $0x1a2] sm:$0xff]  ;;  %v20825_v50 = vpack.c.bf16 %v9102_v47, %v9101_v53 }
 0x87c   : > { %20778 = vmatprep.subr.bf16.mxu0 %v20777_v15 }
 0x87d   : > { %18594 = vmatmul.mubr.f32.vlgmr.msra.gmra.mrb[32].mxu1 %v9114_v23 }
 0x87e   : > { %18452 = vmatmul.mubr.f32.gmra.mrb[44].mxu0 %v8297_v38  ;;  %v9104_v38 = vld [vmem:[#allocation7 + $0xdb8] sm:$0xff] }
 0x87f   : > { %18454 = vmatprep.mubr.f32.mxu0 %v8298_v45  ;;  %20780 = vmatpush3.bf16.msra.mxu0 %v20777_v15  ;;  %v9098_v15 = vld [vmem:[#allocation7 + $0xd88] sm:$0xff] }
 0x880   : > { %20782 = vmatprep.subr.bf16.mxu0 %v20781_v24  ;;  %v20817_v5 = vpack.c.bf16 %v9098_v15, %v9097_v18 }
 0x882   : > { %18455 = vmatmul.mubr.f32.gmra.mrb[46].mxu0 %v8299_v19  ;;  %20818 = vmatprep.subr.bf16.mxu1 %v20817_v5  ;;  %v9105_v19 = vld [vmem:[#allocation7 + $0xdc0] sm:$0xff] }
 0x883   : > { %18457 = vmatprep.mubr.f32.mxu0 %v8300_v46  ;;  %20784 = vmatpush3.bf16.msra.mxu0 %v20781_v24  ;;  %v9103_v24 = vld [vmem:[#allocation7 + $0xdb0] sm:$0xff]  ;;  %v9106_v46 = vld [vmem:[#allocation7 + $0xdc8] sm:$0xff] }
 0x884   : > { %20820 = vmatpush3.bf16.msra.mxu1 %v20817_v5  ;;  %v20829_v45 = vpack.c.bf16 %v9104_v38, %v9103_v24 }
 0x886   : > { %18458 = vmatmul.mubr.f32.gmra.mrb[48].mxu0 %v8301_v27  ;;  %v20833_v27 = vpack.c.bf16 %v9106_v46, %v9105_v19 }
 0x887   : > { %18460 = vmatprep.mubr.f32.mxu0 %v8302_v43  ;;  %v9107_v43 = vld [vmem:[#allocation7 + $0xdd0] sm:$0xff] }
 0x88a   : > { %18461 = vmatmul.mubr.f32.gmra.mrb[50].mxu0 %v8303_v25  ;;  %v9108_v25 = vld [vmem:[#allocation7 + $0xdd8] sm:$0xff] }
 0x88b   : > { %18463 = vmatprep.mubr.f32.mxu0 %v8304_v33  ;;  %v20837_v33 = vpack.c.bf16 %v9108_v25, %v9107_v43 }
 0x88e   : > { %18464 = vmatmul.mubr.f32.gmra.mrb[52].mxu0 %v8305_v40  ;;  %v9109_v40 = vld [vmem:[#allocation7 + $0xde0] sm:$0xff] }
 0x88f   : > { %18466 = vmatprep.mubr.f32.mxu0 %v8306_v37  ;;  %v9110_v37 = vld [vmem:[#allocation7 + $0xde8] sm:$0xff] }
 0x892   : > { %18467 = vmatmul.mubr.f32.gmra.mrb[54].mxu0 %v8307_v60  ;;  %v20841_v60 = vpack.c.bf16 %v9110_v37, %v9109_v40 }
 0x893   : > { %18469 = vmatprep.mubr.f32.mxu0 %v8308_v6  ;;  %v9111_v6 = vld [vmem:[#allocation7 + $0xdf0] sm:$0xff] }
 0x896   : > { %18470 = vmatmul.mubr.f32.gmra.mrb[56].mxu0 %v8309_v17  ;;  %v9112_v17 = vld [vmem:[#allocation7 + $0xdf8] sm:$0xff] }
 0x897   : > { %18472 = vmatprep.mubr.f32.mxu0 %v8310_v54  ;;  %v20845_v54 = vpack.c.bf16 %v9112_v17, %v9111_v6 }
 0x89a   : > { %18473 = vmatmul.mubr.f32.gmra.mrb[58].mxu0 %v8311_v4  ;;  %v9645_v4 = vld [vmem:[#allocation7 + $0xe80] sm:$0xff] }
 0x89b   : > { %18475 = vmatprep.mubr.f32.mxu0 %v8312_v57  ;;  %v9646_v57 = vld [vmem:[#allocation7 + $0xe88] sm:$0xff] }
 0x89e   : > { %18476 = vmatmul.mubr.f32.gmra.mrb[60].mxu0 %v8313_v22  ;;  %v24388_v22 = vld [vmem:[#allocation9 + $0x2] ss:$0 sm:$0xff] }
 0x89f   : > { %18478 = vmatprep.mubr.f32.mxu0 %v8314_v16  ;;  %v24385_v16 = vpack.c.bf16 %v9646_v57, %v9645_v4 }
 0x8a2   : > { %18479 = vmatmul.mubr.f32.gmra.mrb[62].mxu0 %v8315_v39 }
 0x8a3   : > { %18513 = vmatprep.mubr.f32.mxu0 %v8590_v36 }
 0x8a6   : > { %18514 = vmatmul.mubr.f32.vlgmr.msra.gmra.mrb[32].mxu0 %v8591_v59 }
 0x8a7   : > { %18516 = vmatprep.mubr.f32.mxu0 %v8592_v30 }
 0x8aa   : > { %18517 = vmatmul.mubr.f32.gmra.mrb[34].mxu0 %v8593_v32 }
 0x8ab   : > { %18519 = vmatprep.mubr.f32.mxu0 %v8594_v2 }
 0x8ae   : > { %18520 = vmatmul.mubr.f32.gmra.mrb[36].mxu0 %v8595_v51 }
 0x8af   : > { %18522 = vmatprep.mubr.f32.mxu0 %v8596_v0 }
 0x8b2   : > { %18523 = vmatmul.mubr.f32.gmra.mrb[38].mxu0 %v8597_v9 }
 0x8b3   : > { %18525 = vmatprep.mubr.f32.mxu0 %v8598_v11 }
 0x8b6   : > { %18526 = vmatmul.mubr.f32.gmra.mrb[40].mxu0 %v8599_v52 }
 0x8b7   : > { %18528 = vmatprep.mubr.f32.mxu0 %v8600_v62 }
 0x8ba   : > { %18529 = vmatmul.mubr.f32.gmra.mrb[42].mxu0 %v8601_v55 }
 0x8bb   : > { %18531 = vmatprep.mubr.f32.mxu0 %v8602_v7 }
 0x8be   : > { %18532 = vmatmul.mubr.f32.gmra.mrb[44].mxu0 %v8603_v3 }
 0x8bf   : > { %18534 = vmatprep.mubr.f32.mxu0 %v8604_v42 }
 0x8c2   : > { %18535 = vmatmul.mubr.f32.gmra.mrb[46].mxu0 %v8605_v14 }
 0x8c3   : > { %18537 = vmatprep.mubr.f32.mxu0 %v8606_v28 }
 0x8c6   : > { %18538 = vmatmul.mubr.f32.gmra.mrb[48].mxu0 %v8607_v41 }
 0x8c7   : > { %18540 = vmatprep.mubr.f32.mxu0 %v8608_v63 }
 0x8ca   : > { %18541 = vmatmul.mubr.f32.gmra.mrb[50].mxu0 %v8609_v29 }
 0x8cb   : > { %18543 = vmatprep.mubr.f32.mxu0 %v8610_v1 }
 0x8ce   : > { %18544 = vmatmul.mubr.f32.gmra.mrb[52].mxu0 %v8611_v49 }
 0x8cf   : > { %18546 = vmatprep.mubr.f32.mxu0 %v8612_v21 }
 0x8d2   : > { %18547 = vmatmul.mubr.f32.gmra.mrb[54].mxu0 %v8613_v31 }
 0x8d3   : > { %18549 = vmatprep.mubr.f32.mxu0 %v8614_v44 }
 0x8d6   : > { %18550 = vmatmul.mubr.f32.gmra.mrb[56].mxu0 %v8615_v58 }
 0x8d7   : > { %18552 = vmatprep.mubr.f32.mxu0 %v8616_v10 }
 0x8da   : > { %18553 = vmatmul.mubr.f32.gmra.mrb[58].mxu0 %v8617_v12 }
 0x8db   : > { %18555 = vmatprep.mubr.f32.mxu0 %v24338_v20  ;;  %v9099_v20 = vld [vmem:[#allocation7 + $0xd90] sm:$0xff] }
 0x8de   : > { %18556 = vmatmul.mubr.f32.gmra.mrb[60].mxu0 %v24341_v34  ;;  %v20821_v34 = vpack.c.bf16 %v9100_v61, %v9099_v20 }
 0x8df   : > { %18558 = vmatprep.mubr.f32.mxu0 %v8620_v56 }
 0x8e0   : > { %20822 = vmatprep.subr.bf16.mxu1 %v20821_v34 }
 0x8e1   : > { %20824 = vmatpush3.bf16.msra.mxu1 %v20821_v34 }
 0x8e2   : > { %18559 = vmatmul.mubr.f32.gmra.mrb[62].mxu0 %v8621_v13  ;;  %20826 = vmatprep.subr.bf16.mxu1 %v20825_v50 }
 0x8e5   : > { %20828 = vmatpush3.bf16.msra.mxu1 %v20825_v50 }
 0x8e6   : > { %20830 = vmatprep.subr.bf16.mxu1 %v20829_v45 }
 0x8e9   : > { %20832 = vmatpush3.bf16.msra.mxu1 %v20829_v45 }
 0x8ea   : > { %20834 = vmatprep.subr.bf16.mxu1 %v20833_v27 }
 0x8ed   : > { %20836 = vmatpush3.bf16.msra.mxu1 %v20833_v27 }
 0x8ee   : > { %20838 = vmatprep.subr.bf16.mxu1 %v20837_v33 }
 0x8f1   : > { %20840 = vmatpush3.bf16.msra.mxu1 %v20837_v33 }
 0x8f2   : > { %20842 = vmatprep.subr.bf16.mxu1 %v20841_v60 }
 0x8f5   : > { %20844 = vmatpush3.bf16.msra.mxu1 %v20841_v60 }
 0x8f6   : > { %20846 = vmatprep.subr.bf16.mxu1 %v20845_v54 }
 0x8f9   : > { %20848 = vmatpush3.bf16.msra.mxu1 %v20845_v54 }
 0x8fa   : > { %20850 = vmatprep.subr.bf16.mxu1 %v24385_v16 }
 0x979   : > { %v18515_v39 = vpop.f32.mrb[32].mxu0 }
 0x97a   : > { %v8905_v36 = vadd.f32 %v18515_v39, %v24388_v22  ;;  %v8705_v59 = vpop.f32.mrb[33].mxu0 }
 0x97b   : > { %v8904_v30 = vadd.f32 %v24388_v22, %v8705_v59 }
 0x97c   : > { %v8937_v32 = vmax.f32 %v8905_v36, 0.0 }
 0x97d   : > { %v8936_v2 = vmax.f32 %v8904_v30, 0.0  ;;  %v18518_v51 = vpop.f32.mrb[34].mxu0 }
 0x97e   : > { %9033 = vst [vmem:[#allocation3 + $0x21] sm:$0xff] %v8937_v32  ;;  %v8907_v0 = vadd.f32 %v18518_v51, %v24388_v22  ;;  %v8715_v9 = vpop.f32.mrb[35].mxu0 }
 0x97f   : > { %9032 = vst [vmem:[#allocation3 + $0x19] sm:$0xff] %v8936_v2  ;;  %v8906_v11 = vadd.f32 %v24388_v22, %v8715_v9  ;;  %18596 = vmatprep.mubr.f32.mxu1 %v8936_v2 }
 0x980   : > { %v8939_v52 = vmax.f32 %v8907_v0, 0.0  ;;  %18597 = vmatmul.mubr.f32.gmra.mrb[34].mxu1 %v8937_v32 }
 0x981   : > { %v8938_v62 = vmax.f32 %v8906_v11, 0.0  ;;  %v18521_v55 = vpop.f32.mrb[36].mxu0 }
 0x982   : > { %9035 = vst [vmem:[#allocation3 + $0x39] sm:$0xff] %v8939_v52  ;;  %v8909_v7 = vadd.f32 %v18521_v55, %v24388_v22  ;;  %v8725_v3 = vpop.f32.mrb[37].mxu0 }
 0x983   : > { %9034 = vst [vmem:[#allocation3 + $0x31] sm:$0xff] %v8938_v62  ;;  %v8908_v42 = vadd.f32 %v24388_v22, %v8725_v3  ;;  %18599 = vmatprep.mubr.f32.mxu1 %v8938_v62 }
 0x984   : > { %v8941_v14 = vmax.f32 %v8909_v7, 0.0  ;;  %18600 = vmatmul.mubr.f32.gmra.mrb[36].mxu1 %v8939_v52 }
 0x985   : > { %v8940_v28 = vmax.f32 %v8908_v42, 0.0  ;;  %v18524_v41 = vpop.f32.mrb[38].mxu0 }
 0x986   : > { %9037 = vst [vmem:[#allocation3 + $0x51] sm:$0xff] %v8941_v14  ;;  %v8911_v63 = vadd.f32 %v18524_v41, %v24388_v22  ;;  %v8735_v29 = vpop.f32.mrb[39].mxu0 }
 0x987   : > { %9036 = vst [vmem:[#allocation3 + $0x49] sm:$0xff] %v8940_v28  ;;  %v8910_v1 = vadd.f32 %v24388_v22, %v8735_v29  ;;  %18602 = vmatprep.mubr.f32.mxu1 %v8940_v28 }
 0x988   : > { %v8943_v49 = vmax.f32 %v8911_v63, 0.0  ;;  %18603 = vmatmul.mubr.f32.gmra.mrb[38].mxu1 %v8941_v14 }
 0x989   : > { %v8942_v21 = vmax.f32 %v8910_v1, 0.0  ;;  %v18527_v31 = vpop.f32.mrb[40].mxu0 }
 0x98a   : > { %9039 = vst [vmem:[#allocation3 + $0x69] sm:$0xff] %v8943_v49  ;;  %v8913_v44 = vadd.f32 %v18527_v31, %v24388_v22  ;;  %v8745_v58 = vpop.f32.mrb[41].mxu0 }
 0x98b   : > { %9038 = vst [vmem:[#allocation3 + $0x61] sm:$0xff] %v8942_v21  ;;  %v8912_v10 = vadd.f32 %v24388_v22, %v8745_v58  ;;  %18605 = vmatprep.mubr.f32.mxu1 %v8942_v21 }
 0x98c   : > { %v8945_v12 = vmax.f32 %v8913_v44, 0.0  ;;  %18606 = vmatmul.mubr.f32.gmra.mrb[40].mxu1 %v8943_v49 }
 0x98d   : > { %v8944_v56 = vmax.f32 %v8912_v10, 0.0  ;;  %v18530_v13 = vpop.f32.mrb[42].mxu0 }
 0x98e   : > { %9041 = vst [vmem:[#allocation3 + $0x81] sm:$0xff] %v8945_v12  ;;  %v8915_v48 = vadd.f32 %v18530_v13, %v24388_v22  ;;  %v8755_v26 = vpop.f32.mrb[43].mxu0 }
 0x98f   : > { %9040 = vst [vmem:[#allocation3 + $0x79] sm:$0xff] %v8944_v56  ;;  %v8914_v8 = vadd.f32 %v24388_v22, %v8755_v26  ;;  %18608 = vmatprep.mubr.f32.mxu1 %v8944_v56 }
 0x990   : > { %v8947_v35 = vmax.f32 %v8915_v48, 0.0  ;;  %18609 = vmatmul.mubr.f32.gmra.mrb[42].mxu1 %v8945_v12  ;;  %v9064_v48 = vld [vmem:[#allocation3] sm:$0xff] }
 0x991   : > { %v24402_v23 = vmax.f32 %v8914_v8, 0.0  ;;  %v18533_v18 = vpop.f32.mrb[44].mxu0  ;;  %v9647_v8 = vld [vmem:[#allocation7 + $0xe90] sm:$0xff] }
 0x992   : > { %9043 = vst [vmem:[#allocation3 + $0x99] sm:$0xff] %v8947_v35  ;;  %v8917_v15 = vadd.f32 %v18533_v18, %v24388_v22  ;;  %v8765_v5 = vpop.f32.mrb[45].mxu0 }
 0x993   : > { %9042 = vst [vmem:[#allocation3 + $0x91] sm:$0xff] %v24402_v23  ;;  %v8916_v20 = vadd.f32 %v24388_v22, %v8765_v5  ;;  %18611 = vmatprep.mubr.f32.mxu1 %v24402_v23  ;;  %v9065_v5 = vld [vmem:[#allocation3 + $0x8] sm:$0xff] }
 0x994   : > { %v24408_v61 = vmax.f32 %v8917_v15, 0.0  ;;  %18612 = vmatmul.mubr.f32.gmra.mrb[44].mxu1 %v8947_v35  ;;  %v9648_v35 = vld [vmem:[#allocation7 + $0xe98] sm:$0xff] }
 0x995   : > { %v24410_v34 = vmax.f32 %v8916_v20, 0.0  ;;  %v18536_v53 = vpop.f32.mrb[46].mxu0  ;;  %v20853_v20 = vpack.c.bf16 %v9648_v35, %v9647_v8 }
 0x996   : > { %9045 = vst [vmem:[#allocation3 + $0xb1] sm:$0xff] %v24408_v61  ;;  %v8919_v47 = vadd.f32 %v18536_v53, %v24388_v22  ;;  %v8775_v50 = vpop.f32.mrb[47].mxu0  ;;  %v9650_v53 = vld [vmem:[#allocation7 + $0xea8] sm:$0xff] }
 0x997   : > { %9044 = vst [vmem:[#allocation3 + $0xa9] sm:$0xff] %v24410_v34  ;;  %v8918_v24 = vadd.f32 %v24388_v22, %v8775_v50  ;;  %18614 = vmatprep.mubr.f32.mxu1 %v24410_v34 }
 0x998   : > { %v24417_v38 = vmax.f32 %v8919_v47, 0.0  ;;  %18615 = vmatmul.mubr.f32.gmra.mrb[46].mxu1 %v24408_v61  ;;  %v24508_v47 = vld [vmem:[#allocation3 + $0x18] sm:$0xff] }
 0x999   : > { %v24420_v45 = vmax.f32 %v8918_v24, 0.0  ;;  %v18539_v19 = vpop.f32.mrb[48].mxu0  ;;  %v24512_v24 = vld [vmem:[#allocation3 + $0x20] sm:$0xff] }
 0x99a   : > { %9047 = vst [vmem:[#allocation3 + $0xc9] sm:$0xff] %v24417_v38  ;;  %v8921_v46 = vadd.f32 %v18539_v19, %v24388_v22  ;;  %v8785_v27 = vpop.f32.mrb[49].mxu0  ;;  %v9651_v19 = vld [vmem:[#allocation7 + $0xeb0] sm:$0xff] }
 0x99b   : > { %9046 = vst [vmem:[#allocation3 + $0xc1] sm:$0xff] %v24420_v45  ;;  %v8920_v43 = vadd.f32 %v24388_v22, %v8785_v27  ;;  %18617 = vmatprep.mubr.f32.mxu1 %v24420_v45  ;;  %v24515_v27 = vld [vmem:[#allocation3 + $0x30] sm:$0xff] }
 0x99c   : > { %v24427_v25 = vmax.f32 %v8921_v46, 0.0  ;;  %18618 = vmatmul.mubr.f32.gmra.mrb[48].mxu1 %v24417_v38  ;;  %v9652_v46 = vld [vmem:[#allocation7 + $0xeb8] sm:$0xff] }
 0x99d   : > { %v24430_v33 = vmax.f32 %v8920_v43, 0.0  ;;  %v18542_v40 = vpop.f32.mrb[50].mxu0  ;;  %v20861_v43 = vpack.c.bf16 %v9652_v46, %v9651_v19 }
 0x99e   : > { %9049 = vst [vmem:[#allocation3 + $0xe1] sm:$0xff] %v24427_v25  ;;  %v8923_v37 = vadd.f32 %v18542_v40, %v24388_v22  ;;  %v8795_v60 = vpop.f32.mrb[51].mxu0  ;;  %v24518_v40 = vld [vmem:[#allocation3 + $0x38] sm:$0xff] }
 0x99f   : > { %9048 = vst [vmem:[#allocation3 + $0xd9] sm:$0xff] %v24430_v33  ;;  %v8922_v6 = vadd.f32 %v24388_v22, %v8795_v60  ;;  %18620 = vmatprep.mubr.f32.mxu1 %v24430_v33  ;;  %v9654_v60 = vld [vmem:[#allocation7 + $0xec8] sm:$0xff] }
 0x9a0   : > { %v24437_v17 = vmax.f32 %v8923_v37, 0.0  ;;  %18621 = vmatmul.mubr.f32.gmra.mrb[50].mxu1 %v24427_v25  ;;  %v9653_v37 = vld [vmem:[#allocation7 + $0xec0] sm:$0xff] }
 0x9a1   : > { %v24440_v54 = vmax.f32 %v8922_v6, 0.0  ;;  %v18545_v4 = vpop.f32.mrb[52].mxu0  ;;  %v20865_v6 = vpack.c.bf16 %v9654_v60, %v9653_v37 }
 0x9a2   : > { %9051 = vst [vmem:[#allocation3 + $0xf9] sm:$0xff] %v24437_v17  ;;  %v8925_v57 = vadd.f32 %v18545_v4, %v24388_v22  ;;  %v8805_v39 = vpop.f32.mrb[53].mxu0  ;;  %v24524_v4 = vld [vmem:[#allocation3 + $0x50] sm:$0xff] }
 0x9a3   : > { %9050 = vst [vmem:[#allocation3 + $0xf1] sm:$0xff] %v24440_v54  ;;  %v8924_v36 = vadd.f32 %v24388_v22, %v8805_v39  ;;  %18623 = vmatprep.mubr.f32.mxu1 %v24440_v54  ;;  %v9656_v39 = vld [vmem:[#allocation7 + $0xed8] sm:$0xff] }
 0x9a4   : > { %v24447_v59 = vmax.f32 %v8925_v57, 0.0  ;;  %18624 = vmatmul.mubr.f32.gmra.mrb[52].mxu1 %v24437_v17  ;;  %v9655_v57 = vld [vmem:[#allocation7 + $0xed0] sm:$0xff] }
 0x9a5   : > { %v24450_v30 = vmax.f32 %v8924_v36, 0.0  ;;  %v18548_v32 = vpop.f32.mrb[54].mxu0  ;;  %v24527_v36 = vld [vmem:[#allocation3 + $0x60] sm:$0xff] }
 0x9a6   : > { %9053 = vst [vmem:[#allocation3 + $0x111] sm:$0xff] %v24447_v59  ;;  %v8927_v2 = vadd.f32 %v18548_v32, %v24388_v22  ;;  %v8815_v51 = vpop.f32.mrb[55].mxu0  ;;  %v20869_v32 = vpack.c.bf16 %v9656_v39, %v9655_v57  ;;  %v24557_v8 = vld [vmem:[#allocation3 + $0xd8] sm:$0xff]  ;;  %v24560_v35 = vld [vmem:[#allocation3 + $0xe0] sm:$0xff] }
 0x9a7   : > { %9052 = vst [vmem:[#allocation3 + $0x109] sm:$0xff] %v24450_v30  ;;  %v8926_v0 = vadd.f32 %v24388_v22, %v8815_v51  ;;  %18626 = vmatprep.mubr.f32.mxu1 %v24450_v30  ;;  %v9657_v51 = vld [vmem:[#allocation7 + $0xee0] sm:$0xff]  ;;  %v9612_v57 = vld [vmem:[#allocation3 + $0x2] sm:$0xff] }
 0x9a8   : > { %v24457_v9 = vmax.f32 %v8927_v2, 0.0  ;;  %18627 = vmatmul.mubr.f32.gmra.mrb[54].mxu1 %v24447_v59  ;;  %v24530_v2 = vld [vmem:[#allocation3 + $0x68] sm:$0xff] }
 0x9a9   : > { %v24460_v11 = vmax.f32 %v8926_v0, 0.0  ;;  %v18551_v52 = vpop.f32.mrb[56].mxu0  ;;  %v9658_v0 = vld [vmem:[#allocation7 + $0xee8] sm:$0xff] }
 0x9aa   : > { %9055 = vst [vmem:[#allocation3 + $0x129] sm:$0xff] %v24457_v9  ;;  %v8929_v62 = vadd.f32 %v18551_v52, %v24388_v22  ;;  %v8825_v55 = vpop.f32.mrb[57].mxu0  ;;  %v24533_v52 = vld [vmem:[#allocation3 + $0x78] sm:$0xff] }
 0x9ab   : > { %9054 = vst [vmem:[#allocation3 + $0x121] sm:$0xff] %v24460_v11  ;;  %v8928_v7 = vadd.f32 %v24388_v22, %v8825_v55  ;;  %18629 = vmatprep.mubr.f32.mxu1 %v24460_v11  ;;  %v24536_v55 = vld [vmem:[#allocation3 + $0x80] sm:$0xff] }
 0x9ac   : > { %v24467_v3 = vmax.f32 %v8929_v62, 0.0  ;;  %18630 = vmatmul.mubr.f32.gmra.mrb[56].mxu1 %v24457_v9  ;;  %v20873_v62 = vpack.c.bf16 %v9658_v0, %v9657_v51  ;;  %v9954_v51 = vld [vmem:[#allocation7 + $0xf18] sm:$0xff] }
 0x9ad   : > { %v24470_v42 = vmax.f32 %v8928_v7, 0.0  ;;  %v18554_v14 = vpop.f32.mrb[58].mxu0  ;;  %v9659_v7 = vld [vmem:[#allocation7 + $0xef0] sm:$0xff]  ;;  %v9613_v0 = vld [vmem:[#allocation3 + $0xa] sm:$0xff] }
 0x9ae   : > { %9057 = vst [vmem:[#allocation3 + $0x141] sm:$0xff] %v24467_v3  ;;  %v8931_v28 = vadd.f32 %v18554_v14, %v24388_v22  ;;  %v8835_v41 = vpop.f32.mrb[59].mxu0  ;;  %v9660_v14 = vld [vmem:[#allocation7 + $0xef8] sm:$0xff] }
 0x9af   : > { %9056 = vst [vmem:[#allocation3 + $0x139] sm:$0xff] %v24470_v42  ;;  %v8930_v63 = vadd.f32 %v24388_v22, %v8835_v41  ;;  %18632 = vmatprep.mubr.f32.mxu1 %v24470_v42  ;;  %v20877_v41 = vpack.c.bf16 %v9660_v14, %v9659_v7  ;;  %v9955_v7 = vld [vmem:[#allocation7 + $0xf20] sm:$0xff]  ;;  %v9956_v14 = vld [vmem:[#allocation7 + $0xf28] sm:$0xff] }
 0x9b0   : > { %v24477_v29 = vmax.f32 %v8931_v28, 0.0  ;;  %18633 = vmatmul.mubr.f32.gmra.mrb[58].mxu1 %v24467_v3  ;;  %v24539_v28 = vld [vmem:[#allocation3 + $0x90] sm:$0xff] }
 0x9b1   : > { %v24480_v1 = vmax.f32 %v8930_v63, 0.0  ;;  %v18557_v49 = vpop.f32.mrb[60].mxu0  ;;  %v24542_v63 = vld [vmem:[#allocation3 + $0x98] sm:$0xff] }
 0x9b2   : > { %9059 = vst [vmem:[#allocation3 + $0x159] sm:$0xff] %v24477_v29  ;;  %v8933_v21 = vadd.f32 %v18557_v49, %v24388_v22  ;;  %v8845_v31 = vpop.f32.mrb[61].mxu0  ;;  %v9951_v49 = vld [vmem:[#allocation7 + $0xf00] sm:$0xff]  ;;  %v24578_v19 = vld [vmem:[#allocation3 + $0x128] sm:$0xff] }
 0x9b3   : > { %9058 = vst [vmem:[#allocation3 + $0x151] sm:$0xff] %v24480_v1  ;;  %v8932_v44 = vadd.f32 %v24388_v22, %v8845_v31  ;;  %18635 = vmatprep.mubr.f32.mxu1 %v24480_v1  ;;  %v24545_v31 = vld [vmem:[#allocation3 + $0xa8] sm:$0xff] }
 0x9b4   : > { %v24487_v58 = vmax.f32 %v8933_v21, 0.0  ;;  %18636 = vmatmul.mubr.f32.gmra.mrb[60].mxu1 %v24477_v29  ;;  %v9952_v21 = vld [vmem:[#allocation7 + $0xf08] sm:$0xff] }
 0x9b5   : > { %v24490_v10 = vmax.f32 %v8932_v44, 0.0  ;;  %v18560_v12 = vpop.f32.mrb[62].mxu0  ;;  %v20881_v44 = vpack.c.bf16 %v9952_v21, %v9951_v49  ;;  %v20889_v49 = vpack.c.bf16 %v9956_v14, %v9955_v7  ;;  %v24602_v21 = vld [vmem:[#allocation3 + $0x22] sm:$0xff]  ;;  %v24614_v14 = vld [vmem:[#allocation3 + $0x52] sm:$0xff] }
 0x9b6   : > { %9061 = vst [vmem:[#allocation3 + $0x171] sm:$0xff] %v24487_v58  ;;  %v24494_v56 = vadd.f32 %v18560_v12, %v24388_v22  ;;  %v8855_v13 = vpop.f32.mrb[63].mxu0  ;;  %v24548_v12 = vld [vmem:[#allocation3 + $0xb0] sm:$0xff]  ;;  %v24581_v46 = vld [vmem:[#allocation3 + $0x138] sm:$0xff]  ;;  %26150 = vst [vmem:[#allocation22_spill] sm:$0xff] %v24602_v21 }
 0x9b7   : > { %9060 = vst [vmem:[#allocation3 + $0x169] sm:$0xff] %v24490_v10  ;;  %v24498_v26 = vadd.f32 %v24388_v22, %v8855_v13  ;;  %18638 = vmatprep.mubr.f32.mxu1 %v24490_v10  ;;  %v9649_v22 = vld [vmem:[#allocation7 + $0xea0] sm:$0xff]  ;;  %v24551_v13 = vld [vmem:[#allocation3 + $0xc0] sm:$0xff]  ;;  %26154 = vst [vmem:[#allocation26_spill] sm:$0xff] %v24614_v14 }
 0x9b8   : > { %26147 = vst [vmem:[#allocation53_spill] sm:$0xff] %v24494_v56  ;;  %v25867_v18 = vmax.f32 %v24494_v56, 0.0  ;;  %18639 = vmatmul.mubr.f32.gmra.mrb[62].mxu1 %v24487_v58  ;;  %v20857_v50 = vpack.c.bf16 %v9650_v53, %v9649_v22  ;;  %v24569_v22 = vld [vmem:[#allocation3 + $0x108] sm:$0xff]  ;;  %v24572_v53 = vld [vmem:[#allocation3 + $0x110] sm:$0xff] }
 0x9b9   : > { %v25868_v15 = vmax.f32 %v24498_v26, 0.0  ;;  %18673 = vmatprep.mubr.f32.mxu1 %v9064_v48  ;;  %v24554_v48 = vld [vmem:[#allocation3 + $0xc8] sm:$0xff]  ;;  %v24605_v56 = vld [vmem:[#allocation3 + $0x32] sm:$0xff] }
 0x9ba   : > { %9063 = vst [vmem:[#allocation3 + $0x189] sm:$0xff] %v25867_v18  ;;  %v24587_v37 = vld [vmem:[#allocation3 + $0x150] sm:$0xff]  ;;  %v24590_v60 = vld [vmem:[#allocation3 + $0x158] sm:$0xff]  ;;  %v9957_v18 = vld [vmem:[#allocation7 + $0xf30] sm:$0xff] }
 0x9bb   : > { %9062 = vst [vmem:[#allocation3 + $0x181] sm:$0xff] %v25868_v15  ;;  %v9958_v15 = vld [vmem:[#allocation7 + $0xf38] sm:$0xff]  ;;  %26151 = vst [vmem:[#allocation23_spill] sm:$0xff] %v24605_v56 }
 0x9bc   : > { %18674 = vmatmul.mubr.f32.vlgmr.msra.gmra.mrb[32].mxu1 %v9065_v5  ;;  %v24563_v5 = vld [vmem:[#allocation3 + $0xf0] sm:$0xff] }
 0x9bd   : > { %18676 = vmatprep.mubr.f32.mxu1 %v24508_v47  ;;  %20852 = vmatpush3.bf16.msra.mxu1 %v24385_v16  ;;  %v24521_v16 = vld [vmem:[#allocation3 + $0x48] sm:$0xff] }
 0x9be   : > { %20854 = vmatprep.subr.bf16.mxu1 %v20853_v20  ;;  %v24596_v39 = vld [vmem:[#allocation3 + $0x170] sm:$0xff] }
 0x9bf   : > { %26149 = vst [vmem:[#allocation55_spill] sm:$0xff] %v24596_v39 }
 0x9c0   : > { %18677 = vmatmul.mubr.f32.gmra.mrb[34].mxu1 %v24512_v24 }
 0x9c1   : > { %18679 = vmatprep.mubr.f32.mxu1 %v24515_v27  ;;  %20856 = vmatpush3.bf16.msra.mxu1 %v20853_v20  ;;  %v24566_v20 = vld [vmem:[#allocation3 + $0xf8] sm:$0xff] }
 0x9c2   : > { %20858 = vmatprep.subr.bf16.mxu1 %v20857_v50 }
 0x9c4   : > { %18680 = vmatmul.mubr.f32.gmra.mrb[36].mxu1 %v24518_v40 }
 0x9c5   : > { %18682 = vmatprep.mubr.f32.mxu1 %v24521_v16  ;;  %20860 = vmatpush3.bf16.msra.mxu1 %v20857_v50  ;;  %v24575_v50 = vld [vmem:[#allocation3 + $0x120] sm:$0xff] }
 0x9c6   : > { %20862 = vmatprep.subr.bf16.mxu1 %v20861_v43 }
 0x9c8   : > { %18683 = vmatmul.mubr.f32.gmra.mrb[38].mxu1 %v24524_v4 }
 0x9c9   : > { %18685 = vmatprep.mubr.f32.mxu1 %v24527_v36  ;;  %20864 = vmatpush3.bf16.msra.mxu1 %v20861_v43  ;;  %v24584_v43 = vld [vmem:[#allocation3 + $0x140] sm:$0xff] }
 0x9ca   : > { %20866 = vmatprep.subr.bf16.mxu1 %v20865_v6 }
 0x9cc   : > { %18686 = vmatmul.mubr.f32.gmra.mrb[40].mxu1 %v24530_v2 }
 0x9cd   : > { %18688 = vmatprep.mubr.f32.mxu1 %v24533_v52  ;;  %20868 = vmatpush3.bf16.msra.mxu1 %v20865_v6  ;;  %v24593_v6 = vld [vmem:[#allocation3 + $0x168] sm:$0xff] }
 0x9ce   : > { %20870 = vmatprep.subr.bf16.mxu1 %v20869_v32  ;;  %26148 = vst [vmem:[#allocation54_spill] sm:$0xff] %v24593_v6 }
 0x9d0   : > { %18689 = vmatmul.mubr.f32.gmra.mrb[42].mxu1 %v24536_v55 }
 0x9d1   : > { %18691 = vmatprep.mubr.f32.mxu1 %v24539_v28  ;;  %20872 = vmatpush3.bf16.msra.mxu1 %v20869_v32  ;;  %v9953_v32 = vld [vmem:[#allocation7 + $0xf10] sm:$0xff] }
 0x9d2   : > { %20874 = vmatprep.subr.bf16.mxu1 %v20873_v62 }
 0x9d4   : > { %18692 = vmatmul.mubr.f32.gmra.mrb[44].mxu1 %v24542_v63 }
 0x9d5   : > { %18694 = vmatprep.mubr.f32.mxu1 %v24545_v31  ;;  %20876 = vmatpush3.bf16.msra.mxu1 %v20873_v62  ;;  %v20885_v62 = vpack.c.bf16 %v9954_v51, %v9953_v32  ;;  %v24608_v32 = vld [vmem:[#allocation3 + $0x3a] sm:$0xff]  ;;  %v9959_v51 = vld [vmem:[#allocation7 + $0xf40] sm:$0xff] }
 0x9d6   : > { %20878 = vmatprep.subr.bf16.mxu1 %v20877_v41  ;;  %26152 = vst [vmem:[#allocation24_spill] sm:$0xff] %v24608_v32 }
 0x9d8   : > { %18695 = vmatmul.mubr.f32.gmra.mrb[46].mxu1 %v24548_v12 }
 0x9d9   : > { %18697 = vmatprep.mubr.f32.mxu1 %v24551_v13  ;;  %20880 = vmatpush3.bf16.msra.mxu1 %v20877_v41  ;;  %v24599_v41 = vld [vmem:[#allocation3 + $0x1a] sm:$0xff] }
 0x9da   : > { %20882 = vmatprep.subr.bf16.mxu1 %v20881_v44 }
 0x9dc   : > { %18698 = vmatmul.mubr.f32.gmra.mrb[48].mxu1 %v24554_v48 }
 0x9dd   : > { %18700 = vmatprep.mubr.f32.mxu1 %v24557_v8 }
 0x9e0   : > { %18701 = vmatmul.mubr.f32.gmra.mrb[50].mxu1 %v24560_v35 }
 0x9e1   : > { %18703 = vmatprep.mubr.f32.mxu1 %v24563_v5 }
 0x9e4   : > { %18704 = vmatmul.mubr.f32.gmra.mrb[52].mxu1 %v24566_v20 }
 0x9e5   : > { %18706 = vmatprep.mubr.f32.mxu1 %v24569_v22 }
 0x9e8   : > { %18707 = vmatmul.mubr.f32.gmra.mrb[54].mxu1 %v24572_v53 }
 0x9e9   : > { %18709 = vmatprep.mubr.f32.mxu1 %v24575_v50 }
 0x9ec   : > { %18710 = vmatmul.mubr.f32.gmra.mrb[56].mxu1 %v24578_v19 }
 0x9ed   : > { %18712 = vmatprep.mubr.f32.mxu1 %v24581_v46 }
 0x9f0   : > { %18713 = vmatmul.mubr.f32.gmra.mrb[58].mxu1 %v24584_v43 }
 0x9f1   : > { %18715 = vmatprep.mubr.f32.mxu1 %v24587_v37 }
 0x9f4   : > { %18716 = vmatmul.mubr.f32.gmra.mrb[60].mxu1 %v24590_v60 }
 0x9f5   : > { %18718 = vmatprep.mubr.f32.mxu1 %v24593_v6 }
 0x9f8   : > { %18719 = vmatmul.mubr.f32.gmra.mrb[62].mxu1 %v24596_v39 }
 0x9f9   : > { %18753 = vmatprep.mubr.f32.mxu1 %v9612_v57  ;;  %v20893_v57 = vpack.c.bf16 %v9958_v15, %v9957_v18  ;;  %v24617_v18 = vld [vmem:[#allocation3 + $0x62] sm:$0xff] }
 0x9fa   : > { %26155 = vst [vmem:[#allocation27_spill] sm:$0xff] %v24617_v18 }
 0x9fc   : > { %18754 = vmatmul.mubr.f32.vlgmr.msra.gmra.mrb[32].mxu1 %v9613_v0  ;;  %v9960_v0 = vld [vmem:[#allocation7 + $0xf48] sm:$0xff] }
 0x9fd   : > { %18756 = vmatprep.mubr.f32.mxu1 %v24599_v41  ;;  %20884 = vmatpush3.bf16.msra.mxu1 %v20881_v44  ;;  %v24611_v44 = vld [vmem:[#allocation3 + $0x4a] sm:$0xff]  ;;  %v20897_v7 = vpack.c.bf16 %v9960_v0, %v9959_v51  ;;  %v24626_v0 = vld [vmem:[#allocation3 + $0x82] sm:$0xff] }
 0x9fe   : > { %20886 = vmatprep.subr.bf16.mxu1 %v20885_v62  ;;  %26153 = vst [vmem:[#allocation25_spill] sm:$0xff] %v24611_v44 }
 0xa00   : > { %18757 = vmatmul.mubr.f32.gmra.mrb[34].mxu1 %v24602_v21  ;;  %v9961_v21 = vld [vmem:[#allocation7 + $0xf50] sm:$0xff] }
 0xa01   : > { %18759 = vmatprep.mubr.f32.mxu1 %v24605_v56  ;;  %20888 = vmatpush3.bf16.msra.mxu1 %v20885_v62  ;;  %v9962_v56 = vld [vmem:[#allocation7 + $0xf58] sm:$0xff] }
 0xa02   : > { %20890 = vmatprep.subr.bf16.mxu1 %v20889_v49  ;;  %v20901_v15 = vpack.c.bf16 %v9962_v56, %v9961_v21  ;;  %v24620_v62 = vld [vmem:[#allocation3 + $0x6a] sm:$0xff]  ;;  %v24629_v56 = vld [vmem:[#allocation3 + $0x92] sm:$0xff] }
 0xa03   : > { %26156 = vst [vmem:[#allocation28_spill] sm:$0xff] %v24620_v62 }
 0xa04   : > { %18760 = vmatmul.mubr.f32.gmra.mrb[36].mxu1 %v24608_v32  ;;  %v9963_v32 = vld [vmem:[#allocation7 + $0xf60] sm:$0xff] }
 0xa05   : > { %18762 = vmatprep.mubr.f32.mxu1 %v24611_v44  ;;  %20892 = vmatpush3.bf16.msra.mxu1 %v20889_v49  ;;  %v9964_v44 = vld [vmem:[#allocation7 + $0xf68] sm:$0xff] }
 0xa06   : > { %20894 = vmatprep.subr.bf16.mxu1 %v20893_v57  ;;  %v24623_v49 = vld [vmem:[#allocation3 + $0x7a] sm:$0xff]  ;;  %v20905_v51 = vpack.c.bf16 %v9964_v44, %v9963_v32  ;;  %v24635_v32 = vld [vmem:[#allocation3 + $0xaa] sm:$0xff] }
 0xa07   : > { %26157 = vst [vmem:[#allocation29_spill] sm:$0xff] %v24623_v49  ;;  %26158 = vst [vmem:[#allocation30_spill] sm:$0xff] %v24635_v32 }
 0xa08   : > { %18763 = vmatmul.mubr.f32.gmra.mrb[38].mxu1 %v24614_v14  ;;  %v9965_v14 = vld [vmem:[#allocation7 + $0xf70] sm:$0xff] }
 0xa09   : > { %18765 = vmatprep.mubr.f32.mxu1 %v24617_v18  ;;  %20896 = vmatpush3.bf16.msra.mxu1 %v20893_v57  ;;  %v9966_v18 = vld [vmem:[#allocation7 + $0xf78] sm:$0xff]  ;;  %v24632_v57 = vld [vmem:[#allocation3 + $0x9a] sm:$0xff] }
 0xa0a   : > { %20898 = vmatprep.subr.bf16.mxu1 %v20897_v7  ;;  %v20909_v21 = vpack.c.bf16 %v9966_v18, %v9965_v14  ;;  %v24644_v14 = vld [vmem:[#allocation3 + $0xca] sm:$0xff]  ;;  %v24647_v18 = vld [vmem:[#allocation3 + $0xda] sm:$0xff] }
 0xa0b   : > { %26161 = vst [vmem:[#allocation33_spill] sm:$0xff] %v24644_v14  ;;  %26162 = vst [vmem:[#allocation34_spill] sm:$0xff] %v24647_v18 }
 0xa0c   : > { %18766 = vmatmul.mubr.f32.gmra.mrb[40].mxu1 %v24620_v62  ;;  %v10257_v62 = vld [vmem:[#allocation7 + $0xf80] sm:$0xff] }
 0xa0d   : > { %18768 = vmatprep.mubr.f32.mxu1 %v24623_v49  ;;  %20900 = vmatpush3.bf16.msra.mxu1 %v20897_v7  ;;  %v10258_v49 = vld [vmem:[#allocation7 + $0xf88] sm:$0xff] }
 0xa0e   : > { %20902 = vmatprep.subr.bf16.mxu1 %v20901_v15  ;;  %v20913_v44 = vpack.c.bf16 %v10258_v49, %v10257_v62  ;;  %v24638_v7 = vld [vmem:[#allocation3 + $0xb2] sm:$0xff]  ;;  %v24656_v49 = vld [vmem:[#allocation3 + $0xfa] sm:$0xff] }
 0xa0f   : > { %26159 = vst [vmem:[#allocation31_spill] sm:$0xff] %v24638_v7  ;;  %v24653_v62 = vld [vmem:[#allocation3 + $0xf2] sm:$0xff]  ;;  %26165 = vst [vmem:[#allocation37_spill] sm:$0xff] %v24656_v49 }
 0xa10   : > { %18769 = vmatmul.mubr.f32.gmra.mrb[42].mxu1 %v24626_v0  ;;  %26164 = vst [vmem:[#allocation36_spill] sm:$0xff] %v24653_v62 }
 0xa11   : > { %18771 = vmatprep.mubr.f32.mxu1 %v24629_v56  ;;  %20904 = vmatpush3.bf16.msra.mxu1 %v20901_v15  ;;  %v24641_v15 = vld [vmem:[#allocation3 + $0xc2] sm:$0xff] }
 0xa12   : > { %20906 = vmatprep.subr.bf16.mxu1 %v20905_v51  ;;  %26160 = vst [vmem:[#allocation32_spill] sm:$0xff] %v24641_v15 }
 0xa14   : > { %18772 = vmatmul.mubr.f32.gmra.mrb[44].mxu1 %v24632_v57 }
 0xa15   : > { %18774 = vmatprep.mubr.f32.mxu1 %v24635_v32  ;;  %20908 = vmatpush3.bf16.msra.mxu1 %v20905_v51  ;;  %v24650_v51 = vld [vmem:[#allocation3 + $0xe2] sm:$0xff]  ;;  %v10262_v32 = vld [vmem:[#allocation7 + $0xfa8] sm:$0xff] }
 0xa16   : > { %20910 = vmatprep.subr.bf16.mxu1 %v20909_v21  ;;  %26163 = vst [vmem:[#allocation35_spill] sm:$0xff] %v24650_v51 }
 0xa18   : > { %18775 = vmatmul.mubr.f32.gmra.mrb[46].mxu1 %v24638_v7  ;;  %v10261_v7 = vld [vmem:[#allocation7 + $0xfa0] sm:$0xff] }
 0xa19   : > { %18777 = vmatprep.mubr.f32.mxu1 %v24641_v15  ;;  %20912 = vmatpush3.bf16.msra.mxu1 %v20909_v21  ;;  %v24659_v21 = vld [vmem:[#allocation3 + $0x10a] sm:$0xff]  ;;  %v10259_v15 = vld [vmem:[#allocation7 + $0xf90] sm:$0xff] }
 0xa1a   : > { %20914 = vmatprep.subr.bf16.mxu1 %v20913_v44  ;;  %26166 = vst [vmem:[#allocation38_spill] sm:$0xff] %v24659_v21 }
 0xa1c   : > { %18778 = vmatmul.mubr.f32.gmra.mrb[48].mxu1 %v24644_v14  ;;  %v24662_v14 = vld [vmem:[#allocation3 + $0x112] sm:$0xff] }
 0xa1d   : > { %18780 = vmatprep.mubr.f32.mxu1 %v24647_v18  ;;  %26167 = vst [vmem:[#allocation39_spill] sm:$0xff] %v24662_v14  ;;  %v24665_v18 = vld [vmem:[#allocation3 + $0x122] sm:$0xff] }
 0xa1e   : > { %26168 = vst [vmem:[#allocation40_spill] sm:$0xff] %v24665_v18 }
 0xa20   : > { %18781 = vmatmul.mubr.f32.gmra.mrb[50].mxu1 %v24650_v51  ;;  %v24668_v51 = vld [vmem:[#allocation3 + $0x12a] sm:$0xff] }
 0xa21   : > { %18783 = vmatprep.mubr.f32.mxu1 %v24653_v62  ;;  %26169 = vst [vmem:[#allocation41_spill] sm:$0xff] %v24668_v51  ;;  %v24671_v62 = vld [vmem:[#allocation3 + $0x13a] sm:$0xff] }
 0xa22   : > { %26170 = vst [vmem:[#allocation42_spill] sm:$0xff] %v24671_v62 }
 0xa24   : > { %18784 = vmatmul.mubr.f32.gmra.mrb[52].mxu1 %v24656_v49  ;;  %v24674_v49 = vld [vmem:[#allocation3 + $0x142] sm:$0xff] }
 0xa25   : > { %18786 = vmatprep.mubr.f32.mxu1 %v24659_v21  ;;  %26171 = vst [vmem:[#allocation43_spill] sm:$0xff] %v24674_v49  ;;  %v24677_v21 = vld [vmem:[#allocation3 + $0x152] sm:$0xff] }
 0xa26   : > { %26172 = vst [vmem:[#allocation44_spill] sm:$0xff] %v24677_v21 }
 0xa28   : > { %18787 = vmatmul.mubr.f32.gmra.mrb[54].mxu1 %v24662_v14  ;;  %v24680_v14 = vld [vmem:[#allocation3 + $0x15a] sm:$0xff] }
 0xa29   : > { %18789 = vmatprep.mubr.f32.mxu1 %v24665_v18  ;;  %26173 = vst [vmem:[#allocation45_spill] sm:$0xff] %v24680_v14  ;;  %v24683_v18 = vld [vmem:[#allocation3 + $0x16a] sm:$0xff] }
 0xa2a   : > { %26174 = vst [vmem:[#allocation46_spill] sm:$0xff] %v24683_v18 }
 0xa2c   : > { %18790 = vmatmul.mubr.f32.gmra.mrb[56].mxu1 %v24668_v51  ;;  %v24686_v51 = vld [vmem:[#allocation3 + $0x172] sm:$0xff] }
 0xa2d   : > { %18792 = vmatprep.mubr.f32.mxu1 %v24671_v62  ;;  %26175 = vst [vmem:[#allocation47_spill] sm:$0xff] %v24686_v51  ;;  %v10260_v62 = vld [vmem:[#allocation7 + $0xf98] sm:$0xff] }
 0xa30   : > { %18793 = vmatmul.mubr.f32.gmra.mrb[58].mxu1 %v24674_v49  ;;  %v20917_v49 = vpack.c.bf16 %v10260_v62, %v10259_v15  ;;  %v10266_v15 = vld [vmem:[#allocation7 + $0xfc8] sm:$0xff]  ;;  %v10269_v62 = vld [vmem:[#allocation7 + $0xfe0] sm:$0xff] }
 0xa31   : > { %18795 = vmatprep.mubr.f32.mxu1 %v24677_v21  ;;  %v10263_v21 = vld [vmem:[#allocation7 + $0xfb0] sm:$0xff] }
 0xa34   : > { %18796 = vmatmul.mubr.f32.gmra.mrb[60].mxu1 %v24680_v14  ;;  %v20921_v14 = vpack.c.bf16 %v10262_v32, %v10261_v7  ;;  %v10268_v32 = vld [vmem:[#allocation7 + $0xfd8] sm:$0xff] }
 0xa35   : > { %18798 = vmatprep.mubr.f32.mxu1 %v24683_v18  ;;  %v10264_v18 = vld [vmem:[#allocation7 + $0xfb8] sm:$0xff] }
 0xa38   : > { %18799 = vmatmul.mubr.f32.gmra.mrb[62].mxu1 %v24686_v51  ;;  %v20925_v51 = vpack.c.bf16 %v10264_v18, %v10263_v21  ;;  %v10270_v18 = vld [vmem:[#allocation7 + $0xfe8] sm:$0xff]  ;;  %v10272_v21 = vld [vmem:[#allocation7 + $0xff8] sm:$0xff] }
 0xa39   : > { %18833 = vmatprep.mubr.f32.mxu1 %v24508_v47  ;;  %v10265_v47 = vld [vmem:[#allocation7 + $0xfc0] sm:$0xff] }
 0xa3c   : > { %18834 = vmatmul.mubr.f32.vlgmr.msra.gmra.mrb[32].mxu1 %v24512_v24  ;;  %v20929_v24 = vpack.c.bf16 %v10266_v15, %v10265_v47  ;;  %v10563_v47 = vld [vmem:[#allocation7 + $0x1000] sm:$0xff]  ;;  %v10564_v15 = vld [vmem:[#allocation7 + $0x1008] sm:$0xff] }
 0xa3d   : > { %18836 = vmatprep.mubr.f32.mxu1 %v24515_v27  ;;  %20916 = vmatpush3.bf16.msra.mxu1 %v20913_v44  ;;  %v10267_v44 = vld [vmem:[#allocation7 + $0xfd0] sm:$0xff] }
 0xa3e   : > { %20918 = vmatprep.subr.bf16.mxu1 %v20917_v49  ;;  %v20933_v7 = vpack.c.bf16 %v10268_v32, %v10267_v44  ;;  %v24719_v44 = vld [vmem:[#allocation3 + $0x180] sm:$0xff]  ;;  %v24722_v32 = vld [vmem:[#allocation3 + $0x188] sm:$0xff] }
 0xa3f   : > { %26176 = vst [vmem:[#allocation56_spill] sm:$0xff] %v24719_v44  ;;  %26177 = vst [vmem:[#allocation19_spill] sm:$0xff] %v24722_v32 }
 0xa40   : > { %18837 = vmatmul.mubr.f32.gmra.mrb[34].mxu1 %v24518_v40 }
 0xa41   : > { %18839 = vmatprep.mubr.f32.mxu1 %v24521_v16  ;;  %20920 = vmatpush3.bf16.msra.mxu1 %v20917_v49  ;;  %v10271_v49 = vld [vmem:[#allocation7 + $0xff0] sm:$0xff] }
 0xa42   : > { %20922 = vmatprep.subr.bf16.mxu1 %v20921_v14 }
 0xa44   : > { %18840 = vmatmul.mubr.f32.gmra.mrb[36].mxu1 %v24524_v4 }
 0xa45   : > { %18842 = vmatprep.mubr.f32.mxu1 %v24527_v36  ;;  %20924 = vmatpush3.bf16.msra.mxu1 %v20921_v14  ;;  %v20937_v14 = vpack.c.bf16 %v10270_v18, %v10269_v62  ;;  %v10566_v62 = vld [vmem:[#allocation7 + $0x1018] sm:$0xff]  ;;  %v10224_v18 = vld [vmem:[#allocation3 + $0x19] sm:$0xff] }
 0xa46   : > { %20926 = vmatprep.subr.bf16.mxu1 %v20925_v51 }
 0xa48   : > { %18843 = vmatmul.mubr.f32.gmra.mrb[38].mxu1 %v24530_v2 }
 0xa49   : > { %18845 = vmatprep.mubr.f32.mxu1 %v24533_v52  ;;  %20928 = vmatpush3.bf16.msra.mxu1 %v20925_v51  ;;  %v20941_v51 = vpack.c.bf16 %v10272_v21, %v10271_v49  ;;  %v10225_v49 = vld [vmem:[#allocation3 + $0x21] sm:$0xff]  ;;  %v10567_v21 = vld [vmem:[#allocation7 + $0x1020] sm:$0xff] }
 0xa4a   : > { %20930 = vmatprep.subr.bf16.mxu1 %v20929_v24 }
 0xa4c   : > { %18846 = vmatmul.mubr.f32.gmra.mrb[40].mxu1 %v24536_v55 }
 0xa4d   : > { %18848 = vmatprep.mubr.f32.mxu1 %v24539_v28  ;;  %20932 = vmatpush3.bf16.msra.mxu1 %v20929_v24  ;;  %v20945_v24 = vpack.c.bf16 %v10564_v15, %v10563_v47  ;;  %v24725_v47 = vld [vmem:[#allocation3 + $0x31] sm:$0xff] }
 0xa4e   : > { %20934 = vmatprep.subr.bf16.mxu1 %v20933_v7 }
 0xa50   : > { %18849 = vmatmul.mubr.f32.gmra.mrb[42].mxu1 %v24542_v63 }
 0xa51   : > { %18851 = vmatprep.mubr.f32.mxu1 %v24545_v31  ;;  %20936 = vmatpush3.bf16.msra.mxu1 %v20933_v7  ;;  %v10565_v7 = vld [vmem:[#allocation7 + $0x1010] sm:$0xff] }
 0xa52   : > { %20938 = vmatprep.subr.bf16.mxu1 %v20937_v14 }
 0xa54   : > { %18852 = vmatmul.mubr.f32.gmra.mrb[44].mxu1 %v24548_v12 }
 0xa55   : > { %18854 = vmatprep.mubr.f32.mxu1 %v24551_v13  ;;  %20940 = vmatpush3.bf16.msra.mxu1 %v20937_v14  ;;  %v20949_v14 = vpack.c.bf16 %v10566_v62, %v10565_v7  ;;  %v24734_v62 = vld [vmem:[#allocation3 + $0x51] sm:$0xff] }
 0xa56   : > { %20942 = vmatprep.subr.bf16.mxu1 %v20941_v51  ;;  %26180 = vst [vmem:[#allocation48_spill] sm:$0xff] %v24734_v62 }
 0xa58   : > { %18855 = vmatmul.mubr.f32.gmra.mrb[46].mxu1 %v24554_v48 }
 0xa59   : > { %18857 = vmatprep.mubr.f32.mxu1 %v24557_v8  ;;  %20944 = vmatpush3.bf16.msra.mxu1 %v20941_v51  ;;  %v10568_v51 = vld [vmem:[#allocation7 + $0x1028] sm:$0xff] }
 0xa5a   : > { %20946 = vmatprep.subr.bf16.mxu1 %v20945_v24  ;;  %v20953_v15 = vpack.c.bf16 %v10568_v51, %v10567_v21  ;;  %v24740_v51 = vld [vmem:[#allocation3 + $0x69] sm:$0xff] }
 0xa5b   : > { %26182 = vst [vmem:[#allocation50_spill] sm:$0xff] %v24740_v51 }
 0xa5c   : > { %18858 = vmatmul.mubr.f32.gmra.mrb[48].mxu1 %v24560_v35 }
 0xa5d   : > { %18860 = vmatprep.mubr.f32.mxu1 %v24563_v5 }
 0xa60   : > { %18861 = vmatmul.mubr.f32.gmra.mrb[50].mxu1 %v24566_v20 }
 0xa61   : > { %18863 = vmatprep.mubr.f32.mxu1 %v24569_v22 }
 0xa64   : > { %18864 = vmatmul.mubr.f32.gmra.mrb[52].mxu1 %v24572_v53 }
 0xa65   : > { %18866 = vmatprep.mubr.f32.mxu1 %v24575_v50 }
 0xa68   : > { %18867 = vmatmul.mubr.f32.gmra.mrb[54].mxu1 %v24578_v19 }
 0xa69   : > { %18869 = vmatprep.mubr.f32.mxu1 %v24581_v46 }
 0xa6c   : > { %18870 = vmatmul.mubr.f32.gmra.mrb[56].mxu1 %v24584_v43 }
 0xa6d   : > { %18872 = vmatprep.mubr.f32.mxu1 %v24587_v37 }
 0xa70   : > { %18873 = vmatmul.mubr.f32.gmra.mrb[58].mxu1 %v24590_v60 }
 0xa71   : > { %18875 = vmatprep.mubr.f32.mxu1 %v24593_v6  ;;  %v10570_v6 = vld [vmem:[#allocation7 + $0x1038] sm:$0xff] }
 0xa74   : > { %18876 = vmatmul.mubr.f32.gmra.mrb[60].mxu1 %v24596_v39  ;;  %v10569_v39 = vld [vmem:[#allocation7 + $0x1030] sm:$0xff] }
 0xa75   : > { %18878 = vmatprep.mubr.f32.mxu1 %v24719_v44  ;;  %v24728_v44 = vld [vmem:[#allocation3 + $0x39] sm:$0xff]  ;;  %v20957_v7 = vpack.c.bf16 %v10570_v6, %v10569_v39 }
 0xa76   : > { %26178 = vst [vmem:[#allocation20_spill] sm:$0xff] %v24728_v44  ;;  %v24743_v6 = vld [vmem:[#allocation3 + $0x79] sm:$0xff] }
 0xa78   : > { %18879 = vmatmul.mubr.f32.gmra.mrb[62].mxu1 %v24722_v32  ;;  %v24731_v32 = vld [vmem:[#allocation3 + $0x49] sm:$0xff] }
 0xa79   : > { %18913 = vmatprep.mubr.f32.mxu1 %v10224_v18  ;;  %26179 = vst [vmem:[#allocation21_spill] sm:$0xff] %v24731_v32  ;;  %v10571_v18 = vld [vmem:[#allocation7 + $0x1040] sm:$0xff] }
 0xa7c   : > { %18914 = vmatmul.mubr.f32.vlgmr.msra.gmra.mrb[32].mxu1 %v10225_v49  ;;  %v10572_v49 = vld [vmem:[#allocation7 + $0x1048] sm:$0xff] }
 0xa7d   : > { %18916 = vmatprep.mubr.f32.mxu1 %v24725_v47  ;;  %20948 = vmatpush3.bf16.msra.mxu1 %v20945_v24  ;;  %v24737_v24 = vld [vmem:[#allocation3 + $0x61] sm:$0xff]  ;;  %v20961_v21 = vpack.c.bf16 %v10572_v49, %v10571_v18  ;;  %v24750_v18 = vld [vmem:[#allocation3 + $0x99] sm:$0xff] }
 0xa7e   : > { %20950 = vmatprep.subr.bf16.mxu1 %v20949_v14  ;;  %26181 = vst [vmem:[#allocation49_spill] sm:$0xff] %v24737_v24  ;;  %v10577_v49 = vld [vmem:[#allocation7 + $0x1070] sm:$0xff] }
 0xa80   : > { %18917 = vmatmul.mubr.f32.gmra.mrb[34].mxu1 %v24728_v44  ;;  %v10573_v44 = vld [vmem:[#allocation7 + $0x1050] sm:$0xff] }
 0xa81   : > { %18919 = vmatprep.mubr.f32.mxu1 %v24731_v32  ;;  %20952 = vmatpush3.bf16.msra.mxu1 %v20949_v14  ;;  %v10574_v32 = vld [vmem:[#allocation7 + $0x1058] sm:$0xff] }
 0xa82   : > { %20954 = vmatprep.subr.bf16.mxu1 %v20953_v15  ;;  %v20965_v39 = vpack.c.bf16 %v10574_v32, %v10573_v44  ;;  %v24746_v14 = vld [vmem:[#allocation3 + $0x81] sm:$0xff]  ;;  %v10869_v32 = vld [vmem:[#allocation7 + $0x1080] sm:$0xff] }
 0xa84   : > { %18920 = vmatmul.mubr.f32.gmra.mrb[36].mxu1 %v24734_v62  ;;  %v10575_v62 = vld [vmem:[#allocation7 + $0x1060] sm:$0xff] }
 0xa85   : > { %18922 = vmatprep.mubr.f32.mxu1 %v24737_v24  ;;  %20956 = vmatpush3.bf16.msra.mxu1 %v20953_v15  ;;  %v10576_v24 = vld [vmem:[#allocation7 + $0x1068] sm:$0xff] }
 0xa86   : > { %20958 = vmatprep.subr.bf16.mxu1 %v20957_v7  ;;  %v20969_v15 = vpack.c.bf16 %v10576_v24, %v10575_v62  ;;  %v10879_v24 = vld [vmem:[#allocation7 + $0x10d0] sm:$0xff] }
 0xa88   : > { %18923 = vmatmul.mubr.f32.gmra.mrb[38].mxu1 %v24740_v51  ;;  %v10578_v51 = vld [vmem:[#allocation7 + $0x1078] sm:$0xff] }
 0xa89   : > { %18925 = vmatprep.mubr.f32.mxu1 %v24743_v6  ;;  %20960 = vmatpush3.bf16.msra.mxu1 %v20957_v7  ;;  %v20973_v44 = vpack.c.bf16 %v10578_v51, %v10577_v49  ;;  %v10870_v7 = vld [vmem:[#allocation7 + $0x1088] sm:$0xff]  ;;  %v26192_v51 = vld [vmem:[#allocation28_spill] sm:$0xff]  ;;  %v10881_v49 = vld [vmem:[#allocation7 + $0x10e0] sm:$0xff] }
 0xa8a   : > { %20962 = vmatprep.subr.bf16.mxu1 %v20961_v21 }
 0xa8c   : > { %18926 = vmatmul.mubr.f32.gmra.mrb[40].mxu1 %v24746_v14 }
 0xa8d   : > { %18928 = vmatprep.mubr.f32.mxu1 %v24402_v23  ;;  %20964 = vmatpush3.bf16.msra.mxu1 %v20961_v21  ;;  %v20977_v23 = vpack.c.bf16 %v10870_v7, %v10869_v32  ;;  %v10880_v21 = vld [vmem:[#allocation7 + $0x10d8] sm:$0xff]  ;;  %v10883_v7 = vld [vmem:[#allocation7 + $0x10f0] sm:$0xff] }
 0xa8e   : > { %20966 = vmatprep.subr.bf16.mxu1 %v20965_v39 }
 0xa90   : > { %18929 = vmatmul.mubr.f32.gmra.mrb[42].mxu1 %v24750_v18 }
 0xa91   : > { %18931 = vmatprep.mubr.f32.mxu1 %v24410_v34  ;;  %20968 = vmatpush3.bf16.msra.mxu1 %v20965_v39  ;;  %v10871_v34 = vld [vmem:[#allocation7 + $0x1090] sm:$0xff]  ;;  %v26193_v39 = vld [vmem:[#allocation29_spill] sm:$0xff] }
 0xa92   : > { %20970 = vmatprep.subr.bf16.mxu1 %v20969_v15 }
 0xa94   : > { %18932 = vmatmul.mubr.f32.gmra.mrb[44].mxu1 %v24408_v61  ;;  %v26183_v61 = vmax.f32 %v24498_v26, 0.0  ;;  %v26190_v26 = vld [vmem:[#allocation26_spill] sm:$0xff] }
 0xa95   : > { %18934 = vmatprep.mubr.f32.mxu1 %v24420_v45  ;;  %20972 = vmatpush3.bf16.msra.mxu1 %v20969_v15  ;;  %v26184_v45 = vld [vmem:[#allocation53_spill] sm:$0xff]  ;;  %v20997_v15 = vpack.c.bf16 %v10880_v21, %v10879_v24  ;;  %v11177_v24 = vld [vmem:[#allocation7 + $0x1110] sm:$0xff] }
 0xa96   : > { %20974 = vmatprep.subr.bf16.mxu1 %v20973_v44  ;;  %v11178_v21 = vld [vmem:[#allocation7 + $0x1118] sm:$0xff] }
 0xa98   : > { %18935 = vmatmul.mubr.f32.gmra.mrb[46].mxu1 %v24417_v38  ;;  %v10872_v38 = vld [vmem:[#allocation7 + $0x1098] sm:$0xff] }
 0xa99   : > { %18937 = vmatprep.mubr.f32.mxu1 %v24430_v33  ;;  %20976 = vmatpush3.bf16.msra.mxu1 %v20973_v44  ;;  %v20981_v33 = vpack.c.bf16 %v10872_v38, %v10871_v34  ;;  %v10882_v44 = vld [vmem:[#allocation7 + $0x10e8] sm:$0xff]  ;;  %v11175_v38 = vld [vmem:[#allocation7 + $0x1100] sm:$0xff] }
 0xa9a   : > { %20978 = vmatprep.subr.bf16.mxu1 %v20977_v23  ;;  %v21001_v32 = vpack.c.bf16 %v10882_v44, %v10881_v49  ;;  %v11181_v44 = vld [vmem:[#allocation7 + $0x1130] sm:$0xff] }
 0xa9c   : > { %18938 = vmatmul.mubr.f32.gmra.mrb[48].mxu1 %v24427_v25  ;;  %v26185_v25 = vmax.f32 %v26184_v45, 0.0  ;;  %v11176_v45 = vld [vmem:[#allocation7 + $0x1108] sm:$0xff] }
 0xa9d   : > { %18940 = vmatprep.mubr.f32.mxu1 %v24440_v54  ;;  %v10874_v54 = vld [vmem:[#allocation7 + $0x10a8] sm:$0xff] }
 0xaa0   : > { %18941 = vmatmul.mubr.f32.gmra.mrb[50].mxu1 %v24437_v17  ;;  %v10873_v17 = vld [vmem:[#allocation7 + $0x10a0] sm:$0xff] }
 0xaa1   : > { %18943 = vmatprep.mubr.f32.mxu1 %v24450_v30  ;;  %v26187_v30 = vld [vmem:[#allocation23_spill] sm:$0xff] }
 0xaa4   : > { %18944 = vmatmul.mubr.f32.gmra.mrb[52].mxu1 %v24447_v59  ;;  %v26186_v59 = vld [vmem:[#allocation22_spill] sm:$0xff] }
 0xaa5   : > { %18946 = vmatprep.mubr.f32.mxu1 %v24460_v11  ;;  %v10875_v11 = vld [vmem:[#allocation7 + $0x10b0] sm:$0xff] }
 0xaa8   : > { %18947 = vmatmul.mubr.f32.gmra.mrb[54].mxu1 %v24457_v9  ;;  %v20985_v9 = vpack.c.bf16 %v10874_v54, %v10873_v17  ;;  %v26198_v17 = vld [vmem:[#allocation34_spill] sm:$0xff]  ;;  %v26200_v54 = vld [vmem:[#allocation36_spill] sm:$0xff] }
 0xaa9   : > { %18949 = vmatprep.mubr.f32.mxu1 %v24470_v42  ;;  %v26188_v42 = vld [vmem:[#allocation24_spill] sm:$0xff] }
 0xaac   : > { %18950 = vmatmul.mubr.f32.gmra.mrb[56].mxu1 %v24467_v3  ;;  %v10876_v3 = vld [vmem:[#allocation7 + $0x10b8] sm:$0xff] }
 0xaad   : > { %18952 = vmatprep.mubr.f32.mxu1 %v24480_v1  ;;  %v20989_v1 = vpack.c.bf16 %v10876_v3, %v10875_v11  ;;  %v26204_v11 = vld [vmem:[#allocation40_spill] sm:$0xff]  ;;  %v26205_v3 = vld [vmem:[#allocation41_spill] sm:$0xff] }
 0xab0   : > { %18953 = vmatmul.mubr.f32.gmra.mrb[58].mxu1 %v24477_v29  ;;  %v26189_v29 = vld [vmem:[#allocation25_spill] sm:$0xff] }
 0xab1   : > { %18955 = vmatprep.mubr.f32.mxu1 %v24490_v10  ;;  %v10878_v10 = vld [vmem:[#allocation7 + $0x10c8] sm:$0xff] }
 0xab4   : > { %18956 = vmatmul.mubr.f32.gmra.mrb[60].mxu1 %v24487_v58  ;;  %v10877_v58 = vld [vmem:[#allocation7 + $0x10c0] sm:$0xff] }
 0xab5   : > { %18958 = vmatprep.mubr.f32.mxu1 %v26183_v61  ;;  %v20993_v62 = vpack.c.bf16 %v10878_v10, %v10877_v58  ;;  %v26194_v61 = vld [vmem:[#allocation30_spill] sm:$0xff]  ;;  %v26209_v58 = vld [vmem:[#allocation45_spill] sm:$0xff] }
 0xab6   : > { %v26210_v10 = vld [vmem:[#allocation46_spill] sm:$0xff] }
 0xab8   : > { %18959 = vmatmul.mubr.f32.gmra.mrb[62].mxu1 %v26185_v25  ;;  %v26195_v25 = vld [vmem:[#allocation31_spill] sm:$0xff] }
 0xab9   : > { %18993 = vmatprep.mubr.f32.mxu1 %v24599_v41  ;;  %v26191_v41 = vld [vmem:[#allocation27_spill] sm:$0xff] }
 0xabc   : > { %18994 = vmatmul.mubr.f32.vlgmr.msra.gmra.mrb[32].mxu1 %v26186_v59  ;;  %v26201_v59 = vld [vmem:[#allocation37_spill] sm:$0xff] }
 0xabd   : > { %18996 = vmatprep.mubr.f32.mxu1 %v26187_v30  ;;  %20980 = vmatpush3.bf16.msra.mxu1 %v20977_v23  ;;  %v10884_v23 = vld [vmem:[#allocation7 + $0x10f8] sm:$0xff]  ;;  %v26202_v30 = vld [vmem:[#allocation38_spill] sm:$0xff] }
 0xabe   : > { %20982 = vmatprep.subr.bf16.mxu1 %v20981_v33  ;;  %v21005_v34 = vpack.c.bf16 %v10884_v23, %v10883_v7  ;;  %v11184_v23 = vld [vmem:[#allocation7 + $0x1148] sm:$0xff] }
 0xac0   : > { %18997 = vmatmul.mubr.f32.gmra.mrb[34].mxu1 %v26188_v42  ;;  %v26206_v42 = vld [vmem:[#allocation42_spill] sm:$0xff] }
 0xac1   : > { %18999 = vmatprep.mubr.f32.mxu1 %v26189_v29  ;;  %20984 = vmatpush3.bf16.msra.mxu1 %v20981_v33  ;;  %v26196_v33 = vld [vmem:[#allocation32_spill] sm:$0xff]  ;;  %v26207_v29 = vld [vmem:[#allocation43_spill] sm:$0xff] }
 0xac2   : > { %20986 = vmatprep.subr.bf16.mxu1 %v20985_v9 }
 0xac4   : > { %19000 = vmatmul.mubr.f32.gmra.mrb[36].mxu1 %v26190_v26  ;;  %v26211_v26 = vld [vmem:[#allocation47_spill] sm:$0xff] }
 0xac5   : > { %19002 = vmatprep.mubr.f32.mxu1 %v26191_v41  ;;  %20988 = vmatpush3.bf16.msra.mxu1 %v20985_v9  ;;  %v26203_v9 = vld [vmem:[#allocation39_spill] sm:$0xff]  ;;  %v24805_v41 = vld [vmem:[#allocation3 + $0x182] sm:$0xff] }
 0xac6   : > { %20990 = vmatprep.subr.bf16.mxu1 %v20989_v1 }
 0xac8   : > { %19003 = vmatmul.mubr.f32.gmra.mrb[38].mxu1 %v26192_v51  ;;  %v21013_v51 = vpack.c.bf16 %v11178_v21, %v11177_v24  ;;  %v26220_v24 = vld [vmem:[#allocation50_spill] sm:$0xff] }
 0xac9   : > { %19005 = vmatprep.mubr.f32.mxu1 %v26193_v39  ;;  %20992 = vmatpush3.bf16.msra.mxu1 %v20989_v1  ;;  %v26208_v1 = vld [vmem:[#allocation44_spill] sm:$0xff]  ;;  %v11179_v39 = vld [vmem:[#allocation7 + $0x1120] sm:$0xff] }
 0xaca   : > { %20994 = vmatprep.subr.bf16.mxu1 %v20993_v62 }
 0xacc   : > { %19006 = vmatmul.mubr.f32.gmra.mrb[40].mxu1 %v24626_v0  ;;  %v21009_v0 = vpack.c.bf16 %v11176_v45, %v11175_v38  ;;  %v11190_v38 = vld [vmem:[#allocation7 + $0x1178] sm:$0xff]  ;;  %v11482_v45 = vld [vmem:[#allocation7 + $0x1188] sm:$0xff] }
 0xacd   : > { %19008 = vmatprep.mubr.f32.mxu1 %v24629_v56  ;;  %20996 = vmatpush3.bf16.msra.mxu1 %v20993_v62  ;;  %v26197_v56 = vld [vmem:[#allocation33_spill] sm:$0xff] }
 0xace   : > { %20998 = vmatprep.subr.bf16.mxu1 %v20997_v15  ;;  %v24808_v62 = vld [vmem:[#allocation3 + $0x18a] sm:$0xff] }
 0xad0   : > { %19009 = vmatmul.mubr.f32.gmra.mrb[42].mxu1 %v24632_v57  ;;  %v26199_v57 = vld [vmem:[#allocation35_spill] sm:$0xff] }
 0xad1   : > { %19011 = vmatprep.mubr.f32.mxu1 %v26194_v61  ;;  %21000 = vmatpush3.bf16.msra.mxu1 %v20997_v15  ;;  %v11180_v15 = vld [vmem:[#allocation7 + $0x1128] sm:$0xff]  ;;  %v11186_v61 = vld [vmem:[#allocation7 + $0x1158] sm:$0xff] }
 0xad2   : > { %21002 = vmatprep.subr.bf16.mxu1 %v21001_v32  ;;  %v21017_v49 = vpack.c.bf16 %v11180_v15, %v11179_v39  ;;  %v11492_v15 = vld [vmem:[#allocation7 + $0x11d8] sm:$0xff] }
 0xad4   : > { %19012 = vmatmul.mubr.f32.gmra.mrb[44].mxu1 %v26195_v25  ;;  %v11486_v25 = vld [vmem:[#allocation7 + $0x11a8] sm:$0xff] }
 0xad5   : > { %19014 = vmatprep.mubr.f32.mxu1 %v26196_v33  ;;  %21004 = vmatpush3.bf16.msra.mxu1 %v21001_v32  ;;  %v11182_v32 = vld [vmem:[#allocation7 + $0x1138] sm:$0xff]  ;;  %v11912_v33 = vld [vmem:[#allocation10 + $0x20] sm:$0xff] }
 0xad6   : > { %21006 = vmatprep.subr.bf16.mxu1 %v21005_v34  ;;  %v21021_v7 = vpack.c.bf16 %v11182_v32, %v11181_v44  ;;  %v11919_v44 = vld [vmem:[#allocation10 + $0x58] sm:$0xff] }
 0xad7   : > { %v11150_v32 = vld [vmem:[#allocation3 + $0x91] sm:$0xff] }
 0xad8   : > { %19015 = vmatmul.mubr.f32.gmra.mrb[46].mxu1 %v26197_v56  ;;  %v26216_v56 = vld [vmem:[#allocation20_spill] sm:$0xff] }
 0xad9   : > { %19017 = vmatprep.mubr.f32.mxu1 %v26198_v17  ;;  %21008 = vmatpush3.bf16.msra.mxu1 %v21005_v34  ;;  %v11188_v34 = vld [vmem:[#allocation7 + $0x1168] sm:$0xff]  ;;  %v26217_v17 = vld [vmem:[#allocation21_spill] sm:$0xff] }
 0xada   : > { %21010 = vmatprep.subr.bf16.mxu1 %v21009_v0 }
 0xadc   : > { %19018 = vmatmul.mubr.f32.gmra.mrb[48].mxu1 %v26199_v57 }
 0xadd   : > { %19020 = vmatprep.mubr.f32.mxu1 %v26200_v54  ;;  %v11487_v54 = vld [vmem:[#allocation7 + $0x11b0] sm:$0xff] }
 0xae0   : > { %19021 = vmatmul.mubr.f32.gmra.mrb[50].mxu1 %v26201_v59  ;;  %v11488_v59 = vld [vmem:[#allocation7 + $0x11b8] sm:$0xff] }
 0xae1   : > { %19023 = vmatprep.mubr.f32.mxu1 %v26202_v30  ;;  %v11914_v30 = vld [vmem:[#allocation10 + $0x30] sm:$0xff] }
 0xae4   : > { %19024 = vmatmul.mubr.f32.gmra.mrb[52].mxu1 %v26203_v9  ;;  %v11915_v9 = vld [vmem:[#allocation10 + $0x38] sm:$0xff] }
 0xae5   : > { %19026 = vmatprep.mubr.f32.mxu1 %v26204_v11  ;;  %v26218_v11 = vld [vmem:[#allocation48_spill] sm:$0xff] }
 0xae8   : > { %19027 = vmatmul.mubr.f32.gmra.mrb[54].mxu1 %v26205_v3  ;;  %v26219_v3 = vld [vmem:[#allocation49_spill] sm:$0xff] }
 0xae9   : > { %19029 = vmatprep.mubr.f32.mxu1 %v26206_v42  ;;  %v21053_v42 = vpack.c.bf16 %v11488_v59, %v11487_v54  ;;  %v11453_v54 = vld [vmem:[#allocation3 + $0x6a] sm:$0xff]  ;;  %v11455_v59 = vld [vmem:[#allocation3 + $0x82] sm:$0xff] }
 0xaec   : > { %19030 = vmatmul.mubr.f32.gmra.mrb[56].mxu1 %v26207_v29  ;;  %v11489_v29 = vld [vmem:[#allocation7 + $0x11c0] sm:$0xff] }
 0xaed   : > { %19032 = vmatprep.mubr.f32.mxu1 %v26208_v1  ;;  %v21085_v1 = vpack.c.bf16 %v11915_v9, %v11914_v30  ;;  %v11456_v30 = vld [vmem:[#allocation3 + $0x92] sm:$0xff]  ;;  %v11457_v9 = vld [vmem:[#allocation3 + $0x9a] sm:$0xff] }
 0xaf0   : > { %19033 = vmatmul.mubr.f32.gmra.mrb[58].mxu1 %v26209_v58  ;;  %v11490_v58 = vld [vmem:[#allocation7 + $0x11c8] sm:$0xff] }
 0xaf1   : > { %19035 = vmatprep.mubr.f32.mxu1 %v26210_v10  ;;  %v11916_v10 = vld [vmem:[#allocation10 + $0x40] sm:$0xff]  ;;  %v21057_v21 = vpack.c.bf16 %v11490_v58, %v11489_v29  ;;  %v11461_v29 = vld [vmem:[#allocation3 + $0xca] sm:$0xff]  ;;  %v11463_v58 = vld [vmem:[#allocation3 + $0xe2] sm:$0xff] }
 0xaf4   : > { %19036 = vmatmul.mubr.f32.gmra.mrb[60].mxu1 %v26211_v26  ;;  %v11917_v26 = vld [vmem:[#allocation10 + $0x48] sm:$0xff] }
 0xaf5   : > { %19038 = vmatprep.mubr.f32.mxu1 %v24805_v41  ;;  %v21089_v39 = vpack.c.bf16 %v11917_v26, %v11916_v10  ;;  %v11464_v10 = vld [vmem:[#allocation3 + $0xf2] sm:$0xff]  ;;  %v11465_v26 = vld [vmem:[#allocation3 + $0xfa] sm:$0xff] }
 0xaf8   : > { %19039 = vmatmul.mubr.f32.gmra.mrb[62].mxu1 %v24808_v62 }
 0xaf9   : > { %19073 = vmatprep.mubr.f32.mxu1 %v24515_v27  ;;  %v11183_v27 = vld [vmem:[#allocation7 + $0x1140] sm:$0xff] }
 0xafc   : > { %19074 = vmatmul.mubr.f32.vlgmr.msra.gmra.mrb[32].mxu1 %v24518_v40  ;;  %v21025_v40 = vpack.c.bf16 %v11184_v23, %v11183_v27  ;;  %v11493_v27 = vld [vmem:[#allocation7 + $0x11e0] sm:$0xff]  ;;  %v11494_v23 = vld [vmem:[#allocation7 + $0x11e8] sm:$0xff] }
 0xafd   : > { %19076 = vmatprep.mubr.f32.mxu1 %v24521_v16  ;;  %21012 = vmatpush3.bf16.msra.mxu1 %v21009_v0  ;;  %v11185_v16 = vld [vmem:[#allocation7 + $0x1150] sm:$0xff] }
 0xafe   : > { %21014 = vmatprep.subr.bf16.mxu1 %v21013_v51  ;;  %v11913_v0 = vld [vmem:[#allocation10 + $0x28] sm:$0xff] }
 0xb00   : > { %19077 = vmatmul.mubr.f32.gmra.mrb[34].mxu1 %v24524_v4  ;;  %v21029_v4 = vpack.c.bf16 %v11186_v61, %v11185_v16  ;;  %v11921_v16 = vld [vmem:[#allocation10 + $0x68] sm:$0xff]  ;;  %v11152_v61 = vld [vmem:[#allocation3 + $0xa9] sm:$0xff] }
 0xb01   : > { %19079 = vmatprep.mubr.f32.mxu1 %v24527_v36  ;;  %21016 = vmatpush3.bf16.msra.mxu1 %v21013_v51  ;;  %v11187_v36 = vld [vmem:[#allocation7 + $0x1160] sm:$0xff]  ;;  %v11491_v51 = vld [vmem:[#allocation7 + $0x11d0] sm:$0xff] }
 0xb02   : > { %21018 = vmatprep.subr.bf16.mxu1 %v21017_v49 }
 0xb04   : > { %19080 = vmatmul.mubr.f32.gmra.mrb[36].mxu1 %v24530_v2  ;;  %v21033_v2 = vpack.c.bf16 %v11188_v34, %v11187_v36  ;;  %v11495_v36 = vld [vmem:[#allocation7 + $0x11f0] sm:$0xff] }
 0xb05   : > { %19082 = vmatprep.mubr.f32.mxu1 %v24533_v52  ;;  %21020 = vmatpush3.bf16.msra.mxu1 %v21017_v49  ;;  %v11189_v52 = vld [vmem:[#allocation7 + $0x1170] sm:$0xff] }
 0xb06   : > { %21022 = vmatprep.subr.bf16.mxu1 %v21021_v7  ;;  %v11918_v49 = vld [vmem:[#allocation10 + $0x50] sm:$0xff] }
 0xb08   : > { %19083 = vmatmul.mubr.f32.gmra.mrb[38].mxu1 %v24536_v55  ;;  %v21037_v55 = vpack.c.bf16 %v11190_v38, %v11189_v52  ;;  %v11922_v52 = vld [vmem:[#allocation10 + $0x70] sm:$0xff]  ;;  %v11923_v38 = vld [vmem:[#allocation10 + $0x78] sm:$0xff] }
 0xb09   : > { %19085 = vmatprep.mubr.f32.mxu1 %v24539_v28  ;;  %21024 = vmatpush3.bf16.msra.mxu1 %v21021_v7  ;;  %v11481_v28 = vld [vmem:[#allocation7 + $0x1180] sm:$0xff]  ;;  %v21061_v7 = vpack.c.bf16 %v11492_v15, %v11491_v51  ;;  %v11468_v51 = vld [vmem:[#allocation3 + $0x122] sm:$0xff]  ;;  %v11470_v15 = vld [vmem:[#allocation3 + $0x13a] sm:$0xff] }
 0xb0a   : > { %21026 = vmatprep.subr.bf16.mxu1 %v21025_v40 }
 0xb0c   : > { %19086 = vmatmul.mubr.f32.gmra.mrb[40].mxu1 %v24542_v63  ;;  %v21041_v63 = vpack.c.bf16 %v11482_v45, %v11481_v28  ;;  %v21101_v28 = vpack.c.bf16 %v11923_v38, %v11922_v52  ;;  %v11155_v45 = vld [vmem:[#allocation3 + $0xc9] sm:$0xff] }
 0xb0d   : > { %19088 = vmatprep.mubr.f32.mxu1 %v24545_v31  ;;  %21028 = vmatpush3.bf16.msra.mxu1 %v21025_v40  ;;  %v26212_v31 = vld [vmem:[#allocation54_spill] sm:$0xff]  ;;  %v12454_v52 = vld [vmem:[#allocation10 + $0x90] sm:$0xff] }
 0xb0e   : > { %21030 = vmatprep.subr.bf16.mxu1 %v21029_v4  ;;  %v11920_v40 = vld [vmem:[#allocation10 + $0x60] sm:$0xff] }
 0xb0f   : > { %v21097_v34 = vpack.c.bf16 %v11921_v16, %v11920_v40  ;;  %v12452_v40 = vld [vmem:[#allocation10 + $0x80] sm:$0xff]  ;;  %v12453_v16 = vld [vmem:[#allocation10 + $0x88] sm:$0xff] }
 0xb10   : > { %19089 = vmatmul.mubr.f32.gmra.mrb[42].mxu1 %v24548_v12  ;;  %v26213_v12 = vld [vmem:[#allocation55_spill] sm:$0xff] }
 0xb11   : > { %19091 = vmatprep.mubr.f32.mxu1 %v24551_v13  ;;  %21032 = vmatpush3.bf16.msra.mxu1 %v21029_v4  ;;  %v26214_v13 = vld [vmem:[#allocation56_spill] sm:$0xff]  ;;  %v11153_v4 = vld [vmem:[#allocation3 + $0xb1] sm:$0xff] }
 0xb12   : > { %21034 = vmatprep.subr.bf16.mxu1 %v21033_v2 }
 0xb14   : > { %19092 = vmatmul.mubr.f32.gmra.mrb[44].mxu1 %v24554_v48  ;;  %v10866_v48 = vld [vmem:[#allocation3 + $0x198] sm:$0xff] }
 0xb15   : > { %19094 = vmatprep.mubr.f32.mxu1 %v24557_v8  ;;  %21036 = vmatpush3.bf16.msra.mxu1 %v21033_v2  ;;  %v26215_v8 = vld [vmem:[#allocation19_spill] sm:$0xff]  ;;  %v11496_v2 = vld [vmem:[#allocation7 + $0x11f8] sm:$0xff] }
 0xb16   : > { %21038 = vmatprep.subr.bf16.mxu1 %v21037_v55 }
 0xb18   : > { %19095 = vmatmul.mubr.f32.gmra.mrb[46].mxu1 %v24560_v35  ;;  %v10867_v35 = vld [vmem:[#allocation3 + $0x1a0] sm:$0xff] }
 0xb19   : > { %19097 = vmatprep.mubr.f32.mxu1 %v24563_v5  ;;  %21040 = vmatpush3.bf16.msra.mxu1 %v21037_v55  ;;  %v11483_v5 = vld [vmem:[#allocation7 + $0x1190] sm:$0xff] }
 0xb1a   : > { %21042 = vmatprep.subr.bf16.mxu1 %v21041_v63  ;;  %v11154_v55 = vld [vmem:[#allocation3 + $0xc1] sm:$0xff] }
 0xb1c   : > { %19098 = vmatmul.mubr.f32.gmra.mrb[48].mxu1 %v24566_v20  ;;  %v11484_v20 = vld [vmem:[#allocation7 + $0x1198] sm:$0xff] }
 0xb1d   : > { %19100 = vmatprep.mubr.f32.mxu1 %v24569_v22  ;;  %v11908_v22 = vld [vmem:[#allocation10] sm:$0xff] }
 0xb20   : > { %19101 = vmatmul.mubr.f32.gmra.mrb[50].mxu1 %v24572_v53  ;;  %v11909_v53 = vld [vmem:[#allocation10 + $0x8] sm:$0xff] }
 0xb21   : > { %19103 = vmatprep.mubr.f32.mxu1 %v24575_v50  ;;  %v11910_v50 = vld [vmem:[#allocation10 + $0x10] sm:$0xff] }
 0xb24   : > { %19104 = vmatmul.mubr.f32.gmra.mrb[52].mxu1 %v24578_v19  ;;  %v21073_v19 = vpack.c.bf16 %v11909_v53, %v11908_v22  ;;  %v11165_v22 = vld [vmem:[#allocation3 + $0x141] sm:$0xff]  ;;  %v11166_v53 = vld [vmem:[#allocation3 + $0x151] sm:$0xff] }
 0xb25   : > { %19106 = vmatprep.mubr.f32.mxu1 %v24581_v46  ;;  %v11911_v46 = vld [vmem:[#allocation10 + $0x18] sm:$0xff] }
 0xb26   : > { %21074 = vmatprep.subr.bf16.mxu0 %v21073_v19 }
 0xb27   : > { %21076 = vmatpush3.bf16.msra.mxu0 %v21073_v19  ;;  %v11168_v19 = vld [vmem:[#allocation3 + $0x169] sm:$0xff] }
 0xb28   : > { %19107 = vmatmul.mubr.f32.gmra.mrb[54].mxu1 %v24584_v43  ;;  %v21045_v43 = vpack.c.bf16 %v11484_v20, %v11483_v5  ;;  %v11163_v5 = vld [vmem:[#allocation3 + $0x129] sm:$0xff]  ;;  %v11164_v20 = vld [vmem:[#allocation3 + $0x139] sm:$0xff] }
 0xb29   : > { %19109 = vmatprep.mubr.f32.mxu1 %v24587_v37  ;;  %v11485_v37 = vld [vmem:[#allocation7 + $0x11a0] sm:$0xff] }
 0xb2a   : > { %v21049_v57 = vpack.c.bf16 %v11486_v25, %v11485_v37  ;;  %v11172_v37 = vld [vmem:[#allocation3 + $0x199] sm:$0xff]  ;;  %v11173_v25 = vld [vmem:[#allocation3 + $0x1a1] sm:$0xff] }
 0xb2c   : > { %19110 = vmatmul.mubr.f32.gmra.mrb[56].mxu1 %v24590_v60  ;;  %v21077_v60 = vpack.c.bf16 %v11911_v46, %v11910_v50  ;;  %v11167_v50 = vld [vmem:[#allocation3 + $0x159] sm:$0xff]  ;;  %v11169_v46 = vld [vmem:[#allocation3 + $0x171] sm:$0xff] }
 0xb2d   : > { %19112 = vmatprep.mubr.f32.mxu1 %v26212_v31  ;;  %v11157_v31 = vld [vmem:[#allocation3 + $0xe1] sm:$0xff] }
 0xb2e   : > { %21078 = vmatprep.subr.bf16.mxu0 %v21077_v60 }
 0xb2f   : > { %21080 = vmatpush3.bf16.msra.mxu0 %v21077_v60  ;;  %v11171_v60 = vld [vmem:[#allocation3 + $0x189] sm:$0xff] }
 0xb30   : > { %19113 = vmatmul.mubr.f32.gmra.mrb[58].mxu1 %v26213_v12  ;;  %v11158_v12 = vld [vmem:[#allocation3 + $0xf1] sm:$0xff] }
 0xb31   : > { %19115 = vmatprep.mubr.f32.mxu1 %v26214_v13  ;;  %v11159_v13 = vld [vmem:[#allocation3 + $0xf9] sm:$0xff] }
 0xb34   : > { %19116 = vmatmul.mubr.f32.gmra.mrb[60].mxu1 %v26215_v8  ;;  %v11161_v8 = vld [vmem:[#allocation3 + $0x111] sm:$0xff] }
 0xb35   : > { %19118 = vmatprep.mubr.f32.mxu1 %v10866_v48  ;;  %v11160_v48 = vld [vmem:[#allocation3 + $0x109] sm:$0xff] }
 0xb38   : > { %19119 = vmatmul.mubr.f32.gmra.mrb[62].mxu1 %v10867_v35  ;;  %v11162_v35 = vld [vmem:[#allocation3 + $0x121] sm:$0xff] }
 0xb39   : > { %19153 = vmatprep.mubr.f32.mxu1 %v24725_v47  ;;  %v21081_v47 = vpack.c.bf16 %v11913_v0, %v11912_v33  ;;  %v11448_v33 = vld [vmem:[#allocation3 + $0x32] sm:$0xff]  ;;  %v11449_v0 = vld [vmem:[#allocation3 + $0x3a] sm:$0xff] }
 0xb3b   : > { %21082 = vmatprep.subr.bf16.mxu0 %v21081_v47 }
 0xb3c   : > { %19154 = vmatmul.mubr.f32.vlgmr.msra.gmra.mrb[32].mxu1 %v26216_v56  ;;  %21084 = vmatpush3.bf16.msra.mxu0 %v21081_v47  ;;  %v11450_v56 = vld [vmem:[#allocation3 + $0x4a] sm:$0xff]  ;;  %v11454_v47 = vld [vmem:[#allocation3 + $0x7a] sm:$0xff] }
 0xb3d   : > { %19156 = vmatprep.mubr.f32.mxu1 %v26217_v17  ;;  %21044 = vmatpush3.bf16.msra.mxu1 %v21041_v63  ;;  %v11156_v63 = vld [vmem:[#allocation3 + $0xd9] sm:$0xff] }
 0xb3e   : > { %21046 = vmatprep.subr.bf16.mxu1 %v21045_v43  ;;  %21086 = vmatprep.subr.bf16.mxu0 %v21085_v1  ;;  %v11451_v17 = vld [vmem:[#allocation3 + $0x52] sm:$0xff] }
 0xb40   : > { %19157 = vmatmul.mubr.f32.gmra.mrb[34].mxu1 %v26218_v11  ;;  %21088 = vmatpush3.bf16.msra.mxu0 %v21085_v1  ;;  %v11458_v11 = vld [vmem:[#allocation3 + $0xaa] sm:$0xff]  ;;  %v11462_v1 = vld [vmem:[#allocation3 + $0xda] sm:$0xff] }
 0xb41   : > { %19159 = vmatprep.mubr.f32.mxu1 %v26219_v3  ;;  %21048 = vmatpush3.bf16.msra.mxu1 %v21045_v43  ;;  %v11170_v43 = vld [vmem:[#allocation3 + $0x181] sm:$0xff]  ;;  %v11459_v3 = vld [vmem:[#allocation3 + $0xb2] sm:$0xff] }
 0xb42   : > { %21050 = vmatprep.subr.bf16.mxu1 %v21049_v57  ;;  %21090 = vmatprep.subr.bf16.mxu0 %v21089_v39 }
 0xb44   : > { %19160 = vmatmul.mubr.f32.gmra.mrb[36].mxu1 %v26220_v24  ;;  %21092 = vmatpush3.bf16.msra.mxu0 %v21089_v39  ;;  %v11466_v24 = vld [vmem:[#allocation3 + $0x10a] sm:$0xff] }
 0xb45   : > { %19162 = vmatprep.mubr.f32.mxu1 %v24743_v6  ;;  %21052 = vmatpush3.bf16.msra.mxu1 %v21049_v57  ;;  %v21093_v6 = vpack.c.bf16 %v11919_v44, %v11918_v49  ;;  %v11452_v57 = vld [vmem:[#allocation3 + $0x62] sm:$0xff]  ;;  %v11469_v39 = vld [vmem:[#allocation3 + $0x12a] sm:$0xff]  ;;  %v11472_v44 = vld [vmem:[#allocation3 + $0x152] sm:$0xff] }
 0xb46   : > { %21054 = vmatprep.subr.bf16.mxu1 %v21053_v42  ;;  %v11471_v49 = vld [vmem:[#allocation3 + $0x142] sm:$0xff] }
 0xb47   : > { %21094 = vmatprep.subr.bf16.mxu0 %v21093_v6 }
 0xb48   : > { %19163 = vmatmul.mubr.f32.gmra.mrb[38].mxu1 %v24746_v14  ;;  %v21065_v14 = vpack.c.bf16 %v11494_v23, %v11493_v27  ;;  %21096 = vmatpush3.bf16.msra.mxu0 %v21093_v6  ;;  %v11475_v27 = vld [vmem:[#allocation3 + $0x172] sm:$0xff]  ;;  %v11478_v6 = vld [vmem:[#allocation3 + $0x19a] sm:$0xff]  ;;  %v11479_v23 = vld [vmem:[#allocation3 + $0x1a2] sm:$0xff] }
 0xb49   : > { %19165 = vmatprep.mubr.f32.mxu1 %v11150_v32  ;;  %21056 = vmatpush3.bf16.msra.mxu1 %v21053_v42  ;;  %v11460_v42 = vld [vmem:[#allocation3 + $0xc2] sm:$0xff]  ;;  %v11473_v32 = vld [vmem:[#allocation3 + $0x15a] sm:$0xff] }
 0xb4a   : > { %21058 = vmatprep.subr.bf16.mxu1 %v21057_v21  ;;  %21098 = vmatprep.subr.bf16.mxu0 %v21097_v34 }
 0xb4c   : > { %19166 = vmatmul.mubr.f32.gmra.mrb[40].mxu1 %v24750_v18  ;;  %v21069_v18 = vpack.c.bf16 %v11496_v2, %v11495_v36  ;;  %21100 = vmatpush3.bf16.msra.mxu0 %v21097_v34 }
 0xb4d   : > { %19168 = vmatprep.mubr.f32.mxu1 %v11152_v61  ;;  %21060 = vmatpush3.bf16.msra.mxu1 %v21057_v21  ;;  %v11467_v21 = vld [vmem:[#allocation3 + $0x112] sm:$0xff]  ;;  %v21137_v61 = vpack.c.bf16 %v12453_v16, %v12452_v40 }
 0xb4e   : > { %21062 = vmatprep.subr.bf16.mxu1 %v21061_v7  ;;  %21102 = vmatprep.subr.bf16.mxu0 %v21101_v28 }
 0xb50   : > { %19169 = vmatmul.mubr.f32.gmra.mrb[42].mxu1 %v11153_v4  ;;  %21104 = vmatpush3.bf16.msra.mxu0 %v21101_v28  ;;  %v24852_v4 = vld [vmem:[#allocation9 + $0x3] ss:$0 sm:$0xff] }
 0xb51   : > { %19171 = vmatprep.mubr.f32.mxu1 %v11154_v55  ;;  %21064 = vmatpush3.bf16.msra.mxu1 %v21061_v7  ;;  %v11474_v7 = vld [vmem:[#allocation3 + $0x16a] sm:$0xff] }
 0xb52   : > { %21066 = vmatprep.subr.bf16.mxu1 %v21065_v14  ;;  %21138 = vmatprep.subr.bf16.mxu0 %v21137_v61 }
 0xb54   : > { %19172 = vmatmul.mubr.f32.gmra.mrb[44].mxu1 %v11155_v45 }
 0xb55   : > { %19174 = vmatprep.mubr.f32.mxu1 %v11156_v63  ;;  %21068 = vmatpush3.bf16.msra.mxu1 %v21065_v14 }
 0xb56   : > { %21070 = vmatprep.subr.bf16.mxu1 %v21069_v18 }
 0xb58   : > { %19175 = vmatmul.mubr.f32.gmra.mrb[46].mxu1 %v11157_v31  ;;  %v12456_v31 = vld [vmem:[#allocation10 + $0xa0] sm:$0xff] }
 0xb59   : > { %19177 = vmatprep.mubr.f32.mxu1 %v11158_v12  ;;  %21072 = vmatpush3.bf16.msra.mxu1 %v21069_v18  ;;  %v12457_v12 = vld [vmem:[#allocation10 + $0xa8] sm:$0xff] }
 0xb5c   : > { %19178 = vmatmul.mubr.f32.gmra.mrb[48].mxu1 %v11159_v13 }
 0xb5d   : > { %19180 = vmatprep.mubr.f32.mxu1 %v11160_v48 }
 0xb60   : > { %19181 = vmatmul.mubr.f32.gmra.mrb[50].mxu1 %v11161_v8 }
 0xb61   : > { %19183 = vmatprep.mubr.f32.mxu1 %v11162_v35 }
 0xb64   : > { %19184 = vmatmul.mubr.f32.gmra.mrb[52].mxu1 %v11163_v5 }
 0xb65   : > { %19186 = vmatprep.mubr.f32.mxu1 %v11164_v20  ;;  %v21145_v20 = vpack.c.bf16 %v12457_v12, %v12456_v31 }
 0xb68   : > { %19187 = vmatmul.mubr.f32.gmra.mrb[54].mxu1 %v11165_v22 }
 0xb69   : > { %19189 = vmatprep.mubr.f32.mxu1 %v11166_v53  ;;  %v12458_v53 = vld [vmem:[#allocation10 + $0xb0] sm:$0xff] }
 0xb6c   : > { %19190 = vmatmul.mubr.f32.gmra.mrb[56].mxu1 %v11167_v50  ;;  %v12459_v50 = vld [vmem:[#allocation10 + $0xb8] sm:$0xff] }
 0xb6d   : > { %19192 = vmatprep.mubr.f32.mxu1 %v11168_v19 }
 0xb70   : > { %19193 = vmatmul.mubr.f32.gmra.mrb[58].mxu1 %v11169_v46 }
 0xb71   : > { %19195 = vmatprep.mubr.f32.mxu1 %v11170_v43 }
 0xb74   : > { %19196 = vmatmul.mubr.f32.gmra.mrb[60].mxu1 %v11171_v60 }
 0xb75   : > { %19198 = vmatprep.mubr.f32.mxu1 %v11172_v37 }
 0xb78   : > { %19199 = vmatmul.mubr.f32.gmra.mrb[62].mxu1 %v11173_v25  ;;  %v21149_v25 = vpack.c.bf16 %v12459_v50, %v12458_v53 }
 0xb79   : > { %19233 = vmatprep.mubr.f32.mxu1 %v11448_v33 }
 0xb7c   : > { %19234 = vmatmul.mubr.f32.vlgmr.msra.gmra.mrb[32].mxu1 %v11449_v0  ;;  %v12460_v0 = vld [vmem:[#allocation10 + $0xc0] sm:$0xff] }
 0xb7d   : > { %19236 = vmatprep.mubr.f32.mxu1 %v11450_v56  ;;  %v12461_v56 = vld [vmem:[#allocation10 + $0xc8] sm:$0xff] }
 0xb80   : > { %19237 = vmatmul.mubr.f32.gmra.mrb[34].mxu1 %v11451_v17 }
 0xb81   : > { %19239 = vmatprep.mubr.f32.mxu1 %v11452_v57 }
 0xb84   : > { %19240 = vmatmul.mubr.f32.gmra.mrb[36].mxu1 %v11453_v54 }
 0xb85   : > { %19242 = vmatprep.mubr.f32.mxu1 %v11454_v47 }
 0xb88   : > { %19243 = vmatmul.mubr.f32.gmra.mrb[38].mxu1 %v11455_v59 }
 0xb89   : > { %19245 = vmatprep.mubr.f32.mxu1 %v11456_v30  ;;  %v21153_v30 = vpack.c.bf16 %v12461_v56, %v12460_v0  ;;  %v11894_v0 = vld [vmem:[%s25746_s5 + $0x18] sm:$0xff] }
 0xb8c   : > { %19246 = vmatmul.mubr.f32.gmra.mrb[40].mxu1 %v11457_v9 }
 0xb8d   : > { %19248 = vmatprep.mubr.f32.mxu1 %v11458_v11  ;;  %v12462_v11 = vld [vmem:[#allocation10 + $0xd0] sm:$0xff] }
 0xb90   : > { %19249 = vmatmul.mubr.f32.gmra.mrb[42].mxu1 %v11459_v3  ;;  %v12463_v3 = vld [vmem:[#allocation10 + $0xd8] sm:$0xff] }
 0xb91   : > { %19251 = vmatprep.mubr.f32.mxu1 %v11460_v42 }
 0xb94   : > { %19252 = vmatmul.mubr.f32.gmra.mrb[44].mxu1 %v11461_v29 }
 0xb95   : > { %19254 = vmatprep.mubr.f32.mxu1 %v11462_v1 }
 0xb98   : > { %19255 = vmatmul.mubr.f32.gmra.mrb[46].mxu1 %v11463_v58 }
 0xb99   : > { %19257 = vmatprep.mubr.f32.mxu1 %v11464_v10 }
 0xb9c   : > { %19258 = vmatmul.mubr.f32.gmra.mrb[48].mxu1 %v11465_v26  ;;  %v21157_v26 = vpack.c.bf16 %v12463_v3, %v12462_v11 }
 0xb9d   : > { %19260 = vmatprep.mubr.f32.mxu1 %v11466_v24 }
 0xba0   : > { %19261 = vmatmul.mubr.f32.gmra.mrb[50].mxu1 %v11467_v21  ;;  %v12464_v21 = vld [vmem:[#allocation10 + $0xe0] sm:$0xff] }
 0xba1   : > { %19263 = vmatprep.mubr.f32.mxu1 %v11468_v51  ;;  %v12465_v51 = vld [vmem:[#allocation10 + $0xe8] sm:$0xff] }
 0xba4   : > { %19264 = vmatmul.mubr.f32.gmra.mrb[52].mxu1 %v11469_v39 }
 0xba5   : > { %19266 = vmatprep.mubr.f32.mxu1 %v11470_v15 }
 0xba8   : > { %19267 = vmatmul.mubr.f32.gmra.mrb[54].mxu1 %v11471_v49 }
 0xba9   : > { %19269 = vmatprep.mubr.f32.mxu1 %v11472_v44 }
 0xbac   : > { %19270 = vmatmul.mubr.f32.gmra.mrb[56].mxu1 %v11473_v32 }
 0xbad   : > { %19272 = vmatprep.mubr.f32.mxu1 %v11474_v7  ;;  %v21161_v7 = vpack.c.bf16 %v12465_v51, %v12464_v21  ;;  %v11895_v21 = vld [vmem:[%s25746_s5 + $0x20] sm:$0xff]  ;;  %v11896_v51 = vld [vmem:[%s25746_s5 + $0x28] sm:$0xff] }
 0xbb0   : > { %19273 = vmatmul.mubr.f32.gmra.mrb[58].mxu1 %v11475_v27 }
 0xbb1   : > { %19275 = vmatprep.mubr.f32.mxu1 %v24805_v41  ;;  %v12455_v41 = vld [vmem:[#allocation10 + $0x98] sm:$0xff] }
 0xbb2   : > { %v21141_v45 = vpack.c.bf16 %v12455_v41, %v12454_v52  ;;  %v12984_v52 = vld [vmem:[#allocation10 + $0x100] sm:$0xff]  ;;  %v12985_v41 = vld [vmem:[#allocation10 + $0x108] sm:$0xff] }
 0xbb4   : > { %19276 = vmatmul.mubr.f32.gmra.mrb[60].mxu1 %v24808_v62 }
 0xbb5   : > { %19278 = vmatprep.mubr.f32.mxu1 %v11478_v6  ;;  %v12466_v6 = vld [vmem:[#allocation10 + $0xf0] sm:$0xff] }
 0xbb8   : > { %19279 = vmatmul.mubr.f32.gmra.mrb[62].mxu1 %v11479_v23  ;;  %v12467_v23 = vld [vmem:[#allocation10 + $0xf8] sm:$0xff] }
 0xc4f   : > { %v19235_v14 = vpop.f32.mrb[32].mxu1 }
 0xc50   : > { %v11763_v36 = vadd.f32 %v19235_v14, %v24852_v4  ;;  %v11563_v34 = vpop.f32.mrb[33].mxu1 }
 0xc51   : > { %v11762_v2 = vadd.f32 %v24852_v4, %v11563_v34  ;;  %v21165_v34 = vpack.c.bf16 %v12467_v23, %v12466_v6 }
 0xc52   : > { %v24858_v55 = vmax.f32 %v11763_v36, 0.0 }
 0xc53   : > { %v24856_v38 = vmax.f32 %v11762_v2, 0.0  ;;  %v19238_v62 = vpop.f32.mrb[34].mxu1 }
 0xc54   : > { %v11765_v18 = vadd.f32 %v19238_v62, %v24852_v4  ;;  %v11573_v28 = vpop.f32.mrb[35].mxu1 }
 0xc55   : > { %v11764_v63 = vadd.f32 %v24852_v4, %v11573_v28  ;;  %19313 = vmatprep.mubr.f32.mxu0 %v24856_v38  ;;  %v11891_v28 = vld [vmem:[%s25746_s5] sm:$0xff] }
 0xc56   : > { %19314 = vmatmul.mubr.f32.vlgmr.msra.gmra.mrb[64].mxu0 %v24858_v55  ;;  %v24866_v8 = vmax.f32 %v11765_v18, 0.0 }
 0xc57   : > { %v24864_v13 = vmax.f32 %v11764_v63, 0.0  ;;  %v19241_v48 = vpop.f32.mrb[36].mxu1  ;;  %21140 = vmatpush3.bf16.msra.mxu0 %v21137_v61 }
 0xc58   : > { %v11767_v35 = vadd.f32 %v19241_v48, %v24852_v4  ;;  %v11583_v5 = vpop.f32.mrb[37].mxu1  ;;  %21142 = vmatprep.subr.bf16.mxu0 %v21141_v45  ;;  %v24923_v48 = vpack.c.bf16 %v12985_v41, %v12984_v52  ;;  %v11897_v41 = vld [vmem:[%s25746_s5 + $0x30] sm:$0xff] }
 0xc59   : > { %v11766_v22 = vadd.f32 %v24852_v4, %v11583_v5  ;;  %19316 = vmatprep.mubr.f32.mxu0 %v24864_v13 }
 0xc5a   : > { %19317 = vmatmul.mubr.f32.gmra.mrb[66].mxu0 %v24866_v8  ;;  %v24874_v43 = vmax.f32 %v11767_v35, 0.0 }
 0xc5b   : > { %v24872_v19 = vmax.f32 %v11766_v22, 0.0  ;;  %v19244_v46 = vpop.f32.mrb[38].mxu1  ;;  %21144 = vmatpush3.bf16.msra.mxu0 %v21141_v45  ;;  %v11892_v45 = vld [vmem:[%s25746_s5 + $0x8] sm:$0xff] }
 0xc5c   : > { %v11769_v37 = vadd.f32 %v19244_v46, %v24852_v4  ;;  %v11593_v60 = vpop.f32.mrb[39].mxu1  ;;  %21146 = vmatprep.subr.bf16.mxu0 %v21145_v20  ;;  %v24925_v35 = vpack.c.bf16 %v11892_v45, %v11891_v28 }
 0xc5d   : > { %v11768_v33 = vadd.f32 %v24852_v4, %v11593_v60  ;;  %19319 = vmatprep.mubr.f32.mxu0 %v24872_v19 }
 0xc5e   : > { %19320 = vmatmul.mubr.f32.gmra.mrb[68].mxu0 %v24874_v43  ;;  %v24882_v54 = vmax.f32 %v11769_v37, 0.0  ;;  %21106 = vmatprep.subr.bf16.mxu1 %v24925_v35 }
 0xc5f   : > { %v24880_v17 = vmax.f32 %v11768_v33, 0.0  ;;  %v19247_v57 = vpop.f32.mrb[40].mxu1  ;;  %21148 = vmatpush3.bf16.msra.mxu0 %v21145_v20  ;;  %21108 = vmatpush3.bf16.msra.mxu1 %v24925_v35  ;;  %v11893_v33 = vld [vmem:[%s25746_s5 + $0x10] sm:$0xff] }
 0xc60   : > { %v11771_v47 = vadd.f32 %v19247_v57, %v24852_v4  ;;  %v11603_v59 = vpop.f32.mrb[41].mxu1  ;;  %21150 = vmatprep.subr.bf16.mxu0 %v21149_v25 }
 0xc61   : > { %v11770_v9 = vadd.f32 %v24852_v4, %v11603_v59  ;;  %19322 = vmatprep.mubr.f32.mxu0 %v24880_v17  ;;  %v24952_v59 = vpack.c.bf16 %v11894_v0, %v11893_v33 }
 0xc62   : > { %19323 = vmatmul.mubr.f32.gmra.mrb[70].mxu0 %v24882_v54  ;;  %v24890_v1 = vmax.f32 %v11771_v47, 0.0 }
 0xc63   : > { %v24888_v42 = vmax.f32 %v11770_v9, 0.0  ;;  %v19250_v29 = vpop.f32.mrb[42].mxu1  ;;  %21152 = vmatpush3.bf16.msra.mxu0 %v21149_v25  ;;  %21110 = vmatprep.subr.bf16.mxu1 %v24952_v59 }
 0xc64   : > { %v11773_v58 = vadd.f32 %v19250_v29, %v24852_v4  ;;  %v11613_v10 = vpop.f32.mrb[43].mxu1  ;;  %21154 = vmatprep.subr.bf16.mxu0 %v21153_v30  ;;  %21112 = vmatpush3.bf16.msra.mxu1 %v24952_v59 }
 0xc65   : > { %v11772_v24 = vadd.f32 %v24852_v4, %v11613_v10  ;;  %19325 = vmatprep.mubr.f32.mxu0 %v24888_v42 }
 0xc66   : > { %19326 = vmatmul.mubr.f32.gmra.mrb[72].mxu0 %v24890_v1  ;;  %v24898_v49 = vmax.f32 %v11773_v58, 0.0 }
 0xc67   : > { %v24896_v39 = vmax.f32 %v11772_v24, 0.0  ;;  %v19253_v15 = vpop.f32.mrb[44].mxu1  ;;  %21156 = vmatpush3.bf16.msra.mxu0 %v21153_v30 }
 0xc68   : > { %v11775_v44 = vadd.f32 %v19253_v15, %v24852_v4  ;;  %v11623_v32 = vpop.f32.mrb[45].mxu1  ;;  %21158 = vmatprep.subr.bf16.mxu0 %v21157_v26 }
 0xc69   : > { %v11774_v27 = vadd.f32 %v24852_v4, %v11623_v32  ;;  %19328 = vmatprep.mubr.f32.mxu0 %v24896_v39 }
 0xc6a   : > { %19329 = vmatmul.mubr.f32.gmra.mrb[74].mxu0 %v24898_v49  ;;  %v24906_v61 = vmax.f32 %v11775_v44, 0.0 }
 0xc6b   : > { %v24904_v40 = vmax.f32 %v11774_v27, 0.0  ;;  %v19256_v16 = vpop.f32.mrb[46].mxu1  ;;  %21160 = vmatpush3.bf16.msra.mxu0 %v21157_v26 }
 0xc6c   : > { %v11777_v14 = vadd.f32 %v19256_v16, %v24852_v4  ;;  %v11633_v36 = vpop.f32.mrb[47].mxu1  ;;  %21162 = vmatprep.subr.bf16.mxu0 %v21161_v7 }
 0xc6d   : > { %v11776_v2 = vadd.f32 %v24852_v4, %v11633_v36  ;;  %19331 = vmatprep.mubr.f32.mxu0 %v24904_v40 }
 0xc6e   : > { %19332 = vmatmul.mubr.f32.gmra.mrb[76].mxu0 %v24906_v61  ;;  %v24920_v63 = vmax.f32 %v11777_v14, 0.0 }
 0xc6f   : > { %v24912_v62 = vmax.f32 %v11776_v2, 0.0  ;;  %v19259_v18 = vpop.f32.mrb[48].mxu1  ;;  %21164 = vmatpush3.bf16.msra.mxu0 %v21161_v7  ;;  %v24978_v7 = vpack.c.bf16 %v11896_v51, %v11895_v21  ;;  %v11901_v21 = vld [vmem:[%s25746_s5 + $0x50] sm:$0xff]  ;;  %v11902_v51 = vld [vmem:[%s25746_s5 + $0x58] sm:$0xff] }
 0xc70   : > { %v11779_v31 = vadd.f32 %v19259_v18, %v24852_v4  ;;  %v11643_v12 = vpop.f32.mrb[49].mxu1  ;;  %21166 = vmatprep.subr.bf16.mxu0 %v21165_v34  ;;  %v11898_v18 = vld [vmem:[%s25746_s5 + $0x38] sm:$0xff] }
 0xc71   : > { %v11778_v5 = vadd.f32 %v24852_v4, %v11643_v12  ;;  %19334 = vmatprep.mubr.f32.mxu0 %v24912_v62  ;;  %21114 = vmatprep.subr.bf16.mxu1 %v24978_v7  ;;  %v25004_v12 = vpack.c.bf16 %v11898_v18, %v11897_v41 }
 0xc72   : > { %19335 = vmatmul.mubr.f32.gmra.mrb[78].mxu0 %v24920_v63  ;;  %v24934_v53 = vmax.f32 %v11779_v31, 0.0  ;;  %21116 = vmatpush3.bf16.msra.mxu1 %v24978_v7 }
 0xc73   : > { %v24931_v20 = vmax.f32 %v11778_v5, 0.0  ;;  %v19262_v22 = vpop.f32.mrb[50].mxu1  ;;  %21168 = vmatpush3.bf16.msra.mxu0 %v21165_v34  ;;  %21118 = vmatprep.subr.bf16.mxu1 %v25004_v12 }
 0xc74   : > { %v11781_v50 = vadd.f32 %v19262_v22, %v24852_v4  ;;  %v11653_v46 = vpop.f32.mrb[51].mxu1  ;;  %21202 = vmatprep.subr.bf16.mxu0 %v24923_v48 }
 0xc75   : > { %v11780_v37 = vadd.f32 %v24852_v4, %v11653_v46  ;;  %19337 = vmatprep.mubr.f32.mxu0 %v24931_v20 }
 0xc76   : > { %19338 = vmatmul.mubr.f32.gmra.mrb[80].mxu0 %v24934_v53  ;;  %v24949_v56 = vmax.f32 %v11781_v50, 0.0  ;;  %21120 = vmatpush3.bf16.msra.mxu1 %v25004_v12 }
 0xc77   : > { %v24941_v60 = vmax.f32 %v11780_v37, 0.0  ;;  %v19265_v25 = vpop.f32.mrb[52].mxu1 }
 0xc78   : > { %v11783_v57 = vadd.f32 %v19265_v25, %v24852_v4  ;;  %v11663_v47 = vpop.f32.mrb[53].mxu1 }
 0xc79   : > { %v11782_v30 = vadd.f32 %v24852_v4, %v11663_v47  ;;  %19340 = vmatprep.mubr.f32.mxu0 %v24941_v60  ;;  %v11900_v47 = vld [vmem:[%s25746_s5 + $0x48] sm:$0xff] }
 0xc7a   : > { %19341 = vmatmul.mubr.f32.gmra.mrb[82].mxu0 %v24949_v56  ;;  %v24961_v3 = vmax.f32 %v11783_v57, 0.0  ;;  %v11899_v57 = vld [vmem:[%s25746_s5 + $0x40] sm:$0xff] }
 0xc7b   : > { %v24958_v9 = vmax.f32 %v11782_v30, 0.0  ;;  %v19268_v11 = vpop.f32.mrb[54].mxu1 }
 0xc7c   : > { %v11785_v29 = vadd.f32 %v19268_v11, %v24852_v4  ;;  %v11673_v58 = vpop.f32.mrb[55].mxu1  ;;  %v25029_v11 = vpack.c.bf16 %v11900_v47, %v11899_v57 }
 0xc7d   : > { %v11784_v10 = vadd.f32 %v24852_v4, %v11673_v58  ;;  %19343 = vmatprep.mubr.f32.mxu0 %v24958_v9 }
 0xc7e   : > { %19344 = vmatmul.mubr.f32.gmra.mrb[84].mxu0 %v24961_v3  ;;  %v24975_v15 = vmax.f32 %v11785_v29, 0.0  ;;  %v12987_v29 = vld [vmem:[#allocation10 + $0x118] sm:$0xff]  ;;  %21122 = vmatprep.subr.bf16.mxu1 %v25029_v11 }
 0xc7f   : > { %v24967_v26 = vmax.f32 %v11784_v10, 0.0  ;;  %v19271_v24 = vpop.f32.mrb[56].mxu1  ;;  %21124 = vmatpush3.bf16.msra.mxu1 %v25029_v11  ;;  %v12988_v10 = vld [vmem:[#allocation10 + $0x120] sm:$0xff] }
 0xc80   : > { %v11787_v44 = vadd.f32 %v19271_v24, %v24852_v4  ;;  %v11683_v32 = vpop.f32.mrb[57].mxu1  ;;  %v12989_v24 = vld [vmem:[#allocation10 + $0x128] sm:$0xff] }
 0xc81   : > { %v11786_v27 = vadd.f32 %v24852_v4, %v11683_v32  ;;  %19346 = vmatprep.mubr.f32.mxu0 %v24967_v26  ;;  %v25045_v32 = vpack.c.bf16 %v11902_v51, %v11901_v21  ;;  %v13518_v51 = vld [vmem:[#allocation10 + $0x190] sm:$0xff] }
 0xc82   : > { %19347 = vmatmul.mubr.f32.gmra.mrb[86].mxu0 %v24975_v15  ;;  %v24987_v16 = vmax.f32 %v11787_v44, 0.0  ;;  %v21209_v44 = vpack.c.bf16 %v12989_v24, %v12988_v10  ;;  %v13516_v10 = vld [vmem:[#allocation10 + $0x180] sm:$0xff]  ;;  %v13517_v24 = vld [vmem:[#allocation10 + $0x188] sm:$0xff] }
 0xc83   : > { %v24984_v6 = vmax.f32 %v11786_v27, 0.0  ;;  %v19274_v23 = vpop.f32.mrb[58].mxu1  ;;  %v12990_v27 = vld [vmem:[#allocation10 + $0x130] sm:$0xff]  ;;  %21126 = vmatprep.subr.bf16.mxu1 %v25045_v32  ;;  %v21265_v21 = vpack.c.bf16 %v13517_v24, %v13516_v10 }
 0xc84   : > { %v11789_v14 = vadd.f32 %v19274_v23, %v24852_v4  ;;  %v11693_v36 = vpop.f32.mrb[59].mxu1  ;;  %v12991_v23 = vld [vmem:[#allocation10 + $0x138] sm:$0xff]  ;;  %21128 = vmatpush3.bf16.msra.mxu1 %v25045_v32 }
 0xc85   : > { %v11788_v34 = vadd.f32 %v24852_v4, %v11693_v36  ;;  %19349 = vmatprep.mubr.f32.mxu0 %v24984_v6  ;;  %v12993_v36 = vld [vmem:[#allocation10 + $0x148] sm:$0xff] }
 0xc86   : > { %19350 = vmatmul.mubr.f32.gmra.mrb[88].mxu0 %v24987_v16  ;;  %v25001_v28 = vmax.f32 %v11789_v14, 0.0  ;;  %v12992_v14 = vld [vmem:[#allocation10 + $0x140] sm:$0xff] }
 0xc87   : > { %v24993_v2 = vmax.f32 %v11788_v34, 0.0  ;;  %v19277_v52 = vpop.f32.mrb[60].mxu1  ;;  %v11903_v34 = vld [vmem:[%s25746_s5 + $0x60] sm:$0xff]  ;;  %v21217_v41 = vpack.c.bf16 %v12993_v36, %v12992_v14 }
 0xc88   : > { %v11791_v45 = vadd.f32 %v19277_v52, %v24852_v4  ;;  %v11703_v31 = vpop.f32.mrb[61].mxu1  ;;  %v11904_v52 = vld [vmem:[%s25746_s5 + $0x68] sm:$0xff] }
 0xc89   : > { %v11790_v5 = vadd.f32 %v24852_v4, %v11703_v31  ;;  %19352 = vmatprep.mubr.f32.mxu0 %v24993_v2  ;;  %v25059_v18 = vpack.c.bf16 %v11904_v52, %v11903_v34  ;;  %v12995_v31 = vld [vmem:[#allocation10 + $0x158] sm:$0xff]  ;;  %v13522_v36 = vld [vmem:[#allocation10 + $0x1b0] sm:$0xff] }
 0xc8a   : > { %19353 = vmatmul.mubr.f32.gmra.mrb[90].mxu0 %v25001_v28  ;;  %v25013_v46 = vmax.f32 %v11791_v45, 0.0  ;;  %v12994_v45 = vld [vmem:[#allocation10 + $0x150] sm:$0xff]  ;;  %v13523_v34 = vld [vmem:[#allocation10 + $0x1b8] sm:$0xff] }
 0xc8b   : > { %v25010_v22 = vmax.f32 %v11790_v5, 0.0  ;;  %v19280_v50 = vpop.f32.mrb[62].mxu1  ;;  %21130 = vmatprep.subr.bf16.mxu1 %v25059_v18  ;;  %v21221_v5 = vpack.c.bf16 %v12995_v31, %v12994_v45  ;;  %v21277_v52 = vpack.c.bf16 %v13523_v34, %v13522_v36  ;;  %v13525_v45 = vld [vmem:[#allocation10 + $0x1c8] sm:$0xff] }
 0xc8c   : > { %v11793_v37 = vadd.f32 %v19280_v50, %v24852_v4  ;;  %v11713_v25 = vpop.f32.mrb[63].mxu1  ;;  %21132 = vmatpush3.bf16.msra.mxu1 %v25059_v18  ;;  %v12996_v50 = vld [vmem:[#allocation10 + $0x160] sm:$0xff] }
 0xc8d   : > { %v11792_v33 = vadd.f32 %v24852_v4, %v11713_v25  ;;  %19355 = vmatprep.mubr.f32.mxu0 %v25010_v22  ;;  %v12986_v4 = vld [vmem:[#allocation10 + $0x110] sm:$0xff]  ;;  %v11905_v25 = vld [vmem:[%s25746_s5 + $0x70] sm:$0xff] }
 0xc8e   : > { %19356 = vmatmul.mubr.f32.gmra.mrb[92].mxu0 %v25013_v46  ;;  %v25027_v30 = vmax.f32 %v11793_v37, 0.0  ;;  %v21205_v58 = vpack.c.bf16 %v12987_v29, %v12986_v4  ;;  %v12997_v37 = vld [vmem:[#allocation10 + $0x168] sm:$0xff]  ;;  %v12998_v4 = vld [vmem:[#allocation10 + $0x170] sm:$0xff]  ;;  %v12999_v29 = vld [vmem:[#allocation10 + $0x178] sm:$0xff] }
 0xc8f   : > { %v25019_v0 = vmax.f32 %v11792_v33, 0.0  ;;  %v11906_v33 = vld [vmem:[%s25746_s5 + $0x78] sm:$0xff]  ;;  %v21225_v57 = vpack.c.bf16 %v12997_v37, %v12996_v50  ;;  %v13527_v50 = vld [vmem:[#allocation10 + $0x1d8] sm:$0xff] }
 0xc90   : > { %v25073_v47 = vpack.c.bf16 %v11906_v33, %v11905_v25  ;;  %v13528_v25 = vld [vmem:[#allocation10 + $0x1e0] sm:$0xff]  ;;  %v13529_v33 = vld [vmem:[#allocation10 + $0x1e8] sm:$0xff] }
 0xc91   : > { %19358 = vmatprep.mubr.f32.mxu0 %v25019_v0 }
 0xc92   : > { %19359 = vmatmul.mubr.f32.gmra.mrb[94].mxu0 %v25027_v30  ;;  %21134 = vmatprep.subr.bf16.mxu1 %v25073_v47 }
 0xc93   : > { %19473 = vmatprep.mubr.f32.mxu0 %v24856_v38  ;;  %21136 = vmatpush3.bf16.msra.mxu1 %v25073_v47 }
 0xc94   : > { %21170 = vmatprep.subr.bf16.mxu1 %v24925_v35 }
 0xc96   : > { %19474 = vmatmul.mubr.f32.vlgmr.msra.gmra.mrb[96].mxu0 %v24858_v55 }
 0xc97   : > { %19476 = vmatprep.mubr.f32.mxu0 %v24864_v13  ;;  %21204 = vmatpush3.bf16.msra.mxu0 %v24923_v48  ;;  %v21213_v48 = vpack.c.bf16 %v12991_v23, %v12990_v27  ;;  %v13520_v23 = vld [vmem:[#allocation10 + $0x1a0] sm:$0xff] }
 0xc98   : > { %21206 = vmatprep.subr.bf16.mxu0 %v21205_v58 }
 0xc9a   : > { %19477 = vmatmul.mubr.f32.gmra.mrb[98].mxu0 %v24866_v8 }
 0xc9b   : > { %19479 = vmatprep.mubr.f32.mxu0 %v24872_v19  ;;  %21208 = vmatpush3.bf16.msra.mxu0 %v21205_v58  ;;  %v21229_v58 = vpack.c.bf16 %v12999_v29, %v12998_v4  ;;  %v13530_v4 = vld [vmem:[#allocation10 + $0x1f0] sm:$0xff]  ;;  %v13531_v29 = vld [vmem:[#allocation10 + $0x1f8] sm:$0xff] }
 0xc9c   : > { %21210 = vmatprep.subr.bf16.mxu0 %v21209_v44 }
 0xc9e   : > { %19480 = vmatmul.mubr.f32.gmra.mrb[100].mxu0 %v24874_v43 }
 0xc9f   : > { %19482 = vmatprep.mubr.f32.mxu0 %v24880_v17  ;;  %21212 = vmatpush3.bf16.msra.mxu0 %v21209_v44  ;;  %v13519_v44 = vld [vmem:[#allocation10 + $0x198] sm:$0xff] }
 0xca0   : > { %21214 = vmatprep.subr.bf16.mxu0 %v21213_v48  ;;  %v21269_v27 = vpack.c.bf16 %v13519_v44, %v13518_v51 }
 0xca2   : > { %19483 = vmatmul.mubr.f32.gmra.mrb[102].mxu0 %v24882_v54 }
 0xca3   : > { %19485 = vmatprep.mubr.f32.mxu0 %v24888_v42  ;;  %21216 = vmatpush3.bf16.msra.mxu0 %v21213_v48  ;;  %v13521_v48 = vld [vmem:[#allocation10 + $0x1a8] sm:$0xff] }
 0xca4   : > { %21218 = vmatprep.subr.bf16.mxu0 %v21217_v41  ;;  %v21273_v14 = vpack.c.bf16 %v13521_v48, %v13520_v23 }
 0xca6   : > { %19486 = vmatmul.mubr.f32.gmra.mrb[104].mxu0 %v24890_v1 }
 0xca7   : > { %19488 = vmatprep.mubr.f32.mxu0 %v24896_v39  ;;  %21220 = vmatpush3.bf16.msra.mxu0 %v21217_v41  ;;  %v13524_v41 = vld [vmem:[#allocation10 + $0x1c0] sm:$0xff] }
 0xca8   : > { %21222 = vmatprep.subr.bf16.mxu0 %v21221_v5  ;;  %v21281_v31 = vpack.c.bf16 %v13525_v45, %v13524_v41 }
 0xcaa   : > { %19489 = vmatmul.mubr.f32.gmra.mrb[106].mxu0 %v24898_v49 }
 0xcab   : > { %19491 = vmatprep.mubr.f32.mxu0 %v24904_v40  ;;  %21224 = vmatpush3.bf16.msra.mxu0 %v21221_v5  ;;  %v13526_v5 = vld [vmem:[#allocation10 + $0x1d0] sm:$0xff] }
 0xcac   : > { %21226 = vmatprep.subr.bf16.mxu0 %v21225_v57  ;;  %v21285_v37 = vpack.c.bf16 %v13527_v50, %v13526_v5 }
 0xcae   : > { %19492 = vmatmul.mubr.f32.gmra.mrb[108].mxu0 %v24906_v61 }
 0xcaf   : > { %19494 = vmatprep.mubr.f32.mxu0 %v24912_v62  ;;  %21228 = vmatpush3.bf16.msra.mxu0 %v21225_v57  ;;  %v21289_v57 = vpack.c.bf16 %v13529_v33, %v13528_v25 }
 0xcb0   : > { %21230 = vmatprep.subr.bf16.mxu0 %v21229_v58 }
 0xcb2   : > { %19495 = vmatmul.mubr.f32.gmra.mrb[110].mxu0 %v24920_v63 }
 0xcb3   : > { %19497 = vmatprep.mubr.f32.mxu0 %v24931_v20  ;;  %21232 = vmatpush3.bf16.msra.mxu0 %v21229_v58  ;;  %v21293_v58 = vpack.c.bf16 %v13531_v29, %v13530_v4 }
 0xcb4   : > { %21266 = vmatprep.subr.bf16.mxu0 %v21265_v21 }
 0xcb6   : > { %19498 = vmatmul.mubr.f32.gmra.mrb[112].mxu0 %v24934_v53 }
 0xcb7   : > { %19500 = vmatprep.mubr.f32.mxu0 %v24941_v60 }
 0xcba   : > { %19501 = vmatmul.mubr.f32.gmra.mrb[114].mxu0 %v24949_v56 }
 0xcbb   : > { %19503 = vmatprep.mubr.f32.mxu0 %v24958_v9 }
 0xcbe   : > { %19504 = vmatmul.mubr.f32.gmra.mrb[116].mxu0 %v24961_v3 }
 0xcbf   : > { %19506 = vmatprep.mubr.f32.mxu0 %v24967_v26 }
 0xcc2   : > { %19507 = vmatmul.mubr.f32.gmra.mrb[118].mxu0 %v24975_v15 }
 0xcc3   : > { %19509 = vmatprep.mubr.f32.mxu0 %v24984_v6 }
 0xcc6   : > { %19510 = vmatmul.mubr.f32.gmra.mrb[120].mxu0 %v24987_v16 }
 0xcc7   : > { %19512 = vmatprep.mubr.f32.mxu0 %v24993_v2 }
 0xcca   : > { %19513 = vmatmul.mubr.f32.gmra.mrb[122].mxu0 %v25001_v28 }
 0xccb   : > { %19515 = vmatprep.mubr.f32.mxu0 %v25010_v22 }
 0xcce   : > { %19516 = vmatmul.mubr.f32.gmra.mrb[124].mxu0 %v25013_v46 }
 0xccf   : > { %19518 = vmatprep.mubr.f32.mxu0 %v25019_v0 }
 0xcd2   : > { %19519 = vmatmul.mubr.f32.gmra.mrb[126].mxu0 %v25027_v30 }
 0xcd3   : > { %19633 = vmatprep.mubr.f32.mxu0 %v24856_v38 }
 0xcd6   : > { %19634 = vmatmul.mubr.f32.vlgmr.msra.gmra.mrb[128].mxu0 %v24858_v55 }
 0xcd7   : > { %19636 = vmatprep.mubr.f32.mxu0 %v24864_v13  ;;  %21268 = vmatpush3.bf16.msra.mxu0 %v21265_v21 }
 0xcd8   : > { %21270 = vmatprep.subr.bf16.mxu0 %v21269_v27 }
 0xcda   : > { %19637 = vmatmul.mubr.f32.gmra.mrb[130].mxu0 %v24866_v8 }
 0xcdb   : > { %19639 = vmatprep.mubr.f32.mxu0 %v24872_v19  ;;  %21272 = vmatpush3.bf16.msra.mxu0 %v21269_v27 }
 0xcdc   : > { %21274 = vmatprep.subr.bf16.mxu0 %v21273_v14 }
 0xcde   : > { %19640 = vmatmul.mubr.f32.gmra.mrb[132].mxu0 %v24874_v43 }
 0xcdf   : > { %19642 = vmatprep.mubr.f32.mxu0 %v24880_v17  ;;  %21276 = vmatpush3.bf16.msra.mxu0 %v21273_v14 }
 0xce0   : > { %21278 = vmatprep.subr.bf16.mxu0 %v21277_v52 }
 0xce2   : > { %19643 = vmatmul.mubr.f32.gmra.mrb[134].mxu0 %v24882_v54 }
 0xce3   : > { %19645 = vmatprep.mubr.f32.mxu0 %v24888_v42  ;;  %21280 = vmatpush3.bf16.msra.mxu0 %v21277_v52 }
 0xce4   : > { %21282 = vmatprep.subr.bf16.mxu0 %v21281_v31 }
 0xce6   : > { %19646 = vmatmul.mubr.f32.gmra.mrb[136].mxu0 %v24890_v1 }
 0xce7   : > { %19648 = vmatprep.mubr.f32.mxu0 %v24896_v39  ;;  %21284 = vmatpush3.bf16.msra.mxu0 %v21281_v31 }
 0xce8   : > { %21286 = vmatprep.subr.bf16.mxu0 %v21285_v37 }
 0xcea   : > { %19649 = vmatmul.mubr.f32.gmra.mrb[138].mxu0 %v24898_v49 }
 0xceb   : > { %19651 = vmatprep.mubr.f32.mxu0 %v24904_v40  ;;  %21288 = vmatpush3.bf16.msra.mxu0 %v21285_v37 }
 0xcec   : > { %21290 = vmatprep.subr.bf16.mxu0 %v21289_v57 }
 0xcee   : > { %19652 = vmatmul.mubr.f32.gmra.mrb[140].mxu0 %v24906_v61 }
 0xcef   : > { %19654 = vmatprep.mubr.f32.mxu0 %v24912_v62  ;;  %21292 = vmatpush3.bf16.msra.mxu0 %v21289_v57 }
 0xcf0   : > { %21294 = vmatprep.subr.bf16.mxu0 %v21293_v58 }
 0xcf2   : > { %19655 = vmatmul.mubr.f32.gmra.mrb[142].mxu0 %v24920_v63 }
 0xcf3   : > { %19657 = vmatprep.mubr.f32.mxu0 %v24931_v20  ;;  %21296 = vmatpush3.bf16.msra.mxu0 %v21293_v58 }
 0xcf6   : > { %19658 = vmatmul.mubr.f32.gmra.mrb[144].mxu0 %v24934_v53 }
 0xcf7   : > { %19660 = vmatprep.mubr.f32.mxu0 %v24941_v60 }
 0xcfa   : > { %19661 = vmatmul.mubr.f32.gmra.mrb[146].mxu0 %v24949_v56 }
 0xcfb   : > { %19663 = vmatprep.mubr.f32.mxu0 %v24958_v9 }
 0xcfe   : > { %19664 = vmatmul.mubr.f32.gmra.mrb[148].mxu0 %v24961_v3 }
 0xcff   : > { %19666 = vmatprep.mubr.f32.mxu0 %v24967_v26 }
 0xd02   : > { %19667 = vmatmul.mubr.f32.gmra.mrb[150].mxu0 %v24975_v15 }
 0xd03   : > { %19669 = vmatprep.mubr.f32.mxu0 %v24984_v6 }
 0xd06   : > { %19670 = vmatmul.mubr.f32.gmra.mrb[152].mxu0 %v24987_v16 }
 0xd07   : > { %19672 = vmatprep.mubr.f32.mxu0 %v24993_v2 }
 0xd0a   : > { %19673 = vmatmul.mubr.f32.gmra.mrb[154].mxu0 %v25001_v28 }
 0xd0b   : > { %19675 = vmatprep.mubr.f32.mxu0 %v25010_v22 }
 0xd0e   : > { %19676 = vmatmul.mubr.f32.gmra.mrb[156].mxu0 %v25013_v46 }
 0xd0f   : > { %19678 = vmatprep.mubr.f32.mxu0 %v25019_v0 }
 0xd12   : > { %19679 = vmatmul.mubr.f32.gmra.mrb[158].mxu0 %v25027_v30 }
 0xd13   : > { %19793 = vmatprep.mubr.f32.mxu0 %v24856_v38  ;;  %v25142_v38 = vld [vmem:[#allocation12] ss:$0 sm:$0xff] }
 0xd16   : > { %19794 = vmatmul.mubr.f32.vlgmr.msra.gmra.mrb[160].mxu0 %v24858_v55 }
 0xd17   : > { %19796 = vmatprep.mubr.f32.mxu0 %v24864_v13 }
 0xd1a   : > { %19797 = vmatmul.mubr.f32.gmra.mrb[162].mxu0 %v24866_v8 }
 0xd1b   : > { %19799 = vmatprep.mubr.f32.mxu0 %v24872_v19 }
 0xd1e   : > { %19800 = vmatmul.mubr.f32.gmra.mrb[164].mxu0 %v24874_v43 }
 0xd1f   : > { %19802 = vmatprep.mubr.f32.mxu0 %v24880_v17 }
 0xd22   : > { %19803 = vmatmul.mubr.f32.gmra.mrb[166].mxu0 %v24882_v54 }
 0xd23   : > { %19805 = vmatprep.mubr.f32.mxu0 %v24888_v42 }
 0xd26   : > { %19806 = vmatmul.mubr.f32.gmra.mrb[168].mxu0 %v24890_v1 }
 0xd27   : > { %19808 = vmatprep.mubr.f32.mxu0 %v24896_v39 }
 0xd29   : > { %v19315_v55 = vpop.f32.mrb[64].mxu0 }
 0xd2a   : > { %v12002_v13 = vadd.f32 %v19315_v55, %v25142_v38  ;;  %v11996_v8 = vpop.f32.mrb[65].mxu0  ;;  %19809 = vmatmul.mubr.f32.gmra.mrb[170].mxu0 %v24898_v49 }
 0xd2b   : > { %v11997_v19 = vadd.f32 %v25142_v38, %v11996_v8  ;;  %19811 = vmatprep.mubr.f32.mxu0 %v24904_v40 }
 0xd2c   : > { %v12156_v54 = vmax.f32 %v12002_v13, 0.0 }
 0xd2d   : > { %v12155_v43 = vmax.f32 %v11997_v19, 0.0  ;;  %v19318_v17 = vpop.f32.mrb[66].mxu0 }
 0xd2e   : > { %v12012_v42 = vadd.f32 %v19318_v17, %v25142_v38  ;;  %v12006_v1 = vpop.f32.mrb[67].mxu0  ;;  %19812 = vmatmul.mubr.f32.gmra.mrb[172].mxu0 %v24906_v61 }
 0xd2f   : > { %v12007_v39 = vadd.f32 %v25142_v38, %v12006_v1  ;;  %19393 = vmatprep.mubr.f32.mxu1 %v12155_v43  ;;  %19814 = vmatprep.mubr.f32.mxu0 %v24912_v62 }
 0xd30   : > { %19394 = vmatmul.mubr.f32.vlgmr.msra.gmra.mrb[64].mxu1 %v12156_v54  ;;  %v12158_v24 = vmax.f32 %v12012_v42, 0.0 }
 0xd31   : > { %v12157_v10 = vmax.f32 %v12007_v39, 0.0  ;;  %v19321_v49 = vpop.f32.mrb[68].mxu0  ;;  %21172 = vmatpush3.bf16.msra.mxu1 %v24925_v35 }
 0xd32   : > { %v12022_v40 = vadd.f32 %v19321_v49, %v25142_v38  ;;  %v12016_v21 = vpop.f32.mrb[69].mxu0  ;;  %19815 = vmatmul.mubr.f32.gmra.mrb[174].mxu0 %v24920_v63  ;;  %21174 = vmatprep.subr.bf16.mxu1 %v24952_v59 }
 0xd33   : > { %v12017_v61 = vadd.f32 %v25142_v38, %v12016_v21  ;;  %19396 = vmatprep.mubr.f32.mxu1 %v12157_v10  ;;  %19817 = vmatprep.mubr.f32.mxu0 %v24931_v20 }
 0xd34   : > { %19397 = vmatmul.mubr.f32.gmra.mrb[66].mxu1 %v12158_v24  ;;  %v12160_v44 = vmax.f32 %v12022_v40, 0.0 }
 0xd35   : > { %v12159_v62 = vmax.f32 %v12017_v61, 0.0  ;;  %v19324_v51 = vpop.f32.mrb[70].mxu0  ;;  %21176 = vmatpush3.bf16.msra.mxu1 %v24952_v59 }
 0xd36   : > { %v12032_v27 = vadd.f32 %v19324_v51, %v25142_v38  ;;  %v12026_v23 = vpop.f32.mrb[71].mxu0  ;;  %19818 = vmatmul.mubr.f32.gmra.mrb[176].mxu0 %v24934_v53  ;;  %21178 = vmatprep.subr.bf16.mxu1 %v24978_v7 }
 0xd37   : > { %v12027_v63 = vadd.f32 %v25142_v38, %v12026_v23  ;;  %19399 = vmatprep.mubr.f32.mxu1 %v12159_v62  ;;  %19820 = vmatprep.mubr.f32.mxu0 %v24941_v60 }
 0xd38   : > { %19400 = vmatmul.mubr.f32.gmra.mrb[68].mxu1 %v12160_v44  ;;  %v12162_v14 = vmax.f32 %v12032_v27, 0.0 }
 0xd39   : > { %v12161_v20 = vmax.f32 %v12027_v63, 0.0  ;;  %v19327_v48 = vpop.f32.mrb[72].mxu0  ;;  %21180 = vmatpush3.bf16.msra.mxu1 %v24978_v7 }
 0xd3a   : > { %v12042_v36 = vadd.f32 %v19327_v48, %v25142_v38  ;;  %v12036_v34 = vpop.f32.mrb[73].mxu0  ;;  %19821 = vmatmul.mubr.f32.gmra.mrb[178].mxu0 %v24949_v56  ;;  %21182 = vmatprep.subr.bf16.mxu1 %v25004_v12 }
 0xd3b   : > { %v12037_v53 = vadd.f32 %v25142_v38, %v12036_v34  ;;  %19402 = vmatprep.mubr.f32.mxu1 %v12161_v20  ;;  %19823 = vmatprep.mubr.f32.mxu0 %v24958_v9 }
 0xd3c   : > { %19403 = vmatmul.mubr.f32.gmra.mrb[70].mxu1 %v12162_v14  ;;  %v12164_v41 = vmax.f32 %v12042_v36, 0.0 }
 0xd3d   : > { %v12163_v60 = vmax.f32 %v12037_v53, 0.0  ;;  %v19330_v52 = vpop.f32.mrb[74].mxu0  ;;  %21184 = vmatpush3.bf16.msra.mxu1 %v25004_v12 }
 0xd3e   : > { %v12052_v45 = vadd.f32 %v19330_v52, %v25142_v38  ;;  %v12046_v31 = vpop.f32.mrb[75].mxu0  ;;  %19824 = vmatmul.mubr.f32.gmra.mrb[180].mxu0 %v24961_v3  ;;  %21186 = vmatprep.subr.bf16.mxu1 %v25029_v11 }
 0xd3f   : > { %v12047_v56 = vadd.f32 %v25142_v38, %v12046_v31  ;;  %19405 = vmatprep.mubr.f32.mxu1 %v12163_v60  ;;  %19826 = vmatprep.mubr.f32.mxu0 %v24967_v26 }
 0xd40   : > { %19406 = vmatmul.mubr.f32.gmra.mrb[72].mxu1 %v12164_v41  ;;  %v12166_v50 = vmax.f32 %v12052_v45, 0.0 }
 0xd41   : > { %v12165_v9 = vmax.f32 %v12047_v56, 0.0  ;;  %v19333_v5 = vpop.f32.mrb[76].mxu0  ;;  %21188 = vmatpush3.bf16.msra.mxu1 %v25029_v11 }
 0xd42   : > { %v12062_v37 = vadd.f32 %v19333_v5, %v25142_v38  ;;  %v12056_v25 = vpop.f32.mrb[77].mxu0  ;;  %19827 = vmatmul.mubr.f32.gmra.mrb[182].mxu0 %v24975_v15  ;;  %21190 = vmatprep.subr.bf16.mxu1 %v25045_v32 }
 0xd43   : > { %v12057_v3 = vadd.f32 %v25142_v38, %v12056_v25  ;;  %19408 = vmatprep.mubr.f32.mxu1 %v12165_v9  ;;  %19829 = vmatprep.mubr.f32.mxu0 %v24984_v6 }
 0xd44   : > { %19409 = vmatmul.mubr.f32.gmra.mrb[74].mxu1 %v12166_v50  ;;  %v12168_v57 = vmax.f32 %v12062_v37, 0.0 }
 0xd45   : > { %v12167_v26 = vmax.f32 %v12057_v3, 0.0  ;;  %v19336_v33 = vpop.f32.mrb[78].mxu0  ;;  %21192 = vmatpush3.bf16.msra.mxu1 %v25045_v32 }
 0xd46   : > { %v12072_v4 = vadd.f32 %v19336_v33, %v25142_v38  ;;  %v12066_v29 = vpop.f32.mrb[79].mxu0  ;;  %19830 = vmatmul.mubr.f32.gmra.mrb[184].mxu0 %v24987_v16  ;;  %21194 = vmatprep.subr.bf16.mxu1 %v25059_v18 }
 0xd47   : > { %v12067_v15 = vadd.f32 %v25142_v38, %v12066_v29  ;;  %19411 = vmatprep.mubr.f32.mxu1 %v12167_v26  ;;  %19832 = vmatprep.mubr.f32.mxu0 %v24993_v2 }
 0xd48   : > { %19412 = vmatmul.mubr.f32.gmra.mrb[76].mxu1 %v12168_v57  ;;  %v12170_v55 = vmax.f32 %v12072_v4, 0.0 }
 0xd49   : > { %v12169_v6 = vmax.f32 %v12067_v15, 0.0  ;;  %v19339_v58 = vpop.f32.mrb[80].mxu0  ;;  %21196 = vmatpush3.bf16.msra.mxu1 %v25059_v18 }
 0xd4a   : > { %v12082_v13 = vadd.f32 %v19339_v58, %v25142_v38  ;;  %v12076_v8 = vpop.f32.mrb[81].mxu0  ;;  %19833 = vmatmul.mubr.f32.gmra.mrb[186].mxu0 %v25001_v28  ;;  %21198 = vmatprep.subr.bf16.mxu1 %v25073_v47 }
 0xd4b   : > { %v12077_v16 = vadd.f32 %v25142_v38, %v12076_v8  ;;  %19414 = vmatprep.mubr.f32.mxu1 %v12169_v6  ;;  %19835 = vmatprep.mubr.f32.mxu0 %v25010_v22 }
 0xd4c   : > { %19415 = vmatmul.mubr.f32.gmra.mrb[78].mxu1 %v12170_v55  ;;  %v12172_v43 = vmax.f32 %v12082_v13, 0.0 }
 0xd4d   : > { %v12171_v2 = vmax.f32 %v12077_v16, 0.0  ;;  %v19342_v19 = vpop.f32.mrb[82].mxu0  ;;  %21200 = vmatpush3.bf16.msra.mxu1 %v25073_v47 }
 0xd4e   : > { %v12092_v17 = vadd.f32 %v19342_v19, %v25142_v38  ;;  %v12086_v54 = vpop.f32.mrb[83].mxu0  ;;  %19836 = vmatmul.mubr.f32.gmra.mrb[188].mxu0 %v25013_v46  ;;  %21234 = vmatprep.subr.bf16.mxu1 %v24925_v35 }
 0xd4f   : > { %v12087_v28 = vadd.f32 %v25142_v38, %v12086_v54  ;;  %19417 = vmatprep.mubr.f32.mxu1 %v12171_v2  ;;  %19838 = vmatprep.mubr.f32.mxu0 %v25019_v0 }
 0xd50   : > { %19418 = vmatmul.mubr.f32.gmra.mrb[80].mxu1 %v12172_v43  ;;  %v12174_v1 = vmax.f32 %v12092_v17, 0.0 }
 0xd51   : > { %v12173_v22 = vmax.f32 %v12087_v28, 0.0  ;;  %v19345_v42 = vpop.f32.mrb[84].mxu0 }
 0xd52   : > { %v12102_v39 = vadd.f32 %v19345_v42, %v25142_v38  ;;  %v12096_v10 = vpop.f32.mrb[85].mxu0  ;;  %19839 = vmatmul.mubr.f32.gmra.mrb[190].mxu0 %v25027_v30 }
 0xd53   : > { %v12097_v49 = vadd.f32 %v25142_v38, %v12096_v10  ;;  %19420 = vmatprep.mubr.f32.mxu1 %v12173_v22 }
 0xd54   : > { %19421 = vmatmul.mubr.f32.gmra.mrb[82].mxu1 %v12174_v1  ;;  %v12176_v40 = vmax.f32 %v12102_v39, 0.0 }
 0xd55   : > { %v12175_v46 = vmax.f32 %v12097_v49, 0.0  ;;  %v19348_v24 = vpop.f32.mrb[86].mxu0 }
 0xd56   : > { %v12112_v21 = vadd.f32 %v19348_v24, %v25142_v38  ;;  %v12106_v61 = vpop.f32.mrb[87].mxu0 }
 0xd57   : > { %v12107_v0 = vadd.f32 %v25142_v38, %v12106_v61  ;;  %19423 = vmatprep.mubr.f32.mxu1 %v12175_v46 }
 0xd58   : > { %19424 = vmatmul.mubr.f32.gmra.mrb[84].mxu1 %v12176_v40  ;;  %v12178_v44 = vmax.f32 %v12112_v21, 0.0 }
 0xd59   : > { %v12177_v62 = vmax.f32 %v12107_v0, 0.0  ;;  %v19351_v51 = vpop.f32.mrb[88].mxu0 }
 0xd5a   : > { %v12122_v27 = vadd.f32 %v19351_v51, %v25142_v38  ;;  %v12116_v30 = vpop.f32.mrb[89].mxu0 }
 0xd5b   : > { %v12117_v23 = vadd.f32 %v25142_v38, %v12116_v30  ;;  %19426 = vmatprep.mubr.f32.mxu1 %v12177_v62 }
 0xd5c   : > { %19427 = vmatmul.mubr.f32.gmra.mrb[86].mxu1 %v12178_v44  ;;  %v12180_v48 = vmax.f32 %v12122_v27, 0.0 }
 0xd5d   : > { %v12179_v63 = vmax.f32 %v12117_v23, 0.0  ;;  %v19354_v20 = vpop.f32.mrb[90].mxu0 }
 0xd5e   : > { %v12132_v14 = vadd.f32 %v19354_v20, %v25142_v38  ;;  %v12126_v36 = vpop.f32.mrb[91].mxu0 }
 0xd5f   : > { %v12127_v34 = vadd.f32 %v25142_v38, %v12126_v36  ;;  %19429 = vmatprep.mubr.f32.mxu1 %v12179_v63 }
 0xd60   : > { %19430 = vmatmul.mubr.f32.gmra.mrb[88].mxu1 %v12180_v48  ;;  %v12182_v52 = vmax.f32 %v12132_v14, 0.0 }
 0xd61   : > { %v12181_v53 = vmax.f32 %v12127_v34, 0.0  ;;  %v19357_v60 = vpop.f32.mrb[92].mxu0 }
 0xd62   : > { %v12142_v41 = vadd.f32 %v19357_v60, %v25142_v38  ;;  %v12136_v45 = vpop.f32.mrb[93].mxu0 }
 0xd63   : > { %v12137_v31 = vadd.f32 %v25142_v38, %v12136_v45  ;;  %19432 = vmatprep.mubr.f32.mxu1 %v12181_v53 }
 0xd64   : > { %19433 = vmatmul.mubr.f32.gmra.mrb[90].mxu1 %v12182_v52  ;;  %v12184_v5 = vmax.f32 %v12142_v41, 0.0 }
 0xd65   : > { %v12183_v56 = vmax.f32 %v12137_v31, 0.0  ;;  %v19360_v9 = vpop.f32.mrb[94].mxu0 }
 0xd66   : > { %v12152_v50 = vadd.f32 %v19360_v9, %v25142_v38  ;;  %v12146_v37 = vpop.f32.mrb[95].mxu0 }
 0xd67   : > { %v12147_v25 = vadd.f32 %v25142_v38, %v12146_v37  ;;  %19435 = vmatprep.mubr.f32.mxu1 %v12183_v56 }
 0xd68   : > { %19436 = vmatmul.mubr.f32.gmra.mrb[92].mxu1 %v12184_v5  ;;  %v12186_v33 = vmax.f32 %v12152_v50, 0.0 }
 0xd69   : > { %v12185_v3 = vmax.f32 %v12147_v25, 0.0  ;;  %v19475_v26 = vpop.f32.mrb[96].mxu0 }
 0xd6a   : > { %v12540_v57 = vadd.f32 %v19475_v26, %v25142_v38  ;;  %v12534_v4 = vpop.f32.mrb[97].mxu0 }
 0xd6b   : > { %v12535_v29 = vadd.f32 %v25142_v38, %v12534_v4  ;;  %19438 = vmatprep.mubr.f32.mxu1 %v12185_v3 }
 0xd6c   : > { %19439 = vmatmul.mubr.f32.gmra.mrb[94].mxu1 %v12186_v33  ;;  %v12694_v58 = vmax.f32 %v12540_v57, 0.0 }
 0xd6d   : > { %v12693_v15 = vmax.f32 %v12535_v29, 0.0  ;;  %v19478_v6 = vpop.f32.mrb[98].mxu0 }
 0xd6e   : > { %v12550_v55 = vadd.f32 %v19478_v6, %v25142_v38  ;;  %v12544_v13 = vpop.f32.mrb[99].mxu0 }
 0xd6f   : > { %v12545_v8 = vadd.f32 %v25142_v38, %v12544_v13  ;;  %19553 = vmatprep.mubr.f32.mxu1 %v12693_v15 }
 0xd70   : > { %19554 = vmatmul.mubr.f32.vlgmr.msra.gmra.mrb[96].mxu1 %v12694_v58  ;;  %v12696_v19 = vmax.f32 %v12550_v55, 0.0 }
 0xd71   : > { %v12695_v16 = vmax.f32 %v12545_v8, 0.0  ;;  %v19481_v2 = vpop.f32.mrb[100].mxu0  ;;  %21236 = vmatpush3.bf16.msra.mxu1 %v24925_v35 }
 0xd72   : > { %v12560_v43 = vadd.f32 %v19481_v2, %v25142_v38  ;;  %v12554_v17 = vpop.f32.mrb[101].mxu0  ;;  %21238 = vmatprep.subr.bf16.mxu1 %v24952_v59 }
 0xd73   : > { %v12555_v54 = vadd.f32 %v25142_v38, %v12554_v17  ;;  %19556 = vmatprep.mubr.f32.mxu1 %v12695_v16 }
 0xd74   : > { %19557 = vmatmul.mubr.f32.gmra.mrb[98].mxu1 %v12696_v19  ;;  %v12698_v42 = vmax.f32 %v12560_v43, 0.0 }
 0xd75   : > { %v12697_v28 = vmax.f32 %v12555_v54, 0.0  ;;  %v19484_v22 = vpop.f32.mrb[102].mxu0  ;;  %21240 = vmatpush3.bf16.msra.mxu1 %v24952_v59 }
 0xd76   : > { %v12570_v1 = vadd.f32 %v19484_v22, %v25142_v38  ;;  %v12564_v39 = vpop.f32.mrb[103].mxu0  ;;  %21242 = vmatprep.subr.bf16.mxu1 %v24978_v7 }
 0xd77   : > { %v12565_v10 = vadd.f32 %v25142_v38, %v12564_v39  ;;  %19559 = vmatprep.mubr.f32.mxu1 %v12697_v28 }
 0xd78   : > { %19560 = vmatmul.mubr.f32.gmra.mrb[100].mxu1 %v12698_v42  ;;  %v12700_v24 = vmax.f32 %v12570_v1, 0.0 }
 0xd79   : > { %v12699_v49 = vmax.f32 %v12565_v10, 0.0  ;;  %v19487_v46 = vpop.f32.mrb[104].mxu0  ;;  %21244 = vmatpush3.bf16.msra.mxu1 %v24978_v7 }
 0xd7a   : > { %v12580_v40 = vadd.f32 %v19487_v46, %v25142_v38  ;;  %v12574_v21 = vpop.f32.mrb[105].mxu0  ;;  %21246 = vmatprep.subr.bf16.mxu1 %v25004_v12 }
 0xd7b   : > { %v12575_v61 = vadd.f32 %v25142_v38, %v12574_v21  ;;  %19562 = vmatprep.mubr.f32.mxu1 %v12699_v49 }
 0xd7c   : > { %19563 = vmatmul.mubr.f32.gmra.mrb[102].mxu1 %v12700_v24  ;;  %v12702_v51 = vmax.f32 %v12580_v40, 0.0 }
 0xd7d   : > { %v12701_v0 = vmax.f32 %v12575_v61, 0.0  ;;  %v19490_v62 = vpop.f32.mrb[106].mxu0  ;;  %21248 = vmatpush3.bf16.msra.mxu1 %v25004_v12 }
 0xd7e   : > { %v12590_v44 = vadd.f32 %v19490_v62, %v25142_v38  ;;  %v12584_v27 = vpop.f32.mrb[107].mxu0  ;;  %21250 = vmatprep.subr.bf16.mxu1 %v25029_v11 }
 0xd7f   : > { %v12585_v30 = vadd.f32 %v25142_v38, %v12584_v27  ;;  %19565 = vmatprep.mubr.f32.mxu1 %v12701_v0 }
 0xd80   : > { %19566 = vmatmul.mubr.f32.gmra.mrb[104].mxu1 %v12702_v51  ;;  %v12704_v20 = vmax.f32 %v12590_v44, 0.0 }
 0xd81   : > { %v12703_v23 = vmax.f32 %v12585_v30, 0.0  ;;  %v19493_v63 = vpop.f32.mrb[108].mxu0  ;;  %21252 = vmatpush3.bf16.msra.mxu1 %v25029_v11 }
 0xd82   : > { %v12600_v48 = vadd.f32 %v19493_v63, %v25142_v38  ;;  %v12594_v14 = vpop.f32.mrb[109].mxu0  ;;  %21254 = vmatprep.subr.bf16.mxu1 %v25045_v32 }
 0xd83   : > { %v12595_v36 = vadd.f32 %v25142_v38, %v12594_v14  ;;  %19568 = vmatprep.mubr.f32.mxu1 %v12703_v23 }
 0xd84   : > { %19569 = vmatmul.mubr.f32.gmra.mrb[106].mxu1 %v12704_v20  ;;  %v12706_v60 = vmax.f32 %v12600_v48, 0.0 }
 0xd85   : > { %v12705_v34 = vmax.f32 %v12595_v36, 0.0  ;;  %v19496_v53 = vpop.f32.mrb[110].mxu0  ;;  %21256 = vmatpush3.bf16.msra.mxu1 %v25045_v32 }
 0xd86   : > { %v12610_v52 = vadd.f32 %v19496_v53, %v25142_v38  ;;  %v12604_v41 = vpop.f32.mrb[111].mxu0  ;;  %21258 = vmatprep.subr.bf16.mxu1 %v25059_v18 }
 0xd87   : > { %v12605_v45 = vadd.f32 %v25142_v38, %v12604_v41  ;;  %19571 = vmatprep.mubr.f32.mxu1 %v12705_v34 }
 0xd88   : > { %19572 = vmatmul.mubr.f32.gmra.mrb[108].mxu1 %v12706_v60  ;;  %v12708_v9 = vmax.f32 %v12610_v52, 0.0 }
 0xd89   : > { %v12707_v31 = vmax.f32 %v12605_v45, 0.0  ;;  %v19499_v56 = vpop.f32.mrb[112].mxu0  ;;  %21260 = vmatpush3.bf16.msra.mxu1 %v25059_v18 }
 0xd8a   : > { %v12620_v5 = vadd.f32 %v19499_v56, %v25142_v38  ;;  %v12614_v50 = vpop.f32.mrb[113].mxu0  ;;  %21262 = vmatprep.subr.bf16.mxu1 %v25073_v47 }
 0xd8b   : > { %v12615_v37 = vadd.f32 %v25142_v38, %v12614_v50  ;;  %19574 = vmatprep.mubr.f32.mxu1 %v12707_v31 }
 0xd8c   : > { %19575 = vmatmul.mubr.f32.gmra.mrb[110].mxu1 %v12708_v9  ;;  %v12710_v26 = vmax.f32 %v12620_v5, 0.0 }
 0xd8d   : > { %v12709_v25 = vmax.f32 %v12615_v37, 0.0  ;;  %v19502_v3 = vpop.f32.mrb[114].mxu0  ;;  %21264 = vmatpush3.bf16.msra.mxu1 %v25073_v47 }
 0xd8e   : > { %v12630_v33 = vadd.f32 %v19502_v3, %v25142_v38  ;;  %v12624_v57 = vpop.f32.mrb[115].mxu0  ;;  %21298 = vmatprep.subr.bf16.mxu1 %v24925_v35 }
 0xd8f   : > { %v12625_v4 = vadd.f32 %v25142_v38, %v12624_v57  ;;  %19577 = vmatprep.mubr.f32.mxu1 %v12709_v25 }
 0xd90   : > { %19578 = vmatmul.mubr.f32.gmra.mrb[112].mxu1 %v12710_v26  ;;  %v12712_v6 = vmax.f32 %v12630_v33, 0.0 }
 0xd91   : > { %v12711_v29 = vmax.f32 %v12625_v4, 0.0  ;;  %v19505_v15 = vpop.f32.mrb[116].mxu0 }
 0xd92   : > { %v12640_v58 = vadd.f32 %v19505_v15, %v25142_v38  ;;  %v12634_v55 = vpop.f32.mrb[117].mxu0 }
 0xd93   : > { %v12635_v13 = vadd.f32 %v25142_v38, %v12634_v55  ;;  %19580 = vmatprep.mubr.f32.mxu1 %v12711_v29 }
 0xd94   : > { %19581 = vmatmul.mubr.f32.gmra.mrb[114].mxu1 %v12712_v6  ;;  %v12714_v2 = vmax.f32 %v12640_v58, 0.0 }
 0xd95   : > { %v12713_v8 = vmax.f32 %v12635_v13, 0.0  ;;  %v19508_v16 = vpop.f32.mrb[118].mxu0 }
 0xd96   : > { %v12650_v19 = vadd.f32 %v19508_v16, %v25142_v38  ;;  %v12644_v43 = vpop.f32.mrb[119].mxu0 }
 0xd97   : > { %v12645_v17 = vadd.f32 %v25142_v38, %v12644_v43  ;;  %19583 = vmatprep.mubr.f32.mxu1 %v12713_v8 }
 0xd98   : > { %19584 = vmatmul.mubr.f32.gmra.mrb[116].mxu1 %v12714_v2  ;;  %v12716_v22 = vmax.f32 %v12650_v19, 0.0 }
 0xd99   : > { %v12715_v54 = vmax.f32 %v12645_v17, 0.0  ;;  %v19511_v28 = vpop.f32.mrb[120].mxu0 }
 0xd9a   : > { %v12660_v42 = vadd.f32 %v19511_v28, %v25142_v38  ;;  %v12654_v1 = vpop.f32.mrb[121].mxu0 }
 0xd9b   : > { %v12655_v39 = vadd.f32 %v25142_v38, %v12654_v1  ;;  %19586 = vmatprep.mubr.f32.mxu1 %v12715_v54 }
 0xd9c   : > { %19587 = vmatmul.mubr.f32.gmra.mrb[118].mxu1 %v12716_v22  ;;  %v12718_v46 = vmax.f32 %v12660_v42, 0.0 }
 0xd9d   : > { %v12717_v10 = vmax.f32 %v12655_v39, 0.0  ;;  %v19514_v49 = vpop.f32.mrb[122].mxu0 }
 0xd9e   : > { %v12670_v24 = vadd.f32 %v19514_v49, %v25142_v38  ;;  %v12664_v40 = vpop.f32.mrb[123].mxu0 }
 0xd9f   : > { %v12665_v21 = vadd.f32 %v25142_v38, %v12664_v40  ;;  %19589 = vmatprep.mubr.f32.mxu1 %v12717_v10 }
 0xda0   : > { %19590 = vmatmul.mubr.f32.gmra.mrb[120].mxu1 %v12718_v46  ;;  %v12720_v62 = vmax.f32 %v12670_v24, 0.0 }
 0xda1   : > { %v12719_v61 = vmax.f32 %v12665_v21, 0.0  ;;  %v19517_v0 = vpop.f32.mrb[124].mxu0 }
 0xda2   : > { %v12680_v51 = vadd.f32 %v19517_v0, %v25142_v38  ;;  %v12674_v44 = vpop.f32.mrb[125].mxu0 }
 0xda3   : > { %v12675_v27 = vadd.f32 %v25142_v38, %v12674_v44  ;;  %19592 = vmatprep.mubr.f32.mxu1 %v12719_v61 }
 0xda4   : > { %19593 = vmatmul.mubr.f32.gmra.mrb[122].mxu1 %v12720_v62  ;;  %v12722_v63 = vmax.f32 %v12680_v51, 0.0 }
 0xda5   : > { %v12721_v30 = vmax.f32 %v12675_v27, 0.0  ;;  %v19520_v23 = vpop.f32.mrb[126].mxu0 }
 0xda6   : > { %v12690_v20 = vadd.f32 %v19520_v23, %v25142_v38  ;;  %v12684_v48 = vpop.f32.mrb[127].mxu0 }
 0xda7   : > { %v12685_v14 = vadd.f32 %v25142_v38, %v12684_v48  ;;  %19595 = vmatprep.mubr.f32.mxu1 %v12721_v30 }
 0xda8   : > { %19596 = vmatmul.mubr.f32.gmra.mrb[124].mxu1 %v12722_v63  ;;  %v12724_v53 = vmax.f32 %v12690_v20, 0.0 }
 0xda9   : > { %v12723_v36 = vmax.f32 %v12685_v14, 0.0  ;;  %v19635_v34 = vpop.f32.mrb[128].mxu0 }
 0xdaa   : > { %v13072_v60 = vadd.f32 %v19635_v34, %v25142_v38  ;;  %v13066_v52 = vpop.f32.mrb[129].mxu0 }
 0xdab   : > { %v13067_v41 = vadd.f32 %v25142_v38, %v13066_v52  ;;  %19598 = vmatprep.mubr.f32.mxu1 %v12723_v36 }
 0xdac   : > { %19599 = vmatmul.mubr.f32.gmra.mrb[126].mxu1 %v12724_v53  ;;  %v13226_v56 = vmax.f32 %v13072_v60, 0.0 }
 0xdad   : > { %v13225_v45 = vmax.f32 %v13067_v41, 0.0  ;;  %v19638_v31 = vpop.f32.mrb[130].mxu0 }
 0xdae   : > { %v13082_v9 = vadd.f32 %v19638_v31, %v25142_v38  ;;  %v13076_v5 = vpop.f32.mrb[131].mxu0 }
 0xdaf   : > { %v13077_v50 = vadd.f32 %v25142_v38, %v13076_v5  ;;  %19713 = vmatprep.mubr.f32.mxu1 %v13225_v45 }
 0xdb0   : > { %19714 = vmatmul.mubr.f32.vlgmr.msra.gmra.mrb[128].mxu1 %v13226_v56  ;;  %v13228_v3 = vmax.f32 %v13082_v9, 0.0 }
 0xdb1   : > { %v13227_v37 = vmax.f32 %v13077_v50, 0.0  ;;  %v19641_v25 = vpop.f32.mrb[132].mxu0  ;;  %21300 = vmatpush3.bf16.msra.mxu1 %v24925_v35 }
 0xdb2   : > { %v13092_v26 = vadd.f32 %v19641_v25, %v25142_v38  ;;  %v13086_v33 = vpop.f32.mrb[133].mxu0  ;;  %21302 = vmatprep.subr.bf16.mxu1 %v24952_v59 }
 0xdb3   : > { %v13087_v57 = vadd.f32 %v25142_v38, %v13086_v33  ;;  %19716 = vmatprep.mubr.f32.mxu1 %v13227_v37 }
 0xdb4   : > { %19717 = vmatmul.mubr.f32.gmra.mrb[130].mxu1 %v13228_v3  ;;  %v13230_v15 = vmax.f32 %v13092_v26, 0.0 }
 0xdb5   : > { %v13229_v4 = vmax.f32 %v13087_v57, 0.0  ;;  %v19644_v29 = vpop.f32.mrb[134].mxu0  ;;  %21304 = vmatpush3.bf16.msra.mxu1 %v24952_v59 }
 0xdb6   : > { %v13102_v6 = vadd.f32 %v19644_v29, %v25142_v38  ;;  %v13096_v58 = vpop.f32.mrb[135].mxu0  ;;  %21306 = vmatprep.subr.bf16.mxu1 %v24978_v7 }
 0xdb7   : > { %v13097_v35 = vadd.f32 %v25142_v38, %v13096_v58  ;;  %19719 = vmatprep.mubr.f32.mxu1 %v13229_v4 }
 0xdb8   : > { %19720 = vmatmul.mubr.f32.gmra.mrb[132].mxu1 %v13230_v15  ;;  %v13232_v8 = vmax.f32 %v13102_v6, 0.0 }
 0xdb9   : > { %v13231_v55 = vmax.f32 %v13097_v35, 0.0  ;;  %v19647_v13 = vpop.f32.mrb[136].mxu0  ;;  %21308 = vmatpush3.bf16.msra.mxu1 %v24978_v7 }
 0xdba   : > { %v13112_v16 = vadd.f32 %v19647_v13, %v25142_v38  ;;  %v13106_v2 = vpop.f32.mrb[137].mxu0  ;;  %21310 = vmatprep.subr.bf16.mxu1 %v25004_v12 }
 0xdbb   : > { %v13107_v59 = vadd.f32 %v25142_v38, %v13106_v2  ;;  %19722 = vmatprep.mubr.f32.mxu1 %v13231_v55 }
 0xdbc   : > { %19723 = vmatmul.mubr.f32.gmra.mrb[134].mxu1 %v13232_v8  ;;  %v13234_v17 = vmax.f32 %v13112_v16, 0.0 }
 0xdbd   : > { %v13233_v19 = vmax.f32 %v13107_v59, 0.0  ;;  %v19650_v43 = vpop.f32.mrb[138].mxu0  ;;  %21312 = vmatpush3.bf16.msra.mxu1 %v25004_v12 }
 0xdbe   : > { %v13122_v54 = vadd.f32 %v19650_v43, %v25142_v38  ;;  %v13116_v28 = vpop.f32.mrb[139].mxu0  ;;  %21314 = vmatprep.subr.bf16.mxu1 %v25029_v11 }
 0xdbf   : > { %v13117_v7 = vadd.f32 %v25142_v38, %v13116_v28  ;;  %19725 = vmatprep.mubr.f32.mxu1 %v13233_v19 }
 0xdc0   : > { %19726 = vmatmul.mubr.f32.gmra.mrb[136].mxu1 %v13234_v17  ;;  %v13236_v1 = vmax.f32 %v13122_v54, 0.0 }
 0xdc1   : > { %v13235_v22 = vmax.f32 %v13117_v7, 0.0  ;;  %v19653_v42 = vpop.f32.mrb[140].mxu0  ;;  %21316 = vmatpush3.bf16.msra.mxu1 %v25029_v11 }
 0xdc2   : > { %v13132_v39 = vadd.f32 %v19653_v42, %v25142_v38  ;;  %v13126_v10 = vpop.f32.mrb[141].mxu0  ;;  %21318 = vmatprep.subr.bf16.mxu1 %v25045_v32 }
 0xdc3   : > { %v13127_v12 = vadd.f32 %v25142_v38, %v13126_v10  ;;  %19728 = vmatprep.mubr.f32.mxu1 %v13235_v22 }
 0xdc4   : > { %19729 = vmatmul.mubr.f32.gmra.mrb[138].mxu1 %v13236_v1  ;;  %v13238_v24 = vmax.f32 %v13132_v39, 0.0 }
 0xdc5   : > { %v13237_v49 = vmax.f32 %v13127_v12, 0.0  ;;  %v19656_v46 = vpop.f32.mrb[142].mxu0  ;;  %21320 = vmatpush3.bf16.msra.mxu1 %v25045_v32 }
 0xdc6   : > { %v13142_v40 = vadd.f32 %v19656_v46, %v25142_v38  ;;  %v13136_v21 = vpop.f32.mrb[143].mxu0  ;;  %21322 = vmatprep.subr.bf16.mxu1 %v25059_v18 }
 0xdc7   : > { %v13137_v11 = vadd.f32 %v25142_v38, %v13136_v21  ;;  %19731 = vmatprep.mubr.f32.mxu1 %v13237_v49 }
 0xdc8   : > { %19732 = vmatmul.mubr.f32.gmra.mrb[140].mxu1 %v13238_v24  ;;  %v13240_v62 = vmax.f32 %v13142_v40, 0.0 }
 0xdc9   : > { %v13239_v61 = vmax.f32 %v13137_v11, 0.0  ;;  %v19659_v0 = vpop.f32.mrb[144].mxu0  ;;  %21324 = vmatpush3.bf16.msra.mxu1 %v25059_v18 }
 0xdca   : > { %v13152_v51 = vadd.f32 %v19659_v0, %v25142_v38  ;;  %v13146_v44 = vpop.f32.mrb[145].mxu0  ;;  %21326 = vmatprep.subr.bf16.mxu1 %v25073_v47 }
 0xdcb   : > { %v13147_v32 = vadd.f32 %v25142_v38, %v13146_v44  ;;  %19734 = vmatprep.mubr.f32.mxu1 %v13239_v61 }
 0xdcc   : > { %19735 = vmatmul.mubr.f32.gmra.mrb[142].mxu1 %v13240_v62  ;;  %v13242_v23 = vmax.f32 %v13152_v51, 0.0 }
 0xdcd   : > { %v13241_v27 = vmax.f32 %v13147_v32, 0.0  ;;  %v19662_v30 = vpop.f32.mrb[146].mxu0  ;;  %21328 = vmatpush3.bf16.msra.mxu1 %v25073_v47 }
 0xdce   : > { %v13162_v63 = vadd.f32 %v19662_v30, %v25142_v38  ;;  %v13156_v20 = vpop.f32.mrb[147].mxu0 }
 0xdcf   : > { %v13157_v18 = vadd.f32 %v25142_v38, %v13156_v20  ;;  %19737 = vmatprep.mubr.f32.mxu1 %v13241_v27 }
 0xdd0   : > { %19738 = vmatmul.mubr.f32.gmra.mrb[144].mxu1 %v13242_v23  ;;  %v13244_v36 = vmax.f32 %v13162_v63, 0.0 }
 0xdd1   : > { %v13243_v48 = vmax.f32 %v13157_v18, 0.0  ;;  %v19665_v14 = vpop.f32.mrb[148].mxu0 }
 0xdd2   : > { %v13172_v34 = vadd.f32 %v19665_v14, %v25142_v38  ;;  %v13166_v53 = vpop.f32.mrb[149].mxu0 }
 0xdd3   : > { %v13167_v60 = vadd.f32 %v25142_v38, %v13166_v53  ;;  %19740 = vmatprep.mubr.f32.mxu1 %v13243_v48 }
 0xdd4   : > { %19741 = vmatmul.mubr.f32.gmra.mrb[146].mxu1 %v13244_v36  ;;  %v13246_v41 = vmax.f32 %v13172_v34, 0.0 }
 0xdd5   : > { %v13245_v52 = vmax.f32 %v13167_v60, 0.0  ;;  %v19668_v47 = vpop.f32.mrb[150].mxu0 }
 0xdd6   : > { %v13182_v45 = vadd.f32 %v19668_v47, %v25142_v38  ;;  %v13176_v31 = vpop.f32.mrb[151].mxu0 }
 0xdd7   : > { %v13177_v56 = vadd.f32 %v25142_v38, %v13176_v31  ;;  %19743 = vmatprep.mubr.f32.mxu1 %v13245_v52 }
 0xdd8   : > { %19744 = vmatmul.mubr.f32.gmra.mrb[148].mxu1 %v13246_v41  ;;  %v13248_v50 = vmax.f32 %v13182_v45, 0.0 }
 0xdd9   : > { %v13247_v9 = vmax.f32 %v13177_v56, 0.0  ;;  %v19671_v5 = vpop.f32.mrb[152].mxu0  ;;  %v25320_v56 = vld [vmem:[#allocation13] ss:$0 sm:$0xff] }
 0xdda   : > { %v13192_v37 = vadd.f32 %v19671_v5, %v25142_v38  ;;  %v13186_v25 = vpop.f32.mrb[153].mxu0 }
 0xddb   : > { %v13187_v3 = vadd.f32 %v25142_v38, %v13186_v25  ;;  %19746 = vmatprep.mubr.f32.mxu1 %v13247_v9 }
 0xddc   : > { %19747 = vmatmul.mubr.f32.gmra.mrb[150].mxu1 %v13248_v50  ;;  %v13250_v57 = vmax.f32 %v13192_v37, 0.0 }
 0xddd   : > { %v13249_v26 = vmax.f32 %v13187_v3, 0.0  ;;  %v19674_v33 = vpop.f32.mrb[154].mxu0 }
 0xdde   : > { %v13202_v4 = vadd.f32 %v19674_v33, %v25142_v38  ;;  %v13196_v29 = vpop.f32.mrb[155].mxu0 }
 0xddf   : > { %v13197_v15 = vadd.f32 %v25142_v38, %v13196_v29  ;;  %19749 = vmatprep.mubr.f32.mxu1 %v13249_v26 }
 0xde0   : > { %19750 = vmatmul.mubr.f32.gmra.mrb[152].mxu1 %v13250_v57  ;;  %v13252_v35 = vmax.f32 %v13202_v4, 0.0 }
 0xde1   : > { %v13251_v6 = vmax.f32 %v13197_v15, 0.0  ;;  %v19677_v58 = vpop.f32.mrb[156].mxu0  ;;  %v25328_v15 = vld [vmem:[#allocation12] ss:$0 sm:$0xff] }
 0xde2   : > { %v13212_v55 = vadd.f32 %v19677_v58, %v25142_v38  ;;  %v13206_v13 = vpop.f32.mrb[157].mxu0 }
 0xde3   : > { %v13207_v8 = vadd.f32 %v25142_v38, %v13206_v13  ;;  %19752 = vmatprep.mubr.f32.mxu1 %v13251_v6 }
 0xde4   : > { %19753 = vmatmul.mubr.f32.gmra.mrb[154].mxu1 %v13252_v35  ;;  %v13254_v59 = vmax.f32 %v13212_v55, 0.0 }
 0xde5   : > { %v13253_v16 = vmax.f32 %v13207_v8, 0.0  ;;  %v19680_v2 = vpop.f32.mrb[158].mxu0 }
 0xde6   : > { %v13222_v19 = vadd.f32 %v19680_v2, %v25142_v38  ;;  %v13216_v43 = vpop.f32.mrb[159].mxu0 }
 0xde7   : > { %v13217_v17 = vadd.f32 %v25142_v38, %v13216_v43  ;;  %19755 = vmatprep.mubr.f32.mxu1 %v13253_v16 }
 0xde8   : > { %19756 = vmatmul.mubr.f32.gmra.mrb[156].mxu1 %v13254_v59  ;;  %v13256_v7 = vmax.f32 %v13222_v19, 0.0 }
 0xde9   : > { %v13255_v54 = vmax.f32 %v13217_v17, 0.0  ;;  %v19795_v28 = vpop.f32.mrb[160].mxu0 }
 0xdea   : > { %v13604_v22 = vadd.f32 %v19795_v28, %v25142_v38  ;;  %v13598_v42 = vpop.f32.mrb[161].mxu0 }
 0xdeb   : > { %v13599_v1 = vadd.f32 %v25142_v38, %v13598_v42  ;;  %19758 = vmatprep.mubr.f32.mxu1 %v13255_v54 }
 0xdec   : > { %19759 = vmatmul.mubr.f32.gmra.mrb[158].mxu1 %v13256_v7  ;;  %v13758_v12 = vmax.f32 %v13604_v22, 0.0 }
 0xded   : > { %v13757_v39 = vmax.f32 %v13599_v1, 0.0  ;;  %v19798_v10 = vpop.f32.mrb[162].mxu0 }
 0xdee   : > { %v13614_v49 = vadd.f32 %v19798_v10, %v25142_v38  ;;  %v13608_v46 = vpop.f32.mrb[163].mxu0 }
 0xdef   : > { %v13609_v24 = vadd.f32 %v25142_v38, %v13608_v46  ;;  %19873 = vmatprep.mubr.f32.mxu1 %v13757_v39 }
 0xdf0   : > { %19874 = vmatmul.mubr.f32.vlgmr.msra.gmra.mrb[160].mxu1 %v13758_v12  ;;  %v13760_v11 = vmax.f32 %v13614_v49, 0.0 }
 0xdf1   : > { %v13759_v40 = vmax.f32 %v13609_v24, 0.0  ;;  %v19801_v21 = vpop.f32.mrb[164].mxu0 }
 0xdf2   : > { %v13624_v61 = vadd.f32 %v19801_v21, %v25142_v38  ;;  %v13618_v0 = vpop.f32.mrb[165].mxu0 }
 0xdf3   : > { %v13619_v62 = vadd.f32 %v25142_v38, %v13618_v0  ;;  %19876 = vmatprep.mubr.f32.mxu1 %v13759_v40 }
 0xdf4   : > { %19877 = vmatmul.mubr.f32.gmra.mrb[162].mxu1 %v13760_v11  ;;  %v13762_v32 = vmax.f32 %v13624_v61, 0.0 }
 0xdf5   : > { %v13761_v51 = vmax.f32 %v13619_v62, 0.0  ;;  %v19804_v44 = vpop.f32.mrb[166].mxu0 }
 0xdf6   : > { %v13634_v27 = vadd.f32 %v19804_v44, %v25142_v38  ;;  %v13628_v30 = vpop.f32.mrb[167].mxu0 }
 0xdf7   : > { %v13629_v23 = vadd.f32 %v25142_v38, %v13628_v30  ;;  %19879 = vmatprep.mubr.f32.mxu1 %v13761_v51 }
 0xdf8   : > { %19880 = vmatmul.mubr.f32.gmra.mrb[164].mxu1 %v13762_v32  ;;  %v13764_v18 = vmax.f32 %v13634_v27, 0.0 }
 0xdf9   : > { %v13763_v63 = vmax.f32 %v13629_v23, 0.0  ;;  %v19807_v20 = vpop.f32.mrb[168].mxu0 }
 0xdfa   : > { %v13644_v48 = vadd.f32 %v19807_v20, %v25142_v38  ;;  %v13638_v14 = vpop.f32.mrb[169].mxu0 }
 0xdfb   : > { %v13639_v36 = vadd.f32 %v25142_v38, %v13638_v14  ;;  %19882 = vmatprep.mubr.f32.mxu1 %v13763_v63 }
 0xdfc   : > { %19883 = vmatmul.mubr.f32.gmra.mrb[166].mxu1 %v13764_v18  ;;  %v13766_v60 = vmax.f32 %v13644_v48, 0.0 }
 0xdfd   : > { %v13765_v34 = vmax.f32 %v13639_v36, 0.0  ;;  %v19810_v53 = vpop.f32.mrb[170].mxu0 }
 0xdfe   : > { %v13654_v52 = vadd.f32 %v19810_v53, %v25142_v38  ;;  %v13648_v47 = vpop.f32.mrb[171].mxu0 }
 0xdff   : > { %v13649_v41 = vadd.f32 %v25142_v38, %v13648_v47  ;;  %19885 = vmatprep.mubr.f32.mxu1 %v13765_v34 }
 0xe00   : > { %19886 = vmatmul.mubr.f32.gmra.mrb[168].mxu1 %v13766_v60  ;;  %v13768_v9 = vmax.f32 %v13654_v52, 0.0 }
 0xe01   : > { %v13767_v45 = vmax.f32 %v13649_v41, 0.0  ;;  %v19813_v31 = vpop.f32.mrb[172].mxu0 }
 0xe02   : > { %v13664_v5 = vadd.f32 %v19813_v31, %v25142_v38  ;;  %v13658_v50 = vpop.f32.mrb[173].mxu0 }
 0xe03   : > { %v13659_v37 = vadd.f32 %v25142_v38, %v13658_v50  ;;  %v19395_v25 = vpop.f32.mrb[64].mxu1  ;;  %19888 = vmatprep.mubr.f32.mxu1 %v13767_v45 }
 0xe04   : > { %v12265_v3 = vadd.f32 %v19395_v25, %v25320_v56  ;;  %v12259_v26 = vpop.f32.mrb[65].mxu1  ;;  %19889 = vmatmul.mubr.f32.gmra.mrb[170].mxu1 %v13768_v9  ;;  %v13770_v29 = vmax.f32 %v13664_v5, 0.0 }
 0xe05   : > { %v13769_v33 = vmax.f32 %v13659_v37, 0.0  ;;  %v12260_v57 = vadd.f32 %v25320_v56, %v12259_v26  ;;  %v19816_v4 = vpop.f32.mrb[174].mxu0 }
 0xe06   : > { %12420 = vst.msk [vmem:[%s22973_s15 + $0x8] sm:$0xff] %vm12418_vm0, %v12265_v3  ;;  %v13674_v6 = vadd.f32 %v25328_v15, %v19816_v4  ;;  %v13668_v38 = vpop.f32.mrb[175].mxu0 }
 0xe07   : > { %12419 = vst.msk [vmem:[%s22973_s15] sm:$0xff] %vm12418_vm0, %v12260_v57  ;;  %v13669_v58 = vadd.f32 %v25328_v15, %v13668_v38  ;;  %v19398_v35 = vpop.f32.mrb[66].mxu1  ;;  %19891 = vmatprep.mubr.f32.mxu1 %v13769_v33 }
 0xe08   : > { %v12275_v55 = vadd.f32 %v19398_v35, %v25320_v56  ;;  %v12269_v13 = vpop.f32.mrb[67].mxu1  ;;  %19892 = vmatmul.mubr.f32.gmra.mrb[172].mxu1 %v13770_v29  ;;  %v13772_v59 = vmax.f32 %v13674_v6, 0.0 }
 0xe09   : > { %v13771_v8 = vmax.f32 %v13669_v58, 0.0  ;;  %v12270_v16 = vadd.f32 %v25320_v56, %v12269_v13  ;;  %v19819_v2 = vpop.f32.mrb[176].mxu0 }
 0xe0a   : > { %12422 = vst.msk [vmem:[%s22973_s15 + $0x18] sm:$0xff] %vm12418_vm0, %v12275_v55  ;;  %v13684_v19 = vadd.f32 %v25328_v15, %v19819_v2  ;;  %v13678_v43 = vpop.f32.mrb[177].mxu0 }
 0xe0b   : > { %12421 = vst.msk [vmem:[%s22973_s15 + $0x10] sm:$0xff] %vm12418_vm0, %v12270_v16  ;;  %v13679_v17 = vadd.f32 %v25328_v15, %v13678_v43  ;;  %v19401_v54 = vpop.f32.mrb[68].mxu1  ;;  %19894 = vmatprep.mubr.f32.mxu1 %v13771_v8 }
 0xe0c   : > { %v12285_v28 = vadd.f32 %v19401_v54, %v25320_v56  ;;  %v12279_v7 = vpop.f32.mrb[69].mxu1  ;;  %19895 = vmatmul.mubr.f32.gmra.mrb[174].mxu1 %v13772_v59  ;;  %v13774_v39 = vmax.f32 %v13684_v19, 0.0 }
 0xe0d   : > { %v13773_v22 = vmax.f32 %v13679_v17, 0.0  ;;  %v12280_v42 = vadd.f32 %v25320_v56, %v12279_v7  ;;  %v19822_v1 = vpop.f32.mrb[178].mxu0 }
 0xe0e   : > { %12424 = vst.msk [vmem:[%s22973_s15 + $0x28] sm:$0xff] %vm12418_vm0, %v12285_v28  ;;  %v13694_v10 = vadd.f32 %v25328_v15, %v19822_v1  ;;  %v13688_v12 = vpop.f32.mrb[179].mxu0 }
 0xe0f   : > { %12423 = vst.msk [vmem:[%s22973_s15 + $0x20] sm:$0xff] %vm12418_vm0, %v12280_v42  ;;  %v13689_v49 = vadd.f32 %v25328_v15, %v13688_v12  ;;  %v19404_v46 = vpop.f32.mrb[70].mxu1  ;;  %19897 = vmatprep.mubr.f32.mxu1 %v13773_v22 }
 0xe10   : > { %v12295_v24 = vadd.f32 %v19404_v46, %v25320_v56  ;;  %v12289_v40 = vpop.f32.mrb[71].mxu1  ;;  %19898 = vmatmul.mubr.f32.gmra.mrb[176].mxu1 %v13774_v39  ;;  %v13776_v0 = vmax.f32 %v13694_v10, 0.0 }
 0xe11   : > { %v13775_v21 = vmax.f32 %v13689_v49, 0.0  ;;  %v12290_v11 = vadd.f32 %v25320_v56, %v12289_v40  ;;  %v19825_v61 = vpop.f32.mrb[180].mxu0 }
 0xe12   : > { %12426 = vst.msk [vmem:[%s22973_s15 + $0x38] sm:$0xff] %vm12418_vm0, %v12295_v24  ;;  %v13704_v62 = vadd.f32 %v25328_v15, %v19825_v61  ;;  %v13698_v51 = vpop.f32.mrb[181].mxu0 }
 0xe13   : > { %12425 = vst.msk [vmem:[%s22973_s15 + $0x30] sm:$0xff] %vm12418_vm0, %v12290_v11  ;;  %v13699_v44 = vadd.f32 %v25328_v15, %v13698_v51  ;;  %v19407_v32 = vpop.f32.mrb[72].mxu1  ;;  %19900 = vmatprep.mubr.f32.mxu1 %v13775_v21 }
 0xe14   : > { %v12305_v27 = vadd.f32 %v19407_v32, %v25320_v56  ;;  %v12299_v30 = vpop.f32.mrb[73].mxu1  ;;  %19901 = vmatmul.mubr.f32.gmra.mrb[178].mxu1 %v13776_v0  ;;  %v13778_v18 = vmax.f32 %v13704_v62, 0.0 }
 0xe15   : > { %v13777_v23 = vmax.f32 %v13699_v44, 0.0  ;;  %v12300_v63 = vadd.f32 %v25320_v56, %v12299_v30  ;;  %v19828_v20 = vpop.f32.mrb[182].mxu0 }
 0xe16   : > { %12428 = vst.msk [vmem:[%s22973_s15 + $0x48] sm:$0xff] %vm12418_vm0, %v12305_v27  ;;  %v13714_v48 = vadd.f32 %v25328_v15, %v19828_v20  ;;  %v13708_v14 = vpop.f32.mrb[183].mxu0 }
 0xe17   : > { %12427 = vst.msk [vmem:[%s22973_s15 + $0x40] sm:$0xff] %vm12418_vm0, %v12300_v63  ;;  %v13709_v36 = vadd.f32 %v25328_v15, %v13708_v14  ;;  %v19410_v34 = vpop.f32.mrb[74].mxu1  ;;  %19903 = vmatprep.mubr.f32.mxu1 %v13777_v23 }
 0xe18   : > { %v12315_v53 = vadd.f32 %v19410_v34, %v25320_v56  ;;  %v12309_v60 = vpop.f32.mrb[75].mxu1  ;;  %19904 = vmatmul.mubr.f32.gmra.mrb[180].mxu1 %v13778_v18  ;;  %v13780_v45 = vmax.f32 %v13714_v48, 0.0 }
 0xe19   : > { %v13779_v52 = vmax.f32 %v13709_v36, 0.0  ;;  %v12310_v47 = vadd.f32 %v25320_v56, %v12309_v60  ;;  %v19831_v41 = vpop.f32.mrb[184].mxu0 }
 0xe1a   : > { %12430 = vst.msk [vmem:[%s22973_s15 + $0x58] sm:$0xff] %vm12418_vm0, %v12315_v53  ;;  %v13724_v31 = vadd.f32 %v25328_v15, %v19831_v41  ;;  %v13718_v9 = vpop.f32.mrb[185].mxu0 }
 0xe1b   : > { %12429 = vst.msk [vmem:[%s22973_s15 + $0x50] sm:$0xff] %vm12418_vm0, %v12310_v47  ;;  %v13719_v5 = vadd.f32 %v25328_v15, %v13718_v9  ;;  %v19413_v50 = vpop.f32.mrb[76].mxu1  ;;  %19906 = vmatprep.mubr.f32.mxu1 %v13779_v52 }
 0xe1c   : > { %v12325_v37 = vadd.f32 %v19413_v50, %v25320_v56  ;;  %v12319_v25 = vpop.f32.mrb[77].mxu1  ;;  %19907 = vmatmul.mubr.f32.gmra.mrb[182].mxu1 %v13780_v45  ;;  %v13782_v57 = vmax.f32 %v13724_v31, 0.0 }
 0xe1d   : > { %v13781_v3 = vmax.f32 %v13719_v5, 0.0  ;;  %v12320_v26 = vadd.f32 %v25320_v56, %v12319_v25  ;;  %v19834_v33 = vpop.f32.mrb[186].mxu0 }
 0xe1e   : > { %12432 = vst.msk [vmem:[%s22973_s15 + $0x68] sm:$0xff] %vm12418_vm0, %v12325_v37  ;;  %v13734_v4 = vadd.f32 %v25328_v15, %v19834_v33  ;;  %v13728_v29 = vpop.f32.mrb[187].mxu0 }
 0xe1f   : > { %12431 = vst.msk [vmem:[%s22973_s15 + $0x60] sm:$0xff] %vm12418_vm0, %v12320_v26  ;;  %v13729_v6 = vadd.f32 %v25328_v15, %v13728_v29  ;;  %v19416_v38 = vpop.f32.mrb[78].mxu1  ;;  %19909 = vmatprep.mubr.f32.mxu1 %v13781_v3 }
 0xe20   : > { %v12335_v58 = vadd.f32 %v19416_v38, %v25320_v56  ;;  %v12329_v35 = vpop.f32.mrb[79].mxu1  ;;  %19910 = vmatmul.mubr.f32.gmra.mrb[184].mxu1 %v13782_v57  ;;  %v13784_v16 = vmax.f32 %v13734_v4, 0.0 }
 0xe21   : > { %v13783_v55 = vmax.f32 %v13729_v6, 0.0  ;;  %v12330_v13 = vadd.f32 %v25320_v56, %v12329_v35  ;;  %v19837_v8 = vpop.f32.mrb[188].mxu0 }
 0xe22   : > { %12434 = vst.msk [vmem:[%s22973_s15 + $0x78] sm:$0xff] %vm12418_vm0, %v12335_v58  ;;  %v13744_v2 = vadd.f32 %v25328_v15, %v19837_v8  ;;  %v13738_v59 = vpop.f32.mrb[189].mxu0 }
 0xe23   : > { %12433 = vst.msk [vmem:[%s22973_s15 + $0x70] sm:$0xff] %vm12418_vm0, %v12330_v13  ;;  %v13739_v19 = vadd.f32 %v25328_v15, %v13738_v59  ;;  %v19419_v43 = vpop.f32.mrb[80].mxu1  ;;  %19912 = vmatprep.mubr.f32.mxu1 %v13783_v55 }
 0xe24   : > { %v12345_v17 = vadd.f32 %v19419_v43, %v25320_v56  ;;  %v12339_v54 = vpop.f32.mrb[81].mxu1  ;;  %19913 = vmatmul.mubr.f32.gmra.mrb[186].mxu1 %v13784_v16  ;;  %v13786_v42 = vmax.f32 %v13744_v2, 0.0 }
 0xe25   : > { %v13785_v28 = vmax.f32 %v13739_v19, 0.0  ;;  %v12340_v7 = vadd.f32 %v25320_v56, %v12339_v54  ;;  %v19840_v22 = vpop.f32.mrb[190].mxu0 }
 0xe26   : > { %12436 = vst.msk [vmem:[%s22973_s15 + $0x88] sm:$0xff] %vm12418_vm0, %v12345_v17  ;;  %v13754_v1 = vadd.f32 %v25328_v15, %v19840_v22  ;;  %v13748_v39 = vpop.f32.mrb[191].mxu0 }
 0xe27   : > { %12435 = vst.msk [vmem:[%s22973_s15 + $0x80] sm:$0xff] %vm12418_vm0, %v12340_v7  ;;  %v13749_v10 = vadd.f32 %v25328_v15, %v13748_v39  ;;  %v19422_v12 = vpop.f32.mrb[82].mxu1  ;;  %19915 = vmatprep.mubr.f32.mxu1 %v13785_v28 }
 0xe28   : > { %v12355_v49 = vadd.f32 %v19422_v12, %v25320_v56  ;;  %v12349_v46 = vpop.f32.mrb[83].mxu1  ;;  %19916 = vmatmul.mubr.f32.gmra.mrb[188].mxu1 %v13786_v42  ;;  %v13788_v21 = vmax.f32 %v13754_v1, 0.0 }
 0xe29   : > { %v13787_v24 = vmax.f32 %v13749_v10, 0.0  ;;  %v12350_v40 = vadd.f32 %v25320_v56, %v12349_v46 }
 0xe2a   : > { %12438 = vst.msk [vmem:[%s22973_s15 + $0x98] sm:$0xff] %vm12418_vm0, %v12355_v49 }
 0xe2b   : > { %12437 = vst.msk [vmem:[%s22973_s15 + $0x90] sm:$0xff] %vm12418_vm0, %v12350_v40  ;;  %v19425_v11 = vpop.f32.mrb[84].mxu1  ;;  %19918 = vmatprep.mubr.f32.mxu1 %v13787_v24 }
 0xe2c   : > { %v12365_v15 = vadd.f32 %v19425_v11, %v25320_v56  ;;  %v12359_v61 = vpop.f32.mrb[85].mxu1  ;;  %19919 = vmatmul.mubr.f32.gmra.mrb[190].mxu1 %v13788_v21 }
 0xe2d   : > { %v12360_v0 = vadd.f32 %v25320_v56, %v12359_v61 }
 0xe2e   : > { %12440 = vst.msk [vmem:[%s22973_s15 + $0xa8] sm:$0xff] %vm12418_vm0, %v12365_v15 }
 0xe2f   : > { %12439 = vst.msk [vmem:[%s22973_s15 + $0xa0] sm:$0xff] %vm12418_vm0, %v12360_v0  ;;  %v19428_v62 = vpop.f32.mrb[86].mxu1 }
 0xe30   : > { %v12375_v51 = vadd.f32 %v19428_v62, %v25320_v56  ;;  %v12369_v44 = vpop.f32.mrb[87].mxu1 }
 0xe31   : > { %v12370_v32 = vadd.f32 %v25320_v56, %v12369_v44 }
 0xe32   : > { %12442 = vst.msk [vmem:[%s22973_s15 + $0xb8] sm:$0xff] %vm12418_vm0, %v12375_v51 }
 0xe33   : > { %12441 = vst.msk [vmem:[%s22973_s15 + $0xb0] sm:$0xff] %vm12418_vm0, %v12370_v32  ;;  %v19431_v27 = vpop.f32.mrb[88].mxu1 }
 0xe34   : > { %v12385_v30 = vadd.f32 %v19431_v27, %v25320_v56  ;;  %v12379_v23 = vpop.f32.mrb[89].mxu1 }
 0xe35   : > { %v12380_v63 = vadd.f32 %v25320_v56, %v12379_v23 }
 0xe36   : > { %12444 = vst.msk [vmem:[%s22973_s15 + $0xc8] sm:$0xff] %vm12418_vm0, %v12385_v30 }
 0xe37   : > { %12443 = vst.msk [vmem:[%s22973_s15 + $0xc0] sm:$0xff] %vm12418_vm0, %v12380_v63  ;;  %v19434_v20 = vpop.f32.mrb[90].mxu1 }
 0xe38   : > { %v12395_v18 = vadd.f32 %v19434_v20, %v25320_v56  ;;  %v12389_v48 = vpop.f32.mrb[91].mxu1 }
 0xe39   : > { %v12390_v14 = vadd.f32 %v25320_v56, %v12389_v48 }
 0xe3a   : > { %12446 = vst.msk [vmem:[%s22973_s15 + $0xd8] sm:$0xff] %vm12418_vm0, %v12395_v18 }
 0xe3b   : > { %12445 = vst.msk [vmem:[%s22973_s15 + $0xd0] sm:$0xff] %vm12418_vm0, %v12390_v14  ;;  %v19437_v36 = vpop.f32.mrb[92].mxu1 }
 0xe3c   : > { %v12405_v34 = vadd.f32 %v19437_v36, %v25320_v56  ;;  %v12399_v53 = vpop.f32.mrb[93].mxu1 }
 0xe3d   : > { %v12400_v60 = vadd.f32 %v25320_v56, %v12399_v53 }
 0xe3e   : > { %12448 = vst.msk [vmem:[%s22973_s15 + $0xe8] sm:$0xff] %vm12418_vm0, %v12405_v34 }
 0xe3f   : > { %12447 = vst.msk [vmem:[%s22973_s15 + $0xe0] sm:$0xff] %vm12418_vm0, %v12400_v60  ;;  %v19440_v52 = vpop.f32.mrb[94].mxu1 }
 0xe40   : > { %v12415_v47 = vadd.f32 %v19440_v52, %v25320_v56  ;;  %v12409_v41 = vpop.f32.mrb[95].mxu1 }
 0xe41   : > { %v12410_v45 = vadd.f32 %v25320_v56, %v12409_v41 }
 0xe42   : > { %12450 = vst.msk [vmem:[%s22973_s15 + $0xf8] sm:$0xff] %vm12418_vm0, %v12415_v47 }
 0xe43   : > { %12449 = vst.msk [vmem:[%s22973_s15 + $0xf0] sm:$0xff] %vm12418_vm0, %v12410_v45  ;;  %v19555_v31 = vpop.f32.mrb[96].mxu1 }
 0xe44   : > { %v12797_v9 = vadd.f32 %v19555_v31, %v25320_v56  ;;  %v12791_v5 = vpop.f32.mrb[97].mxu1 }
 0xe45   : > { %v12792_v50 = vadd.f32 %v25320_v56, %v12791_v5 }
 0xe46   : > { %14190 = vst.msk [vmem:[%s22973_s15 + $0x108] sm:$0xff] %vm12418_vm0, %v12797_v9 }
 0xe47   : > { %14189 = vst.msk [vmem:[%s22973_s15 + $0x100] sm:$0xff] %vm12418_vm0, %v12792_v50  ;;  %v19558_v37 = vpop.f32.mrb[98].mxu1 }
 0xe48   : > { %v12807_v25 = vadd.f32 %v19558_v37, %v25320_v56  ;;  %v12801_v3 = vpop.f32.mrb[99].mxu1 }
 0xe49   : > { %v12802_v26 = vadd.f32 %v25320_v56, %v12801_v3 }
 0xe4a   : > { %14192 = vst.msk [vmem:[%s22973_s15 + $0x118] sm:$0xff] %vm12418_vm0, %v12807_v25 }
 0xe4b   : > { %14191 = vst.msk [vmem:[%s22973_s15 + $0x110] sm:$0xff] %vm12418_vm0, %v12802_v26  ;;  %v19561_v33 = vpop.f32.mrb[100].mxu1 }
 0xe4c   : > { %v12817_v57 = vadd.f32 %v19561_v33, %v25320_v56  ;;  %v12811_v4 = vpop.f32.mrb[101].mxu1 }
 0xe4d   : > { %v12812_v29 = vadd.f32 %v25320_v56, %v12811_v4 }
 0xe4e   : > { %14194 = vst.msk [vmem:[%s22973_s15 + $0x128] sm:$0xff] %vm12418_vm0, %v12817_v57 }
 0xe4f   : > { %14193 = vst.msk [vmem:[%s22973_s15 + $0x120] sm:$0xff] %vm12418_vm0, %v12812_v29  ;;  %v19564_v6 = vpop.f32.mrb[102].mxu1 }
 0xe50   : > { %v12827_v38 = vadd.f32 %v19564_v6, %v25320_v56  ;;  %v12821_v58 = vpop.f32.mrb[103].mxu1 }
 0xe51   : > { %v12822_v35 = vadd.f32 %v25320_v56, %v12821_v58 }
 0xe52   : > { %14196 = vst.msk [vmem:[%s22973_s15 + $0x138] sm:$0xff] %vm12418_vm0, %v12827_v38 }
 0xe53   : > { %14195 = vst.msk [vmem:[%s22973_s15 + $0x130] sm:$0xff] %vm12418_vm0, %v12822_v35  ;;  %v19567_v55 = vpop.f32.mrb[104].mxu1 }
 0xe54   : > { %v12837_v13 = vadd.f32 %v19567_v55, %v25320_v56  ;;  %v12831_v8 = vpop.f32.mrb[105].mxu1 }
 0xe55   : > { %v12832_v16 = vadd.f32 %v25320_v56, %v12831_v8 }
 0xe56   : > { %14198 = vst.msk [vmem:[%s22973_s15 + $0x148] sm:$0xff] %vm12418_vm0, %v12837_v13 }
 0xe57   : > { %14197 = vst.msk [vmem:[%s22973_s15 + $0x140] sm:$0xff] %vm12418_vm0, %v12832_v16  ;;  %v19570_v2 = vpop.f32.mrb[106].mxu1 }
 0xe58   : > { %v12847_v59 = vadd.f32 %v19570_v2, %v25320_v56  ;;  %v12841_v19 = vpop.f32.mrb[107].mxu1 }
 0xe59   : > { %v12842_v43 = vadd.f32 %v25320_v56, %v12841_v19 }
 0xe5a   : > { %14200 = vst.msk [vmem:[%s22973_s15 + $0x158] sm:$0xff] %vm12418_vm0, %v12847_v59 }
 0xe5b   : > { %14199 = vst.msk [vmem:[%s22973_s15 + $0x150] sm:$0xff] %vm12418_vm0, %v12842_v43  ;;  %v19573_v17 = vpop.f32.mrb[108].mxu1 }
 0xe5c   : > { %v12857_v54 = vadd.f32 %v19573_v17, %v25320_v56  ;;  %v12851_v28 = vpop.f32.mrb[109].mxu1 }
 0xe5d   : > { %v12852_v7 = vadd.f32 %v25320_v56, %v12851_v28 }
 0xe5e   : > { %14202 = vst.msk [vmem:[%s22973_s15 + $0x168] sm:$0xff] %vm12418_vm0, %v12857_v54 }
 0xe5f   : > { %14201 = vst.msk [vmem:[%s22973_s15 + $0x160] sm:$0xff] %vm12418_vm0, %v12852_v7  ;;  %v19576_v22 = vpop.f32.mrb[110].mxu1 }
 0xe60   : > { %v12867_v42 = vadd.f32 %v19576_v22, %v25320_v56  ;;  %v12861_v1 = vpop.f32.mrb[111].mxu1 }
 0xe61   : > { %v12862_v39 = vadd.f32 %v25320_v56, %v12861_v1 }
 0xe62   : > { %14204 = vst.msk [vmem:[%s22973_s15 + $0x178] sm:$0xff] %vm12418_vm0, %v12867_v42 }
 0xe63   : > { %14203 = vst.msk [vmem:[%s22973_s15 + $0x170] sm:$0xff] %vm12418_vm0, %v12862_v39  ;;  %v19579_v10 = vpop.f32.mrb[112].mxu1 }
 0xe64   : > { %v12877_v12 = vadd.f32 %v19579_v10, %v25320_v56  ;;  %v12871_v49 = vpop.f32.mrb[113].mxu1 }
 0xe65   : > { %v12872_v46 = vadd.f32 %v25320_v56, %v12871_v49 }
 0xe66   : > { %14206 = vst.msk [vmem:[%s22973_s15 + $0x188] sm:$0xff] %vm12418_vm0, %v12877_v12 }
 0xe67   : > { %14205 = vst.msk [vmem:[%s22973_s15 + $0x180] sm:$0xff] %vm12418_vm0, %v12872_v46  ;;  %v19582_v24 = vpop.f32.mrb[114].mxu1 }
 0xe68   : > { %v12887_v40 = vadd.f32 %v19582_v24, %v25320_v56  ;;  %v12881_v21 = vpop.f32.mrb[115].mxu1 }
 0xe69   : > { %v12882_v11 = vadd.f32 %v25320_v56, %v12881_v21 }
 0xe6a   : > { %14208 = vst.msk [vmem:[%s22973_s15 + $0x198] sm:$0xff] %vm12418_vm0, %v12887_v40 }
 0xe6b   : > { %14207 = vst.msk [vmem:[%s22973_s15 + $0x190] sm:$0xff] %vm12418_vm0, %v12882_v11  ;;  %v19585_v15 = vpop.f32.mrb[116].mxu1 }
 0xe6c   : > { %v12897_v61 = vadd.f32 %v19585_v15, %v25320_v56  ;;  %v12891_v0 = vpop.f32.mrb[117].mxu1 }
 0xe6d   : > { %v12892_v62 = vadd.f32 %v25320_v56, %v12891_v0 }
 0xe6e   : > { %14210 = vst.msk [vmem:[%s22973_s15 + $0x1a8] sm:$0xff] %vm12418_vm0, %v12897_v61 }
 0xe6f   : > { %14209 = vst.msk [vmem:[%s22973_s15 + $0x1a0] sm:$0xff] %vm12418_vm0, %v12892_v62  ;;  %v19588_v51 = vpop.f32.mrb[118].mxu1 }
 0xe70   : > { %v12907_v44 = vadd.f32 %v19588_v51, %v25320_v56  ;;  %v12901_v32 = vpop.f32.mrb[119].mxu1 }
 0xe71   : > { %v12902_v27 = vadd.f32 %v25320_v56, %v12901_v32 }
 0xe72   : > { %14212 = vst.msk [vmem:[%s22973_s15 + $0x1b8] sm:$0xff] %vm12418_vm0, %v12907_v44 }
 0xe73   : > { %14211 = vst.msk [vmem:[%s22973_s15 + $0x1b0] sm:$0xff] %vm12418_vm0, %v12902_v27  ;;  %v19591_v30 = vpop.f32.mrb[120].mxu1 }
 0xe74   : > { %v12917_v23 = vadd.f32 %v19591_v30, %v25320_v56  ;;  %v12911_v63 = vpop.f32.mrb[121].mxu1 }
 0xe75   : > { %v12912_v20 = vadd.f32 %v25320_v56, %v12911_v63 }
 0xe76   : > { %14214 = vst.msk [vmem:[%s22973_s15 + $0x1c8] sm:$0xff] %vm12418_vm0, %v12917_v23 }
 0xe77   : > { %14213 = vst.msk [vmem:[%s22973_s15 + $0x1c0] sm:$0xff] %vm12418_vm0, %v12912_v20  ;;  %v19594_v18 = vpop.f32.mrb[122].mxu1 }
 0xe78   : > { %v12927_v48 = vadd.f32 %v19594_v18, %v25320_v56  ;;  %v12921_v14 = vpop.f32.mrb[123].mxu1 }
 0xe79   : > { %v12922_v36 = vadd.f32 %v25320_v56, %v12921_v14 }
 0xe7a   : > { %14216 = vst.msk [vmem:[%s22973_s15 + $0x1d8] sm:$0xff] %vm12418_vm0, %v12927_v48 }
 0xe7b   : > { %14215 = vst.msk [vmem:[%s22973_s15 + $0x1d0] sm:$0xff] %vm12418_vm0, %v12922_v36  ;;  %v19597_v34 = vpop.f32.mrb[124].mxu1 }
 0xe7c   : > { %v12937_v53 = vadd.f32 %v19597_v34, %v25320_v56  ;;  %v12931_v60 = vpop.f32.mrb[125].mxu1 }
 0xe7d   : > { %v12932_v52 = vadd.f32 %v25320_v56, %v12931_v60 }
 0xe7e   : > { %14218 = vst.msk [vmem:[%s22973_s15 + $0x1e8] sm:$0xff] %vm12418_vm0, %v12937_v53 }
 0xe7f   : > { %14217 = vst.msk [vmem:[%s22973_s15 + $0x1e0] sm:$0xff] %vm12418_vm0, %v12932_v52  ;;  %v19600_v47 = vpop.f32.mrb[126].mxu1 }
 0xe80   : > { %v12947_v41 = vadd.f32 %v19600_v47, %v25320_v56  ;;  %v12941_v45 = vpop.f32.mrb[127].mxu1 }
 0xe81   : > { %v12942_v31 = vadd.f32 %v25320_v56, %v12941_v45 }
 0xe82   : > { %14220 = vst.msk [vmem:[%s22973_s15 + $0x1f8] sm:$0xff] %vm12418_vm0, %v12947_v41 }
 0xe83   : > { %14219 = vst.msk [vmem:[%s22973_s15 + $0x1f0] sm:$0xff] %vm12418_vm0, %v12942_v31  ;;  %v19715_v9 = vpop.f32.mrb[128].mxu1 }
 0xe84   : > { %v13329_v5 = vadd.f32 %v19715_v9, %v25320_v56  ;;  %v13323_v50 = vpop.f32.mrb[129].mxu1 }
 0xe85   : > { %v13324_v37 = vadd.f32 %v25320_v56, %v13323_v50 }
 0xe86   : > { %14222 = vst.msk [vmem:[%s22973_s15 + $0x208] sm:$0xff] %vm12418_vm0, %v13329_v5 }
 0xe87   : > { %14221 = vst.msk [vmem:[%s22973_s15 + $0x200] sm:$0xff] %vm12418_vm0, %v13324_v37  ;;  %v19718_v25 = vpop.f32.mrb[130].mxu1 }
 0xe88   : > { %v13339_v3 = vadd.f32 %v19718_v25, %v25320_v56  ;;  %v13333_v26 = vpop.f32.mrb[131].mxu1 }
 0xe89   : > { %v13334_v33 = vadd.f32 %v25320_v56, %v13333_v26 }
 0xe8a   : > { %14224 = vst.msk [vmem:[%s22973_s15 + $0x218] sm:$0xff] %vm12418_vm0, %v13339_v3 }
 0xe8b   : > { %14223 = vst.msk [vmem:[%s22973_s15 + $0x210] sm:$0xff] %vm12418_vm0, %v13334_v33  ;;  %v19721_v57 = vpop.f32.mrb[132].mxu1 }
 0xe8c   : > { %v13349_v4 = vadd.f32 %v19721_v57, %v25320_v56  ;;  %v13343_v29 = vpop.f32.mrb[133].mxu1 }
 0xe8d   : > { %v13344_v6 = vadd.f32 %v25320_v56, %v13343_v29 }
 0xe8e   : > { %14226 = vst.msk [vmem:[%s22973_s15 + $0x228] sm:$0xff] %vm12418_vm0, %v13349_v4 }
 0xe8f   : > { %14225 = vst.msk [vmem:[%s22973_s15 + $0x220] sm:$0xff] %vm12418_vm0, %v13344_v6  ;;  %v19724_v38 = vpop.f32.mrb[134].mxu1 }
 0xe90   : > { %v13359_v58 = vadd.f32 %v19724_v38, %v25320_v56  ;;  %v13353_v35 = vpop.f32.mrb[135].mxu1 }
 0xe91   : > { %v13354_v55 = vadd.f32 %v25320_v56, %v13353_v35 }
 0xe92   : > { %14228 = vst.msk [vmem:[%s22973_s15 + $0x238] sm:$0xff] %vm12418_vm0, %v13359_v58 }
 0xe93   : > { %14227 = vst.msk [vmem:[%s22973_s15 + $0x230] sm:$0xff] %vm12418_vm0, %v13354_v55  ;;  %v19727_v13 = vpop.f32.mrb[136].mxu1 }
 0xe94   : > { %v13369_v8 = vadd.f32 %v19727_v13, %v25320_v56  ;;  %v13363_v16 = vpop.f32.mrb[137].mxu1 }
 0xe95   : > { %v13364_v2 = vadd.f32 %v25320_v56, %v13363_v16 }
 0xe96   : > { %14230 = vst.msk [vmem:[%s22973_s15 + $0x248] sm:$0xff] %vm12418_vm0, %v13369_v8 }
 0xe97   : > { %14229 = vst.msk [vmem:[%s22973_s15 + $0x240] sm:$0xff] %vm12418_vm0, %v13364_v2  ;;  %v19730_v59 = vpop.f32.mrb[138].mxu1 }
 0xe98   : > { %v13379_v19 = vadd.f32 %v19730_v59, %v25320_v56  ;;  %v13373_v43 = vpop.f32.mrb[139].mxu1 }
 0xe99   : > { %v13374_v17 = vadd.f32 %v25320_v56, %v13373_v43 }
 0xe9a   : > { %14232 = vst.msk [vmem:[%s22973_s15 + $0x258] sm:$0xff] %vm12418_vm0, %v13379_v19 }
 0xe9b   : > { %14231 = vst.msk [vmem:[%s22973_s15 + $0x250] sm:$0xff] %vm12418_vm0, %v13374_v17  ;;  %v19733_v54 = vpop.f32.mrb[140].mxu1 }
 0xe9c   : > { %v13389_v28 = vadd.f32 %v19733_v54, %v25320_v56  ;;  %v13383_v7 = vpop.f32.mrb[141].mxu1 }
 0xe9d   : > { %v13384_v22 = vadd.f32 %v25320_v56, %v13383_v7 }
 0xe9e   : > { %14234 = vst.msk [vmem:[%s22973_s15 + $0x268] sm:$0xff] %vm12418_vm0, %v13389_v28 }
 0xe9f   : > { %14233 = vst.msk [vmem:[%s22973_s15 + $0x260] sm:$0xff] %vm12418_vm0, %v13384_v22  ;;  %v19736_v42 = vpop.f32.mrb[142].mxu1 }
 0xea0   : > { %v13399_v1 = vadd.f32 %v19736_v42, %v25320_v56  ;;  %v13393_v39 = vpop.f32.mrb[143].mxu1 }
 0xea1   : > { %v13394_v10 = vadd.f32 %v25320_v56, %v13393_v39 }
 0xea2   : > { %14236 = vst.msk [vmem:[%s22973_s15 + $0x278] sm:$0xff] %vm12418_vm0, %v13399_v1 }
 0xea3   : > { %14235 = vst.msk [vmem:[%s22973_s15 + $0x270] sm:$0xff] %vm12418_vm0, %v13394_v10  ;;  %v19739_v12 = vpop.f32.mrb[144].mxu1 }
 0xea4   : > { %v13409_v49 = vadd.f32 %v19739_v12, %v25320_v56  ;;  %v13403_v46 = vpop.f32.mrb[145].mxu1 }
 0xea5   : > { %v13404_v24 = vadd.f32 %v25320_v56, %v13403_v46 }
 0xea6   : > { %14238 = vst.msk [vmem:[%s22973_s15 + $0x288] sm:$0xff] %vm12418_vm0, %v13409_v49 }
 0xea7   : > { %14237 = vst.msk [vmem:[%s22973_s15 + $0x280] sm:$0xff] %vm12418_vm0, %v13404_v24  ;;  %v19742_v40 = vpop.f32.mrb[146].mxu1 }
 0xea8   : > { %v13419_v21 = vadd.f32 %v19742_v40, %v25320_v56  ;;  %v13413_v11 = vpop.f32.mrb[147].mxu1 }
 0xea9   : > { %v13414_v15 = vadd.f32 %v25320_v56, %v13413_v11 }
 0xeaa   : > { %14240 = vst.msk [vmem:[%s22973_s15 + $0x298] sm:$0xff] %vm12418_vm0, %v13419_v21 }
 0xeab   : > { %14239 = vst.msk [vmem:[%s22973_s15 + $0x290] sm:$0xff] %vm12418_vm0, %v13414_v15  ;;  %v19745_v61 = vpop.f32.mrb[148].mxu1 }
 0xeac   : > { %v13429_v0 = vadd.f32 %v19745_v61, %v25320_v56  ;;  %v13423_v62 = vpop.f32.mrb[149].mxu1 }
 0xead   : > { %v13424_v51 = vadd.f32 %v25320_v56, %v13423_v62 }
 0xeae   : > { %14242 = vst.msk [vmem:[%s22973_s15 + $0x2a8] sm:$0xff] %vm12418_vm0, %v13429_v0 }
 0xeaf   : > { %14241 = vst.msk [vmem:[%s22973_s15 + $0x2a0] sm:$0xff] %vm12418_vm0, %v13424_v51  ;;  %v19748_v44 = vpop.f32.mrb[150].mxu1 }
 0xeb0   : > { %v13439_v32 = vadd.f32 %v19748_v44, %v25320_v56  ;;  %v13433_v27 = vpop.f32.mrb[151].mxu1 }
 0xeb1   : > { %v13434_v30 = vadd.f32 %v25320_v56, %v13433_v27 }
 0xeb2   : > { %14244 = vst.msk [vmem:[%s22973_s15 + $0x2b8] sm:$0xff] %vm12418_vm0, %v13439_v32 }
 0xeb3   : > { %14243 = vst.msk [vmem:[%s22973_s15 + $0x2b0] sm:$0xff] %vm12418_vm0, %v13434_v30  ;;  %v19751_v23 = vpop.f32.mrb[152].mxu1 }
 0xeb4   : > { %v13449_v63 = vadd.f32 %v19751_v23, %v25320_v56  ;;  %v13443_v20 = vpop.f32.mrb[153].mxu1 }
 0xeb5   : > { %v13444_v18 = vadd.f32 %v25320_v56, %v13443_v20 }
 0xeb6   : > { %14246 = vst.msk [vmem:[%s22973_s15 + $0x2c8] sm:$0xff] %vm12418_vm0, %v13449_v63 }
 0xeb7   : > { %14245 = vst.msk [vmem:[%s22973_s15 + $0x2c0] sm:$0xff] %vm12418_vm0, %v13444_v18  ;;  %v19754_v48 = vpop.f32.mrb[154].mxu1 }
 0xeb8   : > { %v13459_v14 = vadd.f32 %v19754_v48, %v25320_v56  ;;  %v13453_v36 = vpop.f32.mrb[155].mxu1 }
 0xeb9   : > { %v13454_v34 = vadd.f32 %v25320_v56, %v13453_v36 }
 0xeba   : > { %14248 = vst.msk [vmem:[%s22973_s15 + $0x2d8] sm:$0xff] %vm12418_vm0, %v13459_v14 }
 0xebb   : > { %14247 = vst.msk [vmem:[%s22973_s15 + $0x2d0] sm:$0xff] %vm12418_vm0, %v13454_v34  ;;  %v19757_v53 = vpop.f32.mrb[156].mxu1 }
 0xebc   : > { %v13469_v60 = vadd.f32 %v19757_v53, %v25320_v56  ;;  %v13463_v52 = vpop.f32.mrb[157].mxu1 }
 0xebd   : > { %v13464_v47 = vadd.f32 %v25320_v56, %v13463_v52 }
 0xebe   : > { %14250 = vst.msk [vmem:[%s22973_s15 + $0x2e8] sm:$0xff] %vm12418_vm0, %v13469_v60 }
 0xebf   : > { %14249 = vst.msk [vmem:[%s22973_s15 + $0x2e0] sm:$0xff] %vm12418_vm0, %v13464_v47  ;;  %v19760_v41 = vpop.f32.mrb[158].mxu1 }
 0xec0   : > { %v13479_v45 = vadd.f32 %v19760_v41, %v25320_v56  ;;  %v13473_v31 = vpop.f32.mrb[159].mxu1 }
 0xec1   : > { %v13474_v9 = vadd.f32 %v25320_v56, %v13473_v31 }
 0xec2   : > { %14252 = vst.msk [vmem:[%s22973_s15 + $0x2f8] sm:$0xff] %vm12418_vm0, %v13479_v45 }
 0xec3   : > { %14251 = vst.msk [vmem:[%s22973_s15 + $0x2f0] sm:$0xff] %vm12418_vm0, %v13474_v9  ;;  %v19875_v5 = vpop.f32.mrb[160].mxu1 }
 0xec4   : > { %v13861_v50 = vadd.f32 %v19875_v5, %v25320_v56  ;;  %v13855_v37 = vpop.f32.mrb[161].mxu1 }
 0xec5   : > { %v13856_v25 = vadd.f32 %v25320_v56, %v13855_v37 }
 0xec6   : > { %14254 = vst.msk [vmem:[%s22973_s15 + $0x308] sm:$0xff] %vm12418_vm0, %v13861_v50 }
 0xec7   : > { %14253 = vst.msk [vmem:[%s22973_s15 + $0x300] sm:$0xff] %vm12418_vm0, %v13856_v25  ;;  %v19878_v3 = vpop.f32.mrb[162].mxu1 }
 0xec8   : > { %v13871_v26 = vadd.f32 %v19878_v3, %v25320_v56  ;;  %v13865_v33 = vpop.f32.mrb[163].mxu1 }
 0xec9   : > { %v13866_v57 = vadd.f32 %v25320_v56, %v13865_v33 }
 0xeca   : > { %14256 = vst.msk [vmem:[%s22973_s15 + $0x318] sm:$0xff] %vm12418_vm0, %v13871_v26 }
 0xecb   : > { %14255 = vst.msk [vmem:[%s22973_s15 + $0x310] sm:$0xff] %vm12418_vm0, %v13866_v57  ;;  %v19881_v4 = vpop.f32.mrb[164].mxu1 }
 0xecc   : > { %v13881_v29 = vadd.f32 %v19881_v4, %v25320_v56  ;;  %v13875_v6 = vpop.f32.mrb[165].mxu1 }
 0xecd   : > { %v13876_v38 = vadd.f32 %v25320_v56, %v13875_v6 }
 0xece   : > { %14258 = vst.msk [vmem:[%s22973_s15 + $0x328] sm:$0xff] %vm12418_vm0, %v13881_v29 }
 0xecf   : > { %14257 = vst.msk [vmem:[%s22973_s15 + $0x320] sm:$0xff] %vm12418_vm0, %v13876_v38  ;;  %v19884_v58 = vpop.f32.mrb[166].mxu1 }
 0xed0   : > { %v13891_v35 = vadd.f32 %v19884_v58, %v25320_v56  ;;  %v13885_v55 = vpop.f32.mrb[167].mxu1 }
 0xed1   : > { %v13886_v13 = vadd.f32 %v25320_v56, %v13885_v55 }
 0xed2   : > { %14260 = vst.msk [vmem:[%s22973_s15 + $0x338] sm:$0xff] %vm12418_vm0, %v13891_v35 }
 0xed3   : > { %14259 = vst.msk [vmem:[%s22973_s15 + $0x330] sm:$0xff] %vm12418_vm0, %v13886_v13  ;;  %v19887_v8 = vpop.f32.mrb[168].mxu1 }
 0xed4   : > { %v13901_v16 = vadd.f32 %v19887_v8, %v25320_v56  ;;  %v13895_v2 = vpop.f32.mrb[169].mxu1 }
 0xed5   : > { %v13896_v59 = vadd.f32 %v25320_v56, %v13895_v2 }
 0xed6   : > { %14262 = vst.msk [vmem:[%s22973_s15 + $0x348] sm:$0xff] %vm12418_vm0, %v13901_v16 }
 0xed7   : > { %14261 = vst.msk [vmem:[%s22973_s15 + $0x340] sm:$0xff] %vm12418_vm0, %v13896_v59  ;;  %v19890_v19 = vpop.f32.mrb[170].mxu1 }
 0xed8   : > { %v13911_v43 = vadd.f32 %v19890_v19, %v25320_v56  ;;  %v13905_v17 = vpop.f32.mrb[171].mxu1 }
 0xed9   : > { %v13906_v54 = vadd.f32 %v25320_v56, %v13905_v17 }
 0xeda   : > { %14264 = vst.msk [vmem:[%s22973_s15 + $0x358] sm:$0xff] %vm12418_vm0, %v13911_v43 }
 0xedb   : > { %14263 = vst.msk [vmem:[%s22973_s15 + $0x350] sm:$0xff] %vm12418_vm0, %v13906_v54  ;;  %v19893_v28 = vpop.f32.mrb[172].mxu1 }
 0xedc   : > { %v13921_v7 = vadd.f32 %v19893_v28, %v25320_v56  ;;  %v13915_v22 = vpop.f32.mrb[173].mxu1 }
 0xedd   : > { %v13916_v42 = vadd.f32 %v25320_v56, %v13915_v22 }
 0xede   : > { %14266 = vst.msk [vmem:[%s22973_s15 + $0x368] sm:$0xff] %vm12418_vm0, %v13921_v7 }
 0xedf   : > { %14265 = vst.msk [vmem:[%s22973_s15 + $0x360] sm:$0xff] %vm12418_vm0, %v13916_v42  ;;  %v19896_v1 = vpop.f32.mrb[174].mxu1 }
 0xee0   : > { %v13931_v39 = vadd.f32 %v19896_v1, %v25320_v56  ;;  %v13925_v10 = vpop.f32.mrb[175].mxu1 }
 0xee1   : > { %v13926_v12 = vadd.f32 %v25320_v56, %v13925_v10 }
 0xee2   : > { %14268 = vst.msk [vmem:[%s22973_s15 + $0x378] sm:$0xff] %vm12418_vm0, %v13931_v39 }
 0xee3   : > { %14267 = vst.msk [vmem:[%s22973_s15 + $0x370] sm:$0xff] %vm12418_vm0, %v13926_v12  ;;  %v19899_v49 = vpop.f32.mrb[176].mxu1 }
 0xee4   : > { %v13941_v46 = vadd.f32 %v19899_v49, %v25320_v56  ;;  %v13935_v24 = vpop.f32.mrb[177].mxu1 }
 0xee5   : > { %v13936_v40 = vadd.f32 %v25320_v56, %v13935_v24 }
 0xee6   : > { %14270 = vst.msk [vmem:[%s22973_s15 + $0x388] sm:$0xff] %vm12418_vm0, %v13941_v46 }
 0xee7   : > { %14269 = vst.msk [vmem:[%s22973_s15 + $0x380] sm:$0xff] %vm12418_vm0, %v13936_v40  ;;  %v19902_v21 = vpop.f32.mrb[178].mxu1 }
 0xee8   : > { %v13951_v11 = vadd.f32 %v19902_v21, %v25320_v56  ;;  %v13945_v15 = vpop.f32.mrb[179].mxu1 }
 0xee9   : > { %v13946_v61 = vadd.f32 %v25320_v56, %v13945_v15 }
 0xeea   : > { %14272 = vst.msk [vmem:[%s22973_s15 + $0x398] sm:$0xff] %vm12418_vm0, %v13951_v11 }
 0xeeb   : > { %14271 = vst.msk [vmem:[%s22973_s15 + $0x390] sm:$0xff] %vm12418_vm0, %v13946_v61  ;;  %v19905_v0 = vpop.f32.mrb[180].mxu1 }
 0xeec   : > { %v13961_v62 = vadd.f32 %v19905_v0, %v25320_v56  ;;  %v13955_v51 = vpop.f32.mrb[181].mxu1 }
 0xeed   : > { %v13956_v44 = vadd.f32 %v25320_v56, %v13955_v51 }
 0xeee   : > { %14274 = vst.msk [vmem:[%s22973_s15 + $0x3a8] sm:$0xff] %vm12418_vm0, %v13961_v62 }
 0xeef   : > { %14273 = vst.msk [vmem:[%s22973_s15 + $0x3a0] sm:$0xff] %vm12418_vm0, %v13956_v44  ;;  %v19908_v32 = vpop.f32.mrb[182].mxu1 }
 0xef0   : > { %v13971_v27 = vadd.f32 %v19908_v32, %v25320_v56  ;;  %v13965_v30 = vpop.f32.mrb[183].mxu1 }
 0xef1   : > { %v13966_v23 = vadd.f32 %v25320_v56, %v13965_v30 }
 0xef2   : > { %14276 = vst.msk [vmem:[%s22973_s15 + $0x3b8] sm:$0xff] %vm12418_vm0, %v13971_v27 }
 0xef3   : > { %14275 = vst.msk [vmem:[%s22973_s15 + $0x3b0] sm:$0xff] %vm12418_vm0, %v13966_v23  ;;  %v19911_v63 = vpop.f32.mrb[184].mxu1 }
 0xef4   : > { %v13981_v20 = vadd.f32 %v19911_v63, %v25320_v56  ;;  %v13975_v18 = vpop.f32.mrb[185].mxu1 }
 0xef5   : > { %v13976_v48 = vadd.f32 %v25320_v56, %v13975_v18 }
 0xef6   : > { %14278 = vst.msk [vmem:[%s22973_s15 + $0x3c8] sm:$0xff] %vm12418_vm0, %v13981_v20 }
 0xef7   : > { %14277 = vst.msk [vmem:[%s22973_s15 + $0x3c0] sm:$0xff] %vm12418_vm0, %v13976_v48  ;;  %v19914_v14 = vpop.f32.mrb[186].mxu1 }
 0xef8   : > { %v13991_v36 = vadd.f32 %v19914_v14, %v25320_v56  ;;  %v13985_v34 = vpop.f32.mrb[187].mxu1 }
 0xef9   : > { %v13986_v53 = vadd.f32 %v25320_v56, %v13985_v34 }
 0xefa   : > { %14280 = vst.msk [vmem:[%s22973_s15 + $0x3d8] sm:$0xff] %vm12418_vm0, %v13991_v36 }
 0xefb   : > { %14279 = vst.msk [vmem:[%s22973_s15 + $0x3d0] sm:$0xff] %vm12418_vm0, %v13986_v53  ;;  %v19917_v60 = vpop.f32.mrb[188].mxu1 }
 0xefc   : > { %v14001_v52 = vadd.f32 %v19917_v60, %v25320_v56  ;;  %v13995_v47 = vpop.f32.mrb[189].mxu1 }
 0xefd   : > { %v13996_v41 = vadd.f32 %v25320_v56, %v13995_v47 }
 0xefe   : > { %14282 = vst.msk [vmem:[%s22973_s15 + $0x3e8] sm:$0xff] %vm12418_vm0, %v14001_v52 }
 0xeff   : > { %14281 = vst.msk [vmem:[%s22973_s15 + $0x3e0] sm:$0xff] %vm12418_vm0, %v13996_v41  ;;  %v19920_v45 = vpop.f32.mrb[190].mxu1 }
 0xf00   : > { %v14011_v31 = vadd.f32 %v19920_v45, %v25320_v56  ;;  %v14005_v9 = vpop.f32.mrb[191].mxu1 }
 0xf01   : > { %v14006_v5 = vadd.f32 %v25320_v56, %v14005_v9 }
 0xf02   : > { %14284 = vst.msk [vmem:[%s22973_s15 + $0x3f8] sm:$0xff] %vm12418_vm0, %v14011_v31 }
 0xf03   : > { %14283 = vst.msk [vmem:[%s22973_s15 + $0x3f0] sm:$0xff] %vm12418_vm0, %v14006_v5 }
 0xf04 PF: > { %p20_p9 = scmp.ge.s32.totalorder %s22883_s19, 4   ;;  %s26221_s24 = smov %s22659_s25 }
 0xf05   : > { %s26222_s25 = smov %s22663_s26  ;;  %s26223_s26 = smov %s22894_s21 }
 0xf06   : > { %s26224_s27 = smov %s22883_s19  ;;  %22 = sbr.rel (!%p20_p9) target bundleno = 8 (0x8), region = 158 }
 0xf0d   :  { %14068 = vsyncpa [#allocation6], 1 }
 0xf0e   :  { %14070 = vsyncpa [#allocation6 + $0x1], 1 }
 0xf0f   :  { %14071 = vsyncpa [#allocation8], 1 }
 0xf10   :  { %14072 = vsyncpa [#allocation11], 1 }
 0xf11   :  { %14073 = vsyncpa [#allocation14], 1 }

</bundles_post_ra>
